<compile_context>
chip_gen: v5e
topology: v5e:2x2
jax: 0.10.0
libtpu: 0.0.40
codegen_flags: <defaults>
</compile_context>

<pallas_src>
import jax
import jax.numpy as jnp
from jax.experimental import pallas as pl
from jax.experimental.pallas import tpu as pltpu

_LANE = 128


def _round_up(x, m):
    return (x + m - 1) // m * m


def _gnn_kernel(x_ref, obj_ref, wstack_ref, wa_ref, agg_ref):
    e = pl.program_id(1)

    @pl.when(e == 0)
    def _():
        agg_ref[...] = jnp.zeros_like(agg_ref)

    a_pad = wa_ref.shape[1]          # width of the attention column block

    # One fused K=128 MXU matmul produces BOTH the attention projection
    # (cols [:A_pad], incl. the Wqr bias riding on the ones-lane of x) and
    # the message base hs+hr (cols [A_pad:A_pad+D_pad], identity columns).
    x = x_ref[...]                                               # [tE, K_pad]
    y = jnp.dot(x, wstack_ref[...],
                preferred_element_type=jnp.float32)              # [tE, A_pad+D_pad]

    attn = jnp.maximum(y[:, :a_pad], 0.0)                        # relu, attn half only
    msg_base = y[:, a_pad:]                                      # hs + hr  [tE, D_pad]

    # w_alpha as a VPU multiply + lane reduce (an N=1 MXU matmul wastes a full
    # push/drain).  b_alpha is folded into lane A of wa_row; attn[:, A] == 1
    # for every real edge by construction of W_stack.
    logit = jnp.sum(attn * wa_ref[...], axis=-1, keepdims=True)  # [tE, 1]
    alpha = jax.nn.sigmoid(logit)
    message = alpha * msg_base                                   # [tE, D_pad]

    # Scatter-sum over obj as a PRE-TRANSPOSED one-hot matmul (lhs-last /
    # rhs-first contraction -> no XLU transpose).  One-hot from a column iota
    # broadcast against the obj lane row; exact in bf16.
    n_pad = agg_ref.shape[1]
    node_ids = jax.lax.broadcasted_iota(jnp.int32, (n_pad, 1), 0)
    onehot_t = (node_ids == obj_ref[...]).astype(jnp.float32) \
                                          .astype(jnp.bfloat16)  # [N_pad, tE]

    # bf16 hi/lo split: two bf16 MXU passes (f32 accumulate) instead of the
    # emulated-f32 MXU path, recovering ~f32 accuracy.
    m_hi = message.astype(jnp.bfloat16)
    m_lo = (message - m_hi.astype(jnp.float32)).astype(jnp.bfloat16)
    agg_ref[0] += (
        jnp.dot(onehot_t, m_hi, preferred_element_type=jnp.float32)
        + jnp.dot(onehot_t, m_lo, preferred_element_type=jnp.float32))


def gnn_layer_forward(q_sub, q_rel, hidden, edges, n_node, old_nodes_new_idx,
                      params, *, tile_e=1024, num_cores=1):
    """Pallas implementation of GNNLayer.forward (act = identity)."""
    del q_sub, old_nodes_new_idx  # unused in the reference forward pass
    assert tile_e % _LANE == 0, "tile_e must be a multiple of 128"

    rela_embed = params["rela_embed"]                         # [2*n_rel+1, D]
    ws, wr, wqr = params["Ws"], params["Wr"], params["Wqr"]   # [D, A] each
    bqr = params["bqr"]                                       # [1, A]
    wa, ba = params["w_alpha"], params["b_alpha"]             # [A, 1], [1, 1]
    wh = params["W_h"]                                        # [D, O]

    D = ws.shape[0]
    A = ws.shape[1]
    O = wh.shape[1]

    D_pad = _round_up(D, _LANE)
    A_pad = _round_up(A + 1, _LANE)     # +1 lane carries b_alpha
    K = 3 * D + 1                       # hs | hr | h_qr | ones (Wqr bias)
    K_pad = _round_up(K, _LANE)
    N_pad = _round_up(n_node, 8)

    sub = edges[:, 4]
    rel = edges[:, 2]
    obj = edges[:, 5]
    r_idx = edges[:, 0]

    # --- glue: data-dependent gathers (plain JAX) --------------------------
    hs = hidden[sub].astype(jnp.float32)                      # [E, D]
    hr = rela_embed[rel].astype(jnp.float32)                  # [E, D]
    h_qr = rela_embed[q_rel][r_idx].astype(jnp.float32)       # [E, D]
    E = hs.shape[0]

    # Single fused edge stream: [hs | hr | h_qr | 1], lane-padded to K_pad.
    ones = jnp.ones((E, 1), jnp.float32)
    x_cat = jnp.concatenate([hs, hr, h_qr, ones], axis=1)     # [E, K]

    # Edge-row padding: padded rows are all-zero -> message == 0 and obj == 0,
    # so they contribute nothing to node 0.
    chunk = num_cores * tile_e
    E_pad = max(_round_up(E, chunk), chunk)
    pad_rows = E_pad - E
    x_cat = jnp.pad(x_cat, ((0, pad_rows), (0, K_pad - K)))
    obj_row = jnp.pad(obj.astype(jnp.int32), ((0, pad_rows),)).reshape(1, E_pad)

    # Attention column block [K_pad, A_pad] = rows [Ws ; Wr ; Wqr ; bqr],
    # with W_stack[3D, A] = 1 so attn[:, A] == 1 for every real edge — that
    # lane folds b_alpha into the wa_row reduce below.
    w_attn = jnp.concatenate([ws, wr, wqr, bqr], axis=0).astype(jnp.float32)
    w_attn = jnp.pad(w_attn, ((0, K_pad - K), (0, A_pad - A)))
    w_attn = w_attn.at[3 * D, A].set(1.0)

    # Message column block [K_pad, D_pad]: identity rows for hs and hr, zeros
    # for h_qr / ones -> y_msg = hs + hr straight out of the fused matmul.
    eye = jnp.eye(D, dtype=jnp.float32)
    sel = jnp.concatenate([eye, eye, jnp.zeros((D + 1, D), jnp.float32)], axis=0)
    sel = jnp.pad(sel, ((0, K_pad - K), (0, D_pad - D)))

    w_stack = jnp.concatenate([w_attn, sel], axis=1)          # [K_pad, A_pad+D_pad]

    # w_alpha as a lane-padded row; lane A carries b_alpha.
    wa_row = jnp.pad(wa.astype(jnp.float32).T, ((0, 0), (0, A_pad - A)))
    wa_row = wa_row.at[0, A].set(ba.reshape(()).astype(jnp.float32))

    steps = E_pad // chunk               # inner (reduction) steps per core
    grid = (num_cores, steps)

    edge_spec = lambda width: pl.BlockSpec(
        (tile_e, width), lambda c, e: (c * steps + e, 0))
    const_spec = lambda s: pl.BlockSpec(s, lambda c, e: (0, 0))

    agg_parts = pl.pallas_call(
        _gnn_kernel,
        out_shape=jax.ShapeDtypeStruct((num_cores, N_pad, D_pad), jnp.float32),
        grid_spec=pltpu.PrefetchScalarGridSpec(
            num_scalar_prefetch=0,
            grid=grid,
            in_specs=[
                edge_spec(K_pad),                               # x_cat
                pl.BlockSpec((1, tile_e),
                             lambda c, e: (0, c * steps + e)),  # obj (lane axis)
                const_spec((K_pad, A_pad + D_pad)),             # W_stack (attn | msg)
                const_spec((1, A_pad)),                         # wa_row (+b_alpha)
            ],
            out_specs=pl.BlockSpec((1, N_pad, D_pad), lambda c, e: (c, 0, 0)),
        ),
        compiler_params=pltpu.CompilerParams(
            # TODO(synk): on v7x set num_cores=2 and use pltpu.CORE_PARALLEL on
            # the leading axis to shard edges across both TensorCores.
            dimension_semantics=("parallel", "arbitrary"),
            vmem_limit_bytes=48 * 1024 * 1024,
        ),
    )(x_cat, obj_row, w_stack, wa_row)

    # Core-sum + W_h matmul in the wrapper (act is the identity, W_h linear).
    agg = agg_parts.sum(axis=0)[:n_node, :D]
    return agg @ wh.astype(jnp.float32)


def _reference_forward(q_rel, hidden, edges, n_node, params):
    """Pure-JAX reference matching the PyTorch semantics."""
    rela_embed = params["rela_embed"]
    sub, rel, obj, r_idx = edges[:, 4], edges[:, 2], edges[:, 5], edges[:, 0]
    hs = hidden[sub]
    hr = rela_embed[rel]
    h_qr = rela_embed[q_rel][r_idx]
    message = hs + hr
    pre = (hs @ params["Ws"] + hr @ params["Wr"]
           + h_qr @ params["Wqr"] + params["bqr"])
    alpha = jax.nn.sigmoid(jnp.maximum(pre, 0.0) @ params["w_alpha"]
                           + params["b_alpha"])
    message = alpha * message
    agg = jnp.zeros((n_node, hidden.shape[1]), jnp.float32).at[obj].add(message)
    return agg @ params["W_h"]


if __name__ == "__main__":
    # small shapes consistent with the module
    n_rel, in_dim, attn_dim, out_dim = 5, 32, 16, 32
    n_node, E, B = 48, 100, 2

    key = jax.random.PRNGKey(0)
    ks = jax.random.split(key, 12)

    params = {
        "rela_embed": jax.random.normal(ks[0], (2 * n_rel + 1, in_dim), jnp.float32) * 0.1,
        "Ws":      jax.random.normal(ks[1], (in_dim, attn_dim), jnp.float32) * 0.1,
        "Wr":      jax.random.normal(ks[2], (in_dim, attn_dim), jnp.float32) * 0.1,
        "Wqr":     jax.random.normal(ks[3], (in_dim, attn_dim), jnp.float32) * 0.1,
        "bqr":     jax.random.normal(ks[4], (1, attn_dim), jnp.float32) * 0.1,
        "w_alpha": jax.random.normal(ks[5], (attn_dim, 1), jnp.float32) * 0.1,
        "b_alpha": jax.random.normal(ks[6], (1, 1), jnp.float32) * 0.1,
        "W_h":     jax.random.normal(ks[7], (in_dim, out_dim), jnp.float32) * 0.1,
    }

    hidden = jax.random.normal(ks[8], (n_node, in_dim), jnp.float32)
    q_rel = jax.random.randint(ks[9], (B,), 0, 2 * n_rel + 1, jnp.int32)
    q_sub = jax.random.randint(ks[9], (B,), 0, n_node, jnp.int32)

    ek = jax.random.split(ks[10], 4)
    edges = jnp.stack([
        jax.random.randint(ek[0], (E,), 0, B, jnp.int32),              # 0: r_idx
        jnp.zeros((E,), jnp.int32),                                    # 1: unused
        jax.random.randint(ek[1], (E,), 0, 2 * n_rel + 1, jnp.int32),  # 2: rel
        jnp.zeros((E,), jnp.int32),                                    # 3: unused
        jax.random.randint(ek[2], (E,), 0, n_node, jnp.int32),         # 4: sub
        jax.random.randint(ek[3], (E,), 0, n_node, jnp.int32),         # 5: obj
    ], axis=1)
    old_nodes_new_idx = jnp.arange(n_node, dtype=jnp.int32)

    out = gnn_layer_forward(q_sub, q_rel, hidden, edges, n_node,
                            old_nodes_new_idx, params)
    out = jax.block_until_ready(out)

    ref = _reference_forward(q_rel, hidden, edges, n_node, params)
    if not jnp.allclose(out, ref, atol=1e-4, rtol=1e-4):
        raise AssertionError("Pallas GNNLayer output mismatch vs reference")

    print("KERNEL_OK")
</pallas_src>

<mosaic_0001>
module attributes {stable_mosaic.version = 11 : i64} {
  func.func @_gnn_kernel(%arg0: i32, %arg1: i32, %arg2: memref<1024x128xf32, #tpu.memory_space<vmem>>, %arg3: memref<1x1024xi32, #tpu.memory_space<vmem>>, %arg4: memref<128x256xf32, #tpu.memory_space<vmem>>, %arg5: memref<1x128xf32, #tpu.memory_space<vmem>>, %arg6: memref<1x48x128xf32, #tpu.memory_space<vmem>>) attributes {dimension_semantics = [#tpu.dimension_semantics<parallel>, #tpu.dimension_semantics<arbitrary>], iteration_bounds = array<i64: 1, 1>, scalar_prefetch = 0 : i64, scratch_operands = 0 : i64, tpu.core_type = #tpu.core_type<tc>, window_params = [{transform_indices = @transform_0, window_bounds = array<i64: 1024, 128>}, {transform_indices = @transform_1, window_bounds = array<i64: 1, 1024>}, {pipeline_mode = #tpu.pipeline_mode<synchronous>, transform_indices = @transform_2, window_bounds = array<i64: 128, 256>}, {pipeline_mode = #tpu.pipeline_mode<synchronous>, transform_indices = @transform_3, window_bounds = array<i64: 1, 128>}, {transform_indices = @transform_4, window_bounds = array<i64: 1, 48, 128>}]} {
    %c0_i32 = arith.constant 0 : i32
    %0 = arith.cmpi eq, %arg1, %c0_i32 : i32
    %1 = arith.extui %0 : i1 to i32
    %c0_i32_0 = arith.constant 0 : i32
    %2 = arith.cmpi ne, %1, %c0_i32_0 : i32
    scf.if %2 {
      %cst_19 = arith.constant 0.000000e+00 : f32
      %43 = vector.broadcast %cst_19 : f32 to vector<1x48x128xf32>
      %c0_20 = arith.constant 0 : index
      %c0_21 = arith.constant 0 : index
      %c0_22 = arith.constant 0 : index
      %44 = vector.load %arg6[%c0_20, %c0_21, %c0_22] : memref<1x48x128xf32, #tpu.memory_space<vmem>>, vector<1x48x128xf32>
      tpu.vector_store %arg6[%c0_20, %c0_21, %c0_22], %43 {strides = array<i32>} : memref<1x48x128xf32, #tpu.memory_space<vmem>>, vector<1x48x128xf32>,
    } else {
    }
    %c0 = arith.constant 0 : index
    %c0_1 = arith.constant 0 : index
    %3 = vector.load %arg2[%c0, %c0_1] : memref<1024x128xf32, #tpu.memory_space<vmem>>, vector<1024x128xf32>
    %c0_2 = arith.constant 0 : index
    %c0_3 = arith.constant 0 : index
    %4 = vector.load %arg4[%c0_2, %c0_3] : memref<128x256xf32, #tpu.memory_space<vmem>>, vector<128x256xf32>
    %cst = arith.constant dense<0.000000e+00> : vector<1024x256xf32>
    %5 = tpu.matmul %3, %4, %cst {dimension_numbers = #tpu.dot_dimension_numbers<[1], [0], [0], [1], [0, 0, 1, 1], [], []>} : vector<1024x128xf32>, vector<128x256xf32>, vector<1024x256xf32> -> vector<1024x256xf32>
    %6 = vector.extract_strided_slice %5 {offsets = [0, 0], sizes = [1024, 128], strides = [1, 1]} : vector<1024x256xf32> to vector<1024x128xf32>
    %cst_4 = arith.constant 0.000000e+00 : f32
    %7 = vector.broadcast %cst_4 : f32 to vector<1024x128xf32>
    %8 = arith.maximumf %6, %7 : vector<1024x128xf32>
    %9 = vector.extract_strided_slice %5 {offsets = [0, 128], sizes = [1024, 128], strides = [1, 1]} : vector<1024x256xf32> to vector<1024x128xf32>
    %c0_5 = arith.constant 0 : index
    %c0_6 = arith.constant 0 : index
    %10 = vector.load %arg5[%c0_5, %c0_6] : memref<1x128xf32, #tpu.memory_space<vmem>>, vector<1x128xf32>
    %11 = vector.broadcast %10 : vector<1x128xf32> to vector<1024x128xf32>
    %12 = arith.mulf %8, %11 : vector<1024x128xf32>
    %cst_7 = arith.constant dense<0.000000e+00> : vector<1024xf32>
    %13 = vector.multi_reduction <add>, %12, %cst_7 [1] : vector<1024x128xf32> to vector<1024xf32>
    %14 = vector.shape_cast %13 : vector<1024xf32> to vector<1024x1xf32>
    %15 = arith.negf %14 : vector<1024x1xf32>
    %16 = math.exp %15 : vector<1024x1xf32>
    %cst_8 = arith.constant 1.000000e+00 : f32
    %17 = vector.broadcast %cst_8 : f32 to vector<1024x1xf32>
    %18 = arith.addf %17, %16 : vector<1024x1xf32>
    %19 = arith.divf %17, %18 : vector<1024x1xf32>
    %20 = vector.broadcast %19 : vector<1024x1xf32> to vector<1024x128xf32>
    %21 = arith.mulf %20, %9 : vector<1024x128xf32>
    %22 = tpu.iota {dimensions = array<i32: 0>} : vector<48x1xi32>
    %c0_9 = arith.constant 0 : index
    %c0_10 = arith.constant 0 : index
    %23 = vector.load %arg3[%c0_9, %c0_10] : memref<1x1024xi32, #tpu.memory_space<vmem>>, vector<1x1024xi32>
    %24 = vector.broadcast %22 : vector<48x1xi32> to vector<48x1024xi32>
    %25 = vector.broadcast %23 : vector<1x1024xi32> to vector<48x1024xi32>
    %26 = arith.cmpi eq, %24, %25 : vector<48x1024xi32>
    %27 = arith.extui %26 : vector<48x1024xi1> to vector<48x1024xi32>
    %28 = arith.sitofp %27 : vector<48x1024xi32> to vector<48x1024xf32>
    %29 = arith.truncf %28 : vector<48x1024xf32> to vector<48x1024xbf16>
    %30 = arith.truncf %21 : vector<1024x128xf32> to vector<1024x128xbf16>
    %31 = arith.extf %30 : vector<1024x128xbf16> to vector<1024x128xf32>
    %32 = arith.subf %21, %31 : vector<1024x128xf32>
    %33 = arith.truncf %32 : vector<1024x128xf32> to vector<1024x128xbf16>
    %c0_11 = arith.constant 0 : index
    %c0_12 = arith.constant 0 : index
    %c0_13 = arith.constant 0 : index
    %34 = vector.load %arg6[%c0_11, %c0_12, %c0_13] : memref<1x48x128xf32, #tpu.memory_space<vmem>>, vector<1x48x128xf32>
    %35 = vector.shape_cast %34 : vector<1x48x128xf32> to vector<48x128xf32>
    %cst_14 = arith.constant dense<0.000000e+00> : vector<48x128xf32>
    %36 = tpu.matmul %29, %30, %cst_14 {dimension_numbers = #tpu.dot_dimension_numbers<[1], [0], [0], [1], [0, 0, 1, 1], [], []>} : vector<48x1024xbf16>, vector<1024x128xbf16>, vector<48x128xf32> -> vector<48x128xf32>
    %cst_15 = arith.constant dense<0.000000e+00> : vector<48x128xf32>
    %37 = tpu.matmul %29, %33, %cst_15 {dimension_numbers = #tpu.dot_dimension_numbers<[1], [0], [0], [1], [0, 0, 1, 1], [], []>} : vector<48x1024xbf16>, vector<1024x128xbf16>, vector<48x128xf32> -> vector<48x128xf32>
    %38 = arith.addf %36, %37 : vector<48x128xf32>
    %39 = arith.addf %35, %38 : vector<48x128xf32>
    %c0_16 = arith.constant 0 : index
    %c0_17 = arith.constant 0 : index
    %c0_18 = arith.constant 0 : index
    %40 = vector.load %arg6[%c0_16, %c0_17, %c0_18] : memref<1x48x128xf32, #tpu.memory_space<vmem>>, vector<1x48x128xf32>
    %41 = vector.shape_cast %40 : vector<1x48x128xf32> to vector<48x128xf32>
    %42 = vector.shape_cast %39 : vector<48x128xf32> to vector<1x48x128xf32>
    tpu.vector_store %arg6[%c0_16, %c0_17, %c0_18], %42 {strides = array<i32>} : memref<1x48x128xf32, #tpu.memory_space<vmem>>, vector<1x48x128xf32>,
    return
  }
  func.func @transform_0(%arg0: i32, %arg1: i32) -> (i32, i32) {
    %c1_i32 = arith.constant 1 : i32
    %0 = arith.muli %arg0, %c1_i32 : i32
    %1 = arith.addi %0, %arg1 : i32
    %c0_i32 = arith.constant 0 : i32
    %c0_i32_0 = arith.constant 0 : i32
    return %1, %c0_i32 : i32, i32
  }
  func.func @transform_1(%arg0: i32, %arg1: i32) -> (i32, i32) {
    %c1_i32 = arith.constant 1 : i32
    %0 = arith.muli %arg0, %c1_i32 : i32
    %1 = arith.addi %0, %arg1 : i32
    %c0_i32 = arith.constant 0 : i32
    %c0_i32_0 = arith.constant 0 : i32
    return %c0_i32, %1 : i32, i32
  }
  func.func @transform_2(%arg0: i32, %arg1: i32) -> (i32, i32) {
    %c0_i32 = arith.constant 0 : i32
    %c0_i32_0 = arith.constant 0 : i32
    %c0_i32_1 = arith.constant 0 : i32
    return %c0_i32, %c0_i32_0 : i32, i32
  }
  func.func @transform_3(%arg0: i32, %arg1: i32) -> (i32, i32) {
    %c0_i32 = arith.constant 0 : i32
    %c0_i32_0 = arith.constant 0 : i32
    %c0_i32_1 = arith.constant 0 : i32
    return %c0_i32, %c0_i32_0 : i32, i32
  }
  func.func @transform_4(%arg0: i32, %arg1: i32) -> (i32, i32, i32) {
    %c0_i32 = arith.constant 0 : i32
    %c0_i32_0 = arith.constant 0 : i32
    %c0_i32_1 = arith.constant 0 : i32
    return %arg0, %c0_i32, %c0_i32_0 : i32, i32, i32
  }
}

</mosaic_0001>

<bundles_post_ra>
// kernel: tpu_custom_call.1
= control target key start
LH: loop header
LB: loop body
LE: loop exit
PB: predicated region body
PF: predicated region fallthrough
CT: control target
= control target key end

     0   :  { %9 = vsyncpa [#allocation3], 0  ;;  %s12516_s0 = inlined_call_operand.hbm [shape: f32[1024,128], index: 0, kind: input, shape index: {}]   ;;  %s12517_s1 = inlined_call_operand.hbm [shape: s32[1,1024], index: 1, kind: input, shape index: {}]   ;;  %s12518_s2 = inlined_call_operand.hbm [shape: f32[128,256], index: 2, kind: input, shape index: {}]   ;;  %s12519_s3 = inlined_call_operand.vmem [shape: f32[1,128], index: 3, kind: input, shape index: {}]   ;;  %s12520_s4 = inlined_call_operand.hbm [shape: f32[1,48,128], index: 4, kind: output, shape index: {}]  }
   0x1   :  { %10 = vsyncpa [#allocation6], 0  ;;  %s37_s17 = sshll.u32 %s12517_s1, 4  ;;  %s38_s17 = int_to_ptr.hbm [resolvable:$true] %s37_s17 }
   0x2   :  { %11 = vsyncpa [#allocation4], 0  ;;  %s6547_s18 = smov [#allocation5]   ;;  %s20_s22 = sshll.u32 %s12516_s0, 4  ;;  %s21_s22 = int_to_ptr.hbm [resolvable:$true] %s20_s22 }
   0x3   :  { %s39_s19 = sshll.u32 %s6547_s18, 4  ;;  %s6548_s23 = smov [#allocation2]   ;;  %s40_s19 = int_to_ptr.vmem [resolvable:$true] %s39_s19 }
   0x4   :  { %42 = dma.hbm_to_vmem [thread:$0]  %s38_s17, 128, %s40_s19, [#allocation6]  }
   0x5   :  { %s22_s24 = sshll.u32 %s6548_s23, 4  ;;  %s6549_s25 = smov 128   ;;  %s23_s24 = int_to_ptr.vmem [resolvable:$true] %s22_s24 }
   0x6   :  { %s6550_s26 = smov 8   ;;  %s47_s28 = sshll.u32 %s12518_s2, 4  ;;  %s48_s28 = int_to_ptr.hbm [resolvable:$true] %s47_s28 }
   0x7   :  { %28 = dma.hbm_to_vmem [thread:$0]  %s21_s22, 16384, %s23_s24, [#allocation3], %s6549_s25, %s6549_s25, %s6550_s26  }
   0x8   :  { %s6551_s29 = smov [#allocation7]   ;;  %s6552_s0 = smov 256  }
   0x9   :  { %s49_s30 = sshll.u32 %s6551_s29, 4  ;;  %s6553_s5 = smov 16   ;;  %s50_s30 = int_to_ptr.vmem [resolvable:$true] %s49_s30 }
   0xa   :  { %55 = dma.hbm_to_vmem [thread:$0]  %s48_s28, 4096, %s50_s30, [#allocation6], %s6552_s0, %s6552_s0, %s6553_s5  }
   0xb   :  { %6541 = dma.done.wait [#allocation3], 16384  }
   0xc   :  { %6542 = vsyncadd [#allocation3], 4294950912 }
   0xd   :  { %6543 = dma.done.wait [#allocation6], 4224  }
   0xe   :  { %6544 = vsyncadd [#allocation6], 4294963072  ;;  %v242_v0 = vld [vmem:[#allocation7 + $0xf0] sm:$0xff]  ;;  %v240_v1 = vld [vmem:[#allocation7 + $0xe0] sm:$0xff]  ;;  %s5546_s22 = sshll.u32 %s12520_s4, 4  ;;  %s5547_s22 = int_to_ptr.hbm [resolvable:$true] %s5546_s22 }
   0xf   :  { %244 = vmatpush.msra.mxu0 %v242_v0  ;;  %5832 = vmatpush.msra.mxu2 %v242_v0  ;;  %v238_v2 = vld [vmem:[#allocation7 + $0xd0] sm:$0xff]  ;;  %v236_v3 = vld [vmem:[#allocation7 + $0xc0] sm:$0xff]  ;;  %v6593_v16 = vld [vmem:[#allocation2] sm:$0xff] }
  0x10   :  { %v234_v4 = vld [vmem:[#allocation7 + $0xb0] sm:$0xff]  ;;  %v232_v5 = vld [vmem:[#allocation7 + $0xa0] sm:$0xff]  ;;  %v6595_v17 = vld [vmem:[#allocation2 + $0x2c0] sm:$0xff] }
  0x11   :  { %245 = vmatpush.msra.mxu0 %v240_v1  ;;  %5833 = vmatpush.msra.mxu2 %v240_v1  ;;  %v230_v6 = vld [vmem:[#allocation7 + $0x90] sm:$0xff]  ;;  %v228_v7 = vld [vmem:[#allocation7 + $0x80] sm:$0xff]  ;;  %v6605_v20 = vld [vmem:[#allocation2 + $0x10] sm:$0xff] }
  0x12   :  { %v226_v8 = vld [vmem:[#allocation7 + $0x70] sm:$0xff]  ;;  %v224_v9 = vld [vmem:[#allocation7 + $0x60] sm:$0xff]  ;;  %v6607_v21 = vld [vmem:[#allocation2 + $0x2d0] sm:$0xff] }
  0x13   :  { %246 = vmatpush.msra.mxu0 %v238_v2  ;;  %5834 = vmatpush.msra.mxu2 %v238_v2  ;;  %v222_v10 = vld [vmem:[#allocation7 + $0x50] sm:$0xff]  ;;  %v220_v11 = vld [vmem:[#allocation7 + $0x40] sm:$0xff]  ;;  %v6617_v24 = vld [vmem:[#allocation2 + $0x20] sm:$0xff] }
  0x14   :  { %v218_v12 = vld [vmem:[#allocation7 + $0x30] sm:$0xff]  ;;  %v216_v13 = vld [vmem:[#allocation7 + $0x20] sm:$0xff]  ;;  %v6619_v25 = vld [vmem:[#allocation2 + $0x2e0] sm:$0xff] }
  0x15   :  { %247 = vmatpush.msra.mxu0 %v236_v3  ;;  %5835 = vmatpush.msra.mxu2 %v236_v3  ;;  %v214_v14 = vld [vmem:[#allocation7 + $0x10] sm:$0xff]  ;;  %v212_v15 = vld [vmem:[#allocation7] sm:$0xff]  ;;  %v6629_v28 = vld [vmem:[#allocation2 + $0x30] sm:$0xff] }
  0x16   :  { %v6599_v18 = vld [vmem:[#allocation2 + $0x8] sm:$0xff]  ;;  %v6611_v22 = vld [vmem:[#allocation2 + $0x18] sm:$0xff]  ;;  %v6631_v29 = vld [vmem:[#allocation2 + $0x2f0] sm:$0xff] }
  0x17   :  { %248 = vmatpush.msra.mxu0 %v234_v4  ;;  %5836 = vmatpush.msra.mxu2 %v234_v4  ;;  %v6601_v19 = vld [vmem:[#allocation2 + $0x2c8] sm:$0xff]  ;;  %v6613_v23 = vld [vmem:[#allocation2 + $0x2d8] sm:$0xff]  ;;  %v6641_v32 = vld [vmem:[#allocation2 + $0x40] sm:$0xff] }
  0x18   :  { %v6623_v26 = vld [vmem:[#allocation2 + $0x28] sm:$0xff]  ;;  %v6635_v30 = vld [vmem:[#allocation2 + $0x38] sm:$0xff]  ;;  %v6643_v33 = vld [vmem:[#allocation2 + $0x300] sm:$0xff] }
  0x19   :  { %249 = vmatpush.msra.mxu0 %v232_v5  ;;  %5837 = vmatpush.msra.mxu2 %v232_v5  ;;  %v6625_v27 = vld [vmem:[#allocation2 + $0x2e8] sm:$0xff]  ;;  %v6637_v31 = vld [vmem:[#allocation2 + $0x2f8] sm:$0xff]  ;;  %v6653_v36 = vld [vmem:[#allocation2 + $0x50] sm:$0xff] }
  0x1a   :  { %v6647_v34 = vld [vmem:[#allocation2 + $0x48] sm:$0xff]  ;;  %v6655_v37 = vld [vmem:[#allocation2 + $0x310] sm:$0xff]  ;;  %v243_v38 = vld [vmem:[#allocation7 + $0xf8] sm:$0xff] }
  0x1b   :  { %250 = vmatpush.msra.mxu0 %v230_v6  ;;  %5838 = vmatpush.msra.mxu2 %v230_v6  ;;  %v6649_v35 = vld [vmem:[#allocation2 + $0x308] sm:$0xff]  ;;  %v241_v39 = vld [vmem:[#allocation7 + $0xe8] sm:$0xff]  ;;  %v6659_v40 = vld [vmem:[#allocation2 + $0x58] sm:$0xff] }
  0x1c   :  { %645 = vmatpush.msra.mxu1 %v243_v38  ;;  %5848 = vmatpush.msra.mxu3 %v243_v38  ;;  %v6661_v41 = vld [vmem:[#allocation2 + $0x318] sm:$0xff]  ;;  %v239_v42 = vld [vmem:[#allocation7 + $0xd8] sm:$0xff]  ;;  %v237_v43 = vld [vmem:[#allocation7 + $0xc8] sm:$0xff] }
  0x1d   :  { %251 = vmatpush.msra.mxu0 %v228_v7  ;;  %5839 = vmatpush.msra.mxu2 %v228_v7  ;;  %v235_v44 = vld [vmem:[#allocation7 + $0xb8] sm:$0xff]  ;;  %v233_v47 = vld [vmem:[#allocation7 + $0xa8] sm:$0xff]  ;;  %v6671_v51 = vld [vmem:[#allocation2 + $0x68] sm:$0xff] }
  0x1e   :  { %646 = vmatpush.msra.mxu1 %v241_v39  ;;  %5849 = vmatpush.msra.mxu3 %v241_v39  ;;  %v6665_v45 = vld [vmem:[#allocation2 + $0x60] sm:$0xff]  ;;  %v229_v49 = vld [vmem:[#allocation7 + $0x88] sm:$0xff]  ;;  %v6673_v52 = vld [vmem:[#allocation2 + $0x328] sm:$0xff] }
  0x1f   :  { %252 = vmatpush.msra.mxu0 %v226_v8  ;;  %5840 = vmatpush.msra.mxu2 %v226_v8  ;;  %v6667_v46 = vld [vmem:[#allocation2 + $0x320] sm:$0xff]  ;;  %v225_v53 = vld [vmem:[#allocation7 + $0x68] sm:$0xff]  ;;  %v6685_v62 = vld [vmem:[#allocation2 + $0x78] sm:$0xff] }
  0x20   :  { %647 = vmatpush.msra.mxu1 %v239_v42  ;;  %5850 = vmatpush.msra.mxu3 %v239_v42  ;;  %v231_v48 = vld [vmem:[#allocation7 + $0x98] sm:$0xff]  ;;  %v221_v55 = vld [vmem:[#allocation7 + $0x48] sm:$0xff]  ;;  %v6687_v63 = vld [vmem:[#allocation2 + $0x338] sm:$0xff] }
  0x21   :  { %253 = vmatpush.msra.mxu0 %v224_v9  ;;  %5841 = vmatpush.msra.mxu2 %v224_v9  ;;  %v227_v50 = vld [vmem:[#allocation7 + $0x78] sm:$0xff]  ;;  %v6677_v57 = vld [vmem:[#allocation2 + $0x70] sm:$0xff]  ;;  %v6707_v9 = vld [vmem:[#allocation2 + $0x88] sm:$0xff] }
  0x22   :  { %648 = vmatpush.msra.mxu1 %v237_v43  ;;  %5851 = vmatpush.msra.mxu3 %v237_v43  ;;  %v223_v54 = vld [vmem:[#allocation7 + $0x58] sm:$0xff]  ;;  %v6679_v58 = vld [vmem:[#allocation2 + $0x330] sm:$0xff]  ;;  %v6727_v39 = vld [vmem:[#allocation2 + $0x98] sm:$0xff] }
  0x23   :  { %254 = vmatpush.msra.mxu0 %v222_v10  ;;  %5842 = vmatpush.msra.mxu2 %v222_v10  ;;  %v219_v56 = vld [vmem:[#allocation7 + $0x38] sm:$0xff]  ;;  %v217_v59 = vld [vmem:[#allocation7 + $0x28] sm:$0xff]  ;;  %v6709_v10 = vld [vmem:[#allocation2 + $0x348] sm:$0xff] }
  0x24   :  { %649 = vmatpush.msra.mxu1 %v235_v44  ;;  %5852 = vmatpush.msra.mxu3 %v235_v44  ;;  %v215_v60 = vld [vmem:[#allocation7 + $0x18] sm:$0xff]  ;;  %v213_v61 = vld [vmem:[#allocation7 + $0x8] sm:$0xff]  ;;  %v6729_v42 = vld [vmem:[#allocation2 + $0x358] sm:$0xff] }
  0x25   :  { %255 = vmatpush.msra.mxu0 %v220_v11  ;;  %5843 = vmatpush.msra.mxu2 %v220_v11  ;;  %v6694_v0 = vld [vmem:[%s12519_s3] ss:$0 sm:$0xff] }
  0x26   :  { %650 = vmatpush.msra.mxu1 %v233_v47  ;;  %5853 = vmatpush.msra.mxu3 %v233_v47  ;;  %v6698_v2 = vld [vmem:[#allocation2 + $0x80] sm:$0xff] }
  0x27   :  { %256 = vmatpush.msra.mxu0 %v218_v12  ;;  %5844 = vmatpush.msra.mxu2 %v218_v12  ;;  %v6700_v3 = vld [vmem:[#allocation2 + $0x340] sm:$0xff] }
  0x28   :  { %651 = vmatpush.msra.mxu1 %v231_v48  ;;  %5854 = vmatpush.msra.mxu3 %v231_v48 }
  0x29   :  { %257 = vmatpush.msra.mxu0 %v216_v13  ;;  %5845 = vmatpush.msra.mxu2 %v216_v13 }
  0x2a   :  { %652 = vmatpush.msra.mxu1 %v229_v49  ;;  %5855 = vmatpush.msra.mxu3 %v229_v49  ;;  %v6737_v49 = vld [vmem:[#allocation2 + $0xa0] sm:$0xff] }
  0x2b   :  { %258 = vmatpush.msra.mxu0 %v214_v14  ;;  %5846 = vmatpush.msra.mxu2 %v214_v14 }
  0x2c   :  { %653 = vmatpush.msra.mxu1 %v227_v50  ;;  %5856 = vmatpush.msra.mxu3 %v227_v50  ;;  %v6739_v50 = vld [vmem:[#allocation2 + $0x360] sm:$0xff] }
  0x2d   :  { %259 = vmatpush.msra.mxu0 %v212_v15  ;;  %5847 = vmatpush.msra.mxu2 %v212_v15 }
  0x2e   :  { %260 = vmatmul.f32.vlgmr.msra.gmra.mxu0 %v6593_v16  ;;  %524 = vmatmul.f32.vlgmr.msra.gmra.mxu2 %v6595_v17 }
  0x2f   :  { %654 = vmatpush.msra.mxu1 %v225_v53  ;;  %5857 = vmatpush.msra.mxu3 %v225_v53 }
  0x31   :  { %655 = vmatpush.msra.mxu1 %v223_v54  ;;  %5858 = vmatpush.msra.mxu3 %v223_v54 }
  0x33   :  { %656 = vmatpush.msra.mxu1 %v221_v55  ;;  %5859 = vmatpush.msra.mxu3 %v221_v55 }
  0x35   :  { %657 = vmatpush.msra.mxu1 %v219_v56  ;;  %5860 = vmatpush.msra.mxu3 %v219_v56 }
  0x36   :  { %263 = vmatmul.f32.gmra.mxu0 %v6599_v18  ;;  %527 = vmatmul.f32.gmra.mxu2 %v6601_v19 }
  0x37   :  { %658 = vmatpush.msra.mxu1 %v217_v59  ;;  %5861 = vmatpush.msra.mxu3 %v217_v59  ;;  %v6747_v59 = vld [vmem:[#allocation2 + $0xa8] sm:$0xff] }
  0x39   :  { %659 = vmatpush.msra.mxu1 %v215_v60  ;;  %5862 = vmatpush.msra.mxu3 %v215_v60  ;;  %v6749_v60 = vld [vmem:[#allocation2 + $0x368] sm:$0xff] }
  0x3b   :  { %660 = vmatpush.msra.mxu1 %v213_v61  ;;  %5863 = vmatpush.msra.mxu3 %v213_v61 }
  0x3c   :  { %661 = vmatmul.f32.vlgmr.msra.gmra.mxu1 %v6593_v16  ;;  %925 = vmatmul.f32.vlgmr.msra.gmra.mxu3 %v6595_v17  ;;  %v6717_v17 = vld [vmem:[#allocation2 + $0x90] sm:$0xff] }
  0x3e   :  { %266 = vmatmul.f32.gmra.mxu0 %v6605_v20  ;;  %530 = vmatmul.f32.gmra.mxu2 %v6607_v21 }
  0x44   :  { %664 = vmatmul.f32.gmra.mxu1 %v6599_v18  ;;  %928 = vmatmul.f32.gmra.mxu3 %v6601_v19  ;;  %v6719_v18 = vld [vmem:[#allocation2 + $0x350] sm:$0xff] }
  0x46   :  { %269 = vmatmul.f32.gmra.mxu0 %v6611_v22  ;;  %533 = vmatmul.f32.gmra.mxu2 %v6613_v23 }
  0x4c   :  { %667 = vmatmul.f32.gmra.mxu1 %v6605_v20  ;;  %931 = vmatmul.f32.gmra.mxu3 %v6607_v21 }
  0x4e   :  { %272 = vmatmul.f32.gmra.mxu0 %v6617_v24  ;;  %536 = vmatmul.f32.gmra.mxu2 %v6619_v25 }
  0x54   :  { %670 = vmatmul.f32.gmra.mxu1 %v6611_v22  ;;  %934 = vmatmul.f32.gmra.mxu3 %v6613_v23 }
  0x56   :  { %275 = vmatmul.f32.gmra.mxu0 %v6623_v26  ;;  %539 = vmatmul.f32.gmra.mxu2 %v6625_v27 }
  0x5c   :  { %673 = vmatmul.f32.gmra.mxu1 %v6617_v24  ;;  %937 = vmatmul.f32.gmra.mxu3 %v6619_v25 }
  0x5e   :  { %278 = vmatmul.f32.gmra.mxu0 %v6629_v28  ;;  %542 = vmatmul.f32.gmra.mxu2 %v6631_v29 }
  0x64   :  { %676 = vmatmul.f32.gmra.mxu1 %v6623_v26  ;;  %940 = vmatmul.f32.gmra.mxu3 %v6625_v27 }
  0x66   :  { %281 = vmatmul.f32.gmra.mxu0 %v6635_v30  ;;  %545 = vmatmul.f32.gmra.mxu2 %v6637_v31 }
  0x6c   :  { %679 = vmatmul.f32.gmra.mxu1 %v6629_v28  ;;  %943 = vmatmul.f32.gmra.mxu3 %v6631_v29 }
  0x6e   :  { %284 = vmatmul.f32.gmra.mxu0 %v6641_v32  ;;  %548 = vmatmul.f32.gmra.mxu2 %v6643_v33 }
  0x74   :  { %682 = vmatmul.f32.gmra.mxu1 %v6635_v30  ;;  %946 = vmatmul.f32.gmra.mxu3 %v6637_v31 }
  0x76   :  { %287 = vmatmul.f32.gmra.mxu0 %v6647_v34  ;;  %551 = vmatmul.f32.gmra.mxu2 %v6649_v35 }
  0x7c   :  { %685 = vmatmul.f32.gmra.mxu1 %v6641_v32  ;;  %949 = vmatmul.f32.gmra.mxu3 %v6643_v33 }
  0x7e   :  { %290 = vmatmul.f32.gmra.mxu0 %v6653_v36  ;;  %554 = vmatmul.f32.gmra.mxu2 %v6655_v37 }
  0x84   :  { %688 = vmatmul.f32.gmra.mxu1 %v6647_v34  ;;  %952 = vmatmul.f32.gmra.mxu3 %v6649_v35  ;;  %v6789_v35 = vld [vmem:[#allocation2 + $0xc8] sm:$0xff] }
  0x86   :  { %293 = vmatmul.f32.gmra.mxu0 %v6659_v40  ;;  %557 = vmatmul.f32.gmra.mxu2 %v6661_v41 }
  0x8c   :  { %691 = vmatmul.f32.gmra.mxu1 %v6653_v36  ;;  %955 = vmatmul.f32.gmra.mxu3 %v6655_v37  ;;  %v6800_v37 = vld [vmem:[#allocation2 + $0xd0] sm:$0xff] }
  0x8e   :  { %296 = vmatmul.f32.gmra.mxu0 %v6665_v45  ;;  %560 = vmatmul.f32.gmra.mxu2 %v6667_v46 }
  0x94   :  { %694 = vmatmul.f32.gmra.mxu1 %v6659_v40  ;;  %958 = vmatmul.f32.gmra.mxu3 %v6661_v41  ;;  %v6811_v41 = vld [vmem:[#allocation2 + $0xd8] sm:$0xff] }
  0x96   :  { %299 = vmatmul.f32.gmra.mxu0 %v6671_v51  ;;  %563 = vmatmul.f32.gmra.mxu2 %v6673_v52 }
  0x9c   :  { %697 = vmatmul.f32.gmra.mxu1 %v6665_v45  ;;  %961 = vmatmul.f32.gmra.mxu3 %v6667_v46  ;;  %v6822_v46 = vld [vmem:[#allocation2 + $0xe0] sm:$0xff] }
  0x9e   :  { %302 = vmatmul.f32.gmra.mxu0 %v6677_v57  ;;  %566 = vmatmul.f32.gmra.mxu2 %v6679_v58 }
  0xa4   :  { %700 = vmatmul.f32.gmra.mxu1 %v6671_v51  ;;  %964 = vmatmul.f32.gmra.mxu3 %v6673_v52  ;;  %v6833_v52 = vld [vmem:[#allocation2 + $0xe8] sm:$0xff] }
  0xa6   :  { %305 = vmatmul.f32.gmra.mxu0 %v6685_v62  ;;  %569 = vmatmul.f32.gmra.mxu2 %v6687_v63 }
  0xab   :  { %v261_v1 = vpop.f32.mrf.mxu0 }
  0xac   :  { %v1046_v4 = vmax.f32 %v261_v1, 0.0  ;;  %703 = vmatmul.f32.gmra.mxu1 %v6677_v57  ;;  %967 = vmatmul.f32.gmra.mxu3 %v6679_v58  ;;  %v6844_v58 = vld [vmem:[#allocation2 + $0xf0] sm:$0xff] }
  0xae   :  { %308 = vmatmul.f32.gmra.mxu0 %v6698_v2  ;;  %572 = vmatmul.f32.gmra.mxu2 %v6700_v3  ;;  %v1178_v5 = vmul.f32 %v6694_v0, %v1046_v4 }
  0xb0   :  { %1306 = vadd.xlane.f32.xlu1 %v1178_v5 }
  0xb1   :  { %v525_v6 = vpop.f32.mrf.mxu2 }
  0xb2   :  { %v1134_v7 = vmax.f32 %v525_v6, 0.0  ;;  %v6757_v6 = vld [vmem:[#allocation2 + $0xb0] sm:$0xff] }
  0xb3   :  { %v264_v8 = vpop.f32.mrf.mxu0 }
  0xb4   :  { %v1047_v11 = vmax.f32 %v264_v8, 0.0  ;;  %v1266_v12 = vmul.f32 %v6694_v0, %v1134_v7  ;;  %v6759_v7 = vld [vmem:[#allocation2 + $0x370] sm:$0xff]  ;;  %706 = vmatmul.f32.gmra.mxu1 %v6685_v62  ;;  %970 = vmatmul.f32.gmra.mxu3 %v6687_v63 }
  0xb6   :  { %311 = vmatmul.f32.gmra.mxu0 %v6707_v9  ;;  %575 = vmatmul.f32.gmra.mxu2 %v6709_v10  ;;  %v1179_v13 = vmul.f32 %v6694_v0, %v1047_v11 }
  0xb7   :  { %1482 = vadd.xlane.f32.xlu0 %v1266_v12 }
  0xb8   :  { %1308 = vadd.xlane.f32.xlu2 %v1179_v13 }
  0xb9   :  { %v528_v14 = vpop.f32.mrf.mxu2 }
  0xba   :  { %v1135_v15 = vmax.f32 %v528_v14, 0.0  ;;  %v6767_v14 = vld [vmem:[#allocation2 + $0xb8] sm:$0xff] }
  0xbb   :  { %v267_v16 = vpop.f32.mrf.mxu0 }
  0xbc   :  { %v1048_v19 = vmax.f32 %v267_v16, 0.0  ;;  %v1267_v20 = vmul.f32 %v6694_v0, %v1135_v15  ;;  %v6769_v15 = vld [vmem:[#allocation2 + $0x378] sm:$0xff]  ;;  %709 = vmatmul.f32.gmra.mxu1 %v6698_v2  ;;  %973 = vmatmul.f32.gmra.mxu3 %v6700_v3 }
  0xbe   :  { %314 = vmatmul.f32.gmra.mxu0 %v6717_v17  ;;  %578 = vmatmul.f32.gmra.mxu2 %v6719_v18  ;;  %v1180_v21 = vmul.f32 %v6694_v0, %v1048_v19 }
  0xbf   :  { %1484 = vadd.xlane.f32.xlu1 %v1267_v20 }
  0xc0   :  { %1310 = vadd.xlane.f32.xlu0 %v1180_v21 }
  0xc1   :  { %v531_v38 = vpop.f32.mrf.mxu2 }
  0xc2   :  { %v1136_v22 = vmax.f32 %v531_v38, 0.0  ;;  %v6777_v38 = vld [vmem:[#allocation2 + $0xc0] sm:$0xff] }
  0xc3   :  { %v270_v23 = vpop.f32.mrf.mxu0 }
  0xc4   :  { %v1049_v43 = vmax.f32 %v270_v23, 0.0  ;;  %v1268_v44 = vmul.f32 %v6694_v0, %v1136_v22  ;;  %v6779_v22 = vld [vmem:[#allocation2 + $0x380] sm:$0xff]  ;;  %712 = vmatmul.f32.gmra.mxu1 %v6707_v9  ;;  %976 = vmatmul.f32.gmra.mxu3 %v6709_v10 }
  0xc6   :  { %317 = vmatmul.f32.gmra.mxu0 %v6727_v39  ;;  %581 = vmatmul.f32.gmra.mxu2 %v6729_v42  ;;  %v1181_v47 = vmul.f32 %v6694_v0, %v1049_v43 }
  0xc7   :  { %1486 = vadd.xlane.f32.xlu2 %v1268_v44 }
  0xc8   :  { %1312 = vadd.xlane.f32.xlu1 %v1181_v47 }
  0xc9   :  { %v534_v48 = vpop.f32.mrf.mxu2 }
  0xca   :  { %v1137_v24 = vmax.f32 %v534_v48, 0.0  ;;  %v6791_v48 = vld [vmem:[#allocation2 + $0x388] sm:$0xff] }
  0xcb   :  { %v273_v25 = vpop.f32.mrf.mxu0 }
  0xcc   :  { %v1050_v53 = vmax.f32 %v273_v25, 0.0  ;;  %v1269_v54 = vmul.f32 %v6694_v0, %v1137_v24  ;;  %715 = vmatmul.f32.gmra.mxu1 %v6717_v17  ;;  %979 = vmatmul.f32.gmra.mxu3 %v6719_v18 }
  0xce   :  { %320 = vmatmul.f32.gmra.mxu0 %v6737_v49  ;;  %584 = vmatmul.f32.gmra.mxu2 %v6739_v50  ;;  %v1182_v55 = vmul.f32 %v6694_v0, %v1050_v53 }
  0xcf   :  { %1488 = vadd.xlane.f32.xlu0 %v1269_v54  ;;  %v6802_v54 = vld [vmem:[#allocation2 + $0x390] sm:$0xff] }
  0xd0   :  { %1314 = vadd.xlane.f32.xlu2 %v1182_v55 }
  0xd1   :  { %v537_v56 = vpop.f32.mrf.mxu2 }
  0xd2   :  { %v1138_v26 = vmax.f32 %v537_v56, 0.0 }
  0xd3   :  { %v276_v27 = vpop.f32.mrf.mxu0 }
  0xd4   :  { %v1051_v61 = vmax.f32 %v276_v27, 0.0  ;;  %v1270_v1 = vmul.f32 %v6694_v0, %v1138_v26  ;;  %v6813_v27 = vld [vmem:[#allocation2 + $0x398] sm:$0xff]  ;;  %718 = vmatmul.f32.gmra.mxu1 %v6727_v39  ;;  %982 = vmatmul.f32.gmra.mxu3 %v6729_v42 }
  0xd6   :  { %323 = vmatmul.f32.gmra.mxu0 %v6747_v59  ;;  %587 = vmatmul.f32.gmra.mxu2 %v6749_v60  ;;  %v1183_v4 = vmul.f32 %v6694_v0, %v1051_v61 }
  0xd7   :  { %1490 = vadd.xlane.f32.xlu1 %v1270_v1 }
  0xd8   :  { %1316 = vadd.xlane.f32.xlu0 %v1183_v4 }
  0xd9   :  { %v540_v5 = vpop.f32.mrf.mxu2 }
  0xda   :  { %v1139_v28 = vmax.f32 %v540_v5, 0.0  ;;  %v6824_v5 = vld [vmem:[#allocation2 + $0x3a0] sm:$0xff] }
  0xdb   :  { %v279_v29 = vpop.f32.mrf.mxu0 }
  0xdc   :  { %v1052_v8 = vmax.f32 %v279_v29, 0.0  ;;  %v1271_v11 = vmul.f32 %v6694_v0, %v1139_v28  ;;  %721 = vmatmul.f32.gmra.mxu1 %v6737_v49  ;;  %985 = vmatmul.f32.gmra.mxu3 %v6739_v50 }
  0xde   :  { %326 = vmatmul.f32.gmra.mxu0 %v6757_v6  ;;  %590 = vmatmul.f32.gmra.mxu2 %v6759_v7  ;;  %v1184_v12 = vmul.f32 %v6694_v0, %v1052_v8 }
  0xdf   :  { %1492 = vadd.xlane.f32.xlu2 %v1271_v11  ;;  %v6835_v11 = vld [vmem:[#allocation2 + $0x3a8] sm:$0xff] }
  0xe0   :  { %1318 = vadd.xlane.f32.xlu1 %v1184_v12 }
  0xe1   :  { %v543_v13 = vpop.f32.mrf.mxu2 }
  0xe2   :  { %v1140_v30 = vmax.f32 %v543_v13, 0.0 }
  0xe3   :  { %v282_v31 = vpop.f32.mrf.mxu0 }
  0xe4   :  { %v1053_v16 = vmax.f32 %v282_v31, 0.0  ;;  %v1272_v19 = vmul.f32 %v6694_v0, %v1140_v30  ;;  %v202_v31 = vld [vmem:[#allocation2 + $0x3b0] sm:$0xff]  ;;  %724 = vmatmul.f32.gmra.mxu1 %v6747_v59  ;;  %988 = vmatmul.f32.gmra.mxu3 %v6749_v60 }
  0xe6   :  { %329 = vmatmul.f32.gmra.mxu0 %v6767_v14  ;;  %593 = vmatmul.f32.gmra.mxu2 %v6769_v15  ;;  %v1185_v20 = vmul.f32 %v6694_v0, %v1053_v16 }
  0xe7   :  { %1494 = vadd.xlane.f32.xlu0 %v1272_v19 }
  0xe8   :  { %1320 = vadd.xlane.f32.xlu2 %v1185_v20 }
  0xe9   :  { %v546_v21 = vpop.f32.mrf.mxu2 }
  0xea   :  { %v1141_v32 = vmax.f32 %v546_v21, 0.0  ;;  %v6850_v21 = vpop.f32.mrf.mxu1 }
  0xeb   :  { %v285_v33 = vpop.f32.mrf.mxu0 }
  0xec   :  { %v1054_v23 = vmax.f32 %v285_v33, 0.0  ;;  %v1273_v43 = vmul.f32 %v6694_v0, %v1141_v32  ;;  %v115_v32 = vld [vmem:[#allocation2 + $0xf8] sm:$0xff]  ;;  %727 = vmatmul.f32.gmra.mxu1 %v6757_v6  ;;  %991 = vmatmul.f32.gmra.mxu3 %v6759_v7 }
  0xed   :  { %v203_v33 = vld [vmem:[#allocation2 + $0x3b8] sm:$0xff] }
  0xee   :  { %332 = vmatmul.f32.gmra.mxu0 %v6777_v38  ;;  %596 = vmatmul.f32.gmra.mxu2 %v6779_v22  ;;  %v1186_v44 = vmul.f32 %v6694_v0, %v1054_v23 }
  0xef   :  { %1496 = vadd.xlane.f32.xlu1 %v1273_v43 }
  0xf0   :  { %1322 = vadd.xlane.f32.xlu0 %v1186_v44 }
  0xf1   :  { %v6785_v47 = vpop.f32.mrf.mxu2 }
  0xf2   :  { %12782 = vst [vmem:[#allocation12_spill] sm:$0xff] %v6785_v47 }
  0xf3   :  { %v288_v34 = vpop.f32.mrf.mxu0 }
  0xf4   :  { %v1055_v24 = vmax.f32 %v288_v34, 0.0  ;;  %730 = vmatmul.f32.gmra.mxu1 %v6767_v14  ;;  %994 = vmatmul.f32.gmra.mxu3 %v6769_v15 }
  0xf6   :  { %335 = vmatmul.f32.gmra.mxu0 %v6789_v35  ;;  %599 = vmatmul.f32.gmra.mxu2 %v6791_v48  ;;  %v1187_v25 = vmul.f32 %v6694_v0, %v1055_v24  ;;  %v6857_v24 = vpop.f32.mrf.mxu1 }
  0xf8   :  { %1324 = vadd.xlane.f32.xlu1 %v1187_v25 }
  0xf9   :  { %v6796_v53 = vpop.f32.mrf.mxu2 }
  0xfa   :  { %12783 = vst [vmem:[#allocation13_spill] sm:$0xff] %v6796_v53 }
  0xfb   :  { %v291_v36 = vpop.f32.mrf.mxu0 }
  0xfc   :  { %v1056_v55 = vmax.f32 %v291_v36, 0.0  ;;  %v116_v36 = vld [vmem:[#allocation2 + $0x100] sm:$0xff]  ;;  %733 = vmatmul.f32.gmra.mxu1 %v6777_v38 }
  0xfe   :  { %338 = vmatmul.f32.gmra.mxu0 %v6800_v37  ;;  %602 = vmatmul.f32.gmra.mxu2 %v6802_v54  ;;  %v1188_v56 = vmul.f32 %v6694_v0, %v1056_v55  ;;  %v204_v55 = vld [vmem:[#allocation2 + $0x3c0] sm:$0xff]  ;;  %v6866_v9 = vpop.f32.mrf.mxu1 }
 0x100   :  { %1326 = vadd.xlane.f32.xlu2 %v1188_v56 }
 0x101   :  { %v6807_v26 = vpop.f32.mrf.mxu2 }
 0x102   :  { %12784 = vst [vmem:[#allocation14_spill] sm:$0xff] %v6807_v26 }
 0x103   :  { %v294_v40 = vpop.f32.mrf.mxu0 }
 0x104   :  { %v1057_v61 = vmax.f32 %v294_v40, 0.0  ;;  %736 = vmatmul.f32.gmra.mxu1 %v6789_v35 }
 0x106   :  { %341 = vmatmul.f32.gmra.mxu0 %v6811_v41  ;;  %605 = vmatmul.f32.gmra.mxu2 %v6813_v27  ;;  %v1189_v1 = vmul.f32 %v6694_v0, %v1057_v61 }
 0x108   :  { %1328 = vadd.xlane.f32.xlu0 %v1189_v1 }
 0x109   :  { %v6818_v4 = vpop.f32.mrf.mxu2 }
 0x10a   :  { %12785 = vst [vmem:[#allocation15_spill] sm:$0xff] %v6818_v4 }
 0x10b   :  { %v297_v45 = vpop.f32.mrf.mxu0 }
 0x10c   :  { %v1058_v28 = vmax.f32 %v297_v45, 0.0  ;;  %739 = vmatmul.f32.gmra.mxu1 %v6800_v37 }
 0x10e   :  { %344 = vmatmul.f32.gmra.mxu0 %v6822_v46  ;;  %608 = vmatmul.f32.gmra.mxu2 %v6824_v5  ;;  %v1190_v29 = vmul.f32 %v6694_v0, %v1058_v28 }
 0x110   :  { %1330 = vadd.xlane.f32.xlu2 %v1190_v29 }
 0x111   :  { %v6829_v8 = vpop.f32.mrf.mxu2 }
 0x112   :  { %12786 = vst [vmem:[#allocation16_spill] sm:$0xff] %v6829_v8 }
 0x113   :  { %v300_v51 = vpop.f32.mrf.mxu0 }
 0x114   :  { %v1059_v12 = vmax.f32 %v300_v51, 0.0  ;;  %v117_v51 = vld [vmem:[#allocation2 + $0x108] sm:$0xff] }
 0x116   :  { %347 = vmatmul.f32.gmra.mxu0 %v6833_v52  ;;  %611 = vmatmul.f32.gmra.mxu2 %v6835_v11  ;;  %v1191_v13 = vmul.f32 %v6694_v0, %v1059_v12  ;;  %v205_v12 = vld [vmem:[#allocation2 + $0x3c8] sm:$0xff] }
 0x118   :  { %1332 = vadd.xlane.f32.xlu2 %v1191_v13 }
 0x119   :  { %v6840_v30 = vpop.f32.mrf.mxu2 }
 0x11a   :  { %12787 = vst [vmem:[#allocation17_spill] sm:$0xff] %v6840_v30 }
 0x11b   :  { %v303_v57 = vpop.f32.mrf.mxu0 }
 0x11c   :  { %v1060_v16 = vmax.f32 %v303_v57, 0.0 }
 0x11e   :  { %350 = vmatmul.f32.gmra.mxu0 %v6844_v58  ;;  %614 = vmatmul.f32.gmra.mxu2 %v202_v31  ;;  %v1192_v19 = vmul.f32 %v6694_v0, %v1060_v16 }
 0x120   :  { %1334 = vadd.xlane.f32.xlu0 %v1192_v19 }
 0x121   :  { %v6848_v20 = vpop.f32.mrf.mxu2 }
 0x122   :  { %12788 = vst [vmem:[#allocation18_spill] sm:$0xff] %v6848_v20 }
 0x123   :  { %v1307_v62 = vpop.xlane.xlu1 %1306  ;;  %v306_v63 = vpop.f32.mrf.mxu0 }
 0x124   :  { %v5560_v23 = vmul.f32 -1.442695, %v1307_v62  ;;  %v1061_v43 = vmax.f32 %v306_v63, 0.0 }
 0x126   :  { %5875 = vpow2.f32 %v5560_v23  ;;  %353 = vmatmul.f32.gmra.mxu0 %v115_v32  ;;  %617 = vmatmul.f32.gmra.mxu2 %v203_v33  ;;  %v1193_v44 = vmul.f32 %v6694_v0, %v1061_v43  ;;  %v6876_v33 = vpop.f32.mrf.mxu1 }
 0x127   :  { %12792 = vst [vmem:[#allocation22_spill] sm:$0xff] %v6876_v33  ;;  %742 = vmatmul.f32.gmra.mxu1 %v6811_v41  ;;  %v133_v33 = vld [vmem:[#allocation2 + $0x188] sm:$0xff] }
 0x128   :  { %1336 = vadd.xlane.f32.xlu0 %v1193_v44 }
 0x129   :  { %v6855_v34 = vpop.f32.mrf.mxu2 }
 0x12a   :  { %12789 = vst [vmem:[#allocation19_spill] sm:$0xff] %v6855_v34  ;;  %v6859_v25 = vpop.xlane.xlu0 %1482  ;;  %v126_v34 = vld [vmem:[#allocation2 + $0x150] sm:$0xff] }
 0x12b   :  { %v1309_v2 = vpop.xlane.xlu2 %1308  ;;  %v309_v3 = vpop.f32.mrf.mxu0 }
 0x12c   :  { %v5876_v56 = vpop.eup %5875  ;;  %v5561_v40 = vmul.f32 -1.442695, %v1309_v2  ;;  %v1062_v61 = vmax.f32 %v309_v3, 0.0  ;;  %v118_v2 = vld [vmem:[#allocation2 + $0x110] sm:$0xff] }
 0x12d   :  { %v1946_v1 = vadd.f32 1.0, %v5876_v56  ;;  %v206_v3 = vld [vmem:[#allocation2 + $0x3d0] sm:$0xff] }
 0x12e   :  { %5877 = vpow2.f32 %v5561_v40  ;;  %356 = vmatmul.f32.gmra.mxu0 %v116_v36  ;;  %620 = vmatmul.f32.gmra.mxu2 %v204_v55  ;;  %v1194_v45 = vmul.f32 %v6694_v0, %v1062_v61 }
 0x12f   :  { %5879 = vrcp.f32 %v1946_v1  ;;  %v2085_v32 = vand.u32 2147483648, %v1946_v1  ;;  %v2083_v43 = vand.u32 2147483647, %v1946_v1  ;;  %vm2079_vm1 = vweird.f32 %v1946_v1 }
 0x130   :  { %1338 = vadd.xlane.f32.xlu0 %v1194_v45 }
 0x131   :  { %v6864_v28 = vpop.f32.mrf.mxu2  ;;  %v2086_v40 = vor.u32 1.1754944e-38, %v2085_v32  ;;  %vm2084_vm3 = vcmp.eq.f32.partialorder %v2083_v43, 8.507059e+37 }
 0x132   :  { %12790 = vst [vmem:[#allocation20_spill] sm:$0xff] %v6864_v28  ;;  %v6880_v45 = vpop.xlane.xlu1 %1484 }
 0x133   :  { %v1311_v10 = vpop.xlane.xlu0 %1310  ;;  %v312_v29 = vpop.f32.mrf.mxu0 }
 0x134   :  { %v5878_v13 = vpop.eup %5877  ;;  %v5562_v57 = vmul.f32 -1.442695, %v1311_v10  ;;  %v1063_v31 = vmax.f32 %v312_v29, 0.0 }
 0x135   :  { %v5880_v16 = vpop.eup %5879  ;;  %v6870_v19 = vadd.f32 1.0, %v5878_v13 }
 0x136   :  { %359 = vmatmul.f32.gmra.mxu0 %v117_v51  ;;  %623 = vmatmul.f32.gmra.mxu2 %v205_v12  ;;  %v1195_v62 = vmul.f32 %v6694_v0, %v1063_v31  ;;  %v2075_v63 = vmul.f32 %v5880_v16, %v1946_v1  ;;  %vm2080_vm0 = vweird.f32 %v5880_v16 }
 0x137   :  { %5881 = vrcp.f32 %v6870_v19  ;;  %vm2081_vm2 = vmor %vm2079_vm1, %vm2080_vm0  ;;  %vm2094_vm5 = vweird.f32 %v6870_v19 }
 0x138   :  { %5883 = vpow2.f32 %v5562_v57  ;;  %1340 = vadd.xlane.f32.xlu1 %v1195_v62  ;;  %v2076_v17 = vsub.f32 1.0, %v2075_v63  ;;  %v6889_v57 = vpop.f32.mrf.mxu1  ;;  %v119_v63 = vld [vmem:[#allocation2 + $0x118] sm:$0xff]  ;;  %745 = vmatmul.f32.gmra.mxu1 %v6822_v46 }
 0x139   :  { %v6874_v18 = vpop.f32.mrf.mxu2 }
 0x13a   :  { %12791 = vst [vmem:[#allocation21_spill] sm:$0xff] %v6874_v18  ;;  %v2077_v23 = vmul.f32 %v5880_v16, %v2076_v17  ;;  %v207_v17 = vld [vmem:[#allocation2 + $0x3d8] sm:$0xff]  ;;  %v6896_v43 = vpop.xlane.xlu2 %1486 }
 0x13b   :  { %v315_v44 = vpop.f32.mrf.mxu0 }
 0x13c   :  { %v1064_v36 = vmax.f32 %v315_v44, 0.0  ;;  %v2078_v55 = vadd.f32 %v5880_v16, %v2077_v23 }
 0x13d   :  { %v5882_v56 = vpop.eup %5881 }
 0x13e   :  { %v5884_v61 = vpop.eup %5883  ;;  %362 = vmatmul.f32.gmra.mxu0 %v118_v2  ;;  %v2082_v10 = vsel %vm2081_vm2, %v5880_v16, %v2078_v55  ;;  %626 = vmatmul.f32.gmra.mxu2 %v206_v3  ;;  %v1196_v39 = vmul.f32 %v6694_v0, %v1064_v36  ;;  %v2090_v42 = vmul.f32 %v5882_v56, %v6870_v19  ;;  %v2100_v16 = vand.u32 2147483648, %v6870_v19  ;;  %v1313_v3 = vpop.xlane.xlu1 %1312 }
 0x13f   :  { %v1948_v29 = vadd.f32 1.0, %v5884_v61  ;;  %v2087_v51 = vsel %vm2084_vm3, %v2086_v40, %v2082_v10  ;;  %vm2095_vm4 = vweird.f32 %v5882_v56 }
 0x140   :  { %v6885_v12 = vmul.f32 %v2087_v51, %v6850_v21  ;;  %1342 = vadd.xlane.f32.xlu2 %v1196_v39  ;;  %v2091_v1 = vsub.f32 1.0, %v2090_v42  ;;  %v2098_v21 = vand.u32 2147483647, %v6870_v19  ;;  %vm2096_vm6 = vmor %vm2094_vm5, %vm2095_vm4  ;;  %v2101_v44 = vor.u32 1.1754944e-38, %v2100_v16  ;;  %v6904_v19 = vpop.f32.mrf.mxu1  ;;  %v120_v42 = vld [vmem:[#allocation2 + $0x120] sm:$0xff]  ;;  %748 = vmatmul.f32.gmra.mxu1 %v6833_v52 }
 0x141   :  { %5885 = vrcp.f32 %v1948_v29  ;;  %v6887_v13 = vpop.f32.mrf.mxu2  ;;  %v208_v51 = vld [vmem:[#allocation2 + $0x3e0] sm:$0xff]  ;;  %vm2109_vm9 = vweird.f32 %v1948_v29 }
 0x142   :  { %12793 = vst [vmem:[#allocation23_spill] sm:$0xff] %v6885_v12  ;;  %v2092_v31 = vmul.f32 %v5882_v56, %v2091_v1  ;;  %vm2099_vm7 = vcmp.eq.f32.partialorder %v2098_v21, 8.507059e+37  ;;  %v6908_v1 = vpop.xlane.xlu0 %1488 }
 0x143   :  { %12794 = vst [vmem:[#allocation24_spill] sm:$0xff] %v6887_v13  ;;  %v318_v62 = vpop.f32.mrf.mxu0  ;;  %v1315_v21 = vpop.xlane.xlu2 %1314 }
 0x144   :  { %v1065_v32 = vmax.f32 %v318_v62, 0.0  ;;  %v2093_v23 = vadd.f32 %v5882_v56, %v2092_v31  ;;  %v5648_v62 = vmul.f32 -1.442695, %v6859_v25 }
 0x146   :  { %365 = vmatmul.f32.gmra.mxu0 %v119_v63  ;;  %629 = vmatmul.f32.gmra.mxu2 %v207_v17  ;;  %v1197_v49 = vmul.f32 %v6694_v0, %v1065_v32  ;;  %v2097_v50 = vsel %vm2096_vm6, %v5882_v56, %v2093_v23  ;;  %v2115_v56 = vand.u32 2147483648, %v1948_v29  ;;  %v5563_v23 = vmul.f32 -1.442695, %v1313_v3 }
 0x147   :  { %v5886_v2 = vpop.eup %5885  ;;  %v2102_v36 = vsel %vm2099_vm7, %v2101_v44, %v2097_v50  ;;  %5887 = vpow2.f32 %v5648_v62 }
 0x148   :  { %1344 = vadd.xlane.f32.xlu0 %v1197_v49  ;;  %v2105_v55 = vmul.f32 %v5886_v2, %v1948_v29  ;;  %v6900_v40 = vmul.f32 %v2102_v36, %v6857_v24  ;;  %vm2110_vm8 = vweird.f32 %v5886_v2  ;;  %v2113_v24 = vand.u32 2147483647, %v1948_v29  ;;  %v6914_v50 = vpop.f32.mrf.mxu1  ;;  %751 = vmatmul.f32.gmra.mxu1 %v6844_v58 }
 0x149   :  { %v6902_v61 = vpop.f32.mrf.mxu2  ;;  %vm2111_vm10 = vmor %vm2109_vm9, %vm2110_vm8  ;;  %v2116_v60 = vor.u32 1.1754944e-38, %v2115_v56  ;;  %5889 = vpow2.f32 %v5563_v23  ;;  %v5650_v23 = vmul.f32 -1.442695, %v6896_v43 }
 0x14a   :  { %12795 = vst [vmem:[#allocation25_spill] sm:$0xff] %v6900_v40  ;;  %v2106_v10 = vsub.f32 1.0, %v2105_v55  ;;  %v6912_v17 = vpop.xlane.xlu1 %1490  ;;  %vm2114_vm11 = vcmp.eq.f32.partialorder %v2113_v24, 8.507059e+37  ;;  %v121_v55 = vld [vmem:[#allocation2 + $0x128] sm:$0xff] }
 0x14b   :  { %12796 = vst [vmem:[#allocation26_spill] sm:$0xff] %v6902_v61  ;;  %v321_v39 = vpop.f32.mrf.mxu0 }
 0x14c   :  { %v1066_v31 = vmax.f32 %v321_v39, 0.0  ;;  %v2107_v16 = vmul.f32 %v5886_v2, %v2106_v10  ;;  %v209_v10 = vld [vmem:[#allocation2 + $0x3e8] sm:$0xff] }
 0x14e   :  { %368 = vmatmul.f32.gmra.mxu0 %v120_v42  ;;  %v2108_v63 = vadd.f32 %v5886_v2, %v2107_v16  ;;  %632 = vmatmul.f32.gmra.mxu2 %v208_v51  ;;  %v1198_v59 = vmul.f32 %v6694_v0, %v1066_v31  ;;  %v1317_v42 = vpop.xlane.xlu0 %1316  ;;  %v5649_v51 = vmul.f32 -1.442695, %v6880_v45 }
 0x14f   :  { %v5565_v45 = vmul.f32 -1.442695, %v1317_v42  ;;  %v123_v42 = vld [vmem:[#allocation2 + $0x138] sm:$0xff] }
 0x150   :  { %v2112_v32 = vsel %vm2111_vm10, %v5886_v2, %v2108_v63  ;;  %1346 = vadd.xlane.f32.xlu1 %v1198_v59  ;;  %v5564_v2 = vmul.f32 -1.442695, %v1315_v21  ;;  %v6924_v7 = vpop.f32.mrf.mxu1  ;;  %v122_v59 = vld [vmem:[#allocation2 + $0x130] sm:$0xff] }
 0x151   :  { %v2117_v44 = vsel %vm2114_vm11, %v2116_v60, %v2112_v32  ;;  %v585_v49 = vpop.f32.mrf.mxu2  ;;  %v210_v60 = vld [vmem:[#allocation2 + $0x3f0] sm:$0xff] }
 0x152   :  { %v6917_v25 = vmul.f32 %v2117_v44, %v6866_v9  ;;  %v1154_v29 = vmax.f32 %v585_v49, 0.0  ;;  %v5888_v9 = vpop.eup %5887  ;;  %5891 = vpow2.f32 %v5564_v2  ;;  %v6932_v44 = vpop.xlane.xlu2 %1492 }
 0x153   :  { %v324_v36 = vpop.f32.mrf.mxu0  ;;  %v1319_v31 = vpop.xlane.xlu1 %1318  ;;  %v6928_v62 = vadd.f32 1.0, %v5888_v9  ;;  %5893 = vpow2.f32 %v5649_v51  ;;  %v5651_v51 = vmul.f32 -1.442695, %v6908_v1  ;;  %v5653_v35 = vmul.f32 -1.442695, %v6932_v44 }
 0x154   :  { %12797 = vst [vmem:[#allocation27_spill] sm:$0xff] %v6917_v25  ;;  %v1067_v39 = vmax.f32 %v324_v36, 0.0  ;;  %v1286_v3 = vmul.f32 %v6694_v0, %v1154_v29  ;;  %v5890_v24 = vpop.eup %5889  ;;  %v6957_v1 = vpop.f32.mrf.mxu3  ;;  %997 = vmatmul.f32.gmra.mxu3 %v6779_v22 }
 0x155   :  { %v6934_v29 = vadd.f32 1.0, %v5890_v24  ;;  %5895 = vrcp.f32 %v6928_v62  ;;  %vm3399_vm12 = vweird.f32 %v6928_v62 }
 0x156   :  { %371 = vmatmul.f32.gmra.mxu0 %v121_v55  ;;  %635 = vmatmul.f32.gmra.mxu2 %v209_v10  ;;  %v1199_v56 = vmul.f32 %v6694_v0, %v1067_v39  ;;  %5897 = vpow2.f32 %v5565_v45  ;;  %v5566_v39 = vmul.f32 -1.442695, %v1319_v31 }
 0x157   :  { %5899 = vpow2.f32 %v5650_v23  ;;  %vm2124_vm0 = vweird.f32 %v6934_v29 }
 0x158   :  { %1348 = vadd.xlane.f32.xlu2 %v1199_v56  ;;  %1522 = vadd.xlane.f32.xlu1 %v1286_v3  ;;  %v5892_v49 = vpop.eup %5891  ;;  %5901 = vrcp.f32 %v6934_v29  ;;  %v211_v56 = vld [vmem:[#allocation2 + $0x3f8] sm:$0xff]  ;;  %v6946_v9 = vpop.f32.mrf.mxu1 }
 0x159   :  { %v588_v6 = vpop.f32.mrf.mxu2  ;;  %v6940_v36 = vadd.f32 1.0, %v5892_v49  ;;  %v5894_v55 = vpop.eup %5893 }
 0x15a   :  { %v1155_v16 = vmax.f32 %v588_v6, 0.0  ;;  %v6936_v14 = vpop.xlane.xlu0 %1494 }
 0x15b   :  { %v327_v63 = vpop.f32.mrf.mxu0  ;;  %v6950_v24 = vpop.eup %5895  ;;  %5903 = vrcp.f32 %v6940_v36  ;;  %vm2139_vm2 = vweird.f32 %v6940_v36 }
 0x15c   :  { %v1068_v21 = vmax.f32 %v327_v63, 0.0  ;;  %v1287_v32 = vmul.f32 %v6694_v0, %v1155_v16  ;;  %v6952_v63 = vadd.f32 1.0, %v5894_v55  ;;  %5905 = vpow2.f32 %v5566_v39  ;;  %v1321_v45 = vpop.xlane.xlu2 %1320  ;;  %v6999_v61 = vpop.f32.mrf.mxu3  ;;  %1000 = vmatmul.f32.gmra.mxu3 %v6791_v48 }
 0x15d   :  { %5907 = vpow2.f32 %v5651_v51  ;;  %v5567_v55 = vmul.f32 -1.442695, %v1321_v45  ;;  %vm3400_vm13 = vweird.f32 %v6950_v24 }
 0x15e   :  { %374 = vmatmul.f32.gmra.mxu0 %v122_v59  ;;  %638 = vmatmul.f32.gmra.mxu2 %v210_v60  ;;  %v1200_v15 = vmul.f32 %v6694_v0, %v1068_v21  ;;  %v5898_v59 = vpop.eup %5897  ;;  %v5652_v60 = vmul.f32 -1.442695, %v6912_v17  ;;  %5909 = vrcp.f32 %v6952_v63  ;;  %v3395_v17 = vmul.f32 %v6950_v24, %v6928_v62  ;;  %vm6995_vm14 = vmor %vm3399_vm12, %vm3400_vm13 }
 0x15f   :  { %v5900_v31 = vpop.eup %5899  ;;  %v6963_v23 = vadd.f32 1.0, %v5898_v59  ;;  %vm3414_vm5 = vweird.f32 %v6952_v63 }
 0x160   :  { %1350 = vadd.xlane.f32.xlu0 %v1200_v15  ;;  %1524 = vadd.xlane.f32.xlu2 %v1287_v32  ;;  %v6960_v21 = vpop.eup %5901  ;;  %v6967_v15 = vadd.f32 1.0, %v5900_v31  ;;  %5911 = vpow2.f32 %v5652_v60  ;;  %v3396_v51 = vsub.f32 1.0, %v3395_v17  ;;  %v3403_v60 = vand.u32 2147483647, %v6928_v62  ;;  %v6982_v45 = vpop.f32.mrf.mxu1 }
 0x161   :  { %v591_v43 = vpop.f32.mrf.mxu2  ;;  %v2120_v39 = vmul.f32 %v6960_v21, %v6934_v29  ;;  %5913 = vrcp.f32 %v6963_v23  ;;  %vm2125_vm1 = vweird.f32 %v6960_v21  ;;  %vm2154_vm11 = vweird.f32 %v6963_v23 }
 0x162   :  { %v1156_v10 = vmax.f32 %v591_v43, 0.0  ;;  %v6943_v2 = vpop.xlane.xlu1 %1496  ;;  %v2130_v43 = vand.u32 2147483648, %v6934_v29  ;;  %v3397_v31 = vmul.f32 %v6950_v24, %v3396_v51  ;;  %5915 = vpow2.f32 %v5567_v55  ;;  %vm7092_vm8 = vmor %vm2124_vm0, %vm2125_vm1 }
 0x163   :  { %v330_v3 = vpop.f32.mrf.mxu0  ;;  %v1323_v32 = vpop.xlane.xlu0 %1322  ;;  %5917 = vrcp.f32 %v6967_v15  ;;  %v2121_v44 = vsub.f32 1.0, %v2120_v39  ;;  %vm7005_vm15 = vcmp.eq.f32.partialorder %v3403_v60, 8.507059e+37  ;;  %v5655_v4 = vmul.f32 -1.442695, %v6943_v2 }
 0x164   :  { %v1069_v6 = vmax.f32 %v330_v3, 0.0  ;;  %v1288_v16 = vmul.f32 %v6694_v0, %v1156_v10  ;;  %v6971_v10 = vpop.eup %5903  ;;  %v5568_v3 = vmul.f32 -1.442695, %v1323_v32  ;;  %v3398_v39 = vadd.f32 %v6950_v24, %v3397_v31  ;;  %v7051_v13 = vpop.f32.mrf.mxu3  ;;  %1003 = vmatmul.f32.gmra.mxu3 %v6802_v54 }
 0x165   :  { %vm2140_vm3 = vweird.f32 %v6971_v10  ;;  %v3433_v46 = vand.u32 2147483647, %v6967_v15 }
 0x166   :  { %377 = vmatmul.f32.gmra.mxu0 %v123_v42  ;;  %641 = vmatmul.f32.gmra.mxu2 %v211_v56  ;;  %v1201_v38 = vmul.f32 %v6694_v0, %v1069_v6  ;;  %v124_v56 = vld [vmem:[#allocation2 + $0x140] sm:$0xff]  ;;  %5919 = vpow2.f32 %v5568_v3  ;;  %v3402_v31 = vsel %vm6995_vm14, %v6950_v24, %v3398_v39  ;;  %v2143_v39 = vand.u32 2147483647, %v6940_v36  ;;  %vm7119_vm10 = vmor %vm2139_vm2, %vm2140_vm3 }
 0x167   :  { %5921 = vpow2.f32 %v5653_v35  ;;  %v2122_v35 = vmul.f32 %v6960_v21, %v2121_v44  ;;  %vm3429_vm14 = vweird.f32 %v6967_v15  ;;  %vm7219_vm3 = vcmp.eq.f32.partialorder %v3433_v46, 8.507059e+37 }
 0x168   :  { %1352 = vadd.xlane.f32.xlu1 %v1201_v38  ;;  %1526 = vadd.xlane.f32.xlu0 %v1288_v16  ;;  %v5906_v38 = vpop.eup %5905  ;;  %vm7062_vm4 = vcmp.eq.f32.partialorder %v2143_v39, 8.507059e+37 }
 0x169   :  { %v594_v49 = vpop.f32.mrf.mxu2  ;;  %v5908_v32 = vpop.eup %5907 }
 0x16a   :  { %v1157_v22 = vmax.f32 %v594_v49, 0.0  ;;  %v2135_v49 = vmul.f32 %v6971_v10, %v6940_v36 }
 0x16b   :  { %v333_v42 = vpop.f32.mrf.mxu0  ;;  %v1325_v6 = vpop.xlane.xlu1 %1324 }
 0x16c   :  { %v1070_v16 = vmax.f32 %v333_v42, 0.0  ;;  %v1289_v59 = vmul.f32 %v6694_v0, %v1157_v22  ;;  %v3405_v22 = vand.u32 2147483648, %v6928_v62  ;;  %v6988_v42 = vpop.eup %5909  ;;  %v5569_v51 = vmul.f32 -1.442695, %v1325_v6  ;;  %v7137_v53 = vpop.f32.mrf.mxu3  ;;  %1006 = vmatmul.f32.gmra.mxu3 %v6813_v27 }
 0x16d   :  { %v5912_v62 = vpop.eup %5911  ;;  %v2136_v3 = vsub.f32 1.0, %v2135_v49  ;;  %v3410_v49 = vmul.f32 %v6988_v42, %v6952_v63  ;;  %vm3415_vm6 = vweird.f32 %v6988_v42 }
 0x16e   :  { %380 = vmatmul.f32.gmra.mxu0 %v124_v56  ;;  %v1202_v17 = vmul.f32 %v6694_v0, %v1070_v16  ;;  %v7002_v56 = vadd.f32 1.0, %v5906_v38  ;;  %v7009_v16 = vadd.f32 1.0, %v5908_v32  ;;  %v3406_v48 = vor.u32 1.1754944e-38, %v3405_v22  ;;  %v7021_v60 = vpop.eup %5913  ;;  %vm7083_vm7 = vmor %vm3414_vm5, %vm3415_vm6 }
 0x16f   :  { %v7014_v38 = vor.u32 1.1754944e-38, %v2130_v43  ;;  %5923 = vpow2.f32 %v5569_v51  ;;  %v5916_v22 = vpop.eup %5915  ;;  %v7029_v55 = vadd.f32 1.0, %v5912_v62  ;;  %v5654_v51 = vmul.f32 -1.442695, %v6936_v14 }
 0x170   :  { %1354 = vadd.xlane.f32.xlu2 %v1202_v17  ;;  %1528 = vadd.xlane.f32.xlu1 %v1289_v59  ;;  %v2145_v59 = vand.u32 2147483648, %v6940_v36  ;;  %v125_v17 = vld [vmem:[#allocation2 + $0x148] sm:$0xff]  ;;  %v3407_v43 = vsel %vm7005_vm15, %v3406_v48, %v3402_v31  ;;  %5925 = vrcp.f32 %v7002_v56  ;;  %v7035_v44 = vpop.eup %5917  ;;  %v3411_v6 = vsub.f32 1.0, %v3410_v49 }
 0x171   :  { %v7012_v18 = vpop.f32.mrf.mxu2  ;;  %v7033_v24 = vmul.f32 %v3407_v43, %v6957_v1  ;;  %5927 = vrcp.f32 %v7009_v16  ;;  %v5920_v48 = vpop.eup %5919  ;;  %v2137_v62 = vmul.f32 %v6971_v10, %v2136_v3  ;;  %v2150_v14 = vmul.f32 %v7021_v60, %v6963_v23 }
 0x172   :  { %12802 = vst [vmem:[#allocation28_spill] sm:$0xff] %v7012_v18  ;;  %v5922_v31 = vpop.eup %5921  ;;  %v7046_v43 = vor.u32 1.1754944e-38, %v2145_v59  ;;  %v3412_v49 = vmul.f32 %v6988_v42, %v3411_v6  ;;  %v7053_v18 = vpop.f32.mrf.mxu1  ;;  %5929 = vrcp.f32 %v7029_v55  ;;  %v2160_v3 = vand.u32 2147483648, %v6963_v23 }
 0x173   :  { %v336_v32 = vpop.f32.mrf.mxu0  ;;  %12803 = vst [vmem:[#allocation29_spill] sm:$0xff] %v7033_v24  ;;  %v1327_v59 = vpop.xlane.xlu2 %1326  ;;  %5931 = vpow2.f32 %v5654_v51  ;;  %v7074_v28 = vadd.f32 1.0, %v5922_v31  ;;  %v3418_v51 = vand.u32 2147483647, %v6952_v63  ;;  %vm2155_vm12 = vweird.f32 %v7021_v60 }
 0x174   :  { %v1071_v37 = vmax.f32 %v336_v32, 0.0  ;;  %v7044_v32 = vadd.f32 1.0, %v5916_v22  ;;  %v3413_v6 = vadd.f32 %v6988_v42, %v3412_v49  ;;  %v5570_v49 = vmul.f32 -1.442695, %v1327_v59  ;;  %vm7204_vm2 = vmor %vm2154_vm11, %vm2155_vm12 }
 0x175   :  { %vm7101_vm9 = vcmp.eq.f32.partialorder %v3418_v51, 8.507059e+37  ;;  %v7128_v51 = vld [vmem:[%s12519_s3] ss:$0 sm:$0xff]  ;;  %v2175_v30 = vand.u32 2147483648, %v7002_v56  ;;  %v3425_v27 = vmul.f32 %v7035_v44, %v6967_v15  ;;  %vm3430_vm15 = vweird.f32 %v7035_v44 }
 0x176   :  { %383 = vmatmul.f32.gmra.mxu0 %v125_v17  ;;  %v1203_v1 = vmul.f32 %v6694_v0, %v1071_v37  ;;  %v7058_v0 = vadd.f32 %v6960_v21, %v2122_v35  ;;  %v5924_v17 = vpop.eup %5923  ;;  %v7066_v37 = vadd.f32 1.0, %v5920_v48  ;;  %5933 = vrcp.f32 %v7044_v32  ;;  %vm7195_vm1 = vmor %vm3429_vm14, %vm3430_vm15 }
 0x177   :  { %v7072_v35 = vpop.eup %5925  ;;  %v2151_v48 = vsub.f32 1.0, %v2150_v14  ;;  %v7096_v31 = vadd.f32 1.0, %v5924_v17  ;;  %v3417_v59 = vsel %vm7083_vm7, %v6988_v42, %v3413_v6  ;;  %v2158_v42 = vand.u32 2147483647, %v6963_v23 }
 0x178   :  { %1356 = vadd.xlane.f32.xlu0 %v1203_v1  ;;  %v2138_v1 = vadd.f32 %v6971_v10, %v2137_v62  ;;  %v7080_v39 = vpop.eup %5927  ;;  %v3420_v62 = vand.u32 2147483648, %v6952_v63  ;;  %5935 = vrcp.f32 %v7066_v37  ;;  %v2165_v17 = vmul.f32 %v7072_v35, %v7002_v56 }
 0x179   :  { %v7068_v54 = vpop.f32.mrf.mxu2  ;;  %5937 = vrcp.f32 %v7074_v28  ;;  %v2152_v47 = vmul.f32 %v7021_v60, %v2151_v48  ;;  %vm7162_vm13 = vcmp.eq.f32.partialorder %v2158_v42, 8.507059e+37  ;;  %vm2169_vm0 = vweird.f32 %v7002_v56 }
 0x17a   :  { %12806 = vst [vmem:[#allocation30_spill] sm:$0xff] %v7068_v54  ;;  %v3421_v8 = vor.u32 1.1754944e-38, %v3420_v62  ;;  %v2142_v36 = vsel %vm7119_vm10, %v6971_v10, %v2138_v1  ;;  %5939 = vpow2.f32 %v5570_v49  ;;  %vm2184_vm7 = vweird.f32 %v7044_v32 }
 0x17b   :  { %v339_v54 = vpop.f32.mrf.mxu0  ;;  %v1329_v6 = vpop.xlane.xlu0 %1328  ;;  %5941 = vrcp.f32 %v7096_v31  ;;  %v2147_v48 = vsel %vm7062_vm4, %v7046_v43, %v2142_v36  ;;  %v2153_v22 = vadd.f32 %v7021_v60, %v2152_v47  ;;  %vm2170_vm4 = vweird.f32 %v7072_v35 }
 0x17c   :  { %v1072_v14 = vmax.f32 %v339_v54, 0.0  ;;  %v7112_v54 = vpop.eup %5929  ;;  %v3422_v26 = vsel %vm7101_vm9, %v3421_v8, %v3417_v59  ;;  %v2166_v8 = vsub.f32 1.0, %v2165_v17  ;;  %v5571_v49 = vmul.f32 -1.442695, %v1329_v6  ;;  %vm7261_vm5 = vmor %vm2169_vm0, %vm2170_vm4 }
 0x17d   :  { %v5932_v63 = vpop.eup %5931  ;;  %v7147_v10 = vmul.f32 %v3422_v26, %v6999_v61  ;;  %5943 = vpow2.f32 %v5655_v4  ;;  %v7178_v4 = vmul.f32 %v2147_v48, %v6889_v57  ;;  %v7181_v61 = vor.u32 1.1754944e-38, %v2175_v30 }
 0x17e   :  { %386 = vmatmul.f32.gmra.mxu0 %v126_v34  ;;  %v1204_v62 = vmul.f32 %v7128_v51, %v1072_v14  ;;  %v7139_v34 = vpop.f32.mrf.mxu1  ;;  %v7143_v14 = vor.u32 1.1754944e-38, %v2160_v3  ;;  %v7149_v2 = vpop.eup %5933  ;;  %v7157_v3 = vadd.f32 1.0, %v5932_v63  ;;  %v127_v63 = vld [vmem:[#allocation2 + $0x158] sm:$0xff]  ;;  %5945 = vpow2.f32 %v5571_v49 }
 0x17f   :  { %12815 = vst [vmem:[#allocation31_spill] sm:$0xff] %v7147_v10  ;;  %v7168_v59 = vpop.eup %5935  ;;  %v2180_v47 = vmul.f32 %v7149_v2, %v7044_v32  ;;  %v2190_v30 = vand.u32 2147483648, %v7044_v32  ;;  %v3435_v49 = vand.u32 2147483648, %v6967_v15  ;;  %vm3444_vm9 = vweird.f32 %v7009_v16 }
 0x180   :  { %1358 = vadd.xlane.f32.xlu1 %v1204_v62  ;;  %v3426_v62 = vsub.f32 1.0, %v3425_v27  ;;  %v7172_v43 = vpop.eup %5937  ;;  %12819 = vst [vmem:[#allocation33_spill] sm:$0xff] %v7178_v4  ;;  %v2167_v27 = vmul.f32 %v7072_v35, %v2166_v8  ;;  %5947 = vrcp.f32 %v7157_v3  ;;  %vm3445_vm10 = vweird.f32 %v7080_v39 }
 0x181   :  { %v7153_v1 = vpop.f32.mrf.mxu2  ;;  %v5940_v36 = vpop.eup %5939  ;;  %v2181_v46 = vsub.f32 1.0, %v2180_v47  ;;  %v7245_v57 = vor.u32 1.1754944e-38, %v2190_v30  ;;  %vm2185_vm11 = vweird.f32 %v7149_v2  ;;  %vm7292_vm12 = vmor %vm3444_vm9, %vm3445_vm10  ;;  %vm2200_vm14 = vweird.f32 %v7168_v59 }
 0x182   :  { %12816 = vst [vmem:[#allocation32_spill] sm:$0xff] %v7153_v1  ;;  %v3427_v1 = vmul.f32 %v7035_v44, %v3426_v62  ;;  %v7184_v10 = vpop.eup %5941  ;;  %v2157_v62 = vsel %vm7204_vm2, %v7021_v60, %v2153_v22  ;;  %v3436_v22 = vor.u32 1.1754944e-38, %v3435_v49  ;;  %vm2199_vm2 = vweird.f32 %v7066_v37 }
 0x183   :  { %v1331_v17 = vpop.xlane.xlu2 %1330  ;;  %v342_v20 = vpop.f32.mrf.mxu0  ;;  %v7242_v8 = vsel %vm7162_vm13, %v7143_v14, %v2157_v62  ;;  %v12830_v62 = vand.u32 2147483647, %v7002_v56  ;;  %vm2215_vm0 = vweird.f32 %v7184_v10  ;;  %vm7360_vm4 = vmor %vm2199_vm2, %vm2200_vm14  ;;  %vm3460_vm9 = vweird.f32 %v7112_v54 }
 0x184   :  { %v5572_v42 = vmul.f32 -1.442695, %v1331_v17  ;;  %v1073_v6 = vmax.f32 %v342_v20, 0.0  ;;  %v2195_v17 = vmul.f32 %v7168_v59, %v7066_v37  ;;  %v3428_v48 = vadd.f32 %v7035_v44, %v3427_v1  ;;  %v5944_v1 = vpop.eup %5943 }
 0x185   :  { %v7255_v26 = vadd.f32 1.0, %v5944_v1  ;;  %vm7267_vm6 = vcmp.eq.f32.partialorder %v12830_v62, 8.507059e+37  ;;  %vm3474_vm14 = vweird.f32 %v7074_v28 }
 0x186   :  { %389 = vmatmul.f32.gmra.mxu0 %v127_v63  ;;  %v1205_v20 = vmul.f32 %v7128_v51, %v1073_v6  ;;  %v7211_v63 = vpop.f32.mrf.mxu3  ;;  %1009 = vmatmul.f32.gmra.mxu3 %v6824_v5  ;;  %v7217_v6 = vadd.f32 1.0, %v5940_v36  ;;  %5949 = vpow2.f32 %v5572_v42  ;;  %v7223_v24 = vpop.f32.mrf.mxu1  ;;  %v2210_v5 = vmul.f32 %v7184_v10, %v7096_v31 }
 0x187   :  { %v3432_v60 = vsel %vm7195_vm1, %v7035_v44, %v3428_v48  ;;  %v7234_v42 = vadd.f32 %v7072_v35, %v2167_v27  ;;  %v2196_v36 = vsub.f32 1.0, %v2195_v17  ;;  %v128_v27 = vld [vmem:[#allocation2 + $0x160] sm:$0xff]  ;;  %v5946_v17 = vpop.eup %5945  ;;  %vm7344_vm1 = vmor %vm2184_vm7, %vm2185_vm11  ;;  %vm3459_vm7 = vweird.f32 %v7029_v55 }
 0x188   :  { %1360 = vadd.xlane.f32.xlu2 %v1205_v20  ;;  %v3440_v20 = vmul.f32 %v7080_v39, %v7009_v16  ;;  %v3437_v47 = vsel %vm7219_vm3, %v3436_v22, %v3432_v60  ;;  %5951 = vrcp.f32 %v7217_v6  ;;  %v7253_v14 = vpop.eup %5947  ;;  %vm7416_vm11 = vmor %vm3459_vm7, %vm3460_vm9 }
 0x189   :  { %v7228_v15 = vpop.f32.mrf.mxu2  ;;  %v7251_v40 = vmul.f32 %v3437_v47, %v7051_v13  ;;  %v2211_v13 = vsub.f32 1.0, %v2210_v5  ;;  %v2172_v22 = vsel %vm7261_vm5, %v7072_v35, %v7234_v42  ;;  %v2197_v56 = vmul.f32 %v7168_v59, %v2196_v36 }
 0x18a   :  { %12826 = vst [vmem:[#allocation34_spill] sm:$0xff] %v7228_v15  ;;  %v2188_v15 = vand.u32 2147483647, %v7044_v32  ;;  %v3441_v60 = vsub.f32 1.0, %v3440_v20  ;;  %v7280_v47 = vadd.f32 1.0, %v5946_v17  ;;  %v2177_v42 = vsel %vm7267_vm6, %v7181_v61, %v2172_v22 }
 0x18b   :  { %v1333_v44 = vpop.xlane.xlu2 %1332  ;;  %v345_v48 = vpop.f32.mrf.mxu0  ;;  %12827 = vst [vmem:[#allocation35_spill] sm:$0xff] %v7251_v40  ;;  %v3448_v20 = vand.u32 2147483647, %v7009_v16  ;;  %v2203_v35 = vand.u32 2147483647, %v7066_v37  ;;  %vm2214_vm5 = vweird.f32 %v7096_v31 }
 0x18c   :  { %v5573_v49 = vmul.f32 -1.442695, %v1333_v44  ;;  %v1074_v52 = vmax.f32 %v345_v48, 0.0  ;;  %v5950_v1 = vpop.eup %5949  ;;  %v2182_v44 = vmul.f32 %v7149_v2, %v2181_v46  ;;  %v3442_v5 = vmul.f32 %v7080_v39, %v3441_v60  ;;  %vm7373_vm6 = vmor %vm2214_vm5, %vm2215_vm0 }
 0x18d   :  { %v3450_v46 = vand.u32 2147483648, %v7009_v16  ;;  %v7297_v36 = vadd.f32 1.0, %v5950_v1  ;;  %vm7303_vm13 = vcmp.eq.f32.partialorder %v3448_v20, 8.507059e+37  ;;  %v2205_v16 = vand.u32 2147483648, %v7066_v37 }
 0x18e   :  { %392 = vmatmul.f32.gmra.mxu0 %v128_v27  ;;  %v1206_v48 = vmul.f32 %v7128_v51, %v1074_v52  ;;  %v7285_v62 = vpop.f32.mrf.mxu3  ;;  %1012 = vmatmul.f32.gmra.mxu3 %v6835_v11  ;;  %5953 = vpow2.f32 %v5573_v49  ;;  %v2212_v27 = vmul.f32 %v7184_v10, %v2211_v13  ;;  %v3443_v11 = vadd.f32 %v7080_v39, %v3442_v5  ;;  %v7307_v49 = vpop.eup %5951 }
 0x18f   :  { %v7310_v30 = vadd.f32 %v7149_v2, %v2182_v44  ;;  %v3451_v60 = vor.u32 1.1754944e-38, %v3450_v46  ;;  %v7314_v1 = vpop.f32.mrf.mxu1  ;;  %5955 = vrcp.f32 %v7280_v47  ;;  %v2198_v13 = vadd.f32 %v7168_v59, %v2197_v56 }
 0x190   :  { %1362 = vadd.xlane.f32.xlu0 %v1206_v48  ;;  %v2220_v48 = vand.u32 2147483648, %v7096_v31  ;;  %v3447_v44 = vsel %vm7292_vm12, %v7080_v39, %v3443_v11  ;;  %vm7323_vm15 = vcmp.eq.f32.partialorder %v2188_v15, 8.507059e+37  ;;  %5957 = vrcp.f32 %v7297_v36 }
 0x191   :  { %v7300_v17 = vpop.f32.mrf.mxu2  ;;  %v3452_v56 = vsel %vm7303_vm13, %v3451_v60, %v3447_v44  ;;  %v2213_v12 = vadd.f32 %v7184_v10, %v2212_v27  ;;  %v2225_v25 = vmul.f32 %v7307_v49, %v7217_v6  ;;  %vm7349_vm3 = vcmp.eq.f32.partialorder %v2203_v35, 8.507059e+37  ;;  %v6388_v35 = vld [vmem:[#allocation2 + $0x3b0] sm:$0xff]  ;;  %v6389_v44 = vld [vmem:[#allocation2 + $0xf8] sm:$0xff] }
 0x192   :  { %12835 = vst [vmem:[#allocation36_spill] sm:$0xff] %v7300_v17  ;;  %v129_v17 = vld [vmem:[#allocation2 + $0x168] sm:$0xff]  ;;  %v7335_v39 = vmul.f32 %v3452_v56, %v7137_v53  ;;  %v2187_v61 = vsel %vm7344_vm1, %v7149_v2, %v7310_v30  ;;  %v2206_v23 = vor.u32 1.1754944e-38, %v2205_v16  ;;  %v2218_v37 = vand.u32 2147483647, %v7096_v31  ;;  %754 = vmatmul.f32.gmra.mxu1 %v6389_v44  ;;  %v130_v56 = vld [vmem:[#allocation2 + $0x170] sm:$0xff] }
 0x193   :  { %v1335_v5 = vpop.xlane.xlu0 %1334  ;;  %v348_v20 = vpop.f32.mrf.mxu0  ;;  %v2221_v52 = vor.u32 1.1754944e-38, %v2220_v48  ;;  %v3455_v31 = vmul.f32 %v7112_v54, %v7029_v55  ;;  %v2217_v16 = vsel %vm7373_vm6, %v7184_v10, %v2213_v12  ;;  %v3463_v48 = vand.u32 2147483647, %v7029_v55 }
 0x194   :  { %v5574_v58 = vmul.f32 -1.442695, %v1335_v5  ;;  %v1075_v46 = vmax.f32 %v348_v20, 0.0  ;;  %12840 = vst [vmem:[#allocation37_spill] sm:$0xff] %v7335_v39  ;;  %v5954_v15 = vpop.eup %5953  ;;  %v3465_v20 = vand.u32 2147483648, %v7029_v55  ;;  %v7396_v12 = vmul.f32 %v2177_v42, %v6914_v50 }
 0x195   :  { %v7379_v30 = vpop.eup %5955  ;;  %v7384_v60 = vadd.f32 1.0, %v5954_v15  ;;  %v3456_v5 = vsub.f32 1.0, %v3455_v31  ;;  %vm2219_vm10 = vcmp.eq.f32.partialorder %v2218_v37, 8.507059e+37  ;;  %v7408_v50 = vsel %vm7323_vm15, %v7245_v57, %v2187_v61 }
 0x196   :  { %395 = vmatmul.f32.gmra.mxu0 %v129_v17  ;;  %v1207_v53 = vmul.f32 %v7128_v51, %v1075_v46  ;;  %v7366_v22 = vpop.f32.mrf.mxu3  ;;  %1015 = vmatmul.f32.gmra.mxu3 %v6388_v35  ;;  %v2202_v17 = vsel %vm7360_vm4, %v7168_v59, %v2198_v13  ;;  %5959 = vpow2.f32 %v5574_v58  ;;  %v2226_v59 = vsub.f32 1.0, %v2225_v25  ;;  %v7392_v58 = vpop.eup %5957 }
 0x197   :  { %5961 = vrcp.f32 %v7255_v26  ;;  %v2207_v25 = vsel %vm7349_vm3, %v2206_v23, %v2202_v17  ;;  %v2222_v15 = vsel %vm2219_vm10, %v2221_v52, %v2217_v16  ;;  %v2240_v11 = vmul.f32 %v7379_v30, %v7280_v47  ;;  %v7403_v35 = vpop.f32.mrf.mxu1 }
 0x198   :  { %1364 = vadd.xlane.f32.xlu1 %v1207_v53  ;;  %v3457_v32 = vmul.f32 %v7112_v54, %v3456_v5  ;;  %5963 = vrcp.f32 %v7384_v60  ;;  %v2227_v42 = vmul.f32 %v7307_v49, %v2226_v59  ;;  %v3466_v23 = vor.u32 1.1754944e-38, %v3465_v20 }
 0x199   :  { %v7386_v13 = vpop.f32.mrf.mxu2  ;;  %vm3464_vm12 = vcmp.eq.f32.partialorder %v3463_v48, 8.507059e+37  ;;  %v2255_v57 = vmul.f32 %v7392_v58, %v7297_v36  ;;  %v7424_v61 = vmul.f32 %v2207_v25, %v6946_v9  ;;  %v7427_v2 = vmul.f32 %v2222_v15, %v6982_v45  ;;  %v6391_v15 = vld [vmem:[#allocation2 + $0x100] sm:$0xff] }
 0x19a   :  { %12849 = vst [vmem:[#allocation38_spill] sm:$0xff] %v7386_v13  ;;  %v3458_v40 = vadd.f32 %v7112_v54, %v3457_v32  ;;  %vm2230_vm13 = vweird.f32 %v7307_v49  ;;  %v2233_v55 = vand.u32 2147483647, %v7217_v6  ;;  %v2241_v52 = vsub.f32 1.0, %v2240_v11  ;;  %757 = vmatmul.f32.gmra.mxu1 %v6391_v15 }
 0x19b   :  { %v1337_v10 = vpop.xlane.xlu0 %1336  ;;  %v351_v46 = vpop.f32.mrf.mxu0  ;;  %v3470_v59 = vmul.f32 %v7172_v43, %v7074_v28  ;;  %v2228_v9 = vadd.f32 %v7307_v49, %v2227_v42  ;;  %v2235_v45 = vand.u32 2147483648, %v7217_v6  ;;  %v131_v42 = vld [vmem:[#allocation2 + $0x178] sm:$0xff]  ;;  %vm3475_vm15 = vweird.f32 %v7172_v43 }
 0x19c   :  { %v1076_v53 = vmax.f32 %v351_v46, 0.0  ;;  %v5960_v37 = vpop.eup %5959  ;;  %v5575_v17 = vmul.f32 -1.442695, %v1337_v10  ;;  %v3462_v31 = vsel %vm7416_vm11, %v7112_v54, %v3458_v40  ;;  %v6390_v10 = vld [vmem:[#allocation2 + $0x3b8] sm:$0xff]  ;;  %v2256_v46 = vsub.f32 1.0, %v2255_v57  ;;  %vm7485_vm3 = vmor %vm3474_vm14, %vm3475_vm15 }
 0x19d   :  { %v7437_v5 = vpop.eup %5961  ;;  %v7441_v48 = vadd.f32 1.0, %v5960_v37  ;;  %v3467_v20 = vsel %vm3464_vm12, %v3466_v23, %v3462_v31  ;;  %v3478_v27 = vand.u32 2147483647, %v7074_v28  ;;  %v3480_v23 = vand.u32 2147483648, %v7074_v28 }
 0x19e   :  { %398 = vmatmul.f32.gmra.mxu0 %v130_v56  ;;  %v1208_v16 = vmul.f32 %v7128_v51, %v1076_v53  ;;  %v7445_v25 = vpop.f32.mrf.mxu3  ;;  %1018 = vmatmul.f32.gmra.mxu3 %v6390_v10  ;;  %5965 = vpow2.f32 %v5575_v17  ;;  %v7448_v54 = vmul.f32 %v3467_v20, %v7211_v63  ;;  %v3471_v56 = vsub.f32 1.0, %v3470_v59  ;;  %v7450_v11 = vpop.eup %5963 }
 0x19f   :  { %v7458_v63 = vpack.c.bf16 %v7424_v61, %v7424_v61  ;;  %vm2229_vm0 = vweird.f32 %v7217_v6  ;;  %v2242_v37 = vmul.f32 %v7379_v30, %v2241_v52  ;;  %v7464_v40 = vpack.c.bf16 %v7427_v2, %v7427_v2 }
 0x1a0   :  { %12853 = vst [vmem:[#allocation40_spill] sm:$0xff] %v7448_v54  ;;  %1366 = vadd.xlane.f32.xlu1 %v1208_v16  ;;  %vm7468_vm1 = vmor %vm2229_vm0, %vm2230_vm13  ;;  %vm7472_vm2 = vcmp.eq.f32.partialorder %v2233_v55, 8.507059e+37  ;;  %v2236_v16 = vor.u32 1.1754944e-38, %v2235_v45  ;;  %v3472_v6 = vmul.f32 %v7172_v43, %v3471_v56  ;;  %v2257_v59 = vmul.f32 %v7392_v58, %v2256_v46  ;;  %v7489_v45 = vpop.f32.mrf.mxu1 }
 0x1a1   :  { %v7443_v44 = vpop.f32.mrf.mxu2  ;;  %12854 = vst [vmem:[#allocation41_spill] sm:$0xff] %v7458_v63  ;;  %v2232_v52 = vsel %vm7468_vm1, %v7307_v49, %v2228_v9  ;;  %v3481_v10 = vor.u32 1.1754944e-38, %v3480_v23  ;;  %5967 = vrcp.f32 %v7441_v48  ;;  %vm3479_vm4 = vcmp.eq.f32.partialorder %v3478_v27, 8.507059e+37 }
 0x1a2   :  { %12852 = vst [vmem:[#allocation39_spill] sm:$0xff] %v7443_v44  ;;  %v3473_v56 = vadd.f32 %v7172_v43, %v3472_v6  ;;  %v2270_v49 = vmul.f32 %v7450_v11, %v7384_v60  ;;  %v7496_v46 = vadd.f32 %v7379_v30, %v2242_v37  ;;  %vm2245_vm5 = vweird.f32 %v7379_v30 }
 0x1a3   :  { %v1339_v53 = vpop.xlane.xlu0 %1338  ;;  %v354_v32 = vpop.f32.mrf.mxu0  ;;  %12855 = vst [vmem:[#allocation42_spill] sm:$0xff] %v7464_v40  ;;  %v2250_v28 = vand.u32 2147483648, %v7280_v47  ;;  %v7502_v15 = vsel %vm7472_vm2, %v2236_v16, %v2232_v52  ;;  %vm2244_vm6 = vweird.f32 %v7280_v47  ;;  %v7512_v27 = vadd.f32 %v7392_v58, %v2257_v59  ;;  %v132_v59 = vld [vmem:[#allocation2 + $0x180] sm:$0xff] }
 0x1a4   :  { %v5576_v17 = vmul.f32 -1.442695, %v1339_v53  ;;  %v1077_v20 = vmax.f32 %v354_v32, 0.0  ;;  %v5966_v9 = vpop.eup %5965  ;;  %v2265_v53 = vand.u32 2147483648, %v7297_v36  ;;  %v3477_v32 = vsel %vm7485_vm3, %v7172_v43, %v3473_v56  ;;  %vm7516_vm9 = vmor %vm2244_vm6, %vm2245_vm5 }
 0x1a5   :  { %vm2260_vm7 = vweird.f32 %v7392_v58  ;;  %v3482_v23 = vsel %vm3479_vm4, %v3481_v10, %v3477_v32  ;;  %v7520_v31 = vadd.f32 1.0, %v5966_v9  ;;  %v2271_v16 = vsub.f32 1.0, %v2270_v49  ;;  %v6393_v49 = vld [vmem:[#allocation2 + $0x3c0] sm:$0xff] }
 0x1a6   :  { %401 = vmatmul.f32.gmra.mxu0 %v131_v42  ;;  %5969 = vpow2.f32 %v5576_v17  ;;  %v1209_v37 = vmul.f32 %v7128_v51, %v1077_v20  ;;  %v6392_v17 = vld [vmem:[#allocation2 + $0x108] sm:$0xff]  ;;  %v7523_v43 = vmul.f32 %v3482_v23, %v7285_v62  ;;  %v3485_v55 = vmul.f32 %v7253_v14, %v7157_v3  ;;  %v7535_v62 = vpop.f32.mrf.mxu3  ;;  %1021 = vmatmul.f32.gmra.mxu3 %v6393_v49 }
 0x1a7   :  { %760 = vmatmul.f32.gmra.mxu1 %v6392_v17  ;;  %v2248_v10 = vand.u32 2147483647, %v7280_v47  ;;  %v7532_v56 = vor.u32 1.1754944e-38, %v2250_v28  ;;  %vm2259_vm10 = vweird.f32 %v7297_v36  ;;  %12866 = vst [vmem:[#allocation45_spill] sm:$0xff] %v7535_v62  ;;  %v7537_v9 = vpop.eup %5967  ;;  %v2263_v32 = vand.u32 2147483647, %v7297_v36 }
 0x1a8   :  { %12865 = vst [vmem:[#allocation44_spill] sm:$0xff] %v7523_v43  ;;  %1368 = vadd.xlane.f32.xlu1 %v1209_v37  ;;  %v7540_v23 = vor.u32 1.1754944e-38, %v2265_v53  ;;  %vm7544_vm11 = vmor %vm2259_vm10, %vm2260_vm7  ;;  %vm3489_vm12 = vweird.f32 %v7157_v3  ;;  %vm3490_vm13 = vweird.f32 %v7253_v14  ;;  %v3493_v28 = vand.u32 2147483647, %v7157_v3  ;;  %v7552_v53 = vpop.f32.mrf.mxu1 }
 0x1a9   :  { %v7509_v42 = vpop.f32.mrf.mxu2  ;;  %v3495_v36 = vand.u32 2147483648, %v7157_v3  ;;  %5971 = vrcp.f32 %v7520_v31  ;;  %vm2274_vm14 = vweird.f32 %v7384_v60  ;;  %vm2275_vm15 = vweird.f32 %v7450_v11  ;;  %vm7573_vm0 = vmor %vm3489_vm12, %vm3490_vm13  ;;  %v6394_v3 = vld [vmem:[#allocation2 + $0x110] sm:$0xff] }
 0x1aa   :  { %12862 = vst [vmem:[#allocation43_spill] sm:$0xff] %v7509_v42  ;;  %v3486_v42 = vsub.f32 1.0, %v3485_v55  ;;  %v2285_v49 = vmul.f32 %v7537_v9, %v7441_v48  ;;  %v2278_v44 = vand.u32 2147483647, %v7384_v60  ;;  %v2280_v13 = vand.u32 2147483648, %v7384_v60  ;;  %vm7617_vm6 = vmor %vm2274_vm14, %vm2275_vm15 }
 0x1ab   :  { %v1341_v6 = vpop.xlane.xlu1 %1340  ;;  %v357_v52 = vpop.f32.mrf.mxu0  ;;  %vm7579_vm1 = vcmp.eq.f32.partialorder %v2263_v32, 8.507059e+37  ;;  %vm7584_vm2 = vcmp.eq.f32.partialorder %v3493_v28, 8.507059e+37  ;;  %vm2290_vm3 = vweird.f32 %v7537_v9  ;;  %vm7605_vm4 = vcmp.eq.f32.partialorder %v2248_v10, 8.507059e+37 }
 0x1ac   :  { %v5577_v17 = vmul.f32 -1.442695, %v1341_v6  ;;  %v5970_v20 = vpop.eup %5969  ;;  %v2272_v6 = vmul.f32 %v7450_v11, %v2271_v16  ;;  %v3487_v55 = vmul.f32 %v7253_v14, %v3486_v42  ;;  %v2286_v54 = vsub.f32 1.0, %v2285_v49 }
 0x1ad   :  { %v7565_v62 = vadd.f32 1.0, %v5970_v20  ;;  %v2281_v16 = vor.u32 1.1754944e-38, %v2280_v13  ;;  %vm2289_vm5 = vweird.f32 %v7441_v48  ;;  %vm3504_vm7 = vweird.f32 %v7255_v26 }
 0x1ae   :  { %404 = vmatmul.f32.gmra.mxu0 %v132_v59  ;;  %v1078_v59 = vmax.f32 %v357_v52, 0.0  ;;  %v3496_v52 = vor.u32 1.1754944e-38, %v3495_v36  ;;  %5973 = vpow2.f32 %v5577_v17  ;;  %v3488_v20 = vadd.f32 %v7253_v14, %v3487_v55  ;;  %v7601_v49 = vpop.f32.mrf.mxu3  ;;  %vm2291_vm10 = vmor %vm2289_vm5, %vm2290_vm3 }
 0x1af   :  { %763 = vmatmul.f32.gmra.mxu1 %v6394_v3  ;;  %v2273_v39 = vadd.f32 %v7450_v11, %v2272_v6  ;;  %v2295_v36 = vand.u32 2147483648, %v7441_v48  ;;  %v3500_v17 = vmul.f32 %v7437_v5, %v7255_v26  ;;  %v2287_v55 = vmul.f32 %v7537_v9, %v2286_v54  ;;  %12876 = vst [vmem:[#allocation47_spill] sm:$0xff] %v7601_v49  ;;  %v6395_v3 = vld [vmem:[#allocation2 + $0x3c8] sm:$0xff] }
 0x1b0   :  { %v3492_v28 = vsel %vm7573_vm0, %v7253_v14, %v3488_v20  ;;  %v2293_v6 = vand.u32 2147483647, %v7441_v48  ;;  %1024 = vmatmul.f32.gmra.mxu3 %v6395_v3  ;;  %5975 = vrcp.f32 %v7565_v62  ;;  %v7626_v43 = vpop.f32.mrf.mxu1  ;;  %vm3505_vm12 = vweird.f32 %v7437_v5 }
 0x1b1   :  { %v7577_v37 = vpop.f32.mrf.mxu2  ;;  %v3497_v14 = vsel %vm7584_vm2, %v3496_v52, %v3492_v28  ;;  %v2288_v20 = vadd.f32 %v7537_v9, %v2287_v55  ;;  %v3501_v13 = vsub.f32 1.0, %v3500_v17  ;;  %v2296_v48 = vor.u32 1.1754944e-38, %v2295_v36  ;;  %vm7639_vm14 = vmor %vm3504_vm7, %vm3505_vm12 }
 0x1b2   :  { %12871 = vst [vmem:[#allocation46_spill] sm:$0xff] %v7577_v37  ;;  %v1210_v37 = vmul.f32 %v7128_v51, %v1078_v59  ;;  %v7603_v59 = vpop.eup %5971  ;;  %v7622_v10 = vmul.f32 %v3497_v14, %v7366_v22  ;;  %v3508_v60 = vand.u32 2147483647, %v7255_v26  ;;  %vm2294_vm13 = vcmp.eq.f32.partialorder %v2293_v6, 8.507059e+37 }
 0x1b3   :  { %v7591_v32 = vpop.f32.mrf.mxu0  ;;  %v2292_v52 = vsel %vm2291_vm10, %v7537_v9, %v2288_v20  ;;  %v3502_v17 = vmul.f32 %v7437_v5, %v3501_v13  ;;  %vm2279_vm15 = vcmp.eq.f32.partialorder %v2278_v44, 8.507059e+37  ;;  %v12887_v54 = vsel %vm7544_vm11, %v7392_v58, %v7512_v27 }
 0x1b4   :  { %1370 = vadd.xlane.f32.xlu0 %v1210_v37  ;;  %v3510_v37 = vand.u32 2147483648, %v7255_v26  ;;  %v5974_v22 = vpop.eup %5973  ;;  %v2297_v28 = vsel %vm2294_vm13, %v2296_v48, %v2292_v52  ;;  %v1079_v55 = vmax.f32 %v7591_v32, 0.0  ;;  %v2300_v26 = vmul.f32 %v7603_v59, %v7520_v31  ;;  %v6396_v32 = vld [vmem:[#allocation2 + $0x118] sm:$0xff] }
 0x1b5   :  { %vm7652_vm0 = vcmp.eq.f32.partialorder %v3508_v60, 8.507059e+37  ;;  %v2267_v44 = vsel %vm7579_vm1, %v7540_v23, %v12887_v54  ;;  %v7666_v13 = vadd.f32 1.0, %v5974_v22  ;;  %v7669_v52 = vmul.f32 %v2297_v28, %v7403_v35  ;;  %v6397_v23 = vld [vmem:[#allocation2 + $0x3d0] sm:$0xff] }
 0x1b6   :  { %407 = vmatmul.f32.gmra.mxu0 %v133_v33  ;;  %v2277_v33 = vsel %vm7617_vm6, %v7450_v11, %v2273_v39  ;;  %v3511_v3 = vor.u32 1.1754944e-38, %v3510_v37  ;;  %v7649_v39 = vpack.c.bf16 %v7622_v10, %v7622_v10  ;;  %v3503_v11 = vadd.f32 %v7437_v5, %v3502_v17  ;;  %v7656_v6 = vpop.eup %5975  ;;  %v134_v37 = vld [vmem:[#allocation2 + $0x190] sm:$0xff]  ;;  %v7676_v27 = vpop.f32.mrf.mxu3 }
 0x1b7   :  { %766 = vmatmul.f32.gmra.mxu1 %v6396_v32  ;;  %v2282_v20 = vsel %vm2279_vm15, %v2281_v16, %v2277_v33  ;;  %v2301_v48 = vsub.f32 1.0, %v2300_v26  ;;  %vm2305_vm2 = vweird.f32 %v7603_v59  ;;  %v2310_v58 = vand.u32 2147483648, %v7520_v31  ;;  %12888 = vst [vmem:[#allocation50_spill] sm:$0xff] %v7676_v27 }
 0x1b8   :  { %12884 = vst [vmem:[#allocation49_spill] sm:$0xff] %v7649_v39  ;;  %v3507_v47 = vsel %vm7639_vm14, %v7437_v5, %v3503_v11  ;;  %1027 = vmatmul.f32.gmra.mxu3 %v6397_v23  ;;  %v2308_v35 = vand.u32 2147483647, %v7520_v31  ;;  %v1211_v22 = vmul.f32 %v7128_v51, %v1079_v55  ;;  %v12889_v5 = vsel %vm7516_vm9, %v7379_v30, %v7496_v46 }
 0x1b9   :  { %v7645_v14 = vpop.f32.mrf.mxu2  ;;  %v3512_v42 = vsel %vm7652_vm0, %v3511_v3, %v3507_v47  ;;  %v2302_v16 = vmul.f32 %v7603_v59, %v2301_v48  ;;  %v2252_v33 = vsel %vm7605_vm4, %v7532_v56, %v12889_v5  ;;  %v7692_v17 = vmul.f32 %v2282_v20, %v7314_v1  ;;  %v7696_v3 = vpop.f32.mrf.mxu1  ;;  %v6400_v5 = vld [vmem:[#allocation2 + $0x128] sm:$0xff] }
 0x1ba   :  { %12883 = vst [vmem:[#allocation48_spill] sm:$0xff] %v7645_v14  ;;  %v4528_v28 = vunpack.c.l.bf16 %v7649_v39  ;;  %v4089_v36 = vmul.f32 %v3512_v42, %v7445_v25  ;;  %v7699_v55 = vmul.f32 %v2267_v44, %v7223_v24  ;;  %5977 = vrcp.f32 %v7666_v13  ;;  %1372 = vadd.xlane.f32.xlu1 %v1211_v22 }
 0x1bb   :  { %v363_v60 = vpop.f32.mrf.mxu0  ;;  %v2303_v30 = vadd.f32 %v7603_v59, %v2302_v16  ;;  %vm2304_vm9 = vweird.f32 %v7520_v31  ;;  %v2311_v1 = vor.u32 1.1754944e-38, %v2310_v58  ;;  %v2315_v46 = vmul.f32 %v7656_v6, %v7565_v62  ;;  %v6399_v58 = vld [vmem:[#allocation2 + $0x3d8] sm:$0xff] }
 0x1bc   :  { %v7704_v4 = vpack.c.bf16 %v4089_v36, %v4089_v36  ;;  %vm2306_vm11 = vmor %vm2304_vm9, %vm2305_vm2  ;;  %v1080_v25 = vmax.f32 %v363_v60, 0.0  ;;  %v7712_v24 = vmul.f32 %v7502_v15, %v7053_v18  ;;  %v7716_v57 = vpack.c.bf16 %v7669_v52, %v7669_v52  ;;  %v6398_v15 = vld [vmem:[#allocation2 + $0x120] sm:$0xff]  ;;  %v135_v60 = vld [vmem:[#allocation2 + $0x198] sm:$0xff] }
 0x1bd   :  { %v2307_v31 = vsel %vm2306_vm11, %v7603_v59, %v2303_v30  ;;  %vm2309_vm1 = vcmp.eq.f32.partialorder %v2308_v35, 8.507059e+37  ;;  %v7723_v26 = vpack.c.bf16 %v7692_v17, %v7692_v17  ;;  %v7726_v11 = vsub.f32 %v7622_v10, %v4528_v28 }
 0x1be   :  { %410 = vmatmul.f32.gmra.mxu0 %v134_v37  ;;  %12890 = vst [vmem:[#allocation51_spill] sm:$0xff] %v7704_v4  ;;  %v4529_v9 = vunpack.c.l.bf16 %v7704_v4  ;;  %v2312_v18 = vsel %vm2309_vm1, %v2311_v1, %v2307_v31  ;;  %v7730_v32 = vmul.f32 %v2252_v33, %v7139_v34  ;;  %v7734_v59 = vpack.c.bf16 %v7699_v55, %v7699_v55  ;;  %v7742_v34 = vpop.f32.mrf.mxu3 }
 0x1bf   :  { %12891 = vst [vmem:[#allocation52_spill] sm:$0xff] %v7716_v57  ;;  %769 = vmatmul.f32.gmra.mxu1 %v6398_v15  ;;  %v4009_v54 = vmul.f32 %v2312_v18, %v7489_v45  ;;  %v2316_v44 = vsub.f32 1.0, %v2315_v46  ;;  %vm2320_vm3 = vweird.f32 %v7656_v6  ;;  %v2325_v37 = vand.u32 2147483648, %v7565_v62 }
 0x1c0   :  { %12893 = vst [vmem:[#allocation54_spill] sm:$0xff] %v7723_v26  ;;  %v7737_v10 = vsub.f32 %v4089_v36, %v4529_v9  ;;  %v1212_v47 = vmul.f32 %v7128_v51, %v1080_v25  ;;  %1030 = vmatmul.f32.gmra.mxu3 %v6399_v58  ;;  %v7744_v23 = vpop.eup %5977  ;;  %v2323_v16 = vand.u32 2147483647, %v7565_v62  ;;  %v4448_v35 = vunpack.c.l.bf16 %v7716_v57  ;;  %v1343_v58 = vpop.xlane.xlu2 %1342 }
 0x1c1   :  { %v7719_v56 = vpop.f32.mrf.mxu2  ;;  %12894 = vst [vmem:[#allocation55_spill] sm:$0xff] %v7726_v11  ;;  %v7746_v42 = vpack.c.bf16 %v4009_v54, %v4009_v54  ;;  %v2317_v45 = vmul.f32 %v7656_v6, %v2316_v44  ;;  %v7753_v22 = vpack.c.bf16 %v7712_v24, %v7712_v24  ;;  %v4447_v28 = vunpack.c.l.bf16 %v7723_v26  ;;  %v7758_v36 = vpop.f32.mrf.mxu1 }
 0x1c2   :  { %12892 = vst [vmem:[#allocation53_spill] sm:$0xff] %v7719_v56  ;;  %1374 = vadd.xlane.f32.xlu2 %v1212_v47  ;;  %vm2319_vm4 = vweird.f32 %v7565_v62  ;;  %v4446_v25 = vunpack.c.l.bf16 %v7734_v59  ;;  %v7766_v46 = vpack.c.bf16 %v7730_v32, %v7730_v32  ;;  %v2326_v31 = vor.u32 1.1754944e-38, %v2325_v37 }
 0x1c3   :  { %12895 = vst [vmem:[#allocation56_spill] sm:$0xff] %v7734_v59  ;;  %v1347_v20 = vpop.xlane.xlu1 %1346  ;;  %v366_v48 = vpop.f32.mrf.mxu0  ;;  %v2318_v30 = vadd.f32 %v7656_v6, %v2317_v45  ;;  %v4449_v1 = vunpack.c.l.bf16 %v7746_v42  ;;  %vm2321_vm5 = vmor %vm2319_vm4, %vm2320_vm3  ;;  %v2330_v18 = vmul.f32 %v7744_v23, %v7666_v13  ;;  %vm2324_vm6 = vcmp.eq.f32.partialorder %v2323_v16, 8.507059e+37  ;;  %v8881_v59 = vld [vmem:[#allocation2 + $0x270] sm:$0xff] }
 0x1c4   :  { %12896 = vst [vmem:[#allocation57_spill] sm:$0xff] %v7737_v10  ;;  %v5580_v33 = vmul.f32 -1.442695, %v1347_v20  ;;  %v1081_v9 = vmax.f32 %v366_v48, 0.0  ;;  %v4576_v62 = vsub.f32 %v7669_v52, %v4448_v35  ;;  %v4575_v48 = vsub.f32 %v7692_v17, %v4447_v28  ;;  %v136_v35 = vld [vmem:[#allocation2 + $0x1a0] sm:$0xff] }
 0x1c5   :  { %12897 = vst [vmem:[#allocation58_spill] sm:$0xff] %v7742_v34  ;;  %v2322_v15 = vsel %vm2321_vm5, %v7656_v6, %v2318_v30  ;;  %v4577_v44 = vsub.f32 %v4009_v54, %v4449_v1  ;;  %v2331_v45 = vsub.f32 1.0, %v2330_v18  ;;  %v4574_v54 = vsub.f32 %v7699_v55, %v4446_v25  ;;  %v6401_v25 = vld [vmem:[#allocation2 + $0x3e0] sm:$0xff] }
 0x1c6   :  { %12898 = vst [vmem:[#allocation59_spill] sm:$0xff] %v7746_v42  ;;  %413 = vmatmul.f32.gmra.mxu0 %v135_v60  ;;  %v12902_v60 = vand.u32 2147483647, %v6934_v29  ;;  %v2327_v37 = vsel %vm2324_vm6, %v2326_v31, %v2322_v15  ;;  %5979 = vpow2.f32 %v5580_v33  ;;  %v2340_v29 = vand.u32 2147483648, %v7666_v13  ;;  %v7796_v1 = vpop.f32.mrf.mxu3  ;;  %v163_v42 = vld [vmem:[#allocation2 + $0x278] sm:$0xff] }
 0x1c7   :  { %12899 = vst [vmem:[#allocation60_spill] sm:$0xff] %v7753_v22  ;;  %772 = vmatmul.f32.gmra.mxu1 %v6400_v5  ;;  %v7784_v6 = vmul.f32 %v2327_v37, %v7552_v53  ;;  %v4697_v52 = vpack.c.bf16 %v4577_v44, %v4576_v62  ;;  %v2332_v30 = vmul.f32 %v7744_v23, %v2331_v45  ;;  %vm2335_vm10 = vweird.f32 %v7744_v23 }
 0x1c8   :  { %12900 = vst [vmem:[#allocation61_spill] sm:$0xff] %v7766_v46  ;;  %vm7778_vm7 = vcmp.eq.f32.partialorder %v12902_v60, 8.507059e+37  ;;  %v2338_v33 = vand.u32 2147483647, %v7666_v13  ;;  %v1213_v17 = vmul.f32 %v7128_v51, %v1081_v9  ;;  %v4001_v5 = vmul.f32 %v7408_v50, %v6924_v7  ;;  %1033 = vmatmul.f32.gmra.mxu3 %v6401_v25  ;;  %v1345_v50 = vpop.xlane.xlu0 %1344 }
 0x1c9   :  { %v7774_v20 = vpop.f32.mrf.mxu2  ;;  %v5578_v53 = vmul.f32 -1.442695, %v1343_v58  ;;  %4760 = vmatpush.bf16.msrb.mxu2 %v4697_v52  ;;  %v4444_v28 = vunpack.c.l.bf16 %v7753_v22  ;;  %v4445_v55 = vunpack.c.l.bf16 %v7766_v46  ;;  %12905 = vst [vmem:[#allocation63_spill] sm:$0xff] %v7796_v1  ;;  %v7800_v31 = vmul.f32 %v7242_v8, %v6904_v19  ;;  %v7804_v7 = vpop.f32.mrf.mxu1 }
 0x1ca   :  { %12901 = vst [vmem:[#allocation62_spill] sm:$0xff] %v7774_v20  ;;  %v4696_v18 = vpack.c.bf16 %v4575_v48, %v4574_v54  ;;  %v2333_v9 = vadd.f32 %v7744_v23, %v2332_v30  ;;  %vm2334_vm12 = vweird.f32 %v7666_v13  ;;  %1376 = vadd.xlane.f32.xlu0 %v1213_v17  ;;  %v2341_v15 = vor.u32 1.1754944e-38, %v2340_v29 }
 0x1cb   :  { %v369_v16 = vpop.f32.mrf.mxu0  ;;  %vm2336_vm13 = vmor %vm2334_vm12, %vm2335_vm10  ;;  %v4573_v62 = vsub.f32 %v7730_v32, %v4445_v55  ;;  %v4442_v19 = vunpack.c.l.bf16 %v7458_v63  ;;  %v7812_v60 = vpack.c.bf16 %v7396_v12, %v7396_v12  ;;  %vm2339_vm14 = vcmp.eq.f32.partialorder %v2338_v33, 8.507059e+37  ;;  %v1349_v29 = vpop.xlane.xlu2 %1348  ;;  %v12909_v33 = vld [vmem:[#allocation33_spill] sm:$0xff]  ;;  %v12913_v55 = vld [vmem:[#allocation22_spill] sm:$0xff]  ;;  %13049 = vst [vmem:[#allocation126_spill] sm:$0xff] %v8881_v59 }
 0x1cc   :  { %v1082_v44 = vmax.f32 %v369_v16, 0.0  ;;  %v5980_v8 = vpop.eup %5979  ;;  %v2337_v13 = vsel %vm2336_vm13, %v7744_v23, %v2333_v9  ;;  %v4443_v58 = vunpack.c.l.bf16 %v7464_v40  ;;  %v7816_v37 = vpack.c.bf16 %v4001_v5, %v4001_v5  ;;  %v6403_v9 = vld [vmem:[#allocation2 + $0x3e8] sm:$0xff] }
 0x1cd   :  { %12906 = vst [vmem:[#allocation64_spill] sm:$0xff] %v7812_v60  ;;  %5981 = vpow2.f32 %v5578_v53  ;;  %4761 = vmatpush.bf16.msrb.mxu2 %v4696_v18  ;;  %v2342_v48 = vsel %vm2339_vm14, %v2341_v15, %v2337_v13  ;;  %v4572_v32 = vsub.f32 %v7712_v24, %v4444_v28  ;;  %v5579_v52 = vmul.f32 -1.442695, %v1345_v50 }
 0x1ce   :  { %416 = vmatmul.f32.gmra.mxu0 %v136_v35  ;;  %12907 = vst [vmem:[#allocation65_spill] sm:$0xff] %v7816_v37  ;;  %v7820_v54 = vmul.f32 %v2342_v48, %v7626_v43  ;;  %v4570_v16 = vsub.f32 %v7424_v61, %v4442_v19  ;;  %v4571_v23 = vsub.f32 %v7427_v2, %v4443_v58  ;;  %v6402_v35 = vld [vmem:[#allocation2 + $0x130] sm:$0xff]  ;;  %v137_v2 = vld [vmem:[#allocation2 + $0x1a8] sm:$0xff]  ;;  %v7841_v41 = vadd.f32 1.0, %v5980_v8  ;;  %v7845_v47 = vpop.f32.mrf.mxu3 }
 0x1cf   :  { %775 = vmatmul.f32.gmra.mxu1 %v6402_v35  ;;  %v12908_v30 = vsel %vm7092_vm8, %v6960_v21, %v7058_v0  ;;  %v7834_v43 = vpack.c.bf16 %v12909_v33, %v12909_v33  ;;  %v4695_v17 = vpack.c.bf16 %v4573_v62, %v4572_v32  ;;  %v1214_v61 = vmul.f32 %v7128_v51, %v1082_v44  ;;  %v7848_v51 = vpop.xlane.xlu1 %1522  ;;  %v12914_v58 = vld [vmem:[#allocation27_spill] sm:$0xff] }
 0x1d0   :  { %v2132_v24 = vsel %vm7778_vm7, %v7014_v38, %v12908_v30  ;;  %v7839_v28 = vpack.c.bf16 %v7800_v31, %v7800_v31  ;;  %v4694_v21 = vpack.c.bf16 %v4571_v23, %v4570_v16  ;;  %v4440_v0 = vunpack.c.l.bf16 %v7812_v60  ;;  %12912 = vst [vmem:[#allocation67_spill] sm:$0xff] %v7845_v47  ;;  %1036 = vmatmul.f32.gmra.mxu3 %v6403_v9 }
 0x1d1   :  { %v633_v45 = vpop.f32.mrf.mxu2  ;;  %12910 = vst [vmem:[#allocation33_spill] sm:$0xff] %v7834_v43  ;;  %4762 = vmatpush.bf16.msrb.mxu2 %v4695_v17  ;;  %1378 = vadd.xlane.f32.xlu1 %v1214_v61  ;;  %v4441_v38 = vunpack.c.l.bf16 %v7816_v37  ;;  %v3997_v25 = vmul.f32 %v2132_v24, %v12913_v55  ;;  %5983 = vpow2.f32 %v5579_v52  ;;  %v7850_v18 = vpop.f32.mrf.mxu1  ;;  %v4438_v44 = vunpack.c.l.bf16 %v7834_v43  ;;  %v138_v17 = vld [vmem:[#allocation2 + $0x1b0] sm:$0xff] }
 0x1d2   :  { %12911 = vst [vmem:[#allocation66_spill] sm:$0xff] %v7839_v28  ;;  %v4568_v15 = vsub.f32 %v7396_v12, %v4440_v0  ;;  %5985 = vrcp.f32 %v7841_v41  ;;  %v5581_v19 = vmul.f32 -1.442695, %v1349_v29  ;;  %v1170_v8 = vmax.f32 %v633_v45, 0.0  ;;  %v6404_v45 = vld [vmem:[#allocation2 + $0x138] sm:$0xff]  ;;  %v12920_v0 = vld [vmem:[#allocation25_spill] sm:$0xff] }
 0x1d3   :  { %v372_v53 = vpop.f32.mrf.mxu0  ;;  %v5982_v50 = vpop.eup %5981  ;;  %v4569_v62 = vsub.f32 %v4001_v5, %v4441_v38  ;;  %v4439_v13 = vunpack.c.l.bf16 %v7839_v28  ;;  %v7858_v48 = vpack.c.bf16 %v12914_v58, %v12914_v58  ;;  %v7860_v35 = vpack.c.bf16 %v3997_v25, %v3997_v25 }
 0x1d4   :  { %v1351_v52 = vpop.xlane.xlu0 %1350  ;;  %v1083_v16 = vmax.f32 %v372_v53, 0.0  ;;  %v4566_v12 = vsub.f32 %v12909_v33, %v4438_v44  ;;  %v7864_v30 = vpop.xlane.xlu2 %1524  ;;  %v7866_v29 = vadd.f32 1.0, %v5982_v50  ;;  %5987 = vpow2.f32 %v5581_v19  ;;  %v7871_v53 = vld [vmem:[%s12519_s3] ss:$0 sm:$0xff] }
 0x1d5   :  { %12915 = vst [vmem:[#allocation22_spill] sm:$0xff] %v7858_v48  ;;  %4763 = vmatpush.bf16.msrb.mxu2 %v4694_v21  ;;  %v4693_v32 = vpack.c.bf16 %v4569_v62, %v4568_v15  ;;  %v4567_v5 = vsub.f32 %v7800_v31, %v4439_v13  ;;  %v1302_v33 = vmul.f32 %v7871_v53, %v1170_v8  ;;  %v12918_v21 = vld [vmem:[#allocation23_spill] sm:$0xff]  ;;  %v4436_v9 = vunpack.c.l.bf16 %v7858_v48 }
 0x1d6   :  { %419 = vmatmul.f32.gmra.mxu0 %v137_v2  ;;  %12916 = vst [vmem:[#allocation27_spill] sm:$0xff] %v7860_v35  ;;  %v7876_v31 = vpack.c.bf16 %v12918_v21, %v12918_v21  ;;  %v7880_v38 = vpack.c.bf16 %v12920_v0, %v12920_v0  ;;  %v1215_v55 = vmul.f32 %v7871_v53, %v1083_v16  ;;  %v7884_v50 = vpop.f32.mrf.mxu3  ;;  %v4437_v62 = vunpack.c.l.bf16 %v7860_v35  ;;  %v6406_v8 = vld [vmem:[#allocation2 + $0x3f0] sm:$0xff] }
 0x1d7   :  { %12917 = vst [vmem:[#allocation68_spill] sm:$0xff] %v7864_v30  ;;  %778 = vmatmul.f32.gmra.mxu1 %v6404_v45  ;;  %v5984_v61 = vpop.eup %5983  ;;  %v4692_v2 = vpack.c.bf16 %v4567_v5, %v4566_v12  ;;  %1554 = vadd.xlane.f32.xlu0 %v1302_v33  ;;  %5989 = vrcp.f32 %v7866_v29  ;;  %v5582_v13 = vmul.f32 -1.442695, %v1351_v52  ;;  %v6407_v52 = vld [vmem:[#allocation2 + $0x140] sm:$0xff]  ;;  %vm2379_vm15 = vweird.f32 %v7841_v41 }
 0x1d8   :  { %12919 = vst [vmem:[#allocation23_spill] sm:$0xff] %v7876_v31  ;;  %v7886_v15 = vpop.eup %5985  ;;  %v7892_v19 = vadd.f32 1.0, %v5984_v61  ;;  %1380 = vadd.xlane.f32.xlu2 %v1215_v55  ;;  %1039 = vmatmul.f32.gmra.mxu3 %v6406_v8  ;;  %v4565_v16 = vsub.f32 %v3997_v25, %v4437_v62  ;;  %v4434_v45 = vunpack.c.l.bf16 %v7876_v31  ;;  %vm2349_vm11 = vweird.f32 %v7866_v29 }
 0x1d9   :  { %v636_v23 = vpop.f32.mrf.mxu2  ;;  %12921 = vst [vmem:[#allocation25_spill] sm:$0xff] %v7880_v38  ;;  %4764 = vmatpush.bf16.msrb.mxu2 %v4693_v32  ;;  %v7889_v44 = vpop.f32.mrf.mxu1  ;;  %v4564_v32 = vsub.f32 %v12914_v58, %v4436_v9  ;;  %v2375_v33 = vmul.f32 %v7886_v15, %v7841_v41  ;;  %v139_v9 = vld [vmem:[#allocation2 + $0x1b8] sm:$0xff]  ;;  %vm2380_vm8 = vweird.f32 %v7886_v15 }
 0x1da   :  { %12922 = vst [vmem:[#allocation69_spill] sm:$0xff] %v7884_v50  ;;  %v1171_v5 = vmax.f32 %v636_v23, 0.0  ;;  %v5988_v61 = vpop.eup %5987  ;;  %5991 = vrcp.f32 %v7892_v19  ;;  %v4562_v58 = vsub.f32 %v12918_v21, %v4434_v45  ;;  %vm2381_vm0 = vmor %vm2379_vm15, %vm2380_vm8  ;;  %vm2364_vm5 = vweird.f32 %v7892_v19 }
 0x1db   :  { %v375_v24 = vpop.f32.mrf.mxu0  ;;  %v1353_v12 = vpop.xlane.xlu1 %1352  ;;  %v4691_v55 = vpack.c.bf16 %v4565_v16, %v4564_v32  ;;  %5993 = vpow2.f32 %v5582_v13  ;;  %v2376_v62 = vsub.f32 1.0, %v2375_v33  ;;  %v7906_v43 = vadd.f32 1.0, %v5988_v61  ;;  %v6408_v33 = vld [vmem:[#allocation2 + $0x3f8] sm:$0xff] }
 0x1dc   :  { %v7899_v48 = vpop.xlane.xlu0 %1526  ;;  %v1084_v35 = vmax.f32 %v375_v24, 0.0  ;;  %v5583_v25 = vmul.f32 -1.442695, %v1353_v12  ;;  %v2385_v32 = vand.u32 2147483648, %v7841_v41  ;;  %v1303_v16 = vmul.f32 %v7871_v53, %v1171_v5 }
 0x1dd   :  { %4765 = vmatpush.bf16.msrb.mxu2 %v4692_v2  ;;  %v2377_v21 = vmul.f32 %v7886_v15, %v2376_v62  ;;  %v2398_v34 = vand.u32 2147483647, %v7906_v43  ;;  %vm2394_vm12 = vweird.f32 %v7906_v43 }
 0x1de   :  { %422 = vmatmul.f32.gmra.mxu0 %v138_v17  ;;  %v4435_v17 = vunpack.c.l.bf16 %v7880_v38  ;;  %v7904_v38 = vpop.eup %5989  ;;  %v7910_v12 = vpop.f32.mrf.mxu3  ;;  %v1216_v13 = vmul.f32 %v7871_v53, %v1084_v35  ;;  %5995 = vpow2.f32 %v5583_v25  ;;  %1556 = vadd.xlane.f32.xlu1 %v1303_v16  ;;  %v2386_v35 = vor.u32 1.1754944e-38, %v2385_v32  ;;  %v140_v16 = vld [vmem:[#allocation2 + $0x1c0] sm:$0xff] }
 0x1df   :  { %781 = vmatmul.f32.gmra.mxu1 %v6407_v52  ;;  %12923 = vst [vmem:[#allocation70_spill] sm:$0xff] %v7910_v12  ;;  %v2345_v5 = vmul.f32 %v7904_v38, %v7866_v29  ;;  %v2378_v61 = vadd.f32 %v7886_v15, %v2377_v21  ;;  %5997 = vrcp.f32 %v7906_v43  ;;  %vm2350_vm9 = vweird.f32 %v7904_v38 }
 0x1e0   :  { %v4563_v23 = vsub.f32 %v12920_v0, %v4435_v17  ;;  %v2383_v0 = vand.u32 2147483647, %v7841_v41  ;;  %1042 = vmatmul.f32.gmra.mxu3 %v6408_v33  ;;  %1382 = vadd.xlane.f32.xlu0 %v1216_v13  ;;  %v7922_v52 = vpop.eup %5991  ;;  %v6409_v41 = vld [vmem:[#allocation2 + $0x148] sm:$0xff]  ;;  %vm7973_vm1 = vmor %vm2349_vm11, %vm2350_vm9  ;;  %vm8039_vm14 = vcmp.eq.f32.partialorder %v2398_v34, 8.507059e+37 }
 0x1e1   :  { %v639_v8 = vpop.f32.mrf.mxu2  ;;  %4766 = vmatpush.bf16.msrb.mxu2 %v4691_v55  ;;  %v7916_v45 = vpop.f32.mrf.mxu1  ;;  %v2346_v21 = vsub.f32 1.0, %v2345_v5  ;;  %vm2365_vm3 = vweird.f32 %v7922_v52 }
 0x1e2   :  { %v4690_v24 = vpack.c.bf16 %v4563_v23, %v4562_v58  ;;  %v1172_v55 = vmax.f32 %v639_v8, 0.0  ;;  %v5994_v58 = vpop.eup %5993  ;;  %v2382_v23 = vsel %vm2381_vm0, %v7886_v15, %v2378_v61  ;;  %vm2384_vm2 = vcmp.eq.f32.partialorder %v2383_v0, 8.507059e+37  ;;  %vm7992_vm6 = vmor %vm2364_vm5, %vm2365_vm3 }
 0x1e3   :  { %v378_v2 = vpop.f32.mrf.mxu0  ;;  %v1355_v31 = vpop.xlane.xlu2 %1354  ;;  %v2387_v8 = vsel %vm2384_vm2, %v2386_v35, %v2382_v23  ;;  %v7936_v15 = vadd.f32 1.0, %v5994_v58  ;;  %v2347_v58 = vmul.f32 %v7904_v38, %v2346_v21 }
 0x1e4   :  { %v5584_v17 = vmul.f32 -1.442695, %v1355_v31  ;;  %v1085_v31 = vmax.f32 %v378_v2, 0.0  ;;  %v7927_v25 = vpop.xlane.xlu1 %1528  ;;  %v7933_v32 = vmul.f32 %v2387_v8, %v7804_v7  ;;  %v1304_v2 = vmul.f32 %v7871_v53, %v1172_v55  ;;  %v5996_v33 = vpop.eup %5995 }
 0x1e5   :  { %4767 = vmatpush.bf16.msrb.mxu2 %v4690_v24  ;;  %v2360_v24 = vmul.f32 %v7922_v52, %v7892_v19  ;;  %v7943_v35 = vpop.eup %5997  ;;  %v5668_v7 = vmul.f32 -1.442695, %v7848_v51  ;;  %v7947_v28 = vadd.f32 1.0, %v5996_v33  ;;  %v2413_v34 = vand.u32 2147483647, %v7936_v15 }
 0x1e6   :  { %425 = vmatmul.f32.gmra.mxu0 %v139_v9  ;;  %5999 = vpow2.f32 %v5584_v17  ;;  %v1217_v0 = vmul.f32 %v7871_v53, %v1085_v31  ;;  %v7939_v17 = vpop.f32.mrf.mxu3  ;;  %1558 = vadd.xlane.f32.xlu2 %v1304_v2  ;;  %v141_v2 = vld [vmem:[#allocation2 + $0x1c8] sm:$0xff]  ;;  %vm2395_vm7 = vweird.f32 %v7943_v35  ;;  %vm2409_vm15 = vweird.f32 %v7936_v15 }
 0x1e7   :  { %784 = vmatmul.f32.gmra.mxu1 %v6409_v41  ;;  %12924 = vst [vmem:[#allocation71_spill] sm:$0xff] %v7939_v17  ;;  %v2361_v8 = vsub.f32 1.0, %v2360_v24  ;;  %6001 = vrcp.f32 %v7936_v15  ;;  %vm8032_vm13 = vmor %vm2394_vm12, %vm2395_vm7  ;;  %vm8076_vm0 = vcmp.eq.f32.partialorder %v2413_v34, 8.507059e+37  ;;  %vm2424_vm9 = vweird.f32 %v7947_v28 }
 0x1e8   :  { %1384 = vadd.xlane.f32.xlu1 %v1217_v0 }
 0x1e9   :  { %v642_v13 = vpop.f32.mrf.mxu2  ;;  %v7941_v5 = vpop.f32.mrf.mxu1  ;;  %v2362_v33 = vmul.f32 %v7922_v52, %v2361_v8 }
 0x1ea   :  { %v1173_v23 = vmax.f32 %v642_v13, 0.0  ;;  %v2348_v13 = vadd.f32 %v7904_v38, %v2347_v58 }
 0x1eb   :  { %v1357_v9 = vpop.xlane.xlu0 %1356  ;;  %v381_v62 = vpop.f32.mrf.mxu0 }
 0x1ec   :  { %v5585_v61 = vmul.f32 -1.442695, %v1357_v9  ;;  %v1086_v55 = vmax.f32 %v381_v62, 0.0  ;;  %v6000_v41 = vpop.eup %5999  ;;  %v2390_v9 = vmul.f32 %v7943_v35, %v7906_v43  ;;  %v1305_v51 = vmul.f32 %v7871_v53, %v1173_v23 }
 0x1ed   :  { %v7950_v31 = vadd.f32 1.0, %v6000_v41  ;;  %v2355_v41 = vand.u32 2147483648, %v7866_v29 }
 0x1ee   :  { %428 = vmatmul.f32.gmra.mxu0 %v140_v16  ;;  %6003 = vpow2.f32 %v5585_v61  ;;  %v6410_v16 = vld [vmem:[#allocation2 + $0x150] sm:$0xff]  ;;  %v1218_v62 = vmul.f32 %v7871_v53, %v1086_v55  ;;  %v2353_v61 = vand.u32 2147483647, %v7866_v29  ;;  %1560 = vadd.xlane.f32.xlu0 %v1305_v51  ;;  %v7963_v23 = vpop.f32.mrf.mxu3  ;;  %v5670_v55 = vmul.f32 -1.442695, %v7899_v48 }
 0x1ef   :  { %787 = vmatmul.f32.gmra.mxu1 %v6410_v16  ;;  %6005 = vpow2.f32 %v5668_v7  ;;  %12925 = vst [vmem:[#allocation72_spill] sm:$0xff] %v7963_v23  ;;  %v2391_v58 = vsub.f32 1.0, %v2390_v9  ;;  %v7969_v16 = vpop.eup %6001  ;;  %v2370_v51 = vand.u32 2147483648, %v7892_v19  ;;  %v2352_v48 = vsel %vm7973_vm1, %v7904_v38, %v2348_v13  ;;  %v6411_v38 = vld [vmem:[#allocation2 + $0x158] sm:$0xff] }
 0x1f0   :  { %6007 = vrcp.f32 %v7947_v28  ;;  %1386 = vadd.xlane.f32.xlu2 %v1218_v62  ;;  %v2363_v29 = vadd.f32 %v7922_v52, %v2362_v33  ;;  %vm2354_vm4 = vcmp.eq.f32.partialorder %v2353_v61, 8.507059e+37  ;;  %v2356_v62 = vor.u32 1.1754944e-38, %v2355_v41 }
 0x1f1   :  { %6009 = vrcp.f32 %v7950_v31  ;;  %v7967_v8 = vpop.f32.mrf.mxu1  ;;  %v2392_v60 = vmul.f32 %v7943_v35, %v2391_v58  ;;  %v2368_v41 = vand.u32 2147483647, %v7892_v19  ;;  %v142_v58 = vld [vmem:[#allocation2 + $0x1d0] sm:$0xff]  ;;  %v2400_v19 = vand.u32 2147483648, %v7906_v43 }
 0x1f2   :  { %v2357_v33 = vsel %vm2354_vm4, %v2356_v62, %v2352_v48  ;;  %vm2410_vm8 = vweird.f32 %v7969_v16 }
 0x1f3   :  { %v1359_v21 = vpop.xlane.xlu1 %1358  ;;  %v384_v24 = vpop.f32.mrf.mxu0  ;;  %vm2369_vm10 = vcmp.eq.f32.partialorder %v2368_v41, 8.507059e+37  ;;  %vm8086_vm2 = vmor %vm2409_vm15, %vm2410_vm8 }
 0x1f4   :  { %v5586_v0 = vmul.f32 -1.442695, %v1359_v21  ;;  %v1087_v7 = vmax.f32 %v384_v24, 0.0  ;;  %v6004_v24 = vpop.eup %6003  ;;  %v2405_v21 = vmul.f32 %v7969_v16, %v7936_v15 }
 0x1f5   :  { %v6006_v9 = vpop.eup %6005  ;;  %v7997_v37 = vadd.f32 1.0, %v6004_v24  ;;  %v2393_v24 = vadd.f32 %v7943_v35, %v2392_v60 }
 0x1f6   :  { %6011 = vpow2.f32 %v5586_v0  ;;  %431 = vmatmul.f32.gmra.mxu0 %v141_v2  ;;  %v1219_v2 = vmul.f32 %v7871_v53, %v1087_v7  ;;  %v7984_v0 = vpop.eup %6007  ;;  %v2371_v7 = vor.u32 1.1754944e-38, %v2370_v51  ;;  %v7999_v49 = vadd.f32 1.0, %v6006_v9 }
 0x1f7   :  { %6013 = vpow2.f32 %v5670_v55  ;;  %790 = vmatmul.f32.gmra.mxu1 %v6411_v38  ;;  %v7990_v13 = vpop.eup %6009  ;;  %v2367_v38 = vsel %vm7992_vm6, %v7922_v52, %v2363_v29  ;;  %v5671_v51 = vmul.f32 -1.442695, %v7927_v25  ;;  %v2406_v27 = vsub.f32 1.0, %v2405_v21 }
 0x1f8   :  { %1388 = vadd.xlane.f32.xlu0 %v1219_v2  ;;  %v2420_v9 = vmul.f32 %v7984_v0, %v7947_v28  ;;  %v2435_v29 = vmul.f32 %v7990_v13, %v7950_v31  ;;  %v8019_v2 = vpop.f32.mrf.mxu3  ;;  %v8025_v21 = vpack.c.bf16 %v7784_v6, %v7784_v6  ;;  %v2372_v61 = vsel %vm2369_vm10, %v2371_v7, %v2367_v38 }
 0x1f9   :  { %v8011_v52 = vpop.f32.mrf.mxu1  ;;  %12930 = vst [vmem:[#allocation73_spill] sm:$0xff] %v8019_v2  ;;  %v2397_v43 = vsel %vm8032_vm13, %v7943_v35, %v2393_v24  ;;  %v2415_v35 = vand.u32 2147483648, %v7936_v15  ;;  %vm2425_vm11 = vweird.f32 %v7984_v0  ;;  %vm2440_vm1 = vweird.f32 %v7990_v13 }
 0x1fa   :  { %12931 = vst [vmem:[#allocation74_spill] sm:$0xff] %v8025_v21  ;;  %v2421_v38 = vsub.f32 1.0, %v2420_v9  ;;  %vm3699_vm3 = vweird.f32 %v7999_v49  ;;  %v3705_v2 = vand.u32 2147483648, %v7999_v49  ;;  %vm8129_vm5 = vmor %vm2424_vm9, %vm2425_vm11  ;;  %vm2439_vm6 = vweird.f32 %v7950_v31 }
 0x1fb   :  { %v1361_v55 = vpop.xlane.xlu2 %1360  ;;  %v387_v63 = vpop.f32.mrf.mxu0  ;;  %vm8145_vm10 = vmor %vm2439_vm6, %vm2440_vm1  ;;  %vm2454_vm15 = vweird.f32 %v7997_v37 }
 0x1fc   :  { %v6012_v40 = vpop.eup %6011  ;;  %v5587_v48 = vmul.f32 -1.442695, %v1361_v55  ;;  %v1088_v62 = vmax.f32 %v387_v63, 0.0 }
 0x1fd   :  { %v8014_v63 = vadd.f32 1.0, %v6012_v40  ;;  %v6014_v60 = vpop.eup %6013  ;;  %v8028_v40 = vmul.f32 %v2357_v33, %v7696_v3  ;;  %v2407_v3 = vmul.f32 %v7969_v16, %v2406_v27  ;;  %v6412_v33 = vld [vmem:[#allocation2 + $0x160] sm:$0xff]  ;;  %v8052_v27 = vmul.f32 %v2372_v61, %v7758_v36 }
 0x1fe   :  { %6015 = vpow2.f32 %v5587_v48  ;;  %434 = vmatmul.f32.gmra.mxu0 %v142_v58  ;;  %v1220_v25 = vmul.f32 %v7871_v53, %v1088_v62  ;;  %v2401_v58 = vor.u32 1.1754944e-38, %v2400_v19  ;;  %v8044_v7 = vadd.f32 1.0, %v6014_v60 }
 0x1ff   :  { %6017 = vrcp.f32 %v7997_v37  ;;  %793 = vmatmul.f32.gmra.mxu1 %v6412_v33  ;;  %v2436_v48 = vsub.f32 1.0, %v2435_v29  ;;  %v8056_v60 = vpack.c.bf16 %v7933_v32, %v7933_v32  ;;  %v2408_v1 = vadd.f32 %v7969_v16, %v2407_v3 }
 0x200   :  { %6019 = vrcp.f32 %v7999_v49  ;;  %1390 = vadd.xlane.f32.xlu1 %v1220_v25  ;;  %v143_v25 = vld [vmem:[#allocation2 + $0x1d8] sm:$0xff]  ;;  %v2402_v9 = vsel %vm8039_vm14, %v2401_v58, %v2397_v43  ;;  %v2422_v43 = vmul.f32 %v7984_v0, %v2421_v38  ;;  %v8094_v38 = vpop.f32.mrf.mxu3  ;;  %vm2469_vm9 = vweird.f32 %v8014_v63 }
 0x201   :  { %6021 = vpow2.f32 %v5671_v51  ;;  %12936 = vst [vmem:[#allocation75_spill] sm:$0xff] %v8056_v60  ;;  %v8067_v61 = vpop.f32.mrf.mxu1  ;;  %v2437_v41 = vmul.f32 %v7990_v13, %v2436_v48  ;;  %v8074_v58 = vmul.f32 %v2402_v9, %v7850_v18  ;;  %v2428_v18 = vand.u32 2147483647, %v7947_v28 }
 0x202   :  { %6023 = vrcp.f32 %v8014_v63  ;;  %12941 = vst [vmem:[#allocation76_spill] sm:$0xff] %v8094_v38  ;;  %v2412_v34 = vsel %vm8086_vm2, %v7969_v16, %v2408_v1 }
 0x203   :  { %v1363_v62 = vpop.xlane.xlu0 %1362  ;;  %v390_v51 = vpop.f32.mrf.mxu0  ;;  %v2438_v9 = vadd.f32 %v7990_v13, %v2437_v41  ;;  %vm8139_vm7 = vcmp.eq.f32.partialorder %v2428_v18, 8.507059e+37 }
 0x204   :  { %v6016_v55 = vpop.eup %6015  ;;  %v5588_v24 = vmul.f32 -1.442695, %v1363_v62  ;;  %v1089_v19 = vmax.f32 %v390_v51, 0.0  ;;  %v2416_v51 = vor.u32 1.1754944e-38, %v2415_v35  ;;  %v2430_v35 = vand.u32 2147483648, %v7947_v28 }
 0x205   :  { %v8049_v47 = vpop.eup %6017  ;;  %v8060_v29 = vadd.f32 1.0, %v6016_v55 }
 0x206   :  { %v8062_v33 = vpop.eup %6019  ;;  %6025 = vpow2.f32 %v5588_v24  ;;  %437 = vmatmul.f32.gmra.mxu0 %v143_v25  ;;  %v1221_v36 = vmul.f32 %v7871_v53, %v1089_v19  ;;  %v2450_v25 = vmul.f32 %v8049_v47, %v7997_v37  ;;  %v6413_v24 = vld [vmem:[#allocation2 + $0x168] sm:$0xff]  ;;  %v2423_v19 = vadd.f32 %v7984_v0, %v2422_v43 }
 0x207   :  { %v6022_v62 = vpop.eup %6021  ;;  %6027 = vrcp.f32 %v8044_v7  ;;  %796 = vmatmul.f32.gmra.mxu1 %v6413_v24  ;;  %v3695_v23 = vmul.f32 %v8062_v33, %v7999_v49  ;;  %vm3700_vm4 = vweird.f32 %v8062_v33  ;;  %vm2455_vm8 = vweird.f32 %v8049_v47 }
 0x208   :  { %1392 = vadd.xlane.f32.xlu2 %v1221_v36  ;;  %v8082_v55 = vpop.eup %6023  ;;  %6029 = vrcp.f32 %v8060_v29  ;;  %v8096_v48 = vadd.f32 1.0, %v6022_v62  ;;  %v2445_v36 = vand.u32 2147483648, %v7950_v31  ;;  %v144_v62 = vld [vmem:[#allocation2 + $0x1e0] sm:$0xff]  ;;  %v2451_v1 = vsub.f32 1.0, %v2450_v25  ;;  %vm8158_vm12 = vmor %vm3699_vm3, %vm3700_vm4 }
 0x209   :  { %v2465_v38 = vmul.f32 %v8082_v55, %v8014_v63  ;;  %v3696_v41 = vsub.f32 1.0, %v3695_v23  ;;  %vm2470_vm2 = vweird.f32 %v8082_v55 }
 0x20a   :  { %vm8238_vm1 = vmor %vm2469_vm9, %vm2470_vm2 }
 0x20b   :  { %v1365_v12 = vpop.xlane.xlu1 %1364  ;;  %v393_v50 = vpop.f32.mrf.mxu0  ;;  %v2466_v18 = vsub.f32 1.0, %v2465_v38  ;;  %v6414_v38 = vld [vmem:[#allocation2 + $0x170] sm:$0xff] }
 0x20c   :  { %v6026_v15 = vpop.eup %6025  ;;  %v5589_v16 = vmul.f32 -1.442695, %v1365_v12  ;;  %v1090_v17 = vmax.f32 %v393_v50, 0.0  ;;  %v3703_v50 = vand.u32 2147483647, %v7999_v49  ;;  %v8119_v12 = vpop.f32.mrf.mxu1 }
 0x20d   :  { %v8110_v24 = vpop.eup %6027  ;;  %v8112_v43 = vadd.f32 1.0, %v6026_v15  ;;  %v2417_v15 = vsel %vm8076_vm0, %v2416_v51, %v2412_v34  ;;  %v2431_v51 = vor.u32 1.1754944e-38, %v2430_v35  ;;  %v2442_v34 = vsel %vm8145_vm10, %v7990_v13, %v2438_v9  ;;  %vm8212_vm0 = vmor %vm2454_vm15, %vm2455_vm8 }
 0x20e   :  { %6031 = vpow2.f32 %v5589_v16  ;;  %440 = vmatmul.f32.gmra.mxu0 %v144_v62  ;;  %v1222_v11 = vmul.f32 %v7871_v53, %v1090_v17  ;;  %v8121_v25 = vpop.eup %6029  ;;  %v2443_v17 = vand.u32 2147483647, %v7950_v31  ;;  %v2427_v62 = vsel %vm8129_vm5, %v7984_v0, %v2423_v19 }
 0x20f   :  { %6033 = vrcp.f32 %v8112_v43  ;;  %v3697_v31 = vmul.f32 %v8062_v33, %v3696_v41  ;;  %v2452_v0 = vmul.f32 %v8049_v47, %v2451_v1  ;;  %v3706_v19 = vor.u32 1.1754944e-38, %v3705_v2  ;;  %799 = vmatmul.f32.gmra.mxu1 %v6414_v38  ;;  %v986_v1 = vpop.f32.mrf.mxu3 }
 0x210   :  { %1394 = vadd.xlane.f32.xlu0 %v1222_v11  ;;  %v2446_v16 = vor.u32 1.1754944e-38, %v2445_v36  ;;  %v2480_v11 = vmul.f32 %v8121_v25, %v8060_v29  ;;  %vm8165_vm13 = vcmp.eq.f32.partialorder %v3703_v50, 8.507059e+37  ;;  %6035 = vrcp.f32 %v8096_v48  ;;  %v8175_v36 = vld [vmem:[#allocation2 + $0x1e8] sm:$0xff] }
 0x211   :  { %v3698_v41 = vadd.f32 %v8062_v33, %v3697_v31  ;;  %v8171_v49 = vmul.f32 %v2417_v15, %v7889_v44  ;;  %v2432_v2 = vsel %vm8139_vm7, %v2431_v51, %v2427_v62  ;;  %vm2444_vm14 = vcmp.eq.f32.partialorder %v2443_v17, 8.507059e+37 }
 0x212   :  { %v2447_v50 = vsel %vm2444_vm14, %v2446_v16, %v2442_v34  ;;  %v2453_v44 = vadd.f32 %v8049_v47, %v2452_v0  ;;  %v2467_v17 = vmul.f32 %v8082_v55, %v2466_v18  ;;  %v2481_v34 = vsub.f32 1.0, %v2480_v11 }
 0x213   :  { %v396_v9 = vpop.f32.mrf.mxu0  ;;  %v3702_v31 = vsel %vm8158_vm12, %v8062_v33, %v3698_v41  ;;  %v1367_v62 = vpop.xlane.xlu1 %1366  ;;  %v8196_v0 = vmul.f32 %v2432_v2, %v7916_v45  ;;  %v2460_v18 = vand.u32 2147483648, %v7997_v37  ;;  %v2473_v41 = vand.u32 2147483647, %v8014_v63 }
 0x214   :  { %v6032_v23 = vpop.eup %6031  ;;  %v1091_v28 = vmax.f32 %v396_v9, 0.0  ;;  %v3707_v3 = vsel %vm8165_vm13, %v3706_v19, %v3702_v31  ;;  %v5590_v51 = vmul.f32 -1.442695, %v1367_v62  ;;  %v8193_v33 = vpop.f32.mrf.mxu1  ;;  %v2458_v19 = vand.u32 2147483647, %v7997_v37 }
 0x215   :  { %v8181_v38 = vpop.eup %6033  ;;  %v8184_v15 = vadd.f32 1.0, %v6032_v23  ;;  %v8191_v35 = vmul.f32 %v3707_v3, %v986_v1  ;;  %v8208_v45 = vmul.f32 %v2447_v50, %v7941_v5  ;;  %v2468_v37 = vadd.f32 %v8082_v55, %v2467_v17  ;;  %v6415_v50 = vld [vmem:[#allocation2 + $0x178] sm:$0xff] }
 0x216   :  { %443 = vmatmul.f32.gmra.mxu0 %v8175_v36  ;;  %v1223_v16 = vmul.f32 %v7871_v53, %v1091_v28  ;;  %v2495_v11 = vmul.f32 %v8181_v38, %v8112_v43  ;;  %v8205_v13 = vpop.eup %6035  ;;  %v2475_v9 = vand.u32 2147483648, %v8014_v63  ;;  %v8221_v1 = vpack.c.bf16 %v8171_v49, %v8171_v49 }
 0x217   :  { %12952 = vst [vmem:[#allocation77_spill] sm:$0xff] %v8191_v35  ;;  %6037 = vrcp.f32 %v8184_v15  ;;  %v2457_v5 = vsel %vm8212_vm0, %v8049_v47, %v2453_v44  ;;  %v2482_v23 = vmul.f32 %v8121_v25, %v2481_v34  ;;  %802 = vmatmul.f32.gmra.mxu1 %v6415_v50  ;;  %v8230_v28 = vpack.c.bf16 %v8196_v0, %v8196_v0  ;;  %v8255_v10 = vpop.f32.mrf.mxu3 }
 0x218   :  { %6039 = vpow2.f32 %v5590_v51  ;;  %1396 = vadd.xlane.f32.xlu1 %v1223_v16  ;;  %12955 = vst [vmem:[#allocation78_spill] sm:$0xff] %v8221_v1  ;;  %v2461_v31 = vor.u32 1.1754944e-38, %v2460_v18  ;;  %v2488_v17 = vand.u32 2147483647, %v8060_v29  ;;  %v2490_v62 = vand.u32 2147483648, %v8060_v29  ;;  %v8234_v51 = vld [vmem:[#allocation2 + $0x1f0] sm:$0xff] }
 0x219   :  { %12956 = vst [vmem:[#allocation79_spill] sm:$0xff] %v8230_v28  ;;  %vm2459_vm11 = vcmp.eq.f32.partialorder %v2458_v19, 8.507059e+37  ;;  %vm8242_vm3 = vcmp.eq.f32.partialorder %v2473_v41, 8.507059e+37  ;;  %v2496_v34 = vsub.f32 1.0, %v2495_v11  ;;  %v8250_v18 = vpack.c.bf16 %v8208_v45, %v8208_v45 }
 0x21a   :  { %v2462_v2 = vsel %vm2459_vm11, %v2461_v31, %v2457_v5  ;;  %v2472_v19 = vsel %vm8238_vm1, %v8082_v55, %v2468_v37  ;;  %v2476_v50 = vor.u32 1.1754944e-38, %v2475_v9  ;;  %12962 = vst [vmem:[#allocation81_spill] sm:$0xff] %v8255_v10  ;;  %v2483_v20 = vadd.f32 %v8121_v25, %v2482_v23 }
 0x21b   :  { %v399_v3 = vpop.f32.mrf.mxu0  ;;  %12961 = vst [vmem:[#allocation80_spill] sm:$0xff] %v8250_v18  ;;  %vm2485_vm4 = vweird.f32 %v8121_v25  ;;  %vm2484_vm5 = vweird.f32 %v8060_v29  ;;  %vm8266_vm6 = vcmp.eq.f32.partialorder %v2488_v17, 8.507059e+37  ;;  %v2491_v37 = vor.u32 1.1754944e-38, %v2490_v62  ;;  %v1369_v9 = vpop.xlane.xlu1 %1368 }
 0x21c   :  { %v1092_v44 = vmax.f32 %v399_v3, 0.0  ;;  %v8271_v23 = vmul.f32 %v2462_v2, %v7967_v8  ;;  %v5591_v31 = vmul.f32 -1.442695, %v1369_v9  ;;  %v2497_v47 = vmul.f32 %v8181_v38, %v2496_v34  ;;  %v8274_v56 = vpop.f32.mrf.mxu1  ;;  %vm8283_vm7 = vmor %vm2484_vm5, %vm2485_vm4  ;;  %v6416_v2 = vld [vmem:[#allocation2 + $0x180] sm:$0xff] }
 0x21d   :  { %v8246_v16 = vpop.eup %6037  ;;  %v2503_v8 = vand.u32 2147483647, %v8112_v43  ;;  %v3725_v17 = vmul.f32 %v8110_v24, %v8044_v7  ;;  %v2487_v62 = vsel %vm8283_vm7, %v8121_v25, %v2483_v20  ;;  %v2505_v63 = vand.u32 2147483648, %v8112_v43 }
 0x21e   :  { %v6040_v41 = vpop.eup %6039  ;;  %446 = vmatmul.f32.gmra.mxu0 %v8234_v51  ;;  %v1224_v11 = vmul.f32 %v7871_v53, %v1092_v44  ;;  %v2510_v3 = vmul.f32 %v8246_v16, %v8184_v15  ;;  %vm3729_vm10 = vweird.f32 %v8044_v7  ;;  %vm3730_vm12 = vweird.f32 %v8110_v24 }
 0x21f   :  { %v8263_v5 = vadd.f32 1.0, %v6040_v41  ;;  %v8278_v41 = vsel %vm8242_vm3, %v2476_v50, %v2472_v19  ;;  %805 = vmatmul.f32.gmra.mxu1 %v6416_v2  ;;  %v147_v50 = vld [vmem:[#allocation2 + $0x1f8] sm:$0xff]  ;;  %v2498_v9 = vadd.f32 %v8181_v38, %v2497_v47  ;;  %vm2500_vm13 = vweird.f32 %v8181_v38  ;;  %vm8316_vm0 = vmor %vm3729_vm10, %vm3730_vm12 }
 0x220   :  { %1398 = vadd.xlane.f32.xlu2 %v1224_v11  ;;  %v2511_v44 = vsub.f32 1.0, %v2510_v3  ;;  %v3726_v11 = vsub.f32 1.0, %v3725_v17  ;;  %v3733_v3 = vand.u32 2147483647, %v8044_v7  ;;  %v2518_v25 = vand.u32 2147483647, %v8184_v15 }
 0x221   :  { %6041 = vrcp.f32 %v8263_v5  ;;  %vm2499_vm14 = vweird.f32 %v8112_v43  ;;  %v3735_v29 = vand.u32 2147483648, %v8044_v7  ;;  %vm8305_vm8 = vcmp.eq.f32.partialorder %v2503_v8, 8.507059e+37 }
 0x222   :  { %6043 = vpow2.f32 %v5591_v31  ;;  %v2512_v34 = vmul.f32 %v8246_v16, %v2511_v44  ;;  %v2520_v31 = vand.u32 2147483648, %v8184_v15  ;;  %v3727_v44 = vmul.f32 %v8110_v24, %v3726_v11  ;;  %vm8324_vm2 = vmor %vm2499_vm14, %vm2500_vm13 }
 0x223   :  { %v402_v19 = vpop.f32.mrf.mxu0  ;;  %v2506_v2 = vor.u32 1.1754944e-38, %v2505_v63  ;;  %vm2515_vm15 = vweird.f32 %v8246_v16  ;;  %v2492_v11 = vsel %vm8266_vm6, %v2491_v37, %v2487_v62  ;;  %vm8329_vm9 = vcmp.eq.f32.partialorder %v3733_v3, 8.507059e+37 }
 0x224   :  { %v1093_v20 = vmax.f32 %v402_v19, 0.0  ;;  %v2513_v47 = vadd.f32 %v8246_v16, %v2512_v34  ;;  %v992_v34 = vpop.f32.mrf.mxu3  ;;  %v3736_v7 = vor.u32 1.1754944e-38, %v3735_v29  ;;  %v2502_v55 = vsel %vm8324_vm2, %v8181_v38, %v2498_v9  ;;  %v8342_v3 = vpop.f32.mrf.mxu1 }
 0x225   :  { %vm2514_vm11 = vweird.f32 %v8184_v15  ;;  %vm8337_vm1 = vcmp.eq.f32.partialorder %v2518_v25, 8.507059e+37  ;;  %v2521_v38 = vor.u32 1.1754944e-38, %v2520_v31  ;;  %v8362_v31 = vld [vmem:[#allocation2 + $0x200] sm:$0xff]  ;;  %vm3744_vm5 = vweird.f32 %v8096_v48 }
 0x226   :  { %449 = vmatmul.f32.gmra.mxu0 %v147_v50  ;;  %v1225_v19 = vmul.f32 %v7871_v53, %v1093_v20  ;;  %v3728_v50 = vadd.f32 %v8110_v24, %v3727_v44  ;;  %vm8348_vm3 = vmor %vm2514_vm11, %vm2515_vm15  ;;  %vm3745_vm6 = vweird.f32 %v8205_v13  ;;  %v3748_v20 = vand.u32 2147483647, %v8096_v48 }
 0x227   :  { %v6042_v8 = vpop.eup %6041  ;;  %v1371_v37 = vpop.xlane.xlu0 %1370  ;;  %v2517_v9 = vsel %vm8348_vm3, %v8246_v16, %v2513_v47  ;;  %v3740_v16 = vmul.f32 %v8205_v13, %v8096_v48  ;;  %vm2529_vm7 = vweird.f32 %v8263_v5  ;;  %vm8389_vm13 = vmor %vm3744_vm5, %vm3745_vm6  ;;  %v8397_v62 = vmul.f32 %v8278_v41, %v8011_v52 }
 0x228   :  { %v6044_v14 = vpop.eup %6043  ;;  %1400 = vadd.xlane.f32.xlu0 %v1225_v19  ;;  %v2525_v44 = vmul.f32 %v6042_v8, %v8263_v5  ;;  %v5592_v29 = vmul.f32 -1.442695, %v1371_v37  ;;  %v3732_v15 = vsel %vm8316_vm0, %v8110_v24, %v3728_v50  ;;  %v2533_v19 = vand.u32 2147483647, %v8263_v5  ;;  %v6417_v37 = vld [vmem:[#allocation2 + $0x188] sm:$0xff] }
 0x229   :  { %v8344_v4 = vadd.f32 1.0, %v6044_v14  ;;  %v3737_v14 = vsel %vm8329_vm9, %v3736_v7, %v3732_v15  ;;  %808 = vmatmul.f32.gmra.mxu1 %v6417_v37  ;;  %v2535_v24 = vand.u32 2147483648, %v8263_v5  ;;  %vm2530_vm4 = vweird.f32 %v6042_v8 }
 0x22a   :  { %v2526_v25 = vsub.f32 1.0, %v2525_v44  ;;  %v8364_v35 = vmul.f32 %v3737_v14, %v992_v34  ;;  %v3741_v50 = vsub.f32 1.0, %v3740_v16  ;;  %v3750_v44 = vand.u32 2147483648, %v8096_v48  ;;  %vm2531_vm10 = vmor %vm2529_vm7, %vm2530_vm4 }
 0x22b   :  { %6045 = vrcp.f32 %v8344_v4  ;;  %v405_v39 = vpop.f32.mrf.mxu0  ;;  %v2536_v63 = vor.u32 1.1754944e-38, %v2535_v24  ;;  %vm2534_vm12 = vcmp.eq.f32.partialorder %v2533_v19, 8.507059e+37  ;;  %vm8400_vm14 = vcmp.eq.f32.partialorder %v3748_v20, 8.507059e+37 }
 0x22c   :  { %6047 = vpow2.f32 %v5592_v29  ;;  %v1094_v47 = vmax.f32 %v405_v39, 0.0  ;;  %v2527_v43 = vmul.f32 %v6042_v8, %v2526_v25  ;;  %v2507_v39 = vsel %vm8305_vm8, %v2506_v2, %v2502_v55  ;;  %v8393_v2 = vpop.f32.mrf.mxu1  ;;  %v995_v52 = vpop.f32.mrf.mxu3 }
 0x22d   :  { %v2522_v29 = vsel %vm8337_vm1, %v2521_v38, %v2517_v9  ;;  %v3742_v15 = vmul.f32 %v8205_v13, %v3741_v50  ;;  %v8383_v14 = vpack.c.bf16 %v8364_v35, %v8364_v35  ;;  %v3751_v17 = vor.u32 1.1754944e-38, %v3750_v44  ;;  %v1373_v16 = vpop.xlane.xlu1 %1372 }
 0x22e   :  { %452 = vmatmul.f32.gmra.mxu0 %v8362_v31  ;;  %v2528_v34 = vadd.f32 %v6042_v8, %v2527_v43  ;;  %v1226_v7 = vmul.f32 %v7871_v53, %v1094_v47  ;;  %v8405_v19 = vmul.f32 %v2492_v11, %v8067_v61  ;;  %v8408_v37 = vmul.f32 %v2507_v39, %v8119_v12  ;;  %v6418_v47 = vld [vmem:[#allocation2 + $0x190] sm:$0xff]  ;;  %v8419_v11 = vld [vmem:[#allocation2 + $0x208] sm:$0xff] }
 0x22f   :  { %12979 = vst [vmem:[#allocation82_spill] sm:$0xff] %v8383_v14  ;;  %v8411_v24 = vmul.f32 %v2522_v29, %v8193_v33  ;;  %v5593_v50 = vmul.f32 -1.442695, %v1373_v16  ;;  %v4544_v33 = vunpack.c.l.bf16 %v8383_v14  ;;  %v2550_v29 = vand.u32 2147483648, %v8344_v4 }
 0x230   :  { %v2532_v25 = vsel %vm2531_vm10, %v6042_v8, %v2528_v34  ;;  %1402 = vadd.xlane.f32.xlu2 %v1226_v7  ;;  %v3743_v8 = vadd.f32 %v8205_v13, %v3742_v15  ;;  %v8434_v15 = vpack.c.bf16 %v8271_v23, %v8271_v23  ;;  %vm2544_vm15 = vweird.f32 %v8344_v4 }
 0x231   :  { %v6046_v55 = vpop.eup %6045  ;;  %v2537_v38 = vsel %vm2534_vm12, %v2536_v63, %v2532_v25  ;;  %811 = vmatmul.f32.gmra.mxu1 %v6418_v47  ;;  %v8438_v25 = vpack.c.bf16 %v8397_v62, %v8397_v62  ;;  %v8462_v16 = vsub.f32 %v8364_v35, %v4544_v33  ;;  %v2551_v47 = vor.u32 1.1754944e-38, %v2550_v29  ;;  %v150_v35 = vld [vmem:[#allocation2 + $0x210] sm:$0xff] }
 0x232   :  { %v6048_v48 = vpop.eup %6047  ;;  %v2540_v41 = vmul.f32 %v6046_v55, %v8344_v4  ;;  %v8417_v20 = vmul.f32 %v2537_v38, %v8274_v56  ;;  %v3747_v12 = vsel %vm8389_vm13, %v8205_v13, %v3743_v8  ;;  %v2548_v56 = vand.u32 2147483647, %v8344_v4  ;;  %12984 = vst [vmem:[#allocation83_spill] sm:$0xff] %v8434_v15 }
 0x233   :  { %v8414_v43 = vadd.f32 1.0, %v6048_v48  ;;  %v408_v61 = vpop.f32.mrf.mxu0  ;;  %v3752_v7 = vsel %vm8400_vm14, %v3751_v17, %v3747_v12  ;;  %vm2545_vm8 = vweird.f32 %v6046_v55  ;;  %12985 = vst [vmem:[#allocation84_spill] sm:$0xff] %v8438_v25  ;;  %v8448_v38 = vpack.c.bf16 %v8405_v19, %v8405_v19  ;;  %v6419_v12 = vld [vmem:[#allocation2 + $0x198] sm:$0xff] }
 0x234   :  { %v1095_v34 = vmax.f32 %v408_v61, 0.0  ;;  %v2541_v44 = vsub.f32 1.0, %v2540_v41  ;;  %v4105_v39 = vmul.f32 %v3752_v7, %v995_v52  ;;  %v8442_v5 = vpack.c.bf16 %v8417_v20, %v8417_v20  ;;  %v8455_v9 = vpop.f32.mrf.mxu1  ;;  %12991 = vst [vmem:[#allocation90_spill] sm:$0xff] %v8462_v16  ;;  %vm2546_vm0 = vmor %vm2544_vm15, %vm2545_vm8 }
 0x235   :  { %6049 = vrcp.f32 %v8414_v43  ;;  %12988 = vst [vmem:[#allocation87_spill] sm:$0xff] %v8448_v38  ;;  %v8459_v48 = vpack.c.bf16 %v8411_v24, %v8411_v24  ;;  %v1375_v52 = vpop.xlane.xlu2 %1374  ;;  %vm2549_vm2 = vcmp.eq.f32.partialorder %v2548_v56, 8.507059e+37  ;;  %v2563_v4 = vand.u32 2147483647, %v8414_v43 }
 0x236   :  { %6051 = vpow2.f32 %v5593_v50  ;;  %455 = vmatmul.f32.gmra.mxu0 %v8419_v11  ;;  %v2542_v63 = vmul.f32 %v6046_v55, %v2541_v44  ;;  %v1227_v13 = vmul.f32 %v7871_v53, %v1095_v34  ;;  %12986 = vst [vmem:[#allocation85_spill] sm:$0xff] %v8442_v5  ;;  %v8444_v17 = vpack.c.bf16 %v4105_v39, %v4105_v39 }
 0x237   :  { %v8452_v53 = vpack.c.bf16 %v8408_v37, %v8408_v37  ;;  %12990 = vst [vmem:[#allocation89_spill] sm:$0xff] %v8459_v48  ;;  %v5594_v50 = vmul.f32 -1.442695, %v1375_v52  ;;  %v2565_v33 = vand.u32 2147483648, %v8414_v43  ;;  %vm2559_vm9 = vweird.f32 %v8414_v43 }
 0x238   :  { %12987 = vst [vmem:[#allocation86_spill] sm:$0xff] %v8444_v17  ;;  %v2543_v8 = vadd.f32 %v6046_v55, %v2542_v63  ;;  %1404 = vadd.xlane.f32.xlu0 %v1227_v13  ;;  %v4545_v41 = vunpack.c.l.bf16 %v8444_v17  ;;  %v4464_v13 = vunpack.c.l.bf16 %v8442_v5  ;;  %v4463_v52 = vunpack.c.l.bf16 %v8459_v48 }
 0x239   :  { %12989 = vst [vmem:[#allocation88_spill] sm:$0xff] %v8452_v53  ;;  %814 = vmatmul.f32.gmra.mxu1 %v6419_v12  ;;  %6053 = vpow2.f32 %v5594_v50  ;;  %vm8481_vm11 = vcmp.eq.f32.partialorder %v2563_v4, 8.507059e+37  ;;  %v4462_v12 = vunpack.c.l.bf16 %v8452_v53  ;;  %v4459_v16 = vunpack.c.l.bf16 %v8434_v15 }
 0x23a   :  { %v2547_v61 = vsel %vm2546_vm0, %v6046_v55, %v2543_v8  ;;  %v8467_v7 = vsub.f32 %v4105_v39, %v4545_v41  ;;  %v4591_v14 = vsub.f32 %v8411_v24, %v4463_v52 }
 0x23b   :  { %v6050_v34 = vpop.eup %6049  ;;  %v2552_v44 = vsel %vm2549_vm2, %v2551_v47, %v2547_v61  ;;  %v411_v63 = vpop.f32.mrf.mxu0  ;;  %v2566_v61 = vor.u32 1.1754944e-38, %v2565_v33  ;;  %v4458_v33 = vunpack.c.l.bf16 %v8250_v18  ;;  %v8512_v53 = vsub.f32 %v8271_v23, %v4459_v16 }
 0x23c   :  { %12992 = vst [vmem:[#allocation91_spill] sm:$0xff] %v8467_v7  ;;  %v6052_v17 = vpop.eup %6051  ;;  %v4025_v29 = vmul.f32 %v2552_v44, %v8342_v3  ;;  %v1096_v55 = vmax.f32 %v411_v63, 0.0  ;;  %v2555_v56 = vmul.f32 %v6050_v34, %v8414_v43  ;;  %v8488_v3 = vld [vmem:[%s12519_s3] ss:$0 sm:$0xff]  ;;  %v4460_v44 = vunpack.c.l.bf16 %v8438_v25 }
 0x23d   :  { %v8473_v8 = vadd.f32 1.0, %v6052_v17  ;;  %vm2560_vm1 = vweird.f32 %v6050_v34  ;;  %v1377_v39 = vpop.xlane.xlu0 %1376  ;;  %v8509_v52 = vsub.f32 %v8208_v45, %v4458_v33  ;;  %v8528_v16 = vpack.c.bf16 %v8074_v58, %v8074_v58 }
 0x23e   :  { %v8479_v41 = vpack.c.bf16 %v4025_v29, %v4025_v29  ;;  %458 = vmatmul.f32.gmra.mxu0 %v150_v35  ;;  %v2556_v47 = vsub.f32 1.0, %v2555_v56  ;;  %v1228_v17 = vmul.f32 %v8488_v3, %v1096_v55  ;;  %v4592_v35 = vsub.f32 %v8417_v20, %v4464_v13  ;;  %v8496_v56 = vpop.f32.mrf.mxu1  ;;  %vm2561_vm3 = vmor %vm2559_vm9, %vm2560_vm1  ;;  %v151_v13 = vld [vmem:[#allocation2 + $0x218] sm:$0xff] }
 0x23f   :  { %6055 = vrcp.f32 %v8473_v8  ;;  %v4461_v55 = vunpack.c.l.bf16 %v8448_v38  ;;  %v6054_v7 = vpop.eup %6053  ;;  %v5595_v5 = vmul.f32 -1.442695, %v1377_v39  ;;  %v4702_v45 = vpack.c.bf16 %v8512_v53, %v8509_v52  ;;  %12997 = vst [vmem:[#allocation94_spill] sm:$0xff] %v8528_v16 }
 0x240   :  { %12993 = vst [vmem:[#allocation92_spill] sm:$0xff] %v8479_v41  ;;  %v2557_v63 = vmul.f32 %v6050_v34, %v2556_v47  ;;  %1406 = vadd.xlane.f32.xlu1 %v1228_v17  ;;  %v4465_v4 = vunpack.c.l.bf16 %v8479_v41  ;;  %v4456_v17 = vunpack.c.l.bf16 %v8221_v1  ;;  %v6421_v41 = vld [vmem:[#allocation2 + $0x1a0] sm:$0xff]  ;;  %v8503_v20 = vadd.f32 1.0, %v6054_v7  ;;  %v13014_v1 = vld [vmem:[#allocation31_spill] sm:$0xff] }
 0x241   :  { %817 = vmatmul.f32.gmra.mxu1 %v6421_v41  ;;  %6057 = vpow2.f32 %v5595_v5  ;;  %vm2574_vm5 = vweird.f32 %v8473_v8 }
 0x242   :  { %v2558_v47 = vadd.f32 %v6050_v34, %v2557_v63  ;;  %v4593_v48 = vsub.f32 %v4025_v29, %v4465_v4  ;;  %v4457_v29 = vunpack.c.l.bf16 %v8230_v28  ;;  %6059 = vrcp.f32 %v8503_v20 }
 0x243   :  { %v414_v24 = vpop.f32.mrf.mxu0  ;;  %v4590_v4 = vsub.f32 %v8408_v37, %v4462_v12  ;;  %v8532_v37 = vsub.f32 %v8171_v49, %v4456_v17  ;;  %v2578_v12 = vand.u32 2147483647, %v8473_v8  ;;  %v4588_v49 = vsub.f32 %v8397_v62, %v4460_v44 }
 0x244   :  { %v2562_v39 = vsel %vm2561_vm3, %v6050_v34, %v2558_v47  ;;  %v4705_v63 = vpack.c.bf16 %v4593_v48, %v4592_v35  ;;  %v1097_v41 = vmax.f32 %v414_v24, 0.0  ;;  %v4589_v34 = vsub.f32 %v8405_v19, %v4461_v55  ;;  %v6422_v24 = vld [vmem:[#allocation2 + $0x1a8] sm:$0xff] }
 0x245   :  { %v6056_v7 = vpop.eup %6055  ;;  %v2567_v43 = vsel %vm8481_vm11, %v2566_v61, %v2562_v39  ;;  %v8535_v53 = vsub.f32 %v8196_v0, %v4457_v29  ;;  %v4704_v50 = vpack.c.bf16 %v4591_v14, %v4590_v4  ;;  %v8544_v35 = vpack.c.bf16 %v8028_v40, %v8028_v40  ;;  %v8560_v29 = vld [vmem:[#allocation2 + $0x220] sm:$0xff] }
 0x246   :  { %v8522_v23 = vmul.f32 %v2567_v43, %v8393_v2  ;;  %4784 = vmatpush.bf16.msrb.mxu3 %v4705_v63  ;;  %461 = vmatmul.f32.gmra.mxu0 %v151_v13  ;;  %v2570_v5 = vmul.f32 %v6056_v7, %v8473_v8  ;;  %v1229_v48 = vmul.f32 %v8488_v3, %v1097_v41  ;;  %v2580_v19 = vand.u32 2147483648, %v8473_v8  ;;  %v8550_v55 = vpop.f32.mrf.mxu1 }
 0x247   :  { %v8539_v2 = vpack.c.bf16 %v7820_v54, %v7820_v54  ;;  %12999 = vst [vmem:[#allocation96_spill] sm:$0xff] %v8544_v35  ;;  %v4701_v0 = vpack.c.bf16 %v8535_v53, %v8532_v37  ;;  %v6058_v33 = vpop.eup %6057  ;;  %v8554_v14 = vpack.c.bf16 %v8052_v27, %v8052_v27  ;;  %vm2575_vm4 = vweird.f32 %v6056_v7  ;;  %v6424_v53 = vld [vmem:[#allocation2 + $0x1b8] sm:$0xff] }
 0x248   :  { %12996 = vst [vmem:[#allocation93_spill] sm:$0xff] %v8522_v23  ;;  %v2571_v61 = vsub.f32 1.0, %v2570_v5  ;;  %1408 = vadd.xlane.f32.xlu2 %v1229_v48  ;;  %v4454_v17 = vunpack.c.l.bf16 %v8056_v60  ;;  %v6060_v13 = vpop.eup %6059  ;;  %v8557_v52 = vadd.f32 1.0, %v6058_v33  ;;  %v4703_v62 = vpack.c.bf16 %v4589_v34, %v4588_v49  ;;  %vm2576_vm7 = vmor %vm2574_vm5, %vm2575_vm4  ;;  %v6429_v60 = vld [vmem:[#allocation2 + $0x1e0] sm:$0xff] }
 0x249   :  { %12998 = vst [vmem:[#allocation95_spill] sm:$0xff] %v8539_v2  ;;  %820 = vmatmul.f32.gmra.mxu1 %v6422_v24  ;;  %v4455_v39 = vunpack.c.l.bf16 %v8528_v16  ;;  %vm2579_vm6 = vcmp.eq.f32.partialorder %v2578_v12, 8.507059e+37  ;;  %v2585_v43 = vmul.f32 %v6060_v13, %v8503_v20  ;;  %v2581_v4 = vor.u32 1.1754944e-38, %v2580_v19  ;;  %v13012_v16 = vld [vmem:[#allocation29_spill] sm:$0xff] }
 0x24a   :  { %13000 = vst [vmem:[#allocation97_spill] sm:$0xff] %v8554_v14  ;;  %4785 = vmatpush.bf16.msrb.mxu3 %v4704_v50  ;;  %v2572_v47 = vmul.f32 %v6056_v7, %v2571_v61  ;;  %6061 = vrcp.f32 %v8557_v52  ;;  %v4582_v5 = vsub.f32 %v7933_v32, %v4454_v17  ;;  %v2593_v50 = vand.u32 2147483647, %v8503_v20 }
 0x24b   :  { %v417_v44 = vpop.f32.mrf.mxu0  ;;  %v4583_v8 = vsub.f32 %v8074_v58, %v4455_v39  ;;  %v2586_v34 = vsub.f32 1.0, %v2585_v43  ;;  %v2595_v49 = vand.u32 2147483648, %v8503_v20  ;;  %vm2590_vm10 = vweird.f32 %v6060_v13  ;;  %v6423_v39 = vld [vmem:[#allocation2 + $0x1b0] sm:$0xff]  ;;  %v8582_v43 = vld [vmem:[#allocation2 + $0x228] sm:$0xff] }
 0x24c   :  { %v2573_v63 = vadd.f32 %v6056_v7, %v2572_v47  ;;  %v1098_v41 = vmax.f32 %v417_v44, 0.0  ;;  %v4452_v47 = vunpack.c.l.bf16 %v8544_v35  ;;  %v4453_v58 = vunpack.c.l.bf16 %v8554_v14  ;;  %13002 = vst [vmem:[#allocation99_spill] sm:$0xff] %v8582_v43 }
 0x24d   :  { %v4700_v33 = vpack.c.bf16 %v4583_v8, %v4582_v5  ;;  %v2587_v32 = vmul.f32 %v6060_v13, %v2586_v34  ;;  %v4451_v17 = vunpack.c.l.bf16 %v8539_v2  ;;  %vm2589_vm12 = vweird.f32 %v8503_v20 }
 0x24e   :  { %v2577_v48 = vsel %vm2576_vm7, %v6056_v7, %v2573_v63  ;;  %4786 = vmatpush.bf16.msrb.mxu3 %v4703_v62  ;;  %464 = vmatmul.f32.gmra.mxu0 %v8560_v29  ;;  %v1230_v61 = vmul.f32 %v8488_v3, %v1098_v41  ;;  %v4450_v7 = vunpack.c.l.bf16 %v8025_v21  ;;  %v8579_v24 = vpop.f32.mrf.mxu1  ;;  %v1379_v62 = vpop.xlane.xlu1 %1378  ;;  %vm2591_vm13 = vmor %vm2589_vm12, %vm2590_vm10  ;;  %v2596_v63 = vor.u32 1.1754944e-38, %v2595_v49 }
 0x24f   :  { %v2582_v12 = vsel %vm2579_vm6, %v2581_v4, %v2577_v48  ;;  %v2588_v44 = vadd.f32 %v6060_v13, %v2587_v32  ;;  %v4581_v4 = vsub.f32 %v8052_v27, %v4453_v58  ;;  %v4579_v5 = vsub.f32 %v7820_v54, %v4451_v17 }
 0x250   :  { %v8574_v19 = vmul.f32 %v2582_v12, %v8455_v9  ;;  %1410 = vadd.xlane.f32.xlu0 %v1230_v61  ;;  %v6062_v9 = vpop.eup %6061  ;;  %vm2594_vm14 = vcmp.eq.f32.partialorder %v2593_v50, 8.507059e+37  ;;  %v4580_v48 = vsub.f32 %v8028_v40, %v4452_v47  ;;  %v4578_v61 = vsub.f32 %v7784_v6, %v4450_v7  ;;  %v8597_v50 = vpop.xlane.xlu0 %1554  ;;  %v8606_v7 = vld [vmem:[#allocation2 + $0x230] sm:$0xff] }
 0x251   :  { %823 = vmatmul.f32.gmra.mxu1 %v6423_v39  ;;  %v2592_v8 = vsel %vm2591_vm13, %v6060_v13, %v2588_v44  ;;  %v2600_v20 = vmul.f32 %v6062_v9, %v8557_v52  ;;  %13003 = vst [vmem:[#allocation100_spill] sm:$0xff] %v8597_v50  ;;  %v2610_v49 = vand.u32 2147483648, %v8557_v52  ;;  %v5596_v47 = vmul.f32 -1.442695, %v1379_v62  ;;  %v1381_v44 = vpop.xlane.xlu2 %1380 }
 0x252   :  { %13001 = vst [vmem:[#allocation98_spill] sm:$0xff] %v8574_v19  ;;  %4787 = vmatpush.bf16.msrb.mxu3 %v4702_v45  ;;  %v2597_v45 = vsel %vm2594_vm14, %v2596_v63, %v2592_v8  ;;  %v4699_v13 = vpack.c.bf16 %v4581_v4, %v4580_v48  ;;  %v4698_v40 = vpack.c.bf16 %v4579_v5, %v4578_v61  ;;  %vm2605_vm8 = vweird.f32 %v6062_v9  ;;  %v6425_v8 = vld [vmem:[#allocation2 + $0x1c0] sm:$0xff] }
 0x253   :  { %v420_v41 = vpop.f32.mrf.mxu0  ;;  %v8590_v12 = vmul.f32 %v2597_v45, %v8496_v56  ;;  %v2601_v54 = vsub.f32 1.0, %v2600_v20  ;;  %v2608_v56 = vand.u32 2147483647, %v8557_v52  ;;  %vm2604_vm15 = vweird.f32 %v8557_v52  ;;  %13005 = vst [vmem:[#allocation102_spill] sm:$0xff] %v8606_v7  ;;  %v8615_v45 = vld [vmem:[#allocation2 + $0x238] sm:$0xff] }
 0x254   :  { %v1099_v34 = vmax.f32 %v420_v41, 0.0  ;;  %vm2606_vm0 = vmor %vm2604_vm15, %vm2605_vm8  ;;  %v2611_v17 = vor.u32 1.1754944e-38, %v2610_v49  ;;  %6063 = vpow2.f32 %v5596_v47  ;;  %v5597_v52 = vmul.f32 -1.442695, %v1381_v44  ;;  %13006 = vst [vmem:[#allocation103_spill] sm:$0xff] %v8615_v45  ;;  %v6426_v49 = vld [vmem:[#allocation2 + $0x1c8] sm:$0xff] }
 0x255   :  { %v2602_v6 = vmul.f32 %v6062_v9, %v2601_v54  ;;  %vm2609_vm2 = vcmp.eq.f32.partialorder %v2608_v56, 8.507059e+37  ;;  %v8684_v28 = vpack.c.bf16 %v13014_v1, %v13014_v1 }
 0x256   :  { %4788 = vmatpush.bf16.msrb.mxu3 %v4701_v0  ;;  %467 = vmatmul.f32.gmra.mxu0 %v8582_v43  ;;  %v1231_v27 = vmul.f32 %v8488_v3, %v1099_v34  ;;  %v8601_v32 = vpop.f32.mrf.mxu1  ;;  %v8603_v37 = vpop.xlane.xlu1 %1556  ;;  %6065 = vpow2.f32 %v5597_v52  ;;  %v6427_v52 = vld [vmem:[#allocation2 + $0x1d0] sm:$0xff] }
 0x257   :  { %13004 = vst [vmem:[#allocation101_spill] sm:$0xff] %v8603_v37  ;;  %v2603_v0 = vadd.f32 %v6062_v9, %v2602_v6  ;;  %v8624_v6 = vld [vmem:[#allocation2 + $0x240] sm:$0xff] }
 0x258   :  { %1412 = vadd.xlane.f32.xlu1 %v1231_v27  ;;  %v1383_v5 = vpop.xlane.xlu0 %1382  ;;  %13007 = vst [vmem:[#allocation104_spill] sm:$0xff] %v8624_v6 }
 0x259   :  { %826 = vmatmul.f32.gmra.mxu1 %v6424_v53  ;;  %v2607_v39 = vsel %vm2606_vm0, %v6062_v9, %v2603_v0  ;;  %v5598_v61 = vmul.f32 -1.442695, %v1383_v5  ;;  %13015 = vst [vmem:[#allocation31_spill] sm:$0xff] %v8684_v28 }
 0x25a   :  { %4789 = vmatpush.bf16.msrb.mxu3 %v4700_v33  ;;  %v2612_v63 = vsel %vm2609_vm2, %v2611_v17, %v2607_v39  ;;  %v6064_v48 = vpop.eup %6063  ;;  %v8630_v17 = vpop.xlane.xlu2 %1558 }
 0x25b   :  { %v423_v58 = vpop.f32.mrf.mxu0  ;;  %v8611_v41 = vmul.f32 %v2612_v63, %v8550_v55  ;;  %v8617_v54 = vadd.f32 1.0, %v6064_v48  ;;  %6067 = vpow2.f32 %v5598_v61  ;;  %13008 = vst [vmem:[#allocation105_spill] sm:$0xff] %v8630_v17 }
 0x25c   :  { %v1100_v62 = vmax.f32 %v423_v58, 0.0 }
 0x25d   :  { %6069 = vrcp.f32 %v8617_v54  ;;  %vm2619_vm11 = vweird.f32 %v8617_v54 }
 0x25e   :  { %4790 = vmatpush.bf16.msrb.mxu3 %v4699_v13  ;;  %470 = vmatmul.f32.gmra.mxu0 %v8606_v7  ;;  %v1232_v33 = vmul.f32 %v8488_v3, %v1100_v62  ;;  %v8613_v4 = vpop.f32.mrf.mxu1  ;;  %v1385_v34 = vpop.xlane.xlu1 %1384 }
 0x25f   :  { %v5599_v27 = vmul.f32 -1.442695, %v1385_v34 }
 0x260   :  { %1414 = vadd.xlane.f32.xlu2 %v1232_v33 }
 0x261   :  { %829 = vmatmul.f32.gmra.mxu1 %v6425_v8  ;;  %6071 = vpow2.f32 %v5599_v27  ;;  %v8635_v39 = vpop.xlane.xlu0 %1560  ;;  %v8641_v8 = vld [vmem:[#allocation2 + $0x248] sm:$0xff] }
 0x262   :  { %4791 = vmatpush.bf16.msrb.mxu3 %v4698_v40  ;;  %v6066_v40 = vpop.eup %6065  ;;  %13009 = vst [vmem:[#allocation106_spill] sm:$0xff] %v8635_v39 }
 0x263   :  { %v426_v9 = vpop.f32.mrf.mxu0  ;;  %v8626_v53 = vadd.f32 1.0, %v6066_v40  ;;  %v6068_v58 = vpop.eup %6067  ;;  %13010 = vst [vmem:[#allocation107_spill] sm:$0xff] %v8641_v8 }
 0x264   :  { %v1101_v20 = vmax.f32 %v426_v9, 0.0  ;;  %v8632_v62 = vpop.eup %6069  ;;  %v8639_v33 = vadd.f32 1.0, %v6068_v58  ;;  %v1387_v27 = vpop.xlane.xlu2 %1386  ;;  %v8657_v58 = vld [vmem:[#allocation2 + $0x250] sm:$0xff] }
 0x265   :  { %6073 = vrcp.f32 %v8626_v53  ;;  %v2615_v9 = vmul.f32 %v8632_v62, %v8617_v54  ;;  %13011 = vst [vmem:[#allocation108_spill] sm:$0xff] %v8657_v58  ;;  %vm2620_vm9 = vweird.f32 %v8632_v62  ;;  %v2638_v18 = vand.u32 2147483647, %v8626_v53 }
 0x266   :  { %473 = vmatmul.f32.gmra.mxu0 %v8615_v45  ;;  %v1233_v55 = vmul.f32 %v8488_v3, %v1101_v20  ;;  %v8621_v13 = vpop.f32.mrf.mxu1  ;;  %6075 = vrcp.f32 %v8639_v33  ;;  %vm8688_vm1 = vmor %vm2619_vm11, %vm2620_vm9  ;;  %v2640_v10 = vand.u32 2147483648, %v8626_v53  ;;  %vm2634_vm5 = vweird.f32 %v8626_v53 }
 0x267   :  { %v6072_v44 = vpop.eup %6071  ;;  %vm8723_vm7 = vcmp.eq.f32.partialorder %v2638_v18, 8.507059e+37  ;;  %vm2649_vm10 = vweird.f32 %v8639_v33 }
 0x268   :  { %1416 = vadd.xlane.f32.xlu0 %v1233_v55  ;;  %v8643_v48 = vadd.f32 1.0, %v6072_v44  ;;  %v2616_v55 = vsub.f32 1.0, %v2615_v9 }
 0x269   :  { %832 = vmatmul.f32.gmra.mxu1 %v6426_v49 }
 0x26a   :  { %6077 = vrcp.f32 %v8643_v48  ;;  %vm2664_vm13 = vweird.f32 %v8643_v48 }
 0x26b   :  { %v429_v47 = vpop.f32.mrf.mxu0  ;;  %v8649_v20 = vpop.eup %6073 }
 0x26c   :  { %v1102_v56 = vmax.f32 %v429_v47, 0.0  ;;  %v2630_v49 = vmul.f32 %v8649_v20, %v8626_v53  ;;  %v6428_v47 = vld [vmem:[#allocation2 + $0x1d8] sm:$0xff]  ;;  %v8659_v44 = vpop.eup %6075  ;;  %vm2635_vm4 = vweird.f32 %v8649_v20 }
 0x26d   :  { %v2645_v2 = vmul.f32 %v8659_v44, %v8639_v33  ;;  %vm8719_vm6 = vmor %vm2634_vm5, %vm2635_vm4  ;;  %vm2650_vm12 = vweird.f32 %v8659_v44 }
 0x26e   :  { %476 = vmatmul.f32.gmra.mxu0 %v8624_v6  ;;  %v1234_v0 = vmul.f32 %v8488_v3, %v1102_v56  ;;  %v8637_v63 = vpop.f32.mrf.mxu1  ;;  %v1389_v56 = vpop.xlane.xlu0 %1388  ;;  %vm8756_vm8 = vmor %vm2649_vm10, %vm2650_vm12 }
 0x26f   :  { %v5601_v21 = vmul.f32 -1.442695, %v1389_v56 }
 0x270   :  { %1418 = vadd.xlane.f32.xlu1 %v1234_v0  ;;  %v8662_v9 = vpop.eup %6077 }
 0x271   :  { %835 = vmatmul.f32.gmra.mxu1 %v6427_v52  ;;  %v2617_v52 = vmul.f32 %v8632_v62, %v2616_v55  ;;  %v2623_v55 = vand.u32 2147483647, %v8617_v54  ;;  %vm2665_vm14 = vweird.f32 %v8662_v9 }
 0x272   :  { %vm8781_vm15 = vmor %vm2664_vm13, %vm2665_vm14 }
 0x273   :  { %v432_v5 = vpop.f32.mrf.mxu0  ;;  %v2618_v14 = vadd.f32 %v8632_v62, %v2617_v52  ;;  %vm2624_vm3 = vcmp.eq.f32.partialorder %v2623_v55, 8.507059e+37 }
 0x274   :  { %v1103_v34 = vmax.f32 %v432_v5, 0.0  ;;  %v5600_v5 = vmul.f32 -1.442695, %v1387_v27  ;;  %v2625_v27 = vand.u32 2147483648, %v8617_v54  ;;  %v2646_v54 = vsub.f32 1.0, %v2645_v2 }
 0x276   :  { %479 = vmatmul.f32.gmra.mxu0 %v8641_v8  ;;  %v1235_v61 = vmul.f32 %v8488_v3, %v1103_v34  ;;  %v8653_v40 = vpop.f32.mrf.mxu1  ;;  %6079 = vpow2.f32 %v5600_v5  ;;  %v8680_v5 = vpack.c.bf16 %v13012_v16, %v13012_v16  ;;  %v2626_v15 = vor.u32 1.1754944e-38, %v2625_v27 }
 0x277   :  { %6081 = vpow2.f32 %v5601_v21  ;;  %v8692_v21 = vld [vmem:[#allocation2 + $0x258] sm:$0xff]  ;;  %v2647_v27 = vmul.f32 %v8659_v44, %v2646_v54 }
 0x278   :  { %1420 = vadd.xlane.f32.xlu2 %v1235_v61  ;;  %v2631_v61 = vsub.f32 1.0, %v2630_v49  ;;  %v2660_v49 = vmul.f32 %v8662_v9, %v8643_v48  ;;  %13013 = vst [vmem:[#allocation29_spill] sm:$0xff] %v8680_v5 }
 0x279   :  { %838 = vmatmul.f32.gmra.mxu1 %v6428_v47  ;;  %v1391_v47 = vpop.xlane.xlu1 %1390  ;;  %13018 = vst [vmem:[#allocation109_spill] sm:$0xff] %v8692_v21 }
 0x27a   :  { %v5602_v52 = vmul.f32 -1.442695, %v1391_v47  ;;  %v2661_v37 = vsub.f32 1.0, %v2660_v49  ;;  %v13019_v49 = vld [vmem:[#allocation35_spill] sm:$0xff] }
 0x27b   :  { %v435_v0 = vpop.f32.mrf.mxu0  ;;  %v1393_v56 = vpop.xlane.xlu2 %1392 }
 0x27c   :  { %v1104_v34 = vmax.f32 %v435_v0, 0.0  ;;  %v5603_v47 = vmul.f32 -1.442695, %v1393_v56  ;;  %v6080_v50 = vpop.eup %6079  ;;  %6083 = vpow2.f32 %v5602_v52  ;;  %v2662_v53 = vmul.f32 %v8662_v9, %v2661_v37 }
 0x27d   :  { %v8715_v52 = vadd.f32 1.0, %v6080_v50 }
 0x27e   :  { %482 = vmatmul.f32.gmra.mxu0 %v8657_v58  ;;  %v1236_v35 = vmul.f32 %v8488_v3, %v1104_v34  ;;  %v8674_v0 = vpop.f32.mrf.mxu1  ;;  %v2632_v34 = vmul.f32 %v8649_v20, %v2631_v61  ;;  %v8708_v58 = vpack.c.bf16 %v13019_v49, %v13019_v49  ;;  %6085 = vpow2.f32 %v5603_v47 }
 0x27f   :  { %v2641_v47 = vor.u32 1.1754944e-38, %v2640_v10  ;;  %v2655_v10 = vand.u32 2147483648, %v8639_v33  ;;  %v2685_v17 = vand.u32 2147483648, %v8715_v52  ;;  %vm2679_vm10 = vweird.f32 %v8715_v52 }
 0x280   :  { %1422 = vadd.xlane.f32.xlu0 %v1236_v35  ;;  %v2633_v2 = vadd.f32 %v8649_v20, %v2632_v34  ;;  %v6082_v35 = vpop.eup %6081  ;;  %13020 = vst [vmem:[#allocation35_spill] sm:$0xff] %v8708_v58  ;;  %v13021_v34 = vld [vmem:[#allocation37_spill] sm:$0xff] }
 0x281   :  { %841 = vmatmul.f32.gmra.mxu1 %v6429_v60  ;;  %v2622_v60 = vsel %vm8688_vm1, %v8632_v62, %v2618_v14  ;;  %v4522_v62 = vunpack.c.l.bf16 %v8680_v5  ;;  %v8738_v18 = vadd.f32 1.0, %v6082_v35 }
 0x282   :  { %v2627_v55 = vsel %vm2624_vm3, %v2626_v15, %v2622_v60  ;;  %v2637_v50 = vsel %vm8719_vm6, %v8649_v20, %v2633_v2  ;;  %v2653_v15 = vand.u32 2147483647, %v8639_v33  ;;  %v2668_v33 = vand.u32 2147483647, %v8643_v48 }
 0x283   :  { %v438_v61 = vpop.f32.mrf.mxu0  ;;  %v1395_v38 = vpop.xlane.xlu0 %1394  ;;  %v8731_v60 = vmul.f32 %v2627_v55, %v8579_v24  ;;  %v8742_v24 = vld [vmem:[#allocation2 + $0x260] sm:$0xff]  ;;  %vm2694_vm9 = vweird.f32 %v8738_v18 }
 0x284   :  { %v1105_v25 = vmax.f32 %v438_v61, 0.0  ;;  %v5604_v56 = vmul.f32 -1.442695, %v1395_v38  ;;  %v4523_v61 = vunpack.c.l.bf16 %v8684_v28  ;;  %13027 = vst [vmem:[#allocation110_spill] sm:$0xff] %v8742_v24  ;;  %v6084_v55 = vpop.eup %6083  ;;  %vm2654_vm0 = vcmp.eq.f32.partialorder %v2653_v15, 8.507059e+37 }
 0x285   :  { %v8805_v15 = vpack.c.bf16 %v8611_v41, %v8611_v41  ;;  %vm2669_vm2 = vcmp.eq.f32.partialorder %v2668_v33, 8.507059e+37 }
 0x286   :  { %485 = vmatmul.f32.gmra.mxu0 %v8692_v21  ;;  %v1237_v14 = vmul.f32 %v8488_v3, %v1105_v25  ;;  %v8713_v25 = vpack.c.bf16 %v13021_v34, %v13021_v34  ;;  %v8728_v54 = vpop.f32.mrf.mxu1  ;;  %6087 = vpow2.f32 %v5604_v56  ;;  %v2642_v56 = vsel %vm8723_vm7, %v2641_v47, %v2637_v50 }
 0x287   :  { %6089 = vrcp.f32 %v8715_v52  ;;  %v8767_v50 = vadd.f32 1.0, %v6084_v55  ;;  %v8771_v47 = vsub.f32 %v13012_v16, %v4522_v62  ;;  %13035 = vst [vmem:[#allocation114_spill] sm:$0xff] %v8805_v15 }
 0x288   :  { %1424 = vadd.xlane.f32.xlu1 %v1237_v14  ;;  %13022 = vst [vmem:[#allocation37_spill] sm:$0xff] %v8713_v25  ;;  %v2648_v14 = vadd.f32 %v8659_v44, %v2647_v27  ;;  %v6086_v27 = vpop.eup %6085 }
 0x289   :  { %844 = vmatmul.f32.gmra.mxu1 %v8175_v36  ;;  %v2663_v36 = vadd.f32 %v8662_v9, %v2662_v53  ;;  %13030 = vst [vmem:[#allocation111_spill] sm:$0xff] %v8771_v47  ;;  %v8791_v16 = vadd.f32 1.0, %v6086_v27  ;;  %vm2709_vm1 = vweird.f32 %v8767_v50 }
 0x28a   :  { %v2652_v38 = vsel %vm8756_vm8, %v8659_v44, %v2648_v14  ;;  %v8786_v14 = vmul.f32 %v2642_v56, %v8601_v32  ;;  %v8812_v56 = vld [vmem:[#allocation2 + $0x268] sm:$0xff] }
 0x28b   :  { %v1397_v37 = vpop.xlane.xlu1 %1396  ;;  %v441_v21 = vpop.f32.mrf.mxu0  ;;  %13037 = vst [vmem:[#allocation116_spill] sm:$0xff] %v8812_v56  ;;  %vm2724_vm5 = vweird.f32 %v8791_v16 }
 0x28c   :  { %v5605_v20 = vmul.f32 -1.442695, %v1397_v37  ;;  %v1106_v2 = vmax.f32 %v441_v21, 0.0  ;;  %v2670_v21 = vand.u32 2147483648, %v8643_v48  ;;  %v8774_v37 = vsub.f32 %v13014_v1, %v4523_v61  ;;  %v6088_v44 = vpop.eup %6087 }
 0x28d   :  { %v2667_v1 = vsel %vm8781_vm15, %v8662_v9, %v2663_v36  ;;  %v4525_v48 = vunpack.c.l.bf16 %v8713_v25  ;;  %v8798_v61 = vpack.c.bf16 %v8590_v12, %v8590_v12  ;;  %v8801_v32 = vpop.eup %6089  ;;  %v8809_v9 = vpack.c.bf16 %v8731_v60, %v8731_v60 }
 0x28e   :  { %6091 = vpow2.f32 %v5605_v20  ;;  %488 = vmatmul.f32.gmra.mxu0 %v8742_v24  ;;  %v1238_v53 = vmul.f32 %v8488_v3, %v1106_v2  ;;  %13031 = vst [vmem:[#allocation112_spill] sm:$0xff] %v8774_v37  ;;  %v4524_v20 = vunpack.c.l.bf16 %v8708_v58  ;;  %v2656_v24 = vor.u32 1.1754944e-38, %v2655_v10  ;;  %v8793_v62 = vpop.f32.mrf.mxu1 }
 0x28f   :  { %6093 = vrcp.f32 %v8738_v18  ;;  %13034 = vst [vmem:[#allocation113_spill] sm:$0xff] %v8798_v61  ;;  %v2671_v10 = vor.u32 1.1754944e-38, %v2670_v21  ;;  %v8820_v2 = vpack.c.bf16 %v8786_v14, %v8786_v14  ;;  %v4468_v58 = vunpack.c.l.bf16 %v8798_v61 }
 0x290   :  { %1426 = vadd.xlane.f32.xlu2 %v1238_v53  ;;  %v2657_v55 = vsel %vm2654_vm0, %v2656_v24, %v2652_v38  ;;  %13036 = vst [vmem:[#allocation115_spill] sm:$0xff] %v8809_v9  ;;  %6095 = vrcp.f32 %v8767_v50  ;;  %vm2680_vm6 = vweird.f32 %v8801_v32 }
 0x291   :  { %847 = vmatmul.f32.gmra.mxu1 %v8234_v51  ;;  %v2672_v35 = vsel %vm2669_vm2, %v2671_v10, %v2667_v1  ;;  %v8814_v51 = vadd.f32 1.0, %v6088_v44  ;;  %13038 = vst [vmem:[#allocation117_spill] sm:$0xff] %v8820_v2  ;;  %v4032_v25 = vmul.f32 %v2657_v55, %v8613_v4  ;;  %6097 = vrcp.f32 %v8791_v16 }
 0x292   :  { %v2675_v44 = vmul.f32 %v8801_v32, %v8715_v52  ;;  %v4469_v10 = vunpack.c.l.bf16 %v8805_v15  ;;  %v4033_v4 = vmul.f32 %v2672_v35, %v8621_v13  ;;  %v8836_v55 = vsub.f32 %v13019_v49, %v4524_v20  ;;  %v13043_v13 = vld [vmem:[#allocation44_spill] sm:$0xff] }
 0x293   :  { %v1399_v36 = vpop.xlane.xlu2 %1398  ;;  %v444_v27 = vpop.f32.mrf.mxu0  ;;  %v8852_v35 = vpack.c.bf16 %v13043_v13, %v13043_v13  ;;  %v4471_v49 = vunpack.c.l.bf16 %v8820_v2  ;;  %v8868_v15 = vsub.f32 %v8590_v12, %v4468_v58  ;;  %v2728_v13 = vand.u32 2147483647, %v8791_v16 }
 0x294   :  { %v6092_v24 = vpop.eup %6091  ;;  %v5606_v21 = vmul.f32 -1.442695, %v1399_v36  ;;  %v1107_v53 = vmax.f32 %v444_v27, 0.0  ;;  %v4470_v36 = vunpack.c.l.bf16 %v8809_v9  ;;  %13039 = vst [vmem:[#allocation118_spill] sm:$0xff] %v8836_v55  ;;  %v8839_v27 = vsub.f32 %v13021_v34, %v4525_v48 }
 0x295   :  { %v8816_v38 = vpop.eup %6093  ;;  %v8824_v33 = vadd.f32 1.0, %v6092_v24  ;;  %13044 = vst [vmem:[#allocation121_spill] sm:$0xff] %v8852_v35  ;;  %v8855_v34 = vpack.c.bf16 %v4032_v25, %v4032_v25  ;;  %v8861_v48 = vpack.c.bf16 %v8522_v23, %v8522_v23  ;;  %v2676_v61 = vsub.f32 1.0, %v2675_v44 }
 0x296   :  { %6099 = vpow2.f32 %v5606_v21  ;;  %491 = vmatmul.f32.gmra.mxu0 %v8812_v56  ;;  %v1239_v1 = vmul.f32 %v8488_v3, %v1107_v53  ;;  %13040 = vst [vmem:[#allocation119_spill] sm:$0xff] %v8839_v27  ;;  %v2690_v24 = vmul.f32 %v8816_v38, %v8738_v18  ;;  %v8844_v21 = vpop.eup %6095  ;;  %v13041_v53 = vld [vmem:[#allocation40_spill] sm:$0xff]  ;;  %v8857_v20 = vpop.f32.mrf.mxu1  ;;  %v8873_v2 = vsub.f32 %v8611_v41, %v4469_v10 }
 0x297   :  { %6101 = vrcp.f32 %v8824_v33  ;;  %v8848_v9 = vpack.c.bf16 %v13041_v53, %v13041_v53  ;;  %13045 = vst [vmem:[#allocation122_spill] sm:$0xff] %v8855_v34  ;;  %v6430_v56 = vld [vmem:[#allocation2 + $0x1f8] sm:$0xff]  ;;  %v8870_v28 = vpop.eup %6097  ;;  %v8876_v5 = vsub.f32 %v8731_v60, %v4470_v36  ;;  %v8878_v39 = vpack.c.bf16 %v4033_v4, %v4033_v4 }
 0x298   :  { %6103 = vrcp.f32 %v8814_v51  ;;  %1428 = vadd.xlane.f32.xlu0 %v1239_v1  ;;  %13046 = vst [vmem:[#allocation123_spill] sm:$0xff] %v8861_v48  ;;  %v8865_v1 = vpack.c.bf16 %v8574_v19, %v8574_v19  ;;  %v2691_v58 = vsub.f32 1.0, %v2690_v24  ;;  %v8888_v60 = vsub.f32 %v8786_v14, %v4471_v49 }
 0x299   :  { %13042 = vst [vmem:[#allocation120_spill] sm:$0xff] %v8848_v9  ;;  %850 = vmatmul.f32.gmra.mxu1 %v6430_v56  ;;  %v2705_v56 = vmul.f32 %v8844_v21, %v8767_v50  ;;  %v4472_v10 = vunpack.c.l.bf16 %v8855_v34  ;;  %v2700_v36 = vand.u32 2147483648, %v8738_v18  ;;  %v2677_v24 = vmul.f32 %v8801_v32, %v2676_v61 }
 0x29a   :  { %13047 = vst [vmem:[#allocation124_spill] sm:$0xff] %v8865_v1  ;;  %v2720_v46 = vmul.f32 %v8870_v28, %v8791_v16  ;;  %v2692_v61 = vmul.f32 %v8816_v38, %v2691_v58  ;;  %v2713_v58 = vand.u32 2147483647, %v8767_v50  ;;  %vm2695_vm11 = vweird.f32 %v8816_v38 }
 0x29b   :  { %13048 = vst [vmem:[#allocation125_spill] sm:$0xff] %v8878_v39  ;;  %v1401_v8 = vpop.xlane.xlu0 %1400  ;;  %v447_v6 = vpop.f32.mrf.mxu0  ;;  %v8910_v34 = vsub.f32 %v4032_v25, %v4472_v10  ;;  %v8921_v57 = vor.u32 1.1754944e-38, %v2700_v36  ;;  %v2730_v10 = vand.u32 2147483648, %v8791_v16  ;;  %vm8949_vm3 = vmor %vm2694_vm9, %vm2695_vm11  ;;  %vm2710_vm4 = vweird.f32 %v8844_v21 }
 0x29c   :  { %v6100_v12 = vpop.eup %6099  ;;  %v5607_v44 = vmul.f32 -1.442695, %v1401_v8  ;;  %v1108_v22 = vmax.f32 %v447_v6, 0.0  ;;  %v4473_v8 = vunpack.c.l.bf16 %v8878_v39  ;;  %v2715_v39 = vand.u32 2147483648, %v8767_v50  ;;  %vm8997_vm0 = vmor %vm2709_vm1, %vm2710_vm4 }
 0x29d   :  { %v8885_v41 = vpop.eup %6101  ;;  %v8892_v30 = vadd.f32 1.0, %v6100_v12  ;;  %v8906_v12 = vor.u32 1.1754944e-38, %v2685_v17  ;;  %v8919_v17 = vadd.f32 %v8801_v32, %v2677_v24  ;;  %v8931_v36 = vadd.f32 %v8816_v38, %v2692_v61 }
 0x29e   :  { %v8894_v26 = vpop.eup %6103  ;;  %6105 = vpow2.f32 %v5607_v44  ;;  %494 = vmatmul.f32.gmra.mxu0 %v8881_v59  ;;  %v1240_v6 = vmul.f32 %v8488_v3, %v1108_v22  ;;  %v2750_v49 = vmul.f32 %v8885_v41, %v8824_v33  ;;  %v2706_v44 = vsub.f32 1.0, %v2705_v56  ;;  %v8916_v59 = vpop.f32.mrf.mxu1 }
 0x29f   :  { %6107 = vrcp.f32 %v8892_v30  ;;  %v2698_v22 = vand.u32 2147483647, %v8738_v18  ;;  %v2735_v14 = vmul.f32 %v8894_v26, %v8814_v51  ;;  %v2721_v56 = vsub.f32 1.0, %v2720_v46 }
 0x2a0   :  { %1430 = vadd.xlane.f32.xlu1 %v1240_v6  ;;  %v8925_v25 = vsub.f32 %v4033_v4, %v4473_v8  ;;  %v2751_v24 = vsub.f32 1.0, %v2750_v49  ;;  %v2707_v46 = vmul.f32 %v8844_v21, %v2706_v44  ;;  %v8936_v8 = vor.u32 1.1754944e-38, %v2715_v39 }
 0x2a1   :  { %853 = vmatmul.f32.gmra.mxu1 %v8362_v31  ;;  %v2736_v23 = vsub.f32 1.0, %v2735_v14  ;;  %v2722_v19 = vmul.f32 %v8870_v28, %v2721_v56  ;;  %v8965_v39 = vor.u32 1.1754944e-38, %v2730_v10  ;;  %vm2725_vm7 = vweird.f32 %v8870_v28 }
 0x2a2   :  { %v2743_v44 = vand.u32 2147483647, %v8814_v51  ;;  %v2745_v56 = vand.u32 2147483648, %v8814_v51  ;;  %vm8975_vm12 = vcmp.eq.f32.partialorder %v2728_v13, 8.507059e+37  ;;  %vm8983_vm14 = vcmp.eq.f32.partialorder %v2698_v22, 8.507059e+37 }
 0x2a3   :  { %v1403_v6 = vpop.xlane.xlu2 %1402  ;;  %v450_v45 = vpop.f32.mrf.mxu0  ;;  %v2737_v14 = vmul.f32 %v8894_v26, %v2736_v23  ;;  %v2775_v23 = vand.u32 2147483648, %v8892_v30  ;;  %vm2740_vm8 = vweird.f32 %v8894_v26  ;;  %vm2755_vm15 = vweird.f32 %v8885_v41 }
 0x2a4   :  { %v6106_v7 = vpop.eup %6105  ;;  %v5608_v43 = vmul.f32 -1.442695, %v1403_v6  ;;  %v1109_v31 = vmax.f32 %v450_v45, 0.0  ;;  %vm9001_vm2 = vcmp.eq.f32.partialorder %v2713_v58, 8.507059e+37  ;;  %vm2769_vm9 = vweird.f32 %v8892_v30 }
 0x2a5   :  { %v8934_v4 = vpop.eup %6107  ;;  %v8939_v53 = vadd.f32 1.0, %v6106_v7  ;;  %v8963_v7 = vadd.f32 %v8844_v21, %v2707_v46  ;;  %v2738_v48 = vadd.f32 %v8894_v26, %v2737_v14  ;;  %vm2754_vm11 = vweird.f32 %v8824_v33 }
 0x2a6   :  { %6109 = vpow2.f32 %v5608_v43  ;;  %497 = vmatmul.f32.gmra.mxu0 %v163_v42  ;;  %v1241_v49 = vmul.f32 %v8488_v3, %v1109_v31  ;;  %v2765_v61 = vmul.f32 %v8934_v4, %v8892_v30  ;;  %v2752_v42 = vmul.f32 %v8885_v41, %v2751_v24  ;;  %v8971_v6 = vpop.f32.mrf.mxu1  ;;  %vm9023_vm4 = vmor %vm2754_vm11, %vm2755_vm15 }
 0x2a7   :  { %6111 = vrcp.f32 %v8939_v53  ;;  %v2723_v24 = vadd.f32 %v8870_v28, %v2722_v19  ;;  %vm2770_vm13 = vweird.f32 %v8934_v4  ;;  %v2758_v58 = vand.u32 2147483647, %v8824_v33  ;;  %vm9044_vm15 = vmor %vm2724_vm5, %vm2725_vm7 }
 0x2a8   :  { %1432 = vadd.xlane.f32.xlu2 %v1241_v49  ;;  %v2766_v18 = vsub.f32 1.0, %v2765_v61  ;;  %v2753_v19 = vadd.f32 %v8885_v41, %v2752_v42  ;;  %v8990_v49 = vld [vmem:[#allocation2 + $0x280] sm:$0xff]  ;;  %v2773_v61 = vand.u32 2147483647, %v8892_v30  ;;  %v2760_v42 = vand.u32 2147483648, %v8824_v33  ;;  %vm9017_vm1 = vmor %vm2769_vm9, %vm2770_vm13 }
 0x2a9   :  { %856 = vmatmul.f32.gmra.mxu1 %v8419_v11  ;;  %13056 = vst [vmem:[#allocation127_spill] sm:$0xff] %v8990_v49  ;;  %vm2739_vm9 = vweird.f32 %v8814_v51  ;;  %v2727_v37 = vsel %vm9044_vm15, %v8870_v28, %v2723_v24  ;;  %vm9069_vm5 = vcmp.eq.f32.partialorder %v2743_v44, 8.507059e+37  ;;  %vm2759_vm7 = vcmp.eq.f32.partialorder %v2758_v58, 8.507059e+37  ;;  %v9089_v44 = vld [vmem:[#allocation2 + $0x288] sm:$0xff] }
 0x2aa   :  { %v2767_v10 = vmul.f32 %v8934_v4, %v2766_v18  ;;  %vm2774_vm11 = vcmp.eq.f32.partialorder %v2773_v61, 8.507059e+37  ;;  %v2790_v61 = vand.u32 2147483648, %v8939_v53  ;;  %v13076_v46 = vsel %vm8949_vm3, %v8816_v38, %v8931_v36  ;;  %v9120_v36 = vld [vmem:[%s12519_s3] ss:$0 sm:$0xff] }
 0x2ab   :  { %v453_v13 = vpop.f32.mrf.mxu0 }
 0x2ac   :  { %v6110_v18 = vpop.eup %6109  ;;  %v1110_v43 = vmax.f32 %v453_v13, 0.0  ;;  %v2768_v35 = vadd.f32 %v8934_v4, %v2767_v10  ;;  %v2776_v10 = vor.u32 1.1754944e-38, %v2775_v23  ;;  %v2746_v23 = vor.u32 1.1754944e-38, %v2745_v56 }
 0x2ad   :  { %v9008_v9 = vpop.eup %6111  ;;  %v9011_v50 = vadd.f32 1.0, %v6110_v18  ;;  %v13065_v18 = vand.u32 2147483647, %v8715_v52  ;;  %v2788_v56 = vand.u32 2147483647, %v8939_v53 }
 0x2ae   :  { %500 = vmatmul.f32.gmra.mxu0 %v8990_v49  ;;  %v2772_v14 = vsel %vm9017_vm1, %v8934_v4, %v2768_v35  ;;  %v1242_v33 = vmul.f32 %v8488_v3, %v1110_v43  ;;  %v2780_v13 = vmul.f32 %v9008_v9, %v8939_v53  ;;  %v2757_v3 = vsel %vm9023_vm4, %v8885_v41, %v2753_v19  ;;  %vm9058_vm1 = vmor %vm2739_vm9, %vm2740_vm8  ;;  %v9073_v24 = vpop.f32.mrf.mxu1 }
 0x2af   :  { %vm9036_vm13 = vcmp.eq.f32.partialorder %v13065_v18, 8.507059e+37  ;;  %6113 = vrcp.f32 %v9011_v50  ;;  %v2761_v35 = vor.u32 1.1754944e-38, %v2760_v42  ;;  %v2777_v4 = vsel %vm2774_vm11, %v2776_v10, %v2772_v14  ;;  %v6431_v42 = vld [vmem:[#allocation2 + $0x210] sm:$0xff]  ;;  %vm9081_vm8 = vmor %vm2679_vm10, %vm2680_vm6 }
 0x2b0   :  { %1434 = vadd.xlane.f32.xlu2 %v1242_v33  ;;  %v2781_v51 = vsub.f32 1.0, %v2780_v13  ;;  %v2712_v41 = vsel %vm8997_vm0, %v8844_v21, %v8963_v7  ;;  %v2742_v43 = vsel %vm9058_vm1, %v8894_v26, %v2738_v48  ;;  %v2732_v21 = vsel %vm8975_vm12, %v8965_v39, %v2727_v37 }
 0x2b1   :  { %v2762_v19 = vsel %vm2759_vm7, %v2761_v35, %v2757_v3  ;;  %859 = vmatmul.f32.gmra.mxu1 %v6431_v42  ;;  %v4040_v48 = vmul.f32 %v2777_v4, %v8916_v59  ;;  %vm2785_vm0 = vweird.f32 %v9008_v9  ;;  %v2682_v52 = vsel %vm9081_vm8, %v8801_v32, %v8919_v17  ;;  %v6433_v3 = vld [vmem:[#allocation2 + $0x218] sm:$0xff] }
 0x2b2   :  { %v2782_v49 = vmul.f32 %v9008_v9, %v2781_v51  ;;  %v2702_v59 = vsel %vm8983_vm14, %v8921_v57, %v13076_v46  ;;  %v2747_v39 = vsel %vm9069_vm5, %v2746_v23, %v2742_v43  ;;  %v2717_v30 = vsel %vm9001_vm2, %v8936_v8, %v2712_v41  ;;  %v166_v51 = vld [vmem:[#allocation2 + $0x290] sm:$0xff] }
 0x2b3   :  { %v456_v7 = vpop.f32.mrf.mxu0  ;;  %v4039_v32 = vmul.f32 %v2762_v19, %v8857_v20  ;;  %vm2784_vm6 = vweird.f32 %v8939_v53  ;;  %v9114_v38 = vmul.f32 %v2732_v21, %v8728_v54  ;;  %v2791_v57 = vor.u32 1.1754944e-38, %v2790_v61 }
 0x2b4   :  { %v1111_v11 = vmax.f32 %v456_v7, 0.0  ;;  %v2783_v17 = vadd.f32 %v9008_v9, %v2782_v49  ;;  %vm2786_vm3 = vmor %vm2784_vm6, %vm2785_vm0  ;;  %v4038_v45 = vmul.f32 %v2747_v39, %v8793_v62  ;;  %v9125_v31 = vpack.c.bf16 %v4040_v48, %v4040_v48 }
 0x2b5   :  { %v6114_v58 = vpop.eup %6113  ;;  %vm2789_vm10 = vcmp.eq.f32.partialorder %v2788_v56, 8.507059e+37  ;;  %v2687_v53 = vsel %vm9036_vm13, %v8906_v12, %v2682_v52  ;;  %v9132_v22 = vmul.f32 %v2702_v59, %v8653_v40  ;;  %v9134_v33 = vpack.c.bf16 %v4039_v32, %v4039_v32 }
 0x2b6   :  { %503 = vmatmul.f32.gmra.mxu0 %v9089_v44  ;;  %v1243_v8 = vmul.f32 %v9120_v36, %v1111_v11  ;;  %v2795_v20 = vmul.f32 %v6114_v58, %v9011_v50  ;;  %13077 = vst [vmem:[#allocation128_spill] sm:$0xff] %v9125_v31  ;;  %v2787_v54 = vsel %vm2786_vm3, %v9008_v9, %v2783_v17  ;;  %v2805_v62 = vand.u32 2147483648, %v9011_v50  ;;  %v9138_v18 = vpop.f32.mrf.mxu1 }
 0x2b7   :  { %v2792_v14 = vsel %vm2789_vm10, %v2791_v57, %v2787_v54  ;;  %13078 = vst [vmem:[#allocation129_spill] sm:$0xff] %v9134_v33  ;;  %v4709_v9 = vpack.c.bf16 %v8925_v25, %v8910_v34  ;;  %v4036_v47 = vmul.f32 %v2717_v30, %v8674_v0  ;;  %vm2800_vm12 = vweird.f32 %v6114_v58  ;;  %v13157_v57 = vld [vmem:[#allocation110_spill] sm:$0xff] }
 0x2b8   :  { %1436 = vadd.xlane.f32.xlu0 %v1243_v8  ;;  %v2796_v10 = vsub.f32 1.0, %v2795_v20  ;;  %v4041_v13 = vmul.f32 %v2792_v14, %v8971_v6  ;;  %v2803_v40 = vand.u32 2147483647, %v9011_v50  ;;  %v9146_v37 = vpack.c.bf16 %v9114_v38, %v9114_v38  ;;  %v13088_v20 = vld [vmem:[#allocation123_spill] sm:$0xff] }
 0x2b9   :  { %862 = vmatmul.f32.gmra.mxu1 %v6433_v3  ;;  %v9148_v6 = vpack.c.bf16 %v4038_v45, %v4038_v45  ;;  %v4480_v16 = vunpack.c.l.bf16 %v9125_v31  ;;  %vm2799_vm14 = vweird.f32 %v9011_v50  ;;  %v4034_v28 = vmul.f32 %v2687_v53, %v8637_v63 }
 0x2ba   :  { %v2797_v12 = vmul.f32 %v6114_v58, %v2796_v10  ;;  %13079 = vst [vmem:[#allocation130_spill] sm:$0xff] %v9146_v37  ;;  %v9151_v35 = vpack.c.bf16 %v4041_v13, %v4041_v13  ;;  %v4479_v23 = vunpack.c.l.bf16 %v9134_v33  ;;  %vm2801_vm2 = vmor %vm2799_vm14, %vm2800_vm12  ;;  %v2806_v49 = vor.u32 1.1754944e-38, %v2805_v62  ;;  %v167_v10 = vld [vmem:[#allocation2 + $0x298] sm:$0xff] }
 0x2bb   :  { %13080 = vst [vmem:[#allocation131_spill] sm:$0xff] %v9148_v6  ;;  %v459_v4 = vpop.f32.mrf.mxu0  ;;  %v9160_v61 = vpack.c.bf16 %v4036_v47, %v4036_v47  ;;  %vm2804_vm4 = vcmp.eq.f32.partialorder %v2803_v40, 8.507059e+37  ;;  %v4478_v50 = vunpack.c.l.bf16 %v9148_v6  ;;  %v4608_v21 = vsub.f32 %v4040_v48, %v4480_v16 }
 0x2bc   :  { %13081 = vst [vmem:[#allocation132_spill] sm:$0xff] %v9151_v35  ;;  %v1112_v41 = vmax.f32 %v459_v4, 0.0  ;;  %v2798_v0 = vadd.f32 %v6114_v58, %v2797_v12  ;;  %v4481_v19 = vunpack.c.l.bf16 %v9151_v35  ;;  %v4467_v63 = vunpack.c.l.bf16 %v8865_v1  ;;  %v13093_v4 = vld [vmem:[#allocation93_spill] sm:$0xff] }
 0x2bd   :  { %13082 = vst [vmem:[#allocation133_spill] sm:$0xff] %v9160_v61  ;;  %v9167_v52 = vpack.c.bf16 %v9132_v22, %v9132_v22  ;;  %v4477_v46 = vunpack.c.l.bf16 %v9146_v37  ;;  %v4607_v39 = vsub.f32 %v4039_v32, %v4479_v23  ;;  %v4708_v48 = vpack.c.bf16 %v8888_v60, %v8876_v5  ;;  %v13091_v60 = vld [vmem:[#allocation121_spill] sm:$0xff]  ;;  %v13095_v23 = vld [vmem:[#allocation40_spill] sm:$0xff] }
 0x2be   :  { %506 = vmatmul.f32.gmra.mxu0 %v166_v51  ;;  %v2802_v42 = vsel %vm2801_vm2, %v6114_v58, %v2798_v0  ;;  %v1244_v26 = vmul.f32 %v9120_v36, %v1112_v41  ;;  %v4609_v7 = vsub.f32 %v4041_v13, %v4481_v19  ;;  %v9173_v58 = vpop.f32.mrf.mxu1  ;;  %v4707_v30 = vpack.c.bf16 %v8873_v2, %v8868_v15  ;;  %v13090_v13 = vld [vmem:[#allocation120_spill] sm:$0xff]  ;;  %v13092_v2 = vld [vmem:[#allocation98_spill] sm:$0xff]  ;;  %v9194_v0 = vpop.f32.mrf.mxu3 }
 0x2bf   :  { %v2807_v56 = vsel %vm2804_vm4, %v2806_v49, %v2802_v42  ;;  %13083 = vst [vmem:[#allocation134_spill] sm:$0xff] %v9167_v52  ;;  %v4466_v54 = vunpack.c.l.bf16 %v13088_v20  ;;  %v4476_v32 = vunpack.c.l.bf16 %v9160_v61  ;;  %v4606_v53 = vsub.f32 %v4038_v45, %v4478_v50  ;;  %v13097_v49 = vld [vmem:[#allocation44_spill] sm:$0xff] }
 0x2c0   :  { %v9171_v59 = vmul.f32 %v2807_v56, %v9073_v24  ;;  %1438 = vadd.xlane.f32.xlu1 %v1244_v26  ;;  %v4713_v11 = vpack.c.bf16 %v4609_v7, %v4608_v21  ;;  %13085 = vst [vmem:[#allocation136_spill] sm:$0xff] %v9173_v58  ;;  %v9183_v24 = vpack.c.bf16 %v4034_v28, %v4034_v28  ;;  %v4526_v5 = vunpack.c.l.bf16 %v13090_v13  ;;  %v13100_v7 = vld [vmem:[#allocation99_spill] sm:$0xff] }
 0x2c1   :  { %865 = vmatmul.f32.gmra.mxu1 %v8560_v29  ;;  %v4527_v62 = vunpack.c.l.bf16 %v13091_v60  ;;  %v4595_v29 = vsub.f32 %v13092_v2, %v4467_v63  ;;  %v4475_v12 = vunpack.c.l.bf16 %v9167_v52  ;;  %v4605_v40 = vsub.f32 %v9114_v38, %v4477_v46  ;;  %13094 = vst [vmem:[#allocation98_spill] sm:$0xff] %v9194_v0  ;;  %v168_v63 = vld [vmem:[#allocation2 + $0x2a0] sm:$0xff] }
 0x2c2   :  { %13084 = vst [vmem:[#allocation135_spill] sm:$0xff] %v9171_v59  ;;  %4808 = vmatpush.bf16.msra.mxu2 %v4713_v11  ;;  %v4712_v3 = vpack.c.bf16 %v4607_v39, %v4606_v53  ;;  %v4594_v45 = vsub.f32 %v13093_v4, %v4466_v54  ;;  %v4474_v51 = vunpack.c.l.bf16 %v9183_v24  ;;  %v4604_v41 = vsub.f32 %v4036_v47, %v4476_v32  ;;  %v13103_v53 = vld [vmem:[#allocation102_spill] sm:$0xff] }
 0x2c3   :  { %13089 = vst [vmem:[#allocation137_spill] sm:$0xff] %v9183_v24  ;;  %v462_v14 = vpop.f32.mrf.mxu0  ;;  %v9197_v19 = vsub.f32 %v13095_v23, %v4526_v5  ;;  %v9200_v42 = vsub.f32 %v13097_v49, %v4527_v62  ;;  %v4603_v38 = vsub.f32 %v9132_v22, %v4475_v12  ;;  %v13104_v62 = vld [vmem:[#allocation59_spill] sm:$0xff]  ;;  %v1405_v12 = vpop.xlane.xlu0 %1404  ;;  %v13111_v23 = vld [vmem:[#allocation54_spill] sm:$0xff] }
 0x2c4   :  { %v1113_v15 = vmax.f32 %v462_v14, 0.0  ;;  %v4711_v26 = vpack.c.bf16 %v4605_v40, %v4604_v41  ;;  %v4706_v21 = vpack.c.bf16 %v4595_v29, %v4594_v45  ;;  %v4602_v56 = vsub.f32 %v4034_v28, %v4474_v51  ;;  %v169_v14 = vld [vmem:[#allocation2 + $0x2a8] sm:$0xff]  ;;  %v13107_v40 = vld [vmem:[#allocation103_spill] sm:$0xff]  ;;  %v13110_v51 = vld [vmem:[#allocation61_spill] sm:$0xff] }
 0x2c5   :  { %13096 = vst [vmem:[#allocation93_spill] sm:$0xff] %v9197_v19  ;;  %v5609_v4 = vmul.f32 -1.442695, %v1405_v12  ;;  %v5091_v41 = vunpack.c.l.b16 %v13110_v51  ;;  %v5093_v49 = vunpack.c.l.b16 %v13111_v23 }
 0x2c6   :  { %509 = vmatmul.f32.gmra.mxu0 %v167_v10  ;;  %v1245_v16 = vmul.f32 %v9120_v36, %v1113_v15  ;;  %4809 = vmatpush.bf16.msra.mxu2 %v4712_v3  ;;  %13098 = vst [vmem:[#allocation40_spill] sm:$0xff] %v9200_v42  ;;  %v9203_v50 = vpop.f32.mrf.mxu1  ;;  %v4710_v11 = vpack.c.bf16 %v4603_v38, %v4602_v56  ;;  %v9209_v22 = vpop.f32.mrf.mxu3  ;;  %v5095_v15 = vunpack.c.l.b16 %v13104_v62  ;;  %v13108_v3 = vld [vmem:[#allocation52_spill] sm:$0xff] }
 0x2c7   :  { %13099 = vst [vmem:[#allocation44_spill] sm:$0xff] %v9203_v50  ;;  %v5094_v34 = vunpack.c.l.b16 %v13108_v3  ;;  %v13112_v38 = vld [vmem:[#allocation68_spill] sm:$0xff]  ;;  %6115 = vpow2.f32 %v5609_v4 }
 0x2c8   :  { %1440 = vadd.xlane.f32.xlu2 %v1245_v16  ;;  %13101 = vst [vmem:[#allocation99_spill] sm:$0xff] %v9209_v22 }
 0x2c9   :  { %868 = vmatmul.f32.gmra.mxu1 %v13100_v7  ;;  %v9225_v45 = vpack.c.b16 %v5095_v15, %v5094_v34  ;;  %v13113_v7 = vld [vmem:[#allocation60_spill] sm:$0xff] }
 0x2ca   :  { %4810 = vmatpush.bf16.msra.mxu2 %v4711_v26  ;;  %v5669_v26 = vmul.f32 -1.442695, %v13112_v38  ;;  %v5090_v56 = vunpack.c.l.b16 %v13113_v7 }
 0x2cb   :  { %v465_v47 = vpop.f32.mrf.mxu0  ;;  %13109 = vst [vmem:[#allocation103_spill] sm:$0xff] %v9225_v45 }
 0x2cc   :  { %v1114_v46 = vmax.f32 %v465_v47, 0.0  ;;  %6117 = vpow2.f32 %v5669_v26 }
 0x2cd   :  { %v6116_v3 = vpop.eup %6115 }
 0x2ce   :  { %512 = vmatmul.f32.gmra.mxu0 %v168_v63  ;;  %v1246_v54 = vmul.f32 %v9120_v36, %v1114_v46  ;;  %4811 = vmatpush.bf16.msra.mxu2 %v4710_v11  ;;  %v9211_v32 = vpop.f32.mrf.mxu1  ;;  %v9221_v29 = vpop.f32.mrf.mxu3 }
 0x2cf   :  { %13102 = vst [vmem:[#allocation138_spill] sm:$0xff] %v9211_v32  ;;  %v1407_v11 = vpop.xlane.xlu1 %1406 }
 0x2d0   :  { %1442 = vadd.xlane.f32.xlu0 %v1246_v54  ;;  %13106 = vst [vmem:[#allocation59_spill] sm:$0xff] %v9221_v29  ;;  %v1411_v54 = vpop.xlane.xlu0 %1410  ;;  %v5610_v15 = vmul.f32 -1.442695, %v1407_v11 }
 0x2d1   :  { %871 = vmatmul.f32.gmra.mxu1 %v13103_v53  ;;  %v13116_v53 = vld [vmem:[#allocation104_spill] sm:$0xff]  ;;  %v5612_v51 = vmul.f32 -1.442695, %v1411_v54 }
 0x2d2   :  { %4812 = vmatpush.bf16.msra.mxu2 %v4709_v9  ;;  %v170_v9 = vld [vmem:[#allocation2 + $0x2b0] sm:$0xff]  ;;  %v6118_v34 = vpop.eup %6117  ;;  %6119 = vpow2.f32 %v5610_v15 }
 0x2d3   :  { %v468_v28 = vpop.f32.mrf.mxu0  ;;  %v9250_v23 = vadd.f32 1.0, %v6118_v34 }
 0x2d4   :  { %v1115_v10 = vmax.f32 %v468_v28, 0.0  ;;  %v1409_v28 = vpop.xlane.xlu2 %1408 }
 0x2d5   :  { %v5611_v12 = vmul.f32 -1.442695, %v1409_v28 }
 0x2d6   :  { %515 = vmatmul.f32.gmra.mxu0 %v169_v14  ;;  %v1247_v5 = vmul.f32 %v9120_v36, %v1115_v10  ;;  %4813 = vmatpush.bf16.msra.mxu2 %v4708_v48  ;;  %v9219_v2 = vpop.f32.mrf.mxu1  ;;  %v9235_v46 = vpop.f32.mrf.mxu3  ;;  %v171_v10 = vld [vmem:[#allocation2 + $0x2b8] sm:$0xff] }
 0x2d7   :  { %13105 = vst [vmem:[#allocation102_spill] sm:$0xff] %v9219_v2  ;;  %6121 = vpow2.f32 %v5611_v12 }
 0x2d8   :  { %1444 = vadd.xlane.f32.xlu1 %v1247_v5  ;;  %13115 = vst [vmem:[#allocation52_spill] sm:$0xff] %v9235_v46  ;;  %v6120_v11 = vpop.eup %6119 }
 0x2d9   :  { %874 = vmatmul.f32.gmra.mxu1 %v13107_v40  ;;  %v9261_v12 = vadd.f32 1.0, %v6120_v11 }
 0x2da   :  { %4814 = vmatpush.bf16.msra.mxu2 %v4707_v30  ;;  %v13114_v30 = vld [vmem:[#allocation56_spill] sm:$0xff] }
 0x2db   :  { %v471_v25 = vpop.f32.mrf.mxu0  ;;  %v5092_v47 = vunpack.c.l.b16 %v13114_v30  ;;  %v1417_v4 = vpop.xlane.xlu0 %1416  ;;  %vm2829_vm1 = vweird.f32 %v9261_v12 }
 0x2dc   :  { %v1116_v16 = vmax.f32 %v471_v25, 0.0  ;;  %v1415_v26 = vpop.xlane.xlu2 %1414  ;;  %v5615_v7 = vmul.f32 -1.442695, %v1417_v4 }
 0x2dd   :  { %v9238_v5 = vpack.c.b16 %v5093_v49, %v5092_v47  ;;  %v1413_v49 = vpop.xlane.xlu1 %1412  ;;  %v6122_v28 = vpop.eup %6121  ;;  %v5614_v54 = vmul.f32 -1.442695, %v1415_v26 }
 0x2de   :  { %518 = vmatmul.f32.gmra.mxu0 %v170_v9  ;;  %v1248_v48 = vmul.f32 %v9120_v36, %v1116_v16  ;;  %4815 = vmatpush.bf16.msra.mxu2 %v4706_v21  ;;  %v9233_v63 = vpop.f32.mrf.mxu1  ;;  %v9240_v21 = vpack.c.b16 %v5091_v41, %v5090_v56  ;;  %v9245_v9 = vpop.f32.mrf.mxu3  ;;  %v9247_v16 = vadd.f32 1.0, %v6116_v3  ;;  %v13121_v56 = vld [vmem:[#allocation105_spill] sm:$0xff] }
 0x2df   :  { %13117 = vst [vmem:[#allocation61_spill] sm:$0xff] %v9238_v5  ;;  %v5686_v30 = vmul.f32 -1.442695, %v13121_v56  ;;  %v13145_v5 = vld [vmem:[#allocation109_spill] sm:$0xff] }
 0x2e0   :  { %1446 = vadd.xlane.f32.xlu2 %v1248_v48  ;;  %13118 = vst [vmem:[#allocation54_spill] sm:$0xff] %v9240_v21  ;;  %v13120_v48 = vld [vmem:[#allocation107_spill] sm:$0xff]  ;;  %6123 = vrcp.f32 %v9247_v16  ;;  %vm2814_vm13 = vweird.f32 %v9247_v16 }
 0x2e1   :  { %877 = vmatmul.f32.gmra.mxu1 %v13116_v53  ;;  %13119 = vst [vmem:[#allocation68_spill] sm:$0xff] %v9245_v9  ;;  %6125 = vpow2.f32 %v5612_v51  ;;  %v5613_v53 = vmul.f32 -1.442695, %v1413_v49  ;;  %v9266_v51 = vadd.f32 1.0, %v6122_v28 }
 0x2e2   :  { %6127 = vrcp.f32 %v9250_v23 }
 0x2e3   :  { %v474_v14 = vpop.f32.mrf.mxu0  ;;  %6129 = vpow2.f32 %v5615_v7  ;;  %vm2844_vm7 = vweird.f32 %v9266_v51 }
 0x2e4   :  { %v1117_v62 = vmax.f32 %v474_v14, 0.0  ;;  %v13122_v14 = vld [vmem:[#allocation106_spill] sm:$0xff]  ;;  %6131 = vpow2.f32 %v5686_v30 }
 0x2e5   :  { %6133 = vpow2.f32 %v5613_v53  ;;  %v1419_v26 = vpop.xlane.xlu1 %1418 }
 0x2e6   :  { %521 = vmatmul.f32.gmra.mxu0 %v171_v10  ;;  %v1249_v40 = vmul.f32 %v9120_v36, %v1117_v62  ;;  %v9243_v25 = vpop.f32.mrf.mxu1  ;;  %v5687_v10 = vmul.f32 -1.442695, %v13122_v14  ;;  %v9259_v15 = vpop.f32.mrf.mxu3  ;;  %6135 = vpow2.f32 %v5614_v54  ;;  %v13135_v14 = vld [vmem:[#allocation100_spill] sm:$0xff]  ;;  %v5616_v46 = vmul.f32 -1.442695, %v1419_v26 }
 0x2e7   :  { %13123 = vst [vmem:[#allocation60_spill] sm:$0xff] %v9259_v15  ;;  %v9268_v49 = vpop.eup %6123  ;;  %v5684_v45 = vmul.f32 -1.442695, %v13135_v14 }
 0x2e8   :  { %1448 = vadd.xlane.f32.xlu0 %v1249_v40  ;;  %v13124_v40 = vld [vmem:[#allocation108_spill] sm:$0xff]  ;;  %6137 = vpow2.f32 %v5687_v10  ;;  %v2810_v10 = vmul.f32 %v9268_v49, %v9247_v16  ;;  %vm2815_vm15 = vweird.f32 %v9268_v49 }
 0x2e9   :  { %880 = vmatmul.f32.gmra.mxu1 %v13120_v48  ;;  %6139 = vrcp.f32 %v9261_v12  ;;  %vm9373_vm11 = vmor %vm2814_vm13, %vm2815_vm15 }
 0x2ea   :  { %6141 = vrcp.f32 %v9266_v51  ;;  %v2811_v52 = vsub.f32 1.0, %v2810_v10 }
 0x2eb   :  { %v477_v41 = vpop.f32.mrf.mxu0  ;;  %6143 = vpow2.f32 %v5684_v45  ;;  %v1421_v22 = vpop.xlane.xlu2 %1420 }
 0x2ec   :  { %v1118_v38 = vmax.f32 %v477_v41, 0.0  ;;  %v5617_v21 = vmul.f32 -1.442695, %v1421_v22 }
 0x2ee   :  { %v1250_v47 = vmul.f32 %v9120_v36, %v1118_v38  ;;  %v9257_v62 = vpop.f32.mrf.mxu1 }
 0x2f0   :  { %1450 = vadd.xlane.f32.xlu1 %v1250_v47  ;;  %v6126_v47 = vpop.eup %6125 }
 0x2f1   :  { %883 = vmatmul.f32.gmra.mxu1 %v13124_v40  ;;  %v9275_v28 = vpop.eup %6127  ;;  %v9289_v31 = vadd.f32 1.0, %v6126_v47 }
 0x2f2   :  { %v3710_v47 = vmul.f32 %v9275_v28, %v9250_v23 }
 0x2f3   :  { %v480_v41 = vpop.f32.mrf.mxu0  ;;  %6145 = vrcp.f32 %v9289_v31  ;;  %v1423_v45 = vpop.xlane.xlu0 %1422  ;;  %vm2859_vm3 = vweird.f32 %v9289_v31 }
 0x2f4   :  { %v1119_v30 = vmax.f32 %v480_v41, 0.0  ;;  %v6130_v41 = vpop.eup %6129  ;;  %6147 = vpow2.f32 %v5616_v46  ;;  %v3711_v10 = vsub.f32 1.0, %v3710_v47 }
 0x2f5   :  { %v6132_v8 = vpop.eup %6131  ;;  %v9300_v35 = vadd.f32 1.0, %v6130_v41 }
 0x2f6   :  { %v1251_v54 = vmul.f32 %v9120_v36, %v1119_v30  ;;  %v6134_v30 = vpop.eup %6133  ;;  %v9294_v29 = vpop.f32.mrf.mxu1  ;;  %v9306_v26 = vadd.f32 1.0, %v6132_v8  ;;  %v9344_v46 = vmul.f32 %v9275_v28, %v3711_v10  ;;  %v2835_v10 = vand.u32 2147483648, %v9261_v12 }
 0x2f7   :  { %v6136_v15 = vpop.eup %6135  ;;  %v9312_v41 = vadd.f32 1.0, %v6134_v30  ;;  %6149 = vrcp.f32 %v9300_v35  ;;  %v13155_v30 = vld [vmem:[#allocation101_spill] sm:$0xff]  ;;  %vm2904_vm13 = vweird.f32 %v9300_v35  ;;  %v2910_v59 = vand.u32 2147483648, %v9300_v35 }
 0x2f8   :  { %1452 = vadd.xlane.f32.xlu2 %v1251_v54  ;;  %v9302_v54 = vpop.f32.mrf.mxu3  ;;  %v6138_v14 = vpop.eup %6137  ;;  %13147 = vst [vmem:[#allocation104_spill] sm:$0xff] %v9306_v26  ;;  %v9318_v8 = vadd.f32 1.0, %v6136_v15  ;;  %6151 = vrcp.f32 %v9306_v26  ;;  %v9347_v17 = vmul.f32 -1.442695, %v13155_v30  ;;  %v9392_v56 = vor.u32 1.1754944e-38, %v2835_v10  ;;  %v13165_v10 = vld [vmem:[#allocation116_spill] sm:$0xff] }
 0x2f9   :  { %13144 = vst [vmem:[#allocation56_spill] sm:$0xff] %v9302_v54  ;;  %886 = vmatmul.f32.gmra.mxu1 %v13145_v5  ;;  %v9308_v48 = vpop.eup %6139  ;;  %v9320_v0 = vadd.f32 1.0, %v6138_v14  ;;  %6153 = vrcp.f32 %v9312_v41  ;;  %vm2874_vm14 = vweird.f32 %v9312_v41 }
 0x2fa   :  { %v9314_v6 = vpop.eup %6141  ;;  %v2825_v61 = vmul.f32 %v9308_v48, %v9261_v12  ;;  %6155 = vrcp.f32 %v9318_v8  ;;  %13154 = vst [vmem:[#allocation106_spill] sm:$0xff] %v9344_v46  ;;  %vm2830_vm5 = vweird.f32 %v9308_v48 }
 0x2fb   :  { %v483_v33 = vpop.f32.mrf.mxu0  ;;  %13151 = vst [vmem:[#allocation107_spill] sm:$0xff] %v9320_v0  ;;  %v2840_v14 = vmul.f32 %v9314_v6, %v9266_v51  ;;  %v9334_v47 = vpop.eup %6143  ;;  %6157 = vrcp.f32 %v9320_v0  ;;  %vm2845_vm8 = vweird.f32 %v9314_v6  ;;  %vm9423_vm0 = vmor %vm2829_vm1, %vm2830_vm5  ;;  %v2893_v0 = vand.u32 2147483647, %v9318_v8 }
 0x2fc   :  { %v1120_v54 = vmax.f32 %v483_v33, 0.0  ;;  %v2812_v33 = vmul.f32 %v9268_v49, %v2811_v52  ;;  %13153 = vst [vmem:[#allocation105_spill] sm:$0xff] %v9334_v47  ;;  %v2820_v52 = vand.u32 2147483648, %v9247_v16  ;;  %v1425_v5 = vpop.xlane.xlu1 %1424  ;;  %v9341_v15 = vpop.eup %6145  ;;  %v2826_v22 = vsub.f32 1.0, %v2825_v61  ;;  %vm9439_vm6 = vmor %vm2844_vm7, %vm2845_vm8 }
 0x2fd   :  { %13156 = vst [vmem:[#allocation108_spill] sm:$0xff] %v9347_v17  ;;  %v6148_v53 = vpop.eup %6147  ;;  %v2841_v30 = vsub.f32 1.0, %v2840_v14  ;;  %v5619_v55 = vmul.f32 -1.442695, %v1425_v5  ;;  %v2855_v61 = vmul.f32 %v9341_v15, %v9289_v31  ;;  %6159 = vpow2.f32 %v5617_v21 }
 0x2fe   :  { %v1252_v9 = vmul.f32 %v9120_v36, %v1120_v54  ;;  %v2818_v54 = vand.u32 2147483647, %v9247_v16  ;;  %v9339_v37 = vpop.f32.mrf.mxu1  ;;  %v2813_v4 = vadd.f32 %v9268_v49, %v2812_v33  ;;  %v9354_v3 = vpop.eup %6149  ;;  %v2821_v43 = vor.u32 1.1754944e-38, %v2820_v52 }
 0x2ff   :  { %v9378_v5 = vadd.f32 1.0, %v6148_v53  ;;  %v2827_v52 = vmul.f32 %v9308_v48, %v2826_v22  ;;  %v2900_v16 = vmul.f32 %v9354_v3, %v9300_v35  ;;  %v2850_v22 = vand.u32 2147483648, %v9266_v51 }
 0x300   :  { %1454 = vadd.xlane.f32.xlu0 %v1252_v9  ;;  %v5618_v9 = vmul.f32 -1.442695, %v1423_v45  ;;  %v9357_v45 = vpop.f32.mrf.mxu3  ;;  %vm9361_vm9 = vcmp.eq.f32.partialorder %v2818_v54, 8.507059e+37  ;;  %v2817_v21 = vsel %vm9373_vm11, %v9268_v49, %v2813_v4  ;;  %v2856_v4 = vsub.f32 1.0, %v2855_v61 }
 0x301   :  { %889 = vmatmul.f32.gmra.mxu1 %v13157_v57  ;;  %13158 = vst [vmem:[#allocation100_spill] sm:$0xff] %v9357_v45  ;;  %v9359_v57 = vpop.eup %6151  ;;  %v9409_v61 = vadd.f32 %v9308_v48, %v2827_v52  ;;  %v2865_v53 = vand.u32 2147483648, %v9289_v31  ;;  %v2863_v52 = vand.u32 2147483647, %v9289_v31  ;;  %vm2860_vm10 = vweird.f32 %v9341_v15 }
 0x302   :  { %13159 = vst [vmem:[#allocation109_spill] sm:$0xff] %v9359_v57  ;;  %v9367_v40 = vpop.eup %6153  ;;  %6161 = vpow2.f32 %v5618_v9  ;;  %v2857_v42 = vmul.f32 %v9341_v15, %v2856_v4  ;;  %vm2905_vm4 = vweird.f32 %v9354_v3  ;;  %vm9493_vm15 = vmor %vm2859_vm3, %vm2860_vm10  ;;  %v2895_v47 = vand.u32 2147483648, %v9318_v8 }
 0x303   :  { %v486_v11 = vpop.f32.mrf.mxu0  ;;  %v1427_v27 = vpop.xlane.xlu2 %1426  ;;  %6163 = vpow2.f32 %v5619_v55  ;;  %v2870_v49 = vmul.f32 %v9367_v40, %v9312_v41  ;;  %vm9460_vm12 = vcmp.eq.f32.partialorder %v2863_v52, 8.507059e+37  ;;  %v13176_v52 = vld [vmem:[#allocation126_spill] sm:$0xff]  ;;  %vm2889_vm11 = vweird.f32 %v9318_v8 }
 0x304   :  { %v1121_v7 = vmax.f32 %v486_v11, 0.0  ;;  %v9381_v54 = vpop.eup %6155  ;;  %v5620_v45 = vmul.f32 -1.442695, %v1427_v27  ;;  %v2822_v27 = vsel %vm9361_vm9, %v2821_v43, %v2817_v21  ;;  %6165 = vrcp.f32 %v9378_v5  ;;  %vm9507_vm9 = vmor %vm2904_vm13, %vm2905_vm4 }
 0x305   :  { %v9389_v34 = vpop.eup %6157  ;;  %v2885_v55 = vmul.f32 %v9381_v54, %v9318_v8  ;;  %v2901_v11 = vsub.f32 1.0, %v2900_v16  ;;  %v2871_v39 = vsub.f32 1.0, %v2870_v49  ;;  %v9433_v4 = vmul.f32 %v2822_v27, %v9138_v18 }
 0x306   :  { %v1253_v14 = vmul.f32 %v9120_v36, %v1121_v7  ;;  %13164 = vst [vmem:[#allocation101_spill] sm:$0xff] %v9389_v34  ;;  %v2842_v7 = vmul.f32 %v9314_v6, %v2841_v30  ;;  %v9399_v9 = vpop.f32.mrf.mxu1  ;;  %v6160_v30 = vpop.eup %6159  ;;  %6167 = vpow2.f32 %v5620_v45  ;;  %v2880_v18 = vand.u32 2147483648, %v9312_v41 }
 0x307   :  { %v9427_v16 = vadd.f32 1.0, %v6160_v30  ;;  %13170 = vst [vmem:[#allocation139_spill] sm:$0xff] %v9433_v4  ;;  %v2858_v27 = vadd.f32 %v9341_v15, %v2857_v42  ;;  %vm2890_vm2 = vweird.f32 %v9381_v54  ;;  %vm2875_vm1 = vweird.f32 %v9367_v40 }
 0x308   :  { %1456 = vadd.xlane.f32.xlu1 %v1253_v14  ;;  %v6162_v43 = vpop.eup %6161  ;;  %v9413_v21 = vadd.f32 %v9314_v6, %v2842_v7  ;;  %v2886_v7 = vsub.f32 1.0, %v2885_v55  ;;  %vm9531_vm7 = vmor %vm2889_vm11, %vm2890_vm2  ;;  %v2911_v8 = vor.u32 1.1754944e-38, %v2910_v59  ;;  %vm2894_vm3 = vcmp.eq.f32.partialorder %v2893_v0, 8.507059e+37 }
 0x309   :  { %892 = vmatmul.f32.gmra.mxu1 %v13165_v10  ;;  %v6164_v1 = vpop.eup %6163  ;;  %v9443_v10 = vor.u32 1.1754944e-38, %v2850_v22  ;;  %v9445_v30 = vadd.f32 1.0, %v6162_v43  ;;  %v2866_v22 = vor.u32 1.1754944e-38, %v2865_v53  ;;  %v2878_v43 = vand.u32 2147483647, %v9312_v41  ;;  %vm9552_vm10 = vmor %vm2874_vm14, %vm2875_vm1 }
 0x30a   :  { %13166 = vst [vmem:[#allocation110_spill] sm:$0xff] %v9413_v21  ;;  %v2872_v53 = vmul.f32 %v9367_v40, %v2871_v39  ;;  %v2925_v41 = vand.u32 2147483648, %v9378_v5  ;;  %vm2919_vm14 = vweird.f32 %v9378_v5 }
 0x30b   :  { %v1429_v14 = vpop.xlane.xlu0 %1428  ;;  %v489_v33 = vpop.f32.mrf.mxu0  ;;  %13173 = vst [vmem:[#allocation140_spill] sm:$0xff] %v9443_v10  ;;  %vm9525_vm5 = vcmp.eq.f32.partialorder %v2878_v43, 8.507059e+37  ;;  %vm2949_vm4 = vweird.f32 %v9445_v30 }
 0x30c   :  { %v5621_v38 = vmul.f32 -1.442695, %v1429_v14  ;;  %v1122_v19 = vmax.f32 %v489_v33, 0.0  ;;  %v9430_v33 = vpop.f32.mrf.mxu3 }
 0x30d   :  { %13169 = vst [vmem:[#allocation116_spill] sm:$0xff] %v9430_v33  ;;  %v9466_v33 = vadd.f32 1.0, %v6164_v1 }
 0x30e   :  { %6169 = vpow2.f32 %v5621_v38  ;;  %v1254_v14 = vmul.f32 %v9120_v36, %v1122_v19  ;;  %v2902_v38 = vmul.f32 %v9354_v3, %v2901_v11  ;;  %v9448_v19 = vpop.eup %6165  ;;  %v9468_v20 = vpop.f32.mrf.mxu1 }
 0x30f   :  { %v6168_v55 = vpop.eup %6167  ;;  %6171 = vrcp.f32 %v9427_v16  ;;  %v2915_v39 = vmul.f32 %v9448_v19, %v9378_v5 }
 0x310   :  { %1458 = vadd.xlane.f32.xlu2 %v1254_v14  ;;  %v2887_v14 = vmul.f32 %v9381_v54, %v2886_v7  ;;  %6173 = vrcp.f32 %v9445_v30  ;;  %v2903_v1 = vadd.f32 %v9354_v3, %v2902_v38  ;;  %v9482_v13 = vadd.f32 1.0, %v6168_v55 }
 0x311   :  { %895 = vmatmul.f32.gmra.mxu1 %v13176_v52  ;;  %6175 = vrcp.f32 %v9466_v33  ;;  %v13236_v45 = vld [vmem:[#allocation110_spill] sm:$0xff] }
 0x312   :  { %v2888_v55 = vadd.f32 %v9381_v54, %v2887_v14  ;;  %vm2979_vm1 = vweird.f32 %v9482_v13 }
 0x313   :  { %v1431_v24 = vpop.xlane.xlu1 %1430  ;;  %v492_v42 = vpop.f32.mrf.mxu0 }
 0x314   :  { %v6170_v60 = vpop.eup %6169  ;;  %v5622_v7 = vmul.f32 -1.442695, %v1431_v24  ;;  %v1123_v52 = vmax.f32 %v492_v42, 0.0  ;;  %v2908_v24 = vand.u32 2147483647, %v9300_v35  ;;  %v9519_v14 = vpop.f32.mrf.mxu3  ;;  %v2892_v43 = vsel %vm9531_vm7, %v9381_v54, %v2888_v55 }
 0x315   :  { %v9487_v34 = vadd.f32 1.0, %v6170_v60  ;;  %v2862_v60 = vsel %vm9493_vm15, %v9341_v15, %v2858_v27  ;;  %v9512_v35 = vpop.eup %6171  ;;  %v2907_v15 = vsel %vm9507_vm9, %v9354_v3, %v2903_v1  ;;  %v2916_v27 = vsub.f32 1.0, %v2915_v39  ;;  %13181 = vst [vmem:[#allocation126_spill] sm:$0xff] %v9519_v14 }
 0x316   :  { %6177 = vpow2.f32 %v5622_v7  ;;  %v1255_v42 = vmul.f32 %v9120_v36, %v1123_v52  ;;  %v9521_v7 = vpop.eup %6173  ;;  %v2873_v52 = vadd.f32 %v9367_v40, %v2872_v53  ;;  %v9535_v1 = vpop.f32.mrf.mxu1  ;;  %v9539_v39 = vsel %vm9460_vm12, %v2866_v22, %v2862_v60 }
 0x317   :  { %6179 = vrcp.f32 %v9487_v34  ;;  %13186 = vst [vmem:[#allocation141_spill] sm:$0xff] %v9539_v39  ;;  %v2881_v53 = vor.u32 1.1754944e-38, %v2880_v18  ;;  %vm2909_vm8 = vcmp.eq.f32.partialorder %v2908_v24, 8.507059e+37  ;;  %v9544_v31 = vpop.eup %6175  ;;  %v2896_v14 = vor.u32 1.1754944e-38, %v2895_v47 }
 0x318   :  { %6181 = vrcp.f32 %v9482_v13  ;;  %1460 = vadd.xlane.f32.xlu0 %v1255_v42  ;;  %v6434_v42 = vld [vmem:[#allocation2 + $0x278] sm:$0xff]  ;;  %v2912_v58 = vsel %vm2909_vm8, %v2911_v8, %v2907_v15  ;;  %v2930_v59 = vmul.f32 %v9512_v35, %v9427_v16  ;;  %v2917_v18 = vmul.f32 %v9448_v19, %v2916_v27 }
 0x319   :  { %898 = vmatmul.f32.gmra.mxu1 %v6434_v42  ;;  %v2945_v0 = vmul.f32 %v9521_v7, %v9445_v30  ;;  %v2877_v60 = vsel %vm9552_vm10, %v9367_v40, %v2873_v52  ;;  %v2897_v15 = vsel %vm2894_vm3, %v2896_v14, %v2892_v43  ;;  %v9570_v27 = vmul.f32 %v2912_v58, %v9243_v25 }
 0x31a   :  { %v2940_v54 = vand.u32 2147483648, %v9427_v16  ;;  %v9581_v14 = vsel %vm9525_vm5, %v2881_v53, %v2877_v60  ;;  %v9584_v58 = vadd.f32 %v9448_v19, %v2917_v18  ;;  %vm2920_vm12 = vweird.f32 %v9448_v19 }
 0x31b   :  { %v1433_v4 = vpop.xlane.xlu2 %1432  ;;  %v495_v11 = vpop.f32.mrf.mxu0  ;;  %13189 = vst [vmem:[#allocation142_spill] sm:$0xff] %v9570_v27  ;;  %v2946_v25 = vsub.f32 1.0, %v2945_v0  ;;  %v9588_v52 = vmul.f32 %v2897_v15, %v9233_v63  ;;  %v2955_v43 = vand.u32 2147483648, %v9445_v30  ;;  %v13192_v63 = vld [vmem:[#allocation127_spill] sm:$0xff]  ;;  %vm9609_vm2 = vmor %vm2919_vm14, %vm2920_vm12  ;;  %vm2950_vm13 = vweird.f32 %v9521_v7 }
 0x31c   :  { %v6178_v22 = vpop.eup %6177  ;;  %v5623_v47 = vmul.f32 -1.442695, %v1433_v4  ;;  %v1124_v55 = vmax.f32 %v495_v11, 0.0  ;;  %v2960_v4 = vmul.f32 %v9544_v31, %v9466_v33  ;;  %v2931_v11 = vsub.f32 1.0, %v2930_v59  ;;  %13190 = vst [vmem:[#allocation143_spill] sm:$0xff] %v9581_v14 }
 0x31d   :  { %v9559_v24 = vpop.eup %6179  ;;  %v9565_v3 = vadd.f32 1.0, %v6178_v22  ;;  %v9597_v22 = vor.u32 1.1754944e-38, %v2925_v41  ;;  %v9614_v41 = vor.u32 1.1754944e-38, %v2940_v54  ;;  %vm2964_vm9 = vweird.f32 %v9466_v33 }
 0x31e   :  { %v9567_v8 = vpop.eup %6181  ;;  %6183 = vpow2.f32 %v5623_v47  ;;  %v1256_v42 = vmul.f32 %v9120_v36, %v1124_v55  ;;  %v2990_v40 = vmul.f32 %v9559_v24, %v9487_v34  ;;  %v9594_v38 = vpop.f32.mrf.mxu1  ;;  %v2961_v0 = vsub.f32 1.0, %v2960_v4 }
 0x31f   :  { %6185 = vrcp.f32 %v9565_v3  ;;  %v2975_v59 = vmul.f32 %v9567_v8, %v9482_v13  ;;  %v9600_v47 = vpop.f32.mrf.mxu3  ;;  %v9605_v55 = vpack.c.bf16 %v9570_v27, %v9570_v27  ;;  %v2932_v15 = vmul.f32 %v9512_v35, %v2931_v11 }
 0x320   :  { %1462 = vadd.xlane.f32.xlu1 %v1256_v42  ;;  %13191 = vst [vmem:[#allocation144_spill] sm:$0xff] %v9600_v47  ;;  %v2991_v53 = vsub.f32 1.0, %v2990_v40  ;;  %v2947_v47 = vmul.f32 %v9521_v7, %v2946_v25  ;;  %v2953_v27 = vand.u32 2147483647, %v9445_v30  ;;  %v9624_v11 = vor.u32 1.1754944e-38, %v2955_v43 }
 0x321   :  { %901 = vmatmul.f32.gmra.mxu1 %v13192_v63  ;;  %13193 = vst [vmem:[#allocation127_spill] sm:$0xff] %v9605_v55  ;;  %v2976_v39 = vsub.f32 1.0, %v2975_v59  ;;  %v2962_v40 = vmul.f32 %v9544_v31, %v2961_v0  ;;  %vm2965_vm11 = vweird.f32 %v9544_v31  ;;  %vm2980_vm8 = vweird.f32 %v9567_v8 }
 0x322   :  { %v2992_v43 = vmul.f32 %v9559_v24, %v2991_v53  ;;  %v9641_v59 = vadd.f32 %v9521_v7, %v2947_v47  ;;  %v2985_v53 = vand.u32 2147483648, %v9482_v13  ;;  %vm2995_vm3 = vweird.f32 %v9559_v24 }
 0x323   :  { %v1435_v42 = vpop.xlane.xlu2 %1434  ;;  %v498_v4 = vpop.f32.mrf.mxu0  ;;  %v9654_v47 = vadd.f32 %v9544_v31, %v2962_v40  ;;  %v3000_v40 = vand.u32 2147483648, %v9487_v34  ;;  %vm3009_vm10 = vweird.f32 %v9565_v3  ;;  %vm9669_vm12 = vcmp.eq.f32.partialorder %v2953_v27, 8.507059e+37  ;;  %v6436_v27 = vld [vmem:[#allocation2 + $0x290] sm:$0xff] }
 0x324   :  { %v6184_v18 = vpop.eup %6183  ;;  %v5624_v17 = vmul.f32 -1.442695, %v1435_v42  ;;  %v1125_v50 = vmax.f32 %v498_v4, 0.0  ;;  %v9634_v42 = vadd.f32 %v9512_v35, %v2932_v15  ;;  %v3015_v4 = vand.u32 2147483648, %v9565_v3 }
 0x325   :  { %v9621_v46 = vpop.eup %6185  ;;  %v9626_v54 = vadd.f32 1.0, %v6184_v18  ;;  %v2977_v18 = vmul.f32 %v9567_v8, %v2976_v39  ;;  %v2993_v39 = vadd.f32 %v9559_v24, %v2992_v43  ;;  %vm2994_vm14 = vweird.f32 %v9487_v34 }
 0x326   :  { %6187 = vpow2.f32 %v5624_v17  ;;  %v1257_v63 = vmul.f32 %v9120_v36, %v1125_v50  ;;  %v3005_v25 = vmul.f32 %v9621_v46, %v9565_v3  ;;  %v2970_v17 = vand.u32 2147483648, %v9466_v33  ;;  %v9650_v0 = vpop.f32.mrf.mxu1  ;;  %vm9688_vm15 = vmor %vm2994_vm14, %vm2995_vm3 }
 0x327   :  { %6189 = vrcp.f32 %v9626_v54  ;;  %vm3010_vm7 = vweird.f32 %v9621_v46  ;;  %v2978_v43 = vadd.f32 %v9567_v8, %v2977_v18  ;;  %v2998_v55 = vand.u32 2147483647, %v9487_v34  ;;  %v9698_v34 = vld [vmem:[%s12519_s3] ss:$0 sm:$0xff] }
 0x328   :  { %1464 = vadd.xlane.f32.xlu2 %v1257_v63  ;;  %v3006_v50 = vsub.f32 1.0, %v3005_v25  ;;  %v3013_v25 = vand.u32 2147483647, %v9565_v3  ;;  %vm9680_vm5 = vmor %vm3009_vm10, %vm3010_vm7  ;;  %v9684_v3 = vpop.f32.mrf.mxu3  ;;  %v3016_v18 = vor.u32 1.1754944e-38, %v3015_v4  ;;  %v13203_v14 = vand.u32 2147483647, %v9427_v16 }
 0x329   :  { %904 = vmatmul.f32.gmra.mxu1 %v9089_v44  ;;  %13200 = vst [vmem:[#allocation145_spill] sm:$0xff] %v9684_v3  ;;  %v2983_v4 = vand.u32 2147483647, %v9482_v13  ;;  %v2971_v30 = vor.u32 1.1754944e-38, %v2970_v17  ;;  %v3001_v10 = vor.u32 1.1754944e-38, %v3000_v40 }
 0x32a   :  { %v3007_v15 = vmul.f32 %v9621_v46, %v3006_v50  ;;  %vm9705_vm7 = vcmp.eq.f32.partialorder %v13203_v14, 8.507059e+37  ;;  %vm3014_vm3 = vcmp.eq.f32.partialorder %v3013_v25, 8.507059e+37  ;;  %v13208_v14 = vand.u32 2147483647, %v9378_v5 }
 0x32b   :  { %v501_v63 = vpop.f32.mrf.mxu0 }
 0x32c   :  { %v6188_v36 = vpop.eup %6187  ;;  %v1126_v32 = vmax.f32 %v501_v63, 0.0  ;;  %v3008_v50 = vadd.f32 %v9621_v46, %v3007_v15  ;;  %vm9724_vm10 = vcmp.eq.f32.partialorder %v13208_v14, 8.507059e+37 }
 0x32d   :  { %v9667_v57 = vpop.eup %6189  ;;  %v9674_v26 = vadd.f32 1.0, %v6188_v36 }
 0x32e   :  { %v3012_v36 = vsel %vm9680_vm5, %v9621_v46, %v3008_v50  ;;  %v1258_v63 = vmul.f32 %v9698_v34, %v1126_v32  ;;  %v3020_v3 = vmul.f32 %v9667_v57, %v9626_v54  ;;  %vm9713_vm5 = vmor %vm2949_vm4, %vm2950_vm13  ;;  %v2997_v32 = vsel %vm9688_vm15, %v9559_v24, %v2993_v39  ;;  %v9751_v25 = vpop.f32.mrf.mxu1 }
 0x32f   :  { %6191 = vrcp.f32 %v9674_v26  ;;  %vm9732_vm4 = vmor %vm2979_vm1, %vm2980_vm8  ;;  %v3017_v21 = vsel %vm3014_vm3, %v3016_v18, %v3012_v36  ;;  %v2952_v5 = vsel %vm9713_vm5, %v9521_v7, %v9641_v59  ;;  %v2986_v39 = vor.u32 1.1754944e-38, %v2985_v53 }
 0x330   :  { %1466 = vadd.xlane.f32.xlu1 %v1258_v63  ;;  %v3021_v24 = vsub.f32 1.0, %v3020_v3  ;;  %vm9744_vm13 = vmor %vm2964_vm9, %vm2965_vm11  ;;  %v2982_v13 = vsel %vm9732_vm4, %v9567_v8, %v2978_v43  ;;  %vm2999_vm15 = vcmp.eq.f32.partialorder %v2998_v55, 8.507059e+37  ;;  %v3030_v3 = vand.u32 2147483648, %v9626_v54 }
 0x331   :  { %v2967_v7 = vsel %vm9744_vm13, %v9544_v31, %v9654_v47  ;;  %v3002_v59 = vsel %vm2999_vm15, %v3001_v10, %v2997_v32  ;;  %907 = vmatmul.f32.gmra.mxu1 %v6436_v27  ;;  %vm13215_vm9 = vweird.f32 %v9512_v35  ;;  %vm13216_vm11 = vweird.f32 %v9427_v16  ;;  %v9790_v32 = vpop.f32.mrf.mxu3 }
 0x332   :  { %v3022_v40 = vmul.f32 %v9667_v57, %v3021_v24  ;;  %vm9763_vm1 = vmor %vm13216_vm11, %vm13215_vm9  ;;  %vm2984_vm8 = vcmp.eq.f32.partialorder %v2983_v4, 8.507059e+37  ;;  %v4056_v55 = vmul.f32 %v3017_v21, %v9594_v38  ;;  %vm3025_vm14 = vweird.f32 %v9667_v57 }
 0x333   :  { %v504_v53 = vpop.f32.mrf.mxu0  ;;  %v3028_v10 = vand.u32 2147483647, %v9626_v54  ;;  %v2937_v31 = vsel %vm9763_vm1, %v9512_v35, %v9634_v42  ;;  %v13219_v47 = vand.u32 2147483647, %v9466_v33  ;;  %v2987_v16 = vsel %vm2984_vm8, %v2986_v39, %v2982_v13 }
 0x334   :  { %v1127_v43 = vmax.f32 %v504_v53, 0.0  ;;  %v4055_v63 = vmul.f32 %v3002_v59, %v9535_v1  ;;  %v3023_v21 = vadd.f32 %v9667_v57, %v3022_v40  ;;  %vm3024_vm3 = vweird.f32 %v9626_v54 }
 0x335   :  { %vm2969_vm5 = vcmp.eq.f32.partialorder %v13219_v47, 8.507059e+37  ;;  %v6192_v36 = vpop.eup %6191  ;;  %v2957_v38 = vsel %vm9669_vm12, %v9624_v11, %v2952_v5  ;;  %vm3026_vm4 = vmor %vm3024_vm3, %vm3025_vm14  ;;  %v3031_v46 = vor.u32 1.1754944e-38, %v3030_v3  ;;  %v9785_v42 = vmul.f32 %v2987_v16, %v9468_v20  ;;  %v13242_v11 = vld [vmem:[#allocation104_spill] sm:$0xff] }
 0x336   :  { %v2972_v18 = vsel %vm2969_vm5, %v2971_v30, %v2967_v7  ;;  %v1259_v35 = vmul.f32 %v9698_v34, %v1127_v43  ;;  %v3035_v33 = vmul.f32 %v6192_v36, %v9674_v26  ;;  %v9787_v4 = vpack.c.bf16 %v4056_v55, %v4056_v55 }
 0x337   :  { %v3027_v1 = vsel %vm3026_vm4, %v9667_v57, %v3023_v21  ;;  %vm3029_vm13 = vcmp.eq.f32.partialorder %v3028_v10, 8.507059e+37  ;;  %v13221_v54 = vand.u32 2147483647, %v9261_v12  ;;  %v2942_v44 = vsel %vm9705_vm7, %v9614_v41, %v2937_v31 }
 0x338   :  { %13220 = vst [vmem:[#allocation146_spill] sm:$0xff] %v9787_v4  ;;  %v9802_v20 = vmul.f32 %v2972_v18, %v9399_v9  ;;  %v3032_v14 = vsel %vm3029_vm13, %v3031_v46, %v3027_v1  ;;  %1468 = vadd.xlane.f32.xlu2 %v1259_v35  ;;  %v3036_v30 = vsub.f32 1.0, %v3035_v33  ;;  %v13224_v57 = vsel %vm9609_vm2, %v9448_v19, %v9584_v58  ;;  %v9816_v9 = vpop.f32.mrf.mxu1  ;;  %v6437_v19 = vld [vmem:[#allocation2 + $0x298] sm:$0xff]  ;;  %v13240_v1 = vld [vmem:[#allocation143_spill] sm:$0xff] }
 0x339   :  { %vm9794_vm15 = vcmp.eq.f32.partialorder %v13221_v54, 8.507059e+37  ;;  %v2927_v12 = vsel %vm9724_vm10, %v9597_v22, %v13224_v57  ;;  %v9812_v15 = vpack.c.bf16 %v4055_v63, %v4055_v63  ;;  %v4057_v2 = vmul.f32 %v3032_v14, %v9650_v0  ;;  %13226 = vst [vmem:[#allocation148_spill] sm:$0xff] %v9816_v9  ;;  %910 = vmatmul.f32.gmra.mxu1 %v6437_v19  ;;  %v9873_v46 = vpop.f32.mrf.mxu3  ;;  %v13238_v33 = vld [vmem:[#allocation140_spill] sm:$0xff]  ;;  %v6438_v14 = vld [vmem:[#allocation2 + $0x2a0] sm:$0xff] }
 0x33a   :  { %v3045_v41 = vand.u32 2147483648, %v9674_v26  ;;  %v9819_v24 = vmul.f32 %v2957_v38, %v9339_v37  ;;  %v3037_v5 = vmul.f32 %v6192_v36, %v3036_v30  ;;  %vm3040_vm12 = vweird.f32 %v6192_v36  ;;  %v13244_v30 = vld [vmem:[#allocation138_spill] sm:$0xff]  ;;  %v13245_v57 = vld [vmem:[#allocation141_spill] sm:$0xff] }
 0x33b   :  { %13225 = vst [vmem:[#allocation147_spill] sm:$0xff] %v9812_v15  ;;  %v3043_v60 = vand.u32 2147483647, %v9674_v26  ;;  %v9823_v58 = vmul.f32 %v2942_v44, %v9294_v29  ;;  %v9827_v22 = vpack.c.bf16 %v9785_v42, %v9785_v42  ;;  %v4496_v0 = vunpack.c.l.bf16 %v9787_v4  ;;  %v507_v17 = vpop.f32.mrf.mxu0  ;;  %v13342_v4 = vld [vmem:[#allocation118_spill] sm:$0xff] }
 0x33c   :  { %v9830_v50 = vpack.c.bf16 %v4057_v2, %v4057_v2  ;;  %v9834_v37 = vpack.c.bf16 %v9802_v20, %v9802_v20  ;;  %v1128_v13 = vmax.f32 %v507_v17, 0.0  ;;  %v3038_v39 = vadd.f32 %v6192_v36, %v3037_v5 }
 0x33d   :  { %13227 = vst [vmem:[#allocation149_spill] sm:$0xff] %v9827_v22  ;;  %vm3039_vm2 = vweird.f32 %v9674_v26  ;;  %v9838_v29 = vmul.f32 %v2927_v12, %v9257_v62  ;;  %v4495_v7 = vunpack.c.l.bf16 %v9812_v15  ;;  %v3046_v40 = vor.u32 1.1754944e-38, %v3045_v41 }
 0x33e   :  { %13228 = vst [vmem:[#allocation150_spill] sm:$0xff] %v9830_v50  ;;  %v4497_v59 = vunpack.c.l.bf16 %v9830_v50  ;;  %vm3041_vm7 = vmor %vm3039_vm2, %vm3040_vm12  ;;  %v9845_v3 = vpack.c.bf16 %v9819_v24, %v9819_v24  ;;  %vm3044_vm10 = vcmp.eq.f32.partialorder %v3043_v60, 8.507059e+37  ;;  %v1260_v8 = vmul.f32 %v9698_v34, %v1128_v13  ;;  %v13344_v50 = vld [vmem:[#allocation12_spill] sm:$0xff] }
 0x33f   :  { %13229 = vst [vmem:[#allocation151_spill] sm:$0xff] %v9834_v37  ;;  %v3042_v27 = vsel %vm3041_vm7, %v6192_v36, %v3038_v39  ;;  %v4494_v26 = vunpack.c.l.bf16 %v9827_v22  ;;  %v4624_v53 = vsub.f32 %v4056_v55, %v4496_v0  ;;  %vm3714_vm9 = vweird.f32 %v9250_v23  ;;  %v13310_v22 = vld [vmem:[#allocation55_spill] sm:$0xff] }
 0x340   :  { %13230 = vst [vmem:[#allocation152_spill] sm:$0xff] %v9845_v3  ;;  %v4625_v62 = vsub.f32 %v4057_v2, %v4497_v59  ;;  %v3047_v10 = vsel %vm3044_vm10, %v3046_v40, %v3042_v27  ;;  %vm3715_vm11 = vweird.f32 %v9275_v28  ;;  %v9853_v31 = vpack.c.bf16 %v9588_v52, %v9588_v52  ;;  %1470 = vadd.xlane.f32.xlu0 %v1260_v8  ;;  %v9875_v35 = vpop.f32.mrf.mxu1 }
 0x341   :  { %v9857_v47 = vpack.c.bf16 %v9823_v58, %v9823_v58  ;;  %v4493_v16 = vunpack.c.l.bf16 %v9834_v37  ;;  %v9861_v43 = vmul.f32 %v3047_v10, %v9751_v25  ;;  %v13234_v55 = vsel %vm9423_vm0, %v9308_v48, %v9409_v61  ;;  %v13239_v61 = vld [vmem:[#allocation102_spill] sm:$0xff]  ;;  %913 = vmatmul.f32.gmra.mxu1 %v6438_v14  ;;  %v13250_v10 = vld [vmem:[#allocation44_spill] sm:$0xff]  ;;  %vm9956_vm5 = vmor %vm3714_vm9, %vm3715_vm11 }
 0x342   :  { %13231 = vst [vmem:[#allocation153_spill] sm:$0xff] %v9853_v31  ;;  %v2837_v36 = vsel %vm9794_vm15, %v9392_v56, %v13234_v55  ;;  %v13235_v18 = vand.u32 2147483647, %v9266_v51  ;;  %v4623_v21 = vsub.f32 %v4055_v63, %v4495_v7  ;;  %v4721_v38 = vpack.c.bf16 %v4625_v62, %v4624_v53  ;;  %v13241_v56 = vld [vmem:[#allocation127_spill] sm:$0xff]  ;;  %v13243_v63 = vld [vmem:[#allocation109_spill] sm:$0xff]  ;;  %v13249_v53 = vld [vmem:[#allocation106_spill] sm:$0xff] }
 0x343   :  { %13232 = vst [vmem:[#allocation154_spill] sm:$0xff] %v9857_v47  ;;  %v13237_v25 = vsel %vm9439_vm6, %v9314_v6, %v13236_v45  ;;  %v9885_v54 = vmul.f32 %v13240_v1, %v13239_v61  ;;  %v4489_v51 = vunpack.c.l.bf16 %v13241_v56  ;;  %v3965_v44 = vmul.f32 %v13243_v63, %v13242_v11  ;;  %v510_v41 = vpop.f32.mrf.mxu0  ;;  %v13257_v1 = vld [vmem:[#allocation136_spill] sm:$0xff]  ;;  %v13309_v37 = vld [vmem:[#allocation57_spill] sm:$0xff] }
 0x344   :  { %13233 = vst [vmem:[#allocation155_spill] sm:$0xff] %v9861_v43  ;;  %vm2849_vm1 = vcmp.eq.f32.partialorder %v13235_v18, 8.507059e+37  ;;  %v9892_v12 = vmul.f32 %v13245_v57, %v13244_v30  ;;  %v9896_v6 = vpack.c.bf16 %v9838_v29, %v9838_v29  ;;  %v4492_v49 = vunpack.c.l.bf16 %v9845_v3  ;;  %4832 = vmatpush.bf16.msra.mxu3 %v4721_v38  ;;  %v1040_v57 = vpop.f32.mrf.mxu3 }
 0x345   :  { %v2852_v48 = vsel %vm2849_vm1, %v13238_v33, %v13237_v25  ;;  %v4622_v2 = vsub.f32 %v9785_v42, %v4494_v26  ;;  %v4488_v5 = vunpack.c.l.bf16 %v9853_v31  ;;  %v4491_v60 = vunpack.c.l.bf16 %v9857_v47  ;;  %v13248_v42 = vld [vmem:[#allocation142_spill] sm:$0xff] }
 0x346   :  { %13246 = vst [vmem:[#allocation110_spill] sm:$0xff] %v9896_v6  ;;  %v4621_v19 = vsub.f32 %v9802_v20, %v4493_v16  ;;  %v1129_v0 = vmax.f32 %v510_v41, 0.0  ;;  %v3966_v13 = vsub.f32 1.0, %v3965_v44  ;;  %vm3969_vm0 = vweird.f32 %v13242_v11  ;;  %v13327_v31 = vld [vmem:[#allocation14_spill] sm:$0xff] }
 0x347   :  { %v4720_v17 = vpack.c.bf16 %v4623_v21, %v4622_v2  ;;  %vm3970_vm6 = vweird.f32 %v13243_v63  ;;  %v9907_v39 = vpack.c.bf16 %v9885_v54, %v9885_v54  ;;  %v9910_v7 = vsub.f32 %v13248_v42, %v4489_v51  ;;  %v13265_v42 = vld [vmem:[#allocation101_spill] sm:$0xff] }
 0x348   :  { %v1261_v59 = vmul.f32 %v9698_v34, %v1129_v0  ;;  %v3973_v40 = vand.u32 2147483647, %v13242_v11  ;;  %v4490_v20 = vunpack.c.l.bf16 %v9896_v6  ;;  %v4620_v27 = vsub.f32 %v9819_v24, %v4492_v49  ;;  %vm9932_vm8 = vmor %vm3969_vm0, %vm3970_vm6  ;;  %v9938_v33 = vpop.f32.mrf.mxu1  ;;  %v1439_v0 = vpop.xlane.xlu1 %1438 }
 0x349   :  { %13247 = vst [vmem:[#allocation140_spill] sm:$0xff] %v9907_v39  ;;  %4833 = vmatpush.bf16.msra.mxu3 %v4720_v17  ;;  %v3967_v8 = vmul.f32 %v13243_v63, %v3966_v13  ;;  %v3975_v26 = vand.u32 2147483648, %v13242_v11  ;;  %v3713_v62 = vadd.f32 %v9275_v28, %v13249_v53  ;;  %v9921_v16 = vmul.f32 %v2852_v48, %v13250_v10  ;;  %v13254_v48 = vld [vmem:[#allocation108_spill] sm:$0xff]  ;;  %v13264_v13 = vld [vmem:[#allocation107_spill] sm:$0xff] }
 0x34a   :  { %v9925_v55 = vpack.c.bf16 %v9892_v12, %v9892_v12  ;;  %v4616_v18 = vsub.f32 %v9588_v52, %v4488_v5  ;;  %1472 = vadd.xlane.f32.xlu1 %v1261_v59  ;;  %v4619_v21 = vsub.f32 %v9823_v58, %v4491_v60  ;;  %v4719_v38 = vpack.c.bf16 %v4621_v19, %v4620_v27  ;;  %v13255_v52 = vld [vmem:[#allocation139_spill] sm:$0xff]  ;;  %v6439_v58 = vld [vmem:[#allocation2 + $0x2a8] sm:$0xff]  ;;  %v13263_v60 = vld [vmem:[#allocation105_spill] sm:$0xff] }
 0x34b   :  { %v3968_v45 = vadd.f32 %v13243_v63, %v3967_v8  ;;  %v3976_v25 = vor.u32 1.1754944e-38, %v3975_v26  ;;  %6193 = vpow2.f32 %v13254_v48  ;;  %v9943_v61 = vpack.c.bf16 %v13255_v52, %v13255_v52  ;;  %916 = vmatmul.f32.gmra.mxu1 %v6439_v58  ;;  %v13268_v8 = vld [vmem:[#allocation135_spill] sm:$0xff] }
 0x34c   :  { %13251 = vst [vmem:[#allocation102_spill] sm:$0xff] %v9925_v55  ;;  %v9946_v51 = vmul.f32 %v2837_v36, %v13257_v1  ;;  %vm9948_vm14 = vcmp.eq.f32.partialorder %v3973_v40, 8.507059e+37  ;;  %v4487_v14 = vunpack.c.l.bf16 %v9907_v39  ;;  %v4618_v30 = vsub.f32 %v9838_v29, %v4490_v20  ;;  %v513_v36 = vpop.f32.mrf.mxu0 }
 0x34d   :  { %13256 = vst [vmem:[#allocation143_spill] sm:$0xff] %v9943_v61  ;;  %4834 = vmatpush.bf16.msra.mxu3 %v4719_v38  ;;  %v3972_v49 = vsel %vm9932_vm8, %v13243_v63, %v3968_v45  ;;  %v4717_v2 = vpack.c.bf16 %v9910_v7, %v4616_v18  ;;  %v13262_v41 = vand.u32 2147483648, %v9250_v23  ;;  %v9969_v19 = vadd.f32 1.0, %v13263_v60 }
 0x34e   :  { %v1130_v17 = vmax.f32 %v513_v36, 0.0  ;;  %v3980_v29 = vmul.f32 %v13265_v42, %v13264_v13  ;;  %v9975_v59 = vpack.c.bf16 %v9921_v16, %v9921_v16  ;;  %v4486_v40 = vunpack.c.l.bf16 %v9925_v55 }
 0x34f   :  { %v3721_v5 = vor.u32 1.1754944e-38, %v13262_v41  ;;  %v3977_v63 = vsel %vm9948_vm14, %v3976_v25, %v3972_v49  ;;  %v4718_v7 = vpack.c.bf16 %v4619_v21, %v4618_v30  ;;  %v3717_v20 = vsel %vm9956_vm5, %v9275_v28, %v3713_v62  ;;  %v1437_v21 = vpop.xlane.xlu0 %1436 }
 0x350   :  { %13266 = vst [vmem:[#allocation104_spill] sm:$0xff] %v9975_v59  ;;  %v13267_v27 = vand.u32 2147483647, %v9250_v23  ;;  %v9987_v26 = vpack.c.bf16 %v13268_v8, %v13268_v8  ;;  %v1262_v53 = vmul.f32 %v9698_v34, %v1130_v17  ;;  %v4483_v10 = vunpack.c.l.bf16 %v9943_v61 }
 0x351   :  { %v9993_v18 = vpack.c.bf16 %v9946_v51, %v9946_v51  ;;  %v4615_v24 = vsub.f32 %v9885_v54, %v4487_v14  ;;  %v5626_v38 = vmul.f32 -1.442695, %v1439_v0  ;;  %4835 = vmatpush.bf16.msra.mxu3 %v4718_v7  ;;  %v6194_v28 = vpop.eup %6193  ;;  %v9996_v23 = vmul.f32 %v3977_v63, %v1040_v57  ;;  %v10003_v54 = vpop.f32.mrf.mxu1  ;;  %v6440_v14 = vld [vmem:[#allocation2 + $0x2b0] sm:$0xff]  ;;  %v13275_v7 = vld [vmem:[#allocation81_spill] sm:$0xff]  ;;  %v13289_v63 = vld [vmem:[#allocation62_spill] sm:$0xff] }
 0x352   :  { %vm3719_vm3 = vcmp.eq.f32.partialorder %v13267_v27, 8.507059e+37  ;;  %13269 = vst [vmem:[#allocation109_spill] sm:$0xff] %v9987_v26  ;;  %1474 = vadd.xlane.f32.xlu2 %v1262_v53  ;;  %v3981_v62 = vsub.f32 1.0, %v3980_v29  ;;  %vm3984_vm4 = vweird.f32 %v13264_v13  ;;  %vm3985_vm13 = vweird.f32 %v13265_v42  ;;  %v1043_v29 = vpop.f32.mrf.mxu3  ;;  %v1441_v27 = vpop.xlane.xlu2 %1440 }
 0x353   :  { %13270 = vst [vmem:[#allocation138_spill] sm:$0xff] %v9993_v18  ;;  %v3722_v45 = vsel %vm3719_vm3, %v3721_v5, %v3717_v20  ;;  %6195 = vrcp.f32 %v9969_v19  ;;  %v4485_v25 = vunpack.c.l.bf16 %v9975_v59  ;;  %v4614_v48 = vsub.f32 %v9892_v12, %v4486_v40  ;;  %919 = vmatmul.f32.gmra.mxu1 %v6440_v14  ;;  %vm10014_vm15 = vmor %vm3984_vm4, %vm3985_vm13  ;;  %v13281_v14 = vld [vmem:[#allocation46_spill] sm:$0xff] }
 0x354   :  { %v5625_v1 = vmul.f32 -1.442695, %v1437_v21  ;;  %v3982_v11 = vmul.f32 %v13265_v42, %v3981_v62  ;;  %v3988_v58 = vand.u32 2147483647, %v13264_v13  ;;  %v3990_v44 = vand.u32 2147483648, %v13264_v13  ;;  %v516_v57 = vpop.f32.mrf.mxu0 }
 0x355   :  { %v4482_v30 = vunpack.c.l.bf16 %v9987_v26  ;;  %v4484_v36 = vunpack.c.l.bf16 %v9993_v18  ;;  %6197 = vpow2.f32 %v5626_v38  ;;  %4836 = vmatpush.bf16.msra.mxu3 %v4717_v2  ;;  %v4716_v49 = vpack.c.bf16 %v4615_v24, %v4614_v48  ;;  %v13294_v26 = vld [vmem:[#allocation87_spill] sm:$0xff] }
 0x356   :  { %v10018_v41 = vadd.f32 1.0, %v6194_v28  ;;  %v4611_v5 = vsub.f32 %v13255_v52, %v4483_v10  ;;  %v10023_v60 = vpack.c.bf16 %v9996_v23, %v9996_v23  ;;  %v3983_v2 = vadd.f32 %v13265_v42, %v3982_v11  ;;  %v13276_v10 = vld [vmem:[#allocation43_spill] sm:$0xff]  ;;  %v13277_v28 = vld [vmem:[#allocation77_spill] sm:$0xff] }
 0x357   :  { %v4613_v0 = vsub.f32 %v9921_v16, %v4485_v25  ;;  %v1131_v17 = vmax.f32 %v516_v57, 0.0  ;;  %vm3989_vm12 = vcmp.eq.f32.partialorder %v3988_v58, 8.507059e+37  ;;  %v3991_v13 = vor.u32 1.1754944e-38, %v3990_v44  ;;  %v1443_v57 = vpop.xlane.xlu0 %1442 }
 0x358   :  { %13273 = vst [vmem:[#allocation141_spill] sm:$0xff] %v10023_v60  ;;  %v10029_v20 = vmul.f32 %v3722_v45, %v13275_v7  ;;  %6199 = vpow2.f32 %v5625_v1  ;;  %v3987_v52 = vsel %vm10014_vm15, %v13265_v42, %v3983_v2  ;;  %v4610_v16 = vsub.f32 %v13268_v8, %v4482_v30  ;;  %v13287_v7 = vld [vmem:[#allocation53_spill] sm:$0xff] }
 0x359   :  { %v10034_v53 = vpop.eup %6195  ;;  %v4612_v21 = vsub.f32 %v9946_v51, %v4484_v36  ;;  %v3992_v38 = vsel %vm3989_vm12, %v3991_v13, %v3987_v52  ;;  %4837 = vmatpush.bf16.msra.mxu3 %v4716_v49  ;;  %v10041_v62 = vpack.c.bf16 %v13277_v28, %v13277_v28  ;;  %6201 = vrcp.f32 %v10018_v41  ;;  %v10046_v8 = vpop.f32.mrf.mxu1  ;;  %v6441_v49 = vld [vmem:[#allocation2 + $0x2b8] sm:$0xff] }
 0x35a   :  { %v4560_v45 = vunpack.c.l.bf16 %v10023_v60  ;;  %v4121_v25 = vmul.f32 %v3992_v38, %v1043_v29  ;;  %v5627_v48 = vmul.f32 -1.442695, %v1441_v27  ;;  %v1263_v1 = vmul.f32 %v9698_v34, %v1131_v17  ;;  %13279 = vst [vmem:[#allocation106_spill] sm:$0xff] %v10046_v8  ;;  %v13290_v29 = vld [vmem:[#allocation80_spill] sm:$0xff]  ;;  %v1447_v24 = vpop.xlane.xlu2 %1446 }
 0x35b   :  { %13278 = vst [vmem:[#allocation142_spill] sm:$0xff] %v10041_v62  ;;  %v6198_v42 = vpop.eup %6197  ;;  %v4715_v11 = vpack.c.bf16 %v4613_v0, %v4612_v21  ;;  %v4714_v58 = vpack.c.bf16 %v4611_v5, %v4610_v16  ;;  %v10052_v36 = vpack.c.bf16 %v10029_v20, %v10029_v20  ;;  %922 = vmatmul.f32.gmra.mxu1 %v6441_v49  ;;  %v13286_v5 = vld [vmem:[#allocation48_spill] sm:$0xff]  ;;  %v4542_v30 = vunpack.c.l.bf16 %v10041_v62 }
 0x35c   :  { %v10054_v12 = vpack.c.bf16 %v4121_v25, %v4121_v25  ;;  %1476 = vadd.xlane.f32.xlu0 %v1263_v1  ;;  %v519_v52 = vpop.f32.mrf.mxu0  ;;  %v10060_v21 = vadd.f32 1.0, %v6198_v42  ;;  %v3935_v38 = vmul.f32 %v10034_v53, %v9969_v19  ;;  %v10065_v44 = vsub.f32 %v9996_v23, %v4560_v45  ;;  %v10071_v1 = vld [vmem:[#allocation5] sm:$0xff]  ;;  %v13291_v42 = vld [vmem:[#allocation83_spill] sm:$0xff]  ;;  %v13293_v45 = vld [vmem:[#allocation84_spill] sm:$0xff] }
 0x35d   :  { %13282 = vst [vmem:[#allocation44_spill] sm:$0xff] %v10052_v36  ;;  %4838 = vmatpush.bf16.msra.mxu3 %v4715_v11  ;;  %6203 = vpow2.f32 %v5627_v48  ;;  %v4543_v27 = vunpack.c.l.bf16 %v10052_v36  ;;  %v1132_v23 = vmax.f32 %v519_v52, 0.0  ;;  %v4122_v48 = vlaneseq  ;;  %v13296_v52 = vld [vmem:[#allocation88_spill] sm:$0xff] }
 0x35e   :  { %13283 = vst [vmem:[#allocation108_spill] sm:$0xff] %v10054_v12  ;;  %v6200_v16 = vpop.eup %6199  ;;  %v4561_v49 = vunpack.c.l.bf16 %v10054_v12  ;;  %6205 = vrcp.f32 %v10060_v21  ;;  %v3936_v62 = vsub.f32 1.0, %v3935_v38  ;;  %v10087_v36 = vperm.slane %v10071_v1, 1 }
 0x35f   :  { %13288 = vst [vmem:[#allocation139_spill] sm:$0xff] %v10065_v44  ;;  %v10073_v11 = vpop.eup %6201  ;;  %v10081_v61 = vadd.f32 1.0, %v6200_v16  ;;  %v10093_v0 = vshrl.u32 %v4122_v48, 7  ;;  %v13298_v16 = vld [vmem:[#allocation26_spill] sm:$0xff]  ;;  %v10101_v38 = vsub.f32 %v10029_v20, %v4543_v27  ;;  %v5630_v59 = vmul.f32 -1.442695, %v1447_v24  ;;  %v1449_v55 = vpop.xlane.xlu0 %1448 }
 0x360   :  { %v10077_v60 = vsub.f32 %v4121_v25, %v4561_v49  ;;  %v10090_v25 = vsub.f32 %v13277_v28, %v4542_v30  ;;  %v13299_v12 = vmax.f32 %v13298_v16, 0.0  ;;  %v3950_v13 = vmul.f32 %v10073_v11, %v10018_v41  ;;  %v13301_v49 = vld [vmem:[#allocation89_spill] sm:$0xff]  ;;  %v1445_v24 = vpop.xlane.xlu1 %1444 }
 0x361   :  { %4839 = vmatpush.bf16.msra.mxu3 %v4714_v58  ;;  %13297 = vst [vmem:[#allocation107_spill] sm:$0xff] %v10093_v0  ;;  %v10098_v18 = vpop.f32.mrf.mxu1  ;;  %v1264_v28 = vmul.f32 %v9698_v34, %v1132_v23  ;;  %6207 = vrcp.f32 %v10081_v61  ;;  %v10109_v16 = vadd.s32 8, %v10093_v0  ;;  %vm4139_vm2 = vcmp.eq.s32.totalorder %v10093_v0, %v10087_v36  ;;  %v13303_v23 = vld [vmem:[#allocation85_spill] sm:$0xff] }
 0x362   :  { %13292 = vst [vmem:[#allocation136_spill] sm:$0xff] %v10077_v60  ;;  %v1285_v58 = vmul.f32 %v9698_v34, %v13299_v12  ;;  %v3937_v12 = vmul.f32 %v10034_v53, %v3936_v62  ;;  %v5628_v27 = vmul.f32 -1.442695, %v1443_v57  ;;  %vm3939_vm7 = vweird.f32 %v9969_v19 }
 0x363   :  { %13295 = vst [vmem:[#allocation105_spill] sm:$0xff] %v10090_v25  ;;  %v6204_v30 = vpop.eup %6203  ;;  %1478 = vadd.xlane.f32.xlu1 %v1264_v28  ;;  %v5631_v48 = vmul.f32 -1.442695, %v1449_v55  ;;  %vm4147_vm10 = vcmp.eq.s32.totalorder %v10109_v16, %v10087_v36  ;;  %vm3940_vm9 = vweird.f32 %v10034_v53  ;;  %6209 = vpow2.f32 %v5630_v59  ;;  %v13307_v59 = vld [vmem:[#allocation92_spill] sm:$0xff] }
 0x364   :  { %13300 = vst [vmem:[#allocation101_spill] sm:$0xff] %v10101_v38  ;;  %1520 = vadd.xlane.f32.xlu0 %v1285_v58  ;;  %v522_v20 = vpop.f32.mrf.mxu0  ;;  %v10118_v56 = vpop.eup %6205  ;;  %v10120_v6 = vadd.f32 1.0, %v6204_v30  ;;  %v3951_v58 = vsub.f32 1.0, %v3950_v13  ;;  %vm10126_vm11 = vmpackc.low %vm4147_vm10, %vm4139_vm2  ;;  %v13304_v62 = vmov 0  ;;  %v3943_v55 = vand.u32 2147483647, %v9969_v19 }
 0x365   :  { %13302 = vst [vmem:[#allocation135_spill] sm:$0xff] %v10109_v16  ;;  %v1133_v39 = vmax.f32 %v522_v20, 0.0  ;;  %v13305_v62 = vsel %vm10126_vm11, 4294967295, %v13304_v62  ;;  %v3945_v57 = vand.u32 2147483648, %v9969_v19  ;;  %v5629_v28 = vmul.f32 -1.442695, %v1445_v24  ;;  %vm10149_vm1 = vmor %vm3939_vm7, %vm3940_vm9 }
 0x366   :  { %13306 = vst [vmem:[#allocation81_spill] sm:$0xff] %v13305_v62  ;;  %v12689_v20 = vmov 1.0|1.0   ;;  %v3938_v3 = vadd.f32 %v10034_v53, %v3937_v12  ;;  %6211 = vpow2.f32 %v5628_v27  ;;  %v13311_v51 = vpack.c.bf16 %v13309_v37, %v13310_v22  ;;  %v13315_v27 = vld [vmem:[#allocation20_spill] sm:$0xff]  ;;  %v13329_v62 = vld [vmem:[#allocation21_spill] sm:$0xff] }
 0x367   :  { %5743 = vmatmul.msk.bf16.vlgmr.msrb.gmra.mxu3 %vm10126_vm11, %v12689_v20  ;;  %v1265_v13 = vmul.f32 %v9698_v34, %v1133_v39  ;;  %v10142_v40 = vpop.eup %6207  ;;  %v3065_v12 = vmul.f32 %v10118_v56, %v10060_v21  ;;  %6213 = vpow2.f32 %v5631_v48  ;;  %v13316_v47 = vmax.f32 %v13315_v27, 0.0 }
 0x368   :  { %4880 = vmatpush.bf16.msrb.mxu3 %v13311_v51  ;;  %6215 = vrcp.f32 %v10120_v6  ;;  %v3952_v19 = vmul.f32 %v10073_v11, %v3951_v58  ;;  %v13318_v30 = vmax.f32 %v13287_v7, 0.0  ;;  %vm10167_vm0 = vcmp.eq.f32.partialorder %v3943_v55, 8.507059e+37  ;;  %v13322_v58 = vld [vmem:[#allocation40_spill] sm:$0xff]  ;;  %v13323_v55 = vld [vmem:[#allocation93_spill] sm:$0xff] }
 0x369   :  { %v1282_v22 = vmul.f32 %v9698_v34, %v13316_v47  ;;  %1480 = vadd.xlane.f32.xlu2 %v1265_v13  ;;  %v10158_v37 = vpop.f32.mrf.mxu1  ;;  %v3946_v47 = vor.u32 1.1754944e-38, %v3945_v57  ;;  %6217 = vpow2.f32 %v5629_v28  ;;  %v6210_v13 = vpop.eup %6209  ;;  %v3942_v27 = vsel %vm10149_vm1, %v10034_v53, %v3938_v3  ;;  %v13341_v57 = vld [vmem:[#allocation119_spill] sm:$0xff] }
 0x36a   :  { %v1300_v20 = vmul.f32 %v9698_v34, %v13318_v30  ;;  %vm3954_vm6 = vweird.f32 %v10018_v41  ;;  %vm3955_vm8 = vweird.f32 %v10073_v11  ;;  %v3050_v7 = vmul.f32 %v10142_v40, %v10081_v61 }
 0x36b   :  { %v13324_v30 = vpack.c.bf16 %v13322_v58, %v13323_v55  ;;  %v3066_v17 = vsub.f32 1.0, %v3065_v12  ;;  %v13328_v39 = vmax.f32 %v13327_v31, 0.0  ;;  %v3953_v2 = vadd.f32 %v10073_v11, %v3952_v19  ;;  %v13331_v58 = vld [vmem:[#allocation18_spill] sm:$0xff]  ;;  %vm10208_vm14 = vmor %vm3954_vm6, %vm3955_vm8  ;;  %v13337_v19 = vld [vmem:[#allocation24_spill] sm:$0xff] }
 0x36c   :  { %1514 = vadd.xlane.f32.xlu0 %v1282_v22  ;;  %1550 = vadd.xlane.f32.xlu1 %v1300_v20  ;;  %v6212_v53 = vpop.eup %6211  ;;  %v13330_v51 = vmax.f32 %v13329_v62, 0.0  ;;  %v13332_v55 = vmax.f32 %v13331_v58, 0.0  ;;  %v13338_v58 = vmax.f32 %v13337_v19, 0.0  ;;  %v3051_v22 = vsub.f32 1.0, %v3050_v7  ;;  %v13358_v62 = vld [vmem:[#allocation111_spill] sm:$0xff] }
 0x36d   :  { %4881 = vmatpush.bf16.msrb.mxu3 %v13324_v30  ;;  %v10186_v3 = vmul.f32 %v9698_v34, %v13328_v39  ;;  %v13333_v30 = vld [vmem:[#allocation17_spill] sm:$0xff]  ;;  %v6214_v31 = vpop.eup %6213  ;;  %v3947_v39 = vsel %vm10167_vm0, %v3946_v47, %v3942_v27  ;;  %v3958_v47 = vand.u32 2147483647, %v10018_v41  ;;  %v3960_v27 = vand.u32 2147483648, %v10018_v41  ;;  %v13348_v41 = vld [vmem:[#allocation16_spill] sm:$0xff] }
 0x36e   :  { %v1283_v15 = vmul.f32 %v9698_v34, %v13330_v51  ;;  %v10195_v20 = vmul.f32 %v9698_v34, %v13332_v55  ;;  %v13334_v24 = vmax.f32 %v13333_v30, 0.0  ;;  %v10212_v51 = vadd.f32 1.0, %v6210_v13  ;;  %v10222_v48 = vpop.eup %6215 }
 0x36f   :  { %v1284_v55 = vmul.f32 %v9698_v34, %v13338_v58  ;;  %v13343_v13 = vpack.c.bf16 %v13341_v57, %v13342_v4  ;;  %v13345_v19 = vmax.f32 %v13344_v50, 0.0  ;;  %v13346_v44 = vmax.f32 %v13286_v5, 0.0  ;;  %v13350_v57 = vld [vmem:[#allocation13_spill] sm:$0xff]  ;;  %v13353_v5 = vld [vmem:[#allocation19_spill] sm:$0xff] }
 0x370   :  { %v10200_v12 = vmul.f32 %v9698_v34, %v13334_v24  ;;  %v13339_v24 = vld [vmem:[#allocation15_spill] sm:$0xff]  ;;  %v13349_v7 = vmax.f32 %v13348_v41, 0.0  ;;  %v13351_v50 = vmax.f32 %v13350_v57, 0.0  ;;  %6219 = vrcp.f32 %v10212_v51 }
 0x371   :  { %v13340_v30 = vmax.f32 %v13339_v24, 0.0  ;;  %4882 = vmatpush.bf16.msrb.mxu3 %v13343_v13  ;;  %v10232_v58 = vmul.f32 %v9698_v34, %v13345_v19  ;;  %v6218_v24 = vpop.eup %6217  ;;  %v1299_v60 = vmul.f32 %v9698_v34, %v13346_v44  ;;  %1518 = vadd.xlane.f32.xlu2 %v1284_v55  ;;  %v10238_v38 = vpop.f32.mrf.mxu1  ;;  %v10251_v19 = vmul.f32 %v3947_v39, %v9790_v32 }
 0x372   :  { %13347 = vst [vmem:[#allocation43_spill] sm:$0xff] %v10238_v38  ;;  %v10243_v4 = vmul.f32 %v9698_v34, %v13349_v7  ;;  %v10248_v13 = vmul.f32 %v9698_v34, %v13351_v50  ;;  %v3957_v44 = vsel %vm10208_vm14, %v10073_v11, %v3953_v2  ;;  %v13354_v55 = vmax.f32 %v13353_v5, 0.0 }
 0x373   :  { %v10220_v28 = vmul.f32 %v9698_v34, %v13340_v30  ;;  %v3067_v30 = vmul.f32 %v10118_v56, %v3066_v17  ;;  %13352 = vst [vmem:[#allocation77_spill] sm:$0xff] %v10251_v19  ;;  %v10256_v17 = vadd.f32 1.0, %v6214_v31  ;;  %v10263_v7 = vadd.f32 1.0, %v6212_v53  ;;  %v13357_v53 = vld [vmem:[#allocation112_spill] sm:$0xff] }
 0x374   :  { %v10261_v41 = vmul.f32 %v9698_v34, %v13354_v55  ;;  %v3080_v57 = vmul.f32 %v10222_v48, %v10120_v6  ;;  %1548 = vadd.xlane.f32.xlu0 %v1299_v60  ;;  %v10269_v32 = vperm.slane %v10071_v1, 0  ;;  %vm10271_vm5 = vcmp.eq.f32.partialorder %v3958_v47, 8.507059e+37  ;;  %1516 = vadd.xlane.f32.xlu1 %v1283_v15  ;;  %v1451_v47 = vpop.xlane.xlu1 %1450 }
 0x375   :  { %v3961_v11 = vor.u32 1.1754944e-38, %v3960_v27  ;;  %v3052_v31 = vmul.f32 %v10142_v40, %v3051_v22  ;;  %v10276_v39 = vadd.f32 1.0, %v6218_v24  ;;  %v13359_v50 = vpack.c.bf16 %v13357_v53, %v13358_v62 }
 0x376   :  { %v3068_v5 = vadd.f32 %v10118_v56, %v3067_v30  ;;  %vm3070_vm3 = vweird.f32 %v10118_v56  ;;  %vm4138_vm4 = vcmp.eq.s32.totalorder %v10093_v0, %v10269_v32  ;;  %vm4146_vm13 = vcmp.eq.s32.totalorder %v10109_v16, %v10269_v32  ;;  %v1453_v30 = vpop.xlane.xlu2 %1452 }
 0x377   :  { %4883 = vmatpush.bf16.msrb.mxu3 %v13359_v50  ;;  %v3060_v60 = vand.u32 2147483648, %v10081_v61  ;;  %vm3069_vm15 = vweird.f32 %v10060_v21  ;;  %v3075_v22 = vand.u32 2147483648, %v10060_v21  ;;  %6221 = vrcp.f32 %v10256_v17  ;;  %vm10291_vm12 = vmpackc.low %vm4146_vm13, %vm4138_vm4 }
 0x378   :  { %v13360_v15 = vmov 0  ;;  %6223 = vrcp.f32 %v10263_v7  ;;  %v3073_v27 = vand.u32 2147483647, %v10060_v21  ;;  %v3081_v24 = vsub.f32 1.0, %v3080_v57  ;;  %vm10314_vm7 = vmor %vm3069_vm15, %vm3070_vm3  ;;  %v10318_v57 = vpop.eup %6219 }
 0x379   :  { %v13361_v15 = vsel %vm10291_vm12, 4294967295, %v13360_v15  ;;  %v13363_v55 = vmax.f32 %v13289_v63, 0.0  ;;  %v13364_v62 = vmov 1.0|1.0   ;;  %v3962_v50 = vsel %vm10271_vm5, %v3961_v11, %v3957_v44  ;;  %v10330_v9 = vpop.f32.mrf.mxu1 }
 0x37a   :  { %13362 = vst [vmem:[#allocation46_spill] sm:$0xff] %v13361_v15  ;;  %5737 = vmatmul.msk.bf16.vlgmr.msrb.gmra.mxu2 %vm10291_vm12, %v13364_v62  ;;  %v10306_v25 = vadd.f32 %v10142_v40, %v3052_v31  ;;  %vm3055_vm2 = vweird.f32 %v10142_v40  ;;  %6225 = vrcp.f32 %v10276_v39  ;;  %v10322_v44 = vpack.c.bf16 %v10251_v19, %v10251_v19  ;;  %v1455_v31 = vpop.xlane.xlu0 %1454 }
 0x37b   :  { %v1301_v53 = vmul.f32 %v9698_v34, %v13363_v55  ;;  %v3072_v2 = vsel %vm10314_vm7, %v10118_v56, %v3068_v5  ;;  %v5632_v11 = vmul.f32 -1.442695, %v1451_v47  ;;  %v13368_v55 = vld [vmem:[#allocation39_spill] sm:$0xff]  ;;  %vm3054_vm10 = vweird.f32 %v10081_v61 }
 0x37c   :  { %13367 = vst [vmem:[#allocation48_spill] sm:$0xff] %v10322_v44  ;;  %v13369_v15 = vmax.f32 %v13368_v55, 0.0  ;;  %v3058_v38 = vand.u32 2147483647, %v10081_v61  ;;  %v3076_v8 = vor.u32 1.1754944e-38, %v3075_v22  ;;  %v10335_v44 = vmul.f32 %v3962_v50, %v9873_v46  ;;  %vm10339_vm9 = vmor %vm3054_vm10, %vm3055_vm2  ;;  %1510 = vadd.xlane.f32.xlu1 %v10195_v20 }
 0x37d   :  { %1552 = vadd.xlane.f32.xlu2 %v1301_v53  ;;  %v5633_v19 = vmul.f32 -1.442695, %v1453_v30  ;;  %v3061_v5 = vor.u32 1.1754944e-38, %v3060_v60  ;;  %vm3074_vm1 = vcmp.eq.f32.partialorder %v3073_v27, 8.507059e+37  ;;  %v3082_v47 = vmul.f32 %v10222_v48, %v3081_v24 }
 0x37e   :  { %v1296_v21 = vmul.f32 %v9698_v34, %v13369_v15  ;;  %13370 = vst [vmem:[#allocation53_spill] sm:$0xff] %v10335_v44  ;;  %v10344_v15 = vpop.eup %6221  ;;  %v3057_v61 = vsel %vm10339_vm9, %v10142_v40, %v10306_v25  ;;  %v3077_v46 = vsel %vm3074_vm1, %v3076_v8, %v3072_v2  ;;  %v3125_v22 = vmul.f32 %v10318_v57, %v10212_v51  ;;  %v1457_v2 = vpop.xlane.xlu1 %1456 }
 0x37f   :  { %v5634_v30 = vmul.f32 -1.442695, %v1455_v31  ;;  %v10353_v53 = vpop.eup %6223  ;;  %6227 = vpow2.f32 %v5632_v11  ;;  %v10356_v60 = vadd.s32 16, %v10093_v0  ;;  %v10359_v27 = vadd.s32 24, %v10093_v0 }
 0x380   :  { %1542 = vadd.xlane.f32.xlu0 %v1296_v21  ;;  %v13373_v24 = vunpack.c.l.b16 %v13303_v23  ;;  %v13374_v40 = vunpack.c.l.b16 %v13307_v59  ;;  %v10367_v25 = vpop.eup %6225  ;;  %vm3084_vm0 = vweird.f32 %v10120_v6  ;;  %vm3085_vm6 = vweird.f32 %v10222_v48 }
 0x381   :  { %v3088_v20 = vand.u32 2147483647, %v10120_v6  ;;  %6229 = vpow2.f32 %v5633_v19  ;;  %v3083_v50 = vadd.f32 %v10222_v48, %v3082_v47  ;;  %v3090_v63 = vand.u32 2147483648, %v10120_v6  ;;  %v10385_v21 = vpop.f32.mrf.mxu1  ;;  %vm10420_vm15 = vmor %vm3084_vm0, %vm3085_vm6 }
 0x382   :  { %v10365_v8 = vpack.c.b16 %v13374_v40, %v13373_v24  ;;  %v3140_v23 = vmul.f32 %v10344_v15, %v10256_v17  ;;  %v13376_v59 = vmax.f32 %v13281_v14, 0.0  ;;  %v3095_v31 = vmul.f32 %v10353_v53, %v10263_v7 }
 0x383   :  { %v3126_v55 = vsub.f32 1.0, %v3125_v22  ;;  %6231 = vpow2.f32 %v5634_v30  ;;  %vm4155_vm8 = vcmp.eq.s32.totalorder %v10356_v60, %v10087_v36  ;;  %v3110_v19 = vmul.f32 %v10367_v25, %v10276_v39 }
 0x384   :  { %13375 = vst [vmem:[#allocation62_spill] sm:$0xff] %v10365_v8  ;;  %v1298_v11 = vmul.f32 %v9698_v34, %v13376_v59  ;;  %vm4154_vm14 = vcmp.eq.s32.totalorder %v10356_v60, %v10269_v32  ;;  %vm4162_vm5 = vcmp.eq.s32.totalorder %v10359_v27, %v10269_v32  ;;  %vm4163_vm3 = vcmp.eq.s32.totalorder %v10359_v27, %v10087_v36 }
 0x385   :  { %v5635_v14 = vmul.f32 -1.442695, %v1457_v2  ;;  %v13377_v56 = vmax.f32 %v13276_v10, 0.0  ;;  %vm10396_vm4 = vmpackc.low %vm4163_vm3, %vm4155_vm8  ;;  %v13378_v22 = vmov 0  ;;  %v13381_v30 = vunpack.c.l.b16 %v13296_v52  ;;  %v6228_v2 = vpop.eup %6227 }
 0x386   :  { %1546 = vadd.xlane.f32.xlu2 %v1298_v11  ;;  %v13379_v22 = vsel %vm10396_vm4, 4294967295, %v13378_v22  ;;  %v13382_v24 = vunpack.c.l.b16 %v13301_v49  ;;  %v13384_v59 = vunpack.c.l.b16 %v13293_v45  ;;  %v13385_v11 = vunpack.c.l.b16 %v13294_v26  ;;  %v1459_v26 = vpop.xlane.xlu2 %1458  ;;  %5745 = vmatmul.msk.bf16.gmra.mxu3 %vm10396_vm4, %v13364_v62  ;;  %vm10446_vm2 = vmpackc.low %vm4162_vm5, %vm4154_vm14 }
 0x387   :  { %v1297_v47 = vmul.f32 %v9698_v34, %v13377_v56  ;;  %13380 = vst [vmem:[#allocation80_spill] sm:$0xff] %v13379_v22  ;;  %v10414_v10 = vpack.c.bf16 %v9861_v43, %v9861_v43  ;;  %vm3059_vm13 = vcmp.eq.f32.partialorder %v3058_v38, 8.507059e+37  ;;  %v3141_v49 = vsub.f32 1.0, %v3140_v23 }
 0x388   :  { %v10404_v40 = vpack.c.b16 %v13382_v24, %v13381_v30  ;;  %v10410_v8 = vpack.c.b16 %v13385_v11, %v13384_v59  ;;  %1508 = vadd.xlane.f32.xlu0 %v10200_v12  ;;  %v13390_v45 = vunpack.c.l.b16 %v13290_v29  ;;  %v13391_v38 = vunpack.c.l.b16 %v13291_v42  ;;  %v6230_v30 = vpop.eup %6229 }
 0x389   :  { %13387 = vst [vmem:[#allocation87_spill] sm:$0xff] %v10414_v10  ;;  %v10434_v6 = vsel %vm3059_vm13, %v3061_v5, %v3057_v61  ;;  %v10437_v24 = vmul.f32 %v3077_v46, %v9875_v35  ;;  %v3127_v23 = vmul.f32 %v10318_v57, %v3126_v55  ;;  %1544 = vadd.xlane.f32.xlu1 %v1297_v47  ;;  %v5636_v12 = vmul.f32 -1.442695, %v1459_v26  ;;  %v6232_v61 = vpop.eup %6231 }
 0x38a   :  { %13383 = vst [vmem:[#allocation83_spill] sm:$0xff] %v10404_v40  ;;  %v10432_v56 = vpack.c.b16 %v13391_v38, %v13390_v45  ;;  %v13393_v29 = vmov 0  ;;  %v3087_v42 = vsel %vm10420_vm15, %v10222_v48, %v3083_v50  ;;  %vm3089_vm7 = vcmp.eq.f32.partialorder %v3088_v20, 8.507059e+37  ;;  %5739 = vmatmul.msk.bf16.gmra.mxu2 %vm10446_vm2, %v13364_v62 }
 0x38b   :  { %13386 = vst [vmem:[#allocation84_spill] sm:$0xff] %v10410_v8  ;;  %v13394_v29 = vsel %vm10446_vm2, 4294967295, %v13393_v29  ;;  %v3096_v35 = vsub.f32 1.0, %v3095_v31  ;;  %v3111_v5 = vsub.f32 1.0, %v3110_v19  ;;  %v3091_v46 = vor.u32 1.1754944e-38, %v3090_v63 }
 0x38c   :  { %13392 = vst [vmem:[#allocation88_spill] sm:$0xff] %v10432_v56  ;;  %vm3100_vm10 = vweird.f32 %v10353_v53  ;;  %v10454_v55 = vadd.f32 1.0, %v6228_v2  ;;  %6233 = vpow2.f32 %v5635_v14  ;;  %v3103_v47 = vand.u32 2147483647, %v10263_v7  ;;  %v10475_v2 = vpop.f32.mrf.mxu1 }
 0x38d   :  { %13395 = vst [vmem:[#allocation26_spill] sm:$0xff] %v13394_v29  ;;  %v10457_v59 = vadd.f32 1.0, %v6230_v30  ;;  %v3142_v11 = vmul.f32 %v10344_v15, %v3141_v49  ;;  %6235 = vpow2.f32 %v5636_v12  ;;  %v10463_v48 = vsel %vm3089_vm7, %v3091_v46, %v3087_v42  ;;  %v13396_v49 = vld [vmem:[#allocation36_spill] sm:$0xff]  ;;  %v1461_v30 = vpop.xlane.xlu0 %1460 }
 0x38e   :  { %vm3099_vm9 = vweird.f32 %v10263_v7  ;;  %v3105_v20 = vand.u32 2147483648, %v10263_v7  ;;  %v3128_v50 = vadd.f32 %v10318_v57, %v3127_v23  ;;  %vm3130_vm1 = vweird.f32 %v10318_v57  ;;  %1512 = vadd.xlane.f32.xlu2 %v10261_v41 }
 0x38f   :  { %v3097_v63 = vmul.f32 %v10353_v53, %v3096_v35  ;;  %v3112_v31 = vmul.f32 %v10367_v25, %v3111_v5  ;;  %v3135_v19 = vand.u32 2147483648, %v10212_v51  ;;  %v10472_v14 = vadd.f32 1.0, %v6232_v61  ;;  %vm10542_vm7 = vmor %vm3099_vm9, %vm3100_vm10 }
 0x390   :  { %6237 = vrcp.f32 %v10454_v55  ;;  %vm3129_vm0 = vweird.f32 %v10212_v51  ;;  %v3133_v52 = vand.u32 2147483647, %v10212_v51  ;;  %v13397_v26 = vmax.f32 %v13396_v49, 0.0  ;;  %1502 = vadd.xlane.f32.xlu0 %v10186_v3 }
 0x391   :  { %6239 = vrcp.f32 %v10457_v59  ;;  %vm10484_vm6 = vmor %vm3129_vm0, %vm3130_vm1  ;;  %v3143_v41 = vadd.f32 %v10344_v15, %v3142_v11  ;;  %vm3144_vm8 = vweird.f32 %v10256_v17  ;;  %vm3145_vm14 = vweird.f32 %v10344_v15 }
 0x392   :  { %v1294_v45 = vmul.f32 %v9698_v34, %v13397_v26  ;;  %v6234_v51 = vpop.eup %6233  ;;  %v3132_v34 = vsel %vm10484_vm6, %v10318_v57, %v3128_v50  ;;  %v3148_v23 = vand.u32 2147483647, %v10256_v17  ;;  %v3150_v12 = vand.u32 2147483648, %v10256_v17  ;;  %vm10510_vm13 = vmor %vm3144_vm8, %vm3145_vm14 }
 0x393   :  { %v5637_v42 = vmul.f32 -1.442695, %v1461_v30  ;;  %v6236_v35 = vpop.eup %6235  ;;  %v3136_v5 = vor.u32 1.1754944e-38, %v3135_v19  ;;  %6241 = vrcp.f32 %v10472_v14  ;;  %v10499_v61 = vadd.s32 32, %v10093_v0  ;;  %v1463_v57 = vpop.xlane.xlu1 %1462 }
 0x394   :  { %1538 = vadd.xlane.f32.xlu1 %v1294_v45  ;;  %v10502_v3 = vadd.s32 40, %v10093_v0  ;;  %v3098_v46 = vadd.f32 %v10353_v53, %v3097_v63  ;;  %vm3115_vm5 = vweird.f32 %v10367_v25  ;;  %vm3134_vm3 = vcmp.eq.f32.partialorder %v3133_v52, 8.507059e+37  ;;  %v13406_v45 = vld [vmem:[#allocation34_spill] sm:$0xff] }
 0x395   :  { %13400 = vst [vmem:[#allocation89_spill] sm:$0xff] %v10499_v61  ;;  %6243 = vpow2.f32 %v5637_v42  ;;  %v3113_v11 = vadd.f32 %v10367_v25, %v3112_v31  ;;  %v3137_v50 = vsel %vm3134_vm3, %v3136_v5, %v3132_v34  ;;  %v3147_v19 = vsel %vm10510_vm13, %v10344_v15, %v3143_v41  ;;  %v10531_v31 = vld [vmem:[%s12519_s3] ss:$0 sm:$0xff]  ;;  %s6555_s3 = smov [#allocation8]  }
 0x396   :  { %13401 = vst [vmem:[#allocation85_spill] sm:$0xff] %v10502_v3  ;;  %v10518_v63 = vadd.f32 1.0, %v6234_v51  ;;  %v10520_v49 = vpop.eup %6237  ;;  %vm10522_vm15 = vcmp.eq.f32.partialorder %v3148_v23, 8.507059e+37  ;;  %v3151_v17 = vor.u32 1.1754944e-38, %v3150_v12  ;;  %v10526_v26 = vadd.f32 1.0, %v6236_v35  ;;  %1506 = vadd.xlane.f32.xlu2 %v10243_v4  ;;  %v10547_v51 = vpop.f32.mrf.mxu1  ;;  %s5544_s19 = sshll.u32 %s6555_s3, 4  ;;  %s5545_s19 = int_to_ptr.vmem [resolvable:$true] %s5544_s19 }
 0x397   :  { %v13407_v38 = vmax.f32 %v13406_v45, 0.0  ;;  %v10536_v41 = vpop.eup %6239  ;;  %vm4170_vm1 = vcmp.eq.s32.totalorder %v10499_v61, %v10269_v32  ;;  %vm4178_vm0 = vcmp.eq.s32.totalorder %v10502_v3, %v10269_v32  ;;  %vm4171_vm6 = vcmp.eq.s32.totalorder %v10499_v61, %v10087_v36 }
 0x398   :  { %vm4179_vm8 = vcmp.eq.s32.totalorder %v10502_v3, %v10087_v36  ;;  %vm3114_vm10 = vweird.f32 %v10276_v39  ;;  %v3120_v34 = vand.u32 2147483648, %v10276_v39  ;;  %v10560_v4 = vmul.f32 %v3137_v50, %v10098_v18 }
 0x399   :  { %v1293_v15 = vmul.f32 %v10531_v31, %v13407_v38  ;;  %v3152_v23 = vsel %vm10522_vm15, %v3151_v17, %v3147_v19  ;;  %vm10564_vm9 = vmpackc.low %vm4179_vm8, %vm4171_vm6  ;;  %v13410_v12 = vmov 0  ;;  %v10568_v42 = vpop.eup %6241  ;;  %vm10572_vm14 = vcmp.eq.f32.partialorder %v3103_v47, 8.507059e+37 }
 0x39a   :  { %v13411_v12 = vsel %vm10564_vm9, 4294967295, %v13410_v12  ;;  %vm10578_vm3 = vmor %vm3114_vm10, %vm3115_vm5  ;;  %v3118_v35 = vand.u32 2147483647, %v10276_v39  ;;  %6245 = vrcp.f32 %v10518_v63  ;;  %v3155_v5 = vmul.f32 %v10520_v49, %v10454_v55  ;;  %5747 = vmatmul.msk.bf16.gmra.mxu3 %vm10564_vm9, %v13364_v62 }
 0x39b   :  { %13412 = vst [vmem:[#allocation92_spill] sm:$0xff] %v13411_v12  ;;  %1536 = vadd.xlane.f32.xlu0 %v1293_v15  ;;  %v6244_v47 = vpop.eup %6243  ;;  %v3106_v50 = vor.u32 1.1754944e-38, %v3105_v20  ;;  %6247 = vrcp.f32 %v10526_v26  ;;  %v3170_v39 = vmul.f32 %v10536_v41, %v10457_v59  ;;  %v5638_v19 = vmul.f32 -1.442695, %v1463_v57  ;;  %vm10601_vm5 = vmpackc.low %vm4178_vm0, %vm4170_vm1 }
 0x39c   :  { %1504 = vadd.xlane.f32.xlu1 %v10220_v28  ;;  %v13417_v52 = vmov 0  ;;  %v3102_v7 = vsel %vm10542_vm7, %v10353_v53, %v3098_v46  ;;  %v3117_v20 = vsel %vm10578_vm3, %v10367_v25, %v3113_v11  ;;  %v4065_v28 = vmul.f32 %v3152_v23, %v10158_v37  ;;  %v13421_v53 = vld [vmem:[#allocation38_spill] sm:$0xff]  ;;  %5741 = vmatmul.msk.bf16.gmra.mxu2 %vm10601_vm5, %v13364_v62 }
 0x39d   :  { %v13418_v52 = vsel %vm10601_vm5, 4294967295, %v13417_v52  ;;  %v10612_v17 = vadd.f32 1.0, %v6244_v47  ;;  %v3121_v45 = vor.u32 1.1754944e-38, %v3120_v34  ;;  %v10616_v32 = vpack.c.bf16 %v10560_v4, %v10560_v4 }
 0x39e   :  { %13419 = vst [vmem:[#allocation57_spill] sm:$0xff] %v13418_v52  ;;  %v3185_v38 = vmul.f32 %v10568_v42, %v10472_v14  ;;  %6249 = vpow2.f32 %v5638_v19  ;;  %vm3119_vm13 = vcmp.eq.f32.partialorder %v3118_v35, 8.507059e+37  ;;  %v3156_v15 = vsub.f32 1.0, %v3155_v5  ;;  %v13424_v5 = vld [vmem:[#allocation28_spill] sm:$0xff] }
 0x39f   :  { %13420 = vst [vmem:[#allocation55_spill] sm:$0xff] %v10616_v32  ;;  %6251 = vrcp.f32 %v10612_v17  ;;  %v13422_v46 = vmax.f32 %v13421_v53, 0.0  ;;  %v10629_v37 = vmul.f32 %v10463_v48, %v9938_v33  ;;  %v10633_v11 = vsel %vm10572_vm14, %v3106_v50, %v3102_v7  ;;  %v10646_v48 = vpop.f32.mrf.mxu1 }
 0x3a0   :  { %v10635_v30 = vsel %vm3119_vm13, %v3121_v45, %v3117_v20  ;;  %v3171_v34 = vsub.f32 1.0, %v3170_v39  ;;  %v10637_v23 = vpop.eup %6245  ;;  %v10639_v18 = vpack.c.bf16 %v4065_v28, %v4065_v28  ;;  %vm3159_vm15 = vweird.f32 %v10454_v55  ;;  %v1465_v45 = vpop.xlane.xlu2 %1464  ;;  %v13426_v39 = vld [vmem:[#allocation30_spill] sm:$0xff] }
 0x3a1   :  { %v1295_v25 = vmul.f32 %v10531_v31, %v13422_v46  ;;  %v3180_v35 = vand.u32 2147483648, %v10457_v59  ;;  %v13425_v57 = vmax.f32 %v13424_v5, 0.0  ;;  %v10648_v36 = vpop.eup %6247  ;;  %v3186_v19 = vsub.f32 1.0, %v3185_v38 }
 0x3a2   :  { %13423 = vst [vmem:[#allocation20_spill] sm:$0xff] %v10639_v18  ;;  %v3157_v7 = vmul.f32 %v10520_v49, %v3156_v15  ;;  %vm3160_vm7 = vweird.f32 %v10520_v49  ;;  %vm3174_vm1 = vweird.f32 %v10457_v59  ;;  %v3172_v46 = vmul.f32 %v10536_v41, %v3171_v34 }
 0x3a3   :  { %v1290_v33 = vmul.f32 %v10531_v31, %v13425_v57  ;;  %1540 = vadd.xlane.f32.xlu2 %v1295_v25  ;;  %v3200_v25 = vmul.f32 %v10637_v23, %v10518_v63  ;;  %v5639_v5 = vmul.f32 -1.442695, %v1465_v45  ;;  %v10662_v38 = vperm.slane %v10071_v1, 2  ;;  %vm10700_vm10 = vmor %vm3159_vm15, %vm3160_vm7 }
 0x3a4   :  { %v6250_v53 = vpop.eup %6249  ;;  %1498 = vadd.xlane.f32.xlu1 %v10232_v58  ;;  %v4505_v57 = vunpack.c.l.bf16 %v10639_v18  ;;  %v10667_v50 = vor.u32 1.1754944e-38, %v3180_v35  ;;  %v3215_v34 = vmul.f32 %v10648_v36, %v10526_v26  ;;  %v3187_v47 = vmul.f32 %v10568_v42, %v3186_v19  ;;  %v13428_v35 = vld [vmem:[#allocation32_spill] sm:$0xff] }
 0x3a5   :  { %1530 = vadd.xlane.f32.xlu0 %v1290_v33  ;;  %v10664_v15 = vpop.eup %6251  ;;  %v10669_v33 = vadd.f32 1.0, %v6250_v53  ;;  %6253 = vpow2.f32 %v5639_v5  ;;  %v13427_v58 = vmax.f32 %v13426_v39, 0.0  ;;  %v10680_v52 = vadd.f32 %v10520_v49, %v3157_v7 }
 0x3a6   :  { %v3230_v20 = vmul.f32 %v10664_v15, %v10612_v17  ;;  %vm3175_vm0 = vweird.f32 %v10536_v41  ;;  %v13429_v53 = vmax.f32 %v13428_v35, 0.0  ;;  %v10688_v19 = vadd.f32 %v10536_v41, %v3172_v46 }
 0x3a7   :  { %v1291_v45 = vmul.f32 %v10531_v31, %v13427_v58  ;;  %6255 = vrcp.f32 %v10669_v33  ;;  %v3201_v39 = vsub.f32 1.0, %v3200_v25  ;;  %vm4140_vm6 = vcmp.eq.s32.totalorder %v10093_v0, %v10662_v38  ;;  %v10704_v25 = vpop.f32.mrf.mxu1  ;;  %vm10711_vm14 = vmor %vm3174_vm1, %vm3175_vm0 }
 0x3a8   :  { %v1292_v12 = vmul.f32 %v10531_v31, %v13429_v53  ;;  %vm4148_vm8 = vcmp.eq.s32.totalorder %v10109_v16, %v10662_v38  ;;  %v10694_v7 = vsub.f32 %v4065_v28, %v4505_v57  ;;  %v3216_v31 = vsub.f32 1.0, %v3215_v34 }
 0x3a9   :  { %v3231_v46 = vsub.f32 1.0, %v3230_v20  ;;  %v10707_v58 = vperm.slane %v10071_v1, 3  ;;  %v10716_v57 = vadd.f32 %v10568_v42, %v3187_v47  ;;  %vm3190_vm3 = vweird.f32 %v10568_v42  ;;  %v1467_v20 = vpop.xlane.xlu1 %1466  ;;  %vm10732_vm15 = vmpackc.low %vm4148_vm8, %vm4140_vm6 }
 0x3aa   :  { %v3208_v34 = vand.u32 2147483647, %v10518_v63  ;;  %vm3189_vm13 = vweird.f32 %v10472_v14  ;;  %v13434_v47 = vmov 0  ;;  %v3202_v22 = vmul.f32 %v10637_v23, %v3201_v39 }
 0x3ab   :  { %1534 = vadd.xlane.f32.xlu2 %v1292_v12  ;;  %v3210_v12 = vand.u32 2147483648, %v10518_v63  ;;  %v13435_v47 = vsel %vm10732_vm15, 4294967295, %v13434_v47  ;;  %vm4141_vm7 = vcmp.eq.s32.totalorder %v10093_v0, %v10707_v58  ;;  %vm4149_vm1 = vcmp.eq.s32.totalorder %v10109_v16, %v10707_v58  ;;  %v6254_v35 = vpop.eup %6253  ;;  %vm10753_vm6 = vmor %vm3189_vm13, %vm3190_vm3 }
 0x3ac   :  { %13436 = vst [vmem:[#allocation40_spill] sm:$0xff] %v13435_v47  ;;  %1532 = vadd.xlane.f32.xlu1 %v1291_v45  ;;  %vm10747_vm0 = vmpackc.low %vm4149_vm1, %vm4141_vm7  ;;  %v13437_v18 = vmov 0  ;;  %v10758_v53 = vadd.f32 1.0, %v6254_v35  ;;  %v3217_v29 = vmul.f32 %v10648_v36, %v3216_v31  ;;  %v3232_v39 = vmul.f32 %v10664_v15, %v3231_v46  ;;  %5749 = vmatmul.msk.bf16.vlgmr.msra.gmra.mxu2 %vm10732_vm15, %v13364_v62 }
 0x3ad   :  { %v13438_v18 = vsel %vm10747_vm0, 4294967295, %v13437_v18  ;;  %v6256_v56 = vpop.eup %6255  ;;  %5755 = vmatmul.msk.bf16.vlgmr.msra.gmra.mxu3 %vm10747_vm0, %v13364_v62  ;;  %vm10769_vm3 = vcmp.eq.f32.partialorder %v3208_v34, 8.507059e+37  ;;  %v3211_v40 = vor.u32 1.1754944e-38, %v3210_v12  ;;  %v5640_v35 = vmul.f32 -1.442695, %v1467_v20 }
 0x3ae   :  { %13439 = vst [vmem:[#allocation93_spill] sm:$0xff] %v13438_v18  ;;  %v3245_v16 = vmul.f32 %v6256_v56, %v10669_v33  ;;  %vm3205_vm13 = vweird.f32 %v10637_v23  ;;  %6257 = vrcp.f32 %v10758_v53  ;;  %v3225_v31 = vand.u32 2147483648, %v10526_v26 }
 0x3af   :  { %v3203_v46 = vadd.f32 %v10637_v23, %v3202_v22  ;;  %v3240_v34 = vand.u32 2147483648, %v10612_v17  ;;  %v3218_v20 = vadd.f32 %v10648_v36, %v3217_v29  ;;  %v3233_v45 = vadd.f32 %v10664_v15, %v3232_v39  ;;  %v10789_v0 = vpop.f32.mrf.mxu1 }
 0x3b0   :  { %v3246_v12 = vsub.f32 1.0, %v3245_v16  ;;  %v3255_v18 = vand.u32 2147483648, %v10669_v33  ;;  %vm13444_vm7 = vweird.f32 %v10518_v63  ;;  %6259 = vpow2.f32 %v5640_v35 }
 0x3b1   :  { %vm10795_vm1 = vmor %vm13444_vm7, %vm3205_vm13  ;;  %v3253_v29 = vand.u32 2147483647, %v10669_v33  ;;  %v13447_v39 = vand.u32 2147483647, %v10457_v59  ;;  %vm13450_vm0 = vweird.f32 %v10648_v36  ;;  %vm13451_vm5 = vweird.f32 %v10526_v26  ;;  %v1469_v59 = vpop.xlane.xlu2 %1468 }
 0x3b2   :  { %v3247_v16 = vmul.f32 %v6256_v56, %v3246_v12  ;;  %vm10810_vm9 = vmor %vm13451_vm5, %vm13450_vm0  ;;  %v3223_v35 = vand.u32 2147483647, %v10526_v26  ;;  %v3226_v12 = vor.u32 1.1754944e-38, %v3225_v31  ;;  %vm3234_vm13 = vweird.f32 %v10612_v17 }
 0x3b3   :  { %1500 = vadd.xlane.f32.xlu2 %v10248_v13  ;;  %vm10802_vm8 = vcmp.eq.f32.partialorder %v13447_v39, 8.507059e+37  ;;  %v3238_v47 = vand.u32 2147483647, %v10612_v17  ;;  %v3207_v39 = vsel %vm10795_vm1, %v10637_v23, %v3203_v46  ;;  %vm13454_vm7 = vweird.f32 %v10664_v15 }
 0x3b4   :  { %vm10822_vm15 = vmor %vm3234_vm13, %vm13454_vm7  ;;  %v5641_v10 = vmul.f32 -1.442695, %v1469_v59  ;;  %v3248_v44 = vadd.f32 %v6256_v56, %v3247_v16  ;;  %vm3249_vm5 = vweird.f32 %v10669_v33  ;;  %v6258_v26 = vpop.eup %6257  ;;  %v3222_v17 = vsel %vm10810_vm9, %v10648_v36, %v3218_v20 }
 0x3b5   :  { %v3237_v31 = vsel %vm10822_vm15, %v10664_v15, %v3233_v45  ;;  %v3241_v23 = vor.u32 1.1754944e-38, %v3240_v34  ;;  %vm13457_vm0 = vweird.f32 %v6256_v56  ;;  %v3256_v46 = vor.u32 1.1754944e-38, %v3255_v18 }
 0x3b6   :  { %vm3251_vm1 = vmor %vm3249_vm5, %vm13457_vm0  ;;  %6261 = vpow2.f32 %v5641_v10  ;;  %vm3254_vm13 = vcmp.eq.f32.partialorder %v3253_v29, 8.507059e+37  ;;  %v3260_v16 = vmul.f32 %v6258_v26, %v10758_v53  ;;  %v3212_v33 = vsel %vm10769_vm3, %v3211_v40, %v3207_v39  ;;  %v6260_v36 = vpop.eup %6259  ;;  %v1471_v29 = vpop.xlane.xlu0 %1470 }
 0x3b7   :  { %v3252_v22 = vsel %vm3251_vm1, %v6256_v56, %v3248_v44  ;;  %vm3224_vm7 = vcmp.eq.f32.partialorder %v3223_v35, 8.507059e+37  ;;  %vm3239_vm2 = vcmp.eq.f32.partialorder %v3238_v47, 8.507059e+37  ;;  %v3270_v15 = vand.u32 2147483648, %v10758_v53 }
 0x3b8   :  { %v3257_v63 = vsel %vm3254_vm13, %v3256_v46, %v3252_v22  ;;  %v3227_v20 = vsel %vm3224_vm7, %v3226_v12, %v3222_v17  ;;  %v3242_v59 = vsel %vm3239_vm2, %v3241_v23, %v3237_v31  ;;  %v3261_v43 = vsub.f32 1.0, %v3260_v16 }
 0x3b9   :  { %vm4156_vm9 = vcmp.eq.s32.totalorder %v10356_v60, %v10662_v38  ;;  %vm4164_vm15 = vcmp.eq.s32.totalorder %v10359_v27, %v10662_v38  ;;  %vm4157_vm5 = vcmp.eq.s32.totalorder %v10356_v60, %v10707_v58  ;;  %vm4165_vm3 = vcmp.eq.s32.totalorder %v10359_v27, %v10707_v58 }
 0x3ba   :  { %v4072_v44 = vmul.f32 %v3257_v63, %v10704_v25  ;;  %v3262_v40 = vmul.f32 %v6258_v26, %v3261_v43  ;;  %vm3265_vm0 = vweird.f32 %v6258_v26  ;;  %v3268_v10 = vand.u32 2147483647, %v10758_v53  ;;  %vm10848_vm2 = vmpackc.low %vm4165_vm3, %vm4157_vm5  ;;  %v10859_v25 = vpop.f32.mrf.mxu1 }
 0x3bb   :  { %v13458_v56 = vmov 0  ;;  %v13461_v18 = vand.u32 2147483647, %v10472_v14  ;;  %v13462_v1 = vand.u32 2147483648, %v10472_v14  ;;  %v10856_v45 = vadd.f32 1.0, %v6260_v36  ;;  %vm10876_vm7 = vmpackc.low %vm4164_vm15, %vm4156_vm9 }
 0x3bc   :  { %v13459_v56 = vsel %vm10848_vm2, 4294967295, %v13458_v56  ;;  %v4071_v34 = vmul.f32 %v3242_v59, %v10646_v48  ;;  %v6262_v35 = vpop.eup %6261  ;;  %v13463_v12 = vsel %vm10711_vm14, %v10536_v41, %v10688_v19  ;;  %v5642_v17 = vmul.f32 -1.442695, %v1471_v29  ;;  %5751 = vmatmul.msk.bf16.gmra.mxu2 %vm10876_vm7, %v13364_v62 }
 0x3bd   :  { %13460 = vst [vmem:[#allocation14_spill] sm:$0xff] %v13459_v56  ;;  %vm3194_vm1 = vcmp.eq.f32.partialorder %v13461_v18, 8.507059e+37  ;;  %v3196_v47 = vor.u32 1.1754944e-38, %v13462_v1  ;;  %v3182_v39 = vsel %vm10802_vm8, %v10667_v50, %v13463_v12  ;;  %v3263_v14 = vadd.f32 %v6258_v26, %v3262_v40  ;;  %5757 = vmatmul.msk.bf16.gmra.mxu3 %vm10848_vm2, %v13364_v62 }
 0x3be   :  { %vm3264_vm13 = vweird.f32 %v10758_v53  ;;  %v13464_v48 = vmov 0  ;;  %v13467_v41 = vsel %vm10753_vm6, %v10568_v42, %v10716_v57  ;;  %v10886_v19 = vmul.f32 %v3212_v33, %v10475_v2  ;;  %v13469_v57 = vld [vmem:[#allocation106_spill] sm:$0xff] }
 0x3bf   :  { %v13465_v48 = vsel %vm10876_vm7, 4294967295, %v13464_v48  ;;  %v3197_v50 = vsel %vm3194_vm1, %v3196_v47, %v13467_v41  ;;  %v4070_v28 = vmul.f32 %v3227_v20, %v10547_v51  ;;  %vm3266_vm14 = vmor %vm3264_vm13, %vm3265_vm0  ;;  %v3271_v53 = vor.u32 1.1754944e-38, %v3270_v15 }
 0x3c0   :  { %13466 = vst [vmem:[#allocation21_spill] sm:$0xff] %v13465_v48  ;;  %v4384_v13 = vpack.c.bf16 %v4072_v44, %v4072_v44  ;;  %6263 = vpow2.f32 %v5642_v17  ;;  %v3267_v31 = vsel %vm3266_vm14, %v6258_v26, %v3263_v14  ;;  %vm3269_vm8 = vcmp.eq.f32.partialorder %v3268_v10, 8.507059e+37  ;;  %v13476_v10 = vld [vmem:[#allocation43_spill] sm:$0xff] }
 0x3c1   :  { %6265 = vrcp.f32 %v10856_v45  ;;  %v10894_v8 = vpack.c.bf16 %v4071_v34, %v4071_v34  ;;  %v10896_v42 = vadd.f32 1.0, %v6262_v35  ;;  %v3272_v2 = vsel %vm3269_vm8, %v3271_v53, %v3267_v31  ;;  %v13481_v53 = vld [vmem:[#allocation148_spill] sm:$0xff] }
 0x3c2   :  { %v10903_v51 = vmul.f32 %v10633_v11, %v10003_v54  ;;  %v10907_v23 = vmul.f32 %v10635_v30, %v13469_v57  ;;  %v13470_v26 = vand.u32 2147483648, %v10454_v55  ;;  %v4073_v22 = vmul.f32 %v3272_v2, %v10789_v0  ;;  %v10948_v35 = vpop.f32.mrf.mxu1 }
 0x3c3   :  { %13468 = vst [vmem:[#allocation18_spill] sm:$0xff] %v10894_v8  ;;  %v13471_v16 = vunpack.c.l.bf16 %v10616_v32  ;;  %v13472_v63 = vand.u32 2147483647, %v10454_v55  ;;  %v4068_v54 = vmul.f32 %v3197_v50, %v10385_v21  ;;  %v10920_v11 = vpack.c.bf16 %v4070_v28, %v4070_v28  ;;  %v1473_v21 = vpop.xlane.xlu1 %1472 }
 0x3c4   :  { %v3166_v46 = vor.u32 1.1754944e-38, %v13470_v26  ;;  %v13474_v30 = vsel %vm10700_vm10, %v10520_v49, %v10680_v52  ;;  %v10928_v0 = vmul.f32 %v3182_v39, %v10330_v9  ;;  %v4512_v20 = vunpack.c.l.bf16 %v4384_v13 }
 0x3c5   :  { %v10915_v33 = vsub.f32 %v10560_v4, %v13471_v16  ;;  %vm3164_vm6 = vcmp.eq.f32.partialorder %v13472_v63, 8.507059e+37  ;;  %13473 = vst [vmem:[#allocation17_spill] sm:$0xff] %v10920_v11  ;;  %v4385_v59 = vpack.c.bf16 %v4073_v22, %v4073_v22  ;;  %v10932_v4 = vpack.c.bf16 %v10886_v19, %v10886_v19 }
 0x3c6   :  { %v3167_v36 = vsel %vm3164_vm6, %v3166_v46, %v13474_v30  ;;  %v4511_v55 = vunpack.c.l.bf16 %v10894_v8  ;;  %6267 = vrcp.f32 %v10896_v42  ;;  %v6264_v43 = vpop.eup %6263  ;;  %v5158_v49 = vunpack.c.l.b16 %v4384_v13 }
 0x3c7   :  { %13475 = vst [vmem:[#allocation24_spill] sm:$0xff] %v10932_v4  ;;  %v4513_v52 = vunpack.c.l.bf16 %v4385_v59  ;;  %v5159_v15 = vunpack.c.l.b16 %v4385_v59  ;;  %v5643_v9 = vmul.f32 -1.442695, %v1473_v21  ;;  %v10938_v40 = vpop.eup %6265  ;;  %v10941_v18 = vmul.f32 %v3167_v36, %v13476_v10  ;;  %v13486_v59 = vld [vmem:[#allocation105_spill] sm:$0xff] }
 0x3c8   :  { %v10943_v1 = vpack.c.bf16 %v4068_v54, %v4068_v54  ;;  %v4510_v47 = vunpack.c.l.bf16 %v10920_v11  ;;  %v10946_v29 = vadd.f32 1.0, %v6264_v43  ;;  %v4640_v12 = vsub.f32 %v4072_v44, %v4512_v20  ;;  %v1475_v20 = vpop.xlane.xlu2 %1474 }
 0x3c9   :  { %v4641_v39 = vsub.f32 %v4073_v22, %v4513_v52  ;;  %v10950_v17 = vpack.c.b16 %v5159_v15, %v5158_v49  ;;  %6269 = vpow2.f32 %v5643_v9  ;;  %v10954_v14 = vpack.c.bf16 %v10907_v23, %v10907_v23 }
 0x3ca   :  { %13477 = vst [vmem:[#allocation15_spill] sm:$0xff] %v10943_v1  ;;  %v10958_v41 = vpack.c.bf16 %v10928_v0, %v10928_v0  ;;  %v4509_v50 = vunpack.c.l.bf16 %v10932_v4  ;;  %6271 = vrcp.f32 %v10946_v29  ;;  %v10964_v13 = vmul.f32 %v10434_v6, %v13481_v53 }
 0x3cb   :  { %13478 = vst [vmem:[#allocation119_spill] sm:$0xff] %v10950_v17  ;;  %v4639_v44 = vsub.f32 %v4071_v34, %v4511_v55  ;;  %v4729_v31 = vpack.c.bf16 %v4641_v39, %v4640_v12  ;;  %v3275_v2 = vmul.f32 %v10938_v40, %v10856_v45  ;;  %v10972_v26 = vpack.c.bf16 %v10629_v37, %v10629_v37  ;;  %v13487_v55 = vld [vmem:[#allocation101_spill] sm:$0xff] }
 0x3cc   :  { %13479 = vst [vmem:[#allocation118_spill] sm:$0xff] %v10954_v14  ;;  %v10968_v57 = vpop.eup %6267  ;;  %v10976_v46 = vpack.c.bf16 %v10903_v51, %v10903_v51  ;;  %vm4172_vm10 = vcmp.eq.s32.totalorder %v10499_v61, %v10662_v38  ;;  %vm4180_vm9 = vcmp.eq.s32.totalorder %v10502_v3, %v10662_v38  ;;  %v10984_v6 = vpack.c.bf16 %v10437_v24, %v10437_v24 }
 0x3cd   :  { %13480 = vst [vmem:[#allocation12_spill] sm:$0xff] %v10958_v41  ;;  %v10988_v34 = vpack.c.bf16 %v10941_v18, %v10941_v18  ;;  %v4508_v22 = vunpack.c.l.bf16 %v10943_v1  ;;  %v4638_v16 = vsub.f32 %v4070_v28, %v4510_v47  ;;  %4856 = vmatpush.bf16.msrb.mxu2 %v4729_v31  ;;  %v4503_v63 = vunpack.c.l.bf16 %v10954_v14  ;;  %vm11004_vm15 = vmpackc.low %vm4180_vm9, %vm4172_vm10 }
 0x3ce   :  { %13482 = vst [vmem:[#allocation16_spill] sm:$0xff] %v10972_v26  ;;  %v4507_v30 = vunpack.c.l.bf16 %v10958_v41  ;;  %v4637_v36 = vsub.f32 %v10886_v19, %v4509_v50  ;;  %v3276_v49 = vsub.f32 1.0, %v3275_v2  ;;  %v5644_v52 = vmul.f32 -1.442695, %v1475_v20  ;;  %5753 = vmatmul.msk.bf16.gmra.mxu2 %vm11004_vm15, %v13364_v62 }
 0x3cf   :  { %13483 = vst [vmem:[#allocation13_spill] sm:$0xff] %v10976_v46  ;;  %v6270_v43 = vpop.eup %6269  ;;  %v4728_v15 = vpack.c.bf16 %v4639_v44, %v4638_v16  ;;  %v3290_v9 = vmul.f32 %v10968_v57, %v10896_v42  ;;  %v13488_v28 = vmov 0  ;;  %v11012_v10 = vpack.c.bf16 %v10964_v13, %v10964_v13  ;;  %v11025_v16 = vpop.f32.mrf.mxu1 }
 0x3d0   :  { %13484 = vst [vmem:[#allocation19_spill] sm:$0xff] %v10984_v6  ;;  %v13489_v28 = vsel %vm11004_vm15, 4294967295, %v13488_v28  ;;  %v11008_v19 = vpop.eup %6271  ;;  %v4501_v47 = vunpack.c.l.bf16 %v10972_v26  ;;  %v4502_v12 = vunpack.c.l.bf16 %v10976_v46  ;;  %v11016_v39 = vadd.f32 1.0, %v6270_v43 }
 0x3d1   :  { %13485 = vst [vmem:[#allocation112_spill] sm:$0xff] %v10988_v34  ;;  %v4500_v50 = vunpack.c.l.bf16 %v10984_v6  ;;  %v4506_v38 = vunpack.c.l.bf16 %v10988_v34  ;;  %v4636_v53 = vsub.f32 %v4068_v54, %v4508_v22  ;;  %6273 = vpow2.f32 %v5644_v52  ;;  %4857 = vmatpush.bf16.msrb.mxu2 %v4728_v15  ;;  %v13493_v15 = vld [vmem:[#allocation48_spill] sm:$0xff] }
 0x3d2   :  { %13490 = vst [vmem:[#allocation111_spill] sm:$0xff] %v13489_v28  ;;  %v11022_v2 = vsub.f32 %v10907_v23, %v4503_v63  ;;  %6275 = vrcp.f32 %v11016_v39  ;;  %v3305_v20 = vmul.f32 %v11008_v19, %v10946_v29  ;;  %v4635_v54 = vsub.f32 %v10928_v0, %v4507_v30  ;;  %v13494_v63 = vld [vmem:[#allocation53_spill] sm:$0xff]  ;;  %v13496_v28 = vld [vmem:[#allocation87_spill] sm:$0xff] }
 0x3d3   :  { %13491 = vst [vmem:[#allocation39_spill] sm:$0xff] %v11012_v10  ;;  %v3277_v22 = vmul.f32 %v10938_v40, %v3276_v49  ;;  %v3291_v43 = vsub.f32 1.0, %v3290_v9  ;;  %v4727_v52 = vpack.c.bf16 %v4637_v36, %v4636_v53  ;;  %v11037_v31 = vpack.c.bf16 %v13494_v63, %v13494_v63  ;;  %v13500_v53 = vld [vmem:[#allocation155_spill] sm:$0xff] }
 0x3d4   :  { %v11040_v21 = vsub.f32 %v10629_v37, %v4501_v47  ;;  %v11043_v5 = vsub.f32 %v10903_v51, %v4502_v12  ;;  %v4498_v48 = vunpack.c.l.bf16 %v13496_v28  ;;  %v4499_v0 = vunpack.c.l.bf16 %v11012_v10 }
 0x3d5   :  { %13495 = vst [vmem:[#allocation36_spill] sm:$0xff] %v11037_v31  ;;  %v11048_v30 = vsub.f32 %v10437_v24, %v4500_v50  ;;  %v4634_v36 = vsub.f32 %v10941_v18, %v4506_v38  ;;  %4858 = vmatpush.bf16.msrb.mxu2 %v4727_v52  ;;  %v3306_v49 = vsub.f32 1.0, %v3305_v20  ;;  %vm4173_vm5 = vcmp.eq.s32.totalorder %v10499_v61, %v10707_v58 }
 0x3d6   :  { %vm4181_vm3 = vcmp.eq.s32.totalorder %v10502_v3, %v10707_v58  ;;  %v4724_v37 = vpack.c.bf16 %v11022_v2, %v11043_v5  ;;  %v3278_v9 = vadd.f32 %v10938_v40, %v3277_v22  ;;  %vm3280_vm0 = vweird.f32 %v10938_v40 }
 0x3d7   :  { %v6274_v51 = vpop.eup %6273  ;;  %v3292_v24 = vmul.f32 %v10968_v57, %v3291_v43  ;;  %v4726_v47 = vpack.c.bf16 %v4635_v54, %v4634_v36  ;;  %vm11060_vm1 = vmpackc.low %vm4181_vm3, %vm4173_vm5  ;;  %v13497_v18 = vmov 0  ;;  %v3283_v50 = vand.u32 2147483647, %v10856_v45  ;;  %v1477_v54 = vpop.xlane.xlu0 %1476 }
 0x3d8   :  { %v13498_v18 = vsel %vm11060_vm1, 4294967295, %v13497_v18  ;;  %v11064_v12 = vpop.eup %6275  ;;  %v3285_v58 = vand.u32 2147483648, %v10856_v45  ;;  %v11068_v38 = vadd.f32 1.0, %v6274_v51  ;;  %5759 = vmatmul.msk.bf16.gmra.mxu3 %vm11060_vm1, %v13364_v62  ;;  %v11076_v2 = vsub.f32 %v13500_v53, %v4498_v48  ;;  %v11099_v5 = vpop.f32.mrf.mxu1 }
 0x3d9   :  { %13499 = vst [vmem:[#allocation34_spill] sm:$0xff] %v13498_v18  ;;  %vm3279_vm13 = vweird.f32 %v10856_v45  ;;  %v3298_v20 = vand.u32 2147483647, %v10896_v42  ;;  %4859 = vmatpush.bf16.msrb.mxu2 %v4726_v47  ;;  %v3320_v22 = vmul.f32 %v11064_v12, %v11016_v39  ;;  %v3300_v48 = vand.u32 2147483648, %v10896_v42 }
 0x3da   :  { %vm11084_vm14 = vmor %vm3279_vm13, %vm3280_vm0  ;;  %6277 = vrcp.f32 %v11068_v38  ;;  %v5645_v52 = vmul.f32 -1.442695, %v1477_v54  ;;  %v3307_v45 = vmul.f32 %v11008_v19, %v3306_v49  ;;  %v3293_v51 = vadd.f32 %v10968_v57, %v3292_v24 }
 0x3db   :  { %v3282_v36 = vsel %vm11084_vm14, %v10938_v40, %v3278_v9  ;;  %vm3295_vm8 = vweird.f32 %v10968_v57  ;;  %v3321_v47 = vsub.f32 1.0, %v3320_v22  ;;  %v11097_v53 = vsub.f32 %v10964_v13, %v4499_v0 }
 0x3dc   :  { %vm3284_vm6 = vcmp.eq.f32.partialorder %v3283_v50, 8.507059e+37  ;;  %v3286_v23 = vor.u32 1.1754944e-38, %v3285_v58  ;;  %6279 = vpow2.f32 %v5645_v52  ;;  %vm3294_vm10 = vweird.f32 %v10896_v42 }
 0x3dd   :  { %vm11102_vm9 = vcmp.eq.f32.partialorder %v3298_v20, 8.507059e+37  ;;  %v3313_v40 = vand.u32 2147483647, %v10946_v29  ;;  %v13505_v9 = vpack.c.bf16 %v10694_v7, %v10915_v33  ;;  %v3322_v13 = vmul.f32 %v11064_v12, %v3321_v47  ;;  %vm11111_vm5 = vmor %vm3294_vm10, %vm3295_vm8  ;;  %v1479_v47 = vpop.xlane.xlu1 %1478 }
 0x3de   :  { %v3287_v0 = vsel %vm3284_vm6, %v3286_v23, %v3282_v36  ;;  %v3308_v50 = vadd.f32 %v11008_v19, %v3307_v45  ;;  %vm3310_vm3 = vweird.f32 %v11008_v19  ;;  %v3315_v42 = vand.u32 2147483648, %v10946_v29 }
 0x3df   :  { %4860 = vmatpush.bf16.msrb.mxu2 %v13505_v9  ;;  %v3297_v58 = vsel %vm11111_vm5, %v10968_v57, %v3293_v51  ;;  %v3301_v20 = vor.u32 1.1754944e-38, %v3300_v48  ;;  %v3323_v7 = vadd.f32 %v11064_v12, %v3322_v13  ;;  %vm3325_vm0 = vweird.f32 %v11064_v12  ;;  %v1521_v52 = vpop.xlane.xlu0 %1520  ;;  %v11160_v9 = vld [vmem:[#allocation5] sm:$0xff] }
 0x3e0   :  { %v11123_v33 = vpop.eup %6277  ;;  %vm3309_vm13 = vweird.f32 %v10946_v29  ;;  %v3328_v23 = vand.u32 2147483647, %v11016_v39  ;;  %v3330_v54 = vand.u32 2147483648, %v11016_v39  ;;  %v4722_v22 = vpack.c.bf16 %v11097_v53, %v11076_v2 }
 0x3e1   :  { %v11131_v43 = vmul.f32 %v3287_v0, %v10859_v25  ;;  %vm11133_vm14 = vmor %vm3309_vm13, %vm3310_vm3  ;;  %vm11137_vm8 = vcmp.eq.f32.partialorder %v3313_v40, 8.507059e+37  ;;  %vm3324_vm6 = vweird.f32 %v11016_v39  ;;  %v3335_v29 = vmul.f32 %v11123_v33, %v11068_v38 }
 0x3e2   :  { %v6280_v45 = vpop.eup %6279  ;;  %v3302_v25 = vsel %vm11102_vm9, %v3301_v20, %v3297_v58  ;;  %v3312_v2 = vsel %vm11133_vm14, %v11008_v19, %v3308_v50  ;;  %v3316_v36 = vor.u32 1.1754944e-38, %v3315_v42  ;;  %v5667_v51 = vmul.f32 -1.442695, %v1521_v52  ;;  %vm11151_vm10 = vmor %vm3324_vm6, %vm3325_vm0  ;;  %v914_v42 = vpop.f32.mrf.mxu1  ;;  %v13515_v58 = vld [vmem:[#allocation107_spill] sm:$0xff] }
 0x3e3   :  { %4861 = vmatpush.bf16.msrb.mxu2 %v4724_v37  ;;  %v11155_v39 = vadd.f32 1.0, %v6280_v45  ;;  %v5646_v53 = vmul.f32 -1.442695, %v1479_v47  ;;  %v3327_v49 = vsel %vm11151_vm10, %v11064_v12, %v3323_v7  ;;  %v3336_v40 = vsub.f32 1.0, %v3335_v29  ;;  %v13516_v20 = vld [vmem:[#allocation135_spill] sm:$0xff] }
 0x3e4   :  { %6281 = vpow2.f32 %v5667_v51  ;;  %vm3329_vm9 = vcmp.eq.f32.partialorder %v3328_v23, 8.507059e+37  ;;  %v3331_v19 = vor.u32 1.1754944e-38, %v3330_v54  ;;  %v11163_v13 = vperm.slane %v11160_v9, 4  ;;  %v1481_v23 = vpop.xlane.xlu2 %1480 }
 0x3e5   :  { %6283 = vrcp.f32 %v11155_v39  ;;  %v3317_v0 = vsel %vm11137_vm8, %v3316_v36, %v3312_v2  ;;  %v13514_v24 = vpack.c.bf16 %v11040_v21, %v11048_v30  ;;  %v3337_v12 = vmul.f32 %v11123_v33, %v3336_v40  ;;  %v13526_v40 = vld [vmem:[#allocation91_spill] sm:$0xff] }
 0x3e6   :  { %vm3340_vm5 = vweird.f32 %v11123_v33  ;;  %6285 = vpow2.f32 %v5646_v53  ;;  %v3332_v50 = vsel %vm3329_vm9, %v3331_v19, %v3327_v49  ;;  %vm4142_vm3 = vcmp.eq.s32.totalorder %v13515_v58, %v11163_v13  ;;  %v13527_v19 = vld [vmem:[#allocation90_spill] sm:$0xff] }
 0x3e7   :  { %4862 = vmatpush.bf16.msrb.mxu2 %v13514_v24  ;;  %vm4150_vm0 = vcmp.eq.s32.totalorder %v13516_v20, %v11163_v13  ;;  %v11178_v7 = vmul.f32 %v3302_v25, %v10948_v35  ;;  %v3338_v21 = vadd.f32 %v11123_v33, %v3337_v12  ;;  %vm3339_vm13 = vweird.f32 %v11068_v38  ;;  %v1515_v37 = vpop.xlane.xlu0 %1514 }
 0x3e8   :  { %v3345_v30 = vand.u32 2147483648, %v11068_v38  ;;  %v11185_v48 = vmul.f32 %v3317_v0, %v11025_v16  ;;  %v5647_v52 = vmul.f32 -1.442695, %v1481_v23  ;;  %vm11187_vm14 = vmor %vm3339_vm13, %vm3340_vm5  ;;  %v3343_v35 = vand.u32 2147483647, %v11068_v38 }
 0x3e9   :  { %v4559_v51 = vunpack.c.l.bf16 %v11037_v31  ;;  %v11196_v47 = vmul.f32 %v3332_v50, %v11099_v5  ;;  %vm11204_vm8 = vmpackc.low %vm4150_vm0, %vm4142_vm3  ;;  %v13522_v16 = vmov 0  ;;  %v11210_v53 = vpack.c.bf16 %v11131_v43, %v11131_v43  ;;  %v1551_v5 = vpop.xlane.xlu1 %1550  ;;  %v13530_v50 = vld [vmem:[#allocation77_spill] sm:$0xff] }
 0x3ea   :  { %v13523_v16 = vsel %vm11204_vm8, 4294967295, %v13522_v16  ;;  %v6282_v38 = vpop.eup %6281  ;;  %v5664_v49 = vmul.f32 -1.442695, %v1515_v37  ;;  %6287 = vpow2.f32 %v5647_v52  ;;  %v13528_v0 = vpack.c.bf16 %v13526_v40, %v13527_v19 }
 0x3eb   :  { %4863 = vmatpush.bf16.msrb.mxu2 %v4722_v22  ;;  %13524 = vst [vmem:[#allocation38_spill] sm:$0xff] %v13523_v16  ;;  %v3342_v22 = vsel %vm11187_vm14, %v11123_v33, %v3338_v21  ;;  %v6284_v24 = vpop.eup %6283  ;;  %v13529_v12 = vunpack.c.l.bf16 %v13493_v15  ;;  %v11225_v57 = vpack.c.bf16 %v11178_v7, %v11178_v7  ;;  %v5682_v37 = vmul.f32 -1.442695, %v1551_v5 }
 0x3ec   :  { %13525 = vst [vmem:[#allocation28_spill] sm:$0xff] %v11210_v53  ;;  %v3346_v52 = vor.u32 1.1754944e-38, %v3345_v30  ;;  %v6286_v25 = vpop.eup %6285  ;;  %v11229_v33 = vpack.c.bf16 %v11185_v48, %v11185_v48  ;;  %6289 = vpow2.f32 %v5664_v49  ;;  %vm3344_vm6 = vcmp.eq.f32.partialorder %v3343_v35, 8.507059e+37 }
 0x3ed   :  { %v11221_v23 = vsub.f32 %v13530_v50, %v13529_v12  ;;  %13531 = vst [vmem:[#allocation30_spill] sm:$0xff] %v11225_v57  ;;  %v3350_v21 = vmul.f32 %v6284_v24, %v11155_v39  ;;  %v11235_v29 = vadd.f32 1.0, %v6282_v38  ;;  %v11237_v40 = vadd.f32 1.0, %v6286_v25  ;;  %v1519_v25 = vpop.xlane.xlu2 %1518 }
 0x3ee   :  { %13532 = vst [vmem:[#allocation32_spill] sm:$0xff] %v11229_v33  ;;  %5761 = vmatmul.msk.bf16.vlgmr.msrb.gmra.mxu2 %vm11204_vm8, %v13364_v62  ;;  %v11241_v30 = vpack.c.bf16 %v11196_v47, %v11196_v47  ;;  %v3347_v5 = vsel %vm3344_vm6, %v3346_v52, %v3342_v22  ;;  %v11244_v19 = vsub.f32 %v13494_v63, %v4559_v51  ;;  %v4514_v35 = vunpack.c.l.bf16 %v11210_v53  ;;  %v917_v52 = vpop.f32.mrf.mxu1 }
 0x3ef   :  { %4904 = vmatpush.bf16.msra.mxu2 %v13528_v0  ;;  %6291 = vpow2.f32 %v5682_v37  ;;  %v13534_v49 = vpack.c.bf16 %v13487_v55, %v13486_v59  ;;  %v3351_v0 = vsub.f32 1.0, %v3350_v21  ;;  %v4515_v38 = vunpack.c.l.bf16 %v11225_v57 }
 0x3f0   :  { %13533 = vst [vmem:[#allocation106_spill] sm:$0xff] %v11241_v30  ;;  %6293 = vrcp.f32 %v11237_v40  ;;  %v3358_v12 = vand.u32 2147483647, %v11155_v39  ;;  %v3360_v22 = vand.u32 2147483648, %v11155_v39  ;;  %v6288_v50 = vpop.eup %6287  ;;  %v11254_v63 = vmul.f32 %v3347_v5, %v914_v42 }
 0x3f1   :  { %v5666_v51 = vmul.f32 -1.442695, %v1519_v25  ;;  %v3352_v37 = vmul.f32 %v6284_v24, %v3351_v0  ;;  %vm3355_vm10 = vweird.f32 %v6284_v24  ;;  %v4516_v59 = vunpack.c.l.bf16 %v11229_v33  ;;  %v1517_v18 = vpop.xlane.xlu1 %1516 }
 0x3f2   :  { %6295 = vrcp.f32 %v11235_v29  ;;  %v4517_v55 = vunpack.c.l.bf16 %v11241_v30  ;;  %v11259_v21 = vadd.f32 1.0, %v6288_v50  ;;  %v6290_v36 = vpop.eup %6289  ;;  %vm3354_vm9 = vweird.f32 %v11155_v39 }
 0x3f3   :  { %4905 = vmatpush.bf16.msra.mxu2 %v13534_v49  ;;  %v1549_v49 = vpop.xlane.xlu0 %1548  ;;  %6297 = vpow2.f32 %v5666_v51  ;;  %v3353_v56 = vadd.f32 %v6284_v24, %v3352_v37  ;;  %v11262_v42 = vadd.f32 1.0, %v6290_v36  ;;  %v5665_v5 = vmul.f32 -1.442695, %v1517_v18  ;;  %vm3356_vm5 = vmor %vm3354_vm9, %vm3355_vm10 }
 0x3f4   :  { %v5681_v16 = vmul.f32 -1.442695, %v1549_v49  ;;  %6299 = vrcp.f32 %v11259_v21  ;;  %v3361_v0 = vor.u32 1.1754944e-38, %v3360_v22  ;;  %v11268_v50 = vpack.c.bf16 %v11254_v63, %v11254_v63 }
 0x3f5   :  { %v6292_v25 = vpop.eup %6291  ;;  %v3357_v49 = vsel %vm3356_vm5, %v6284_v24, %v3353_v56  ;;  %vm3359_vm3 = vcmp.eq.f32.partialorder %v3358_v12, 8.507059e+37  ;;  %vm4158_vm0 = vcmp.eq.s32.totalorder %v10356_v60, %v11163_v13  ;;  %vm4166_vm13 = vcmp.eq.s32.totalorder %v10359_v27, %v11163_v13  ;;  %v1553_v37 = vpop.xlane.xlu2 %1552 }
 0x3f6   :  { %13535 = vst [vmem:[#allocation43_spill] sm:$0xff] %v11268_v50  ;;  %6301 = vpow2.f32 %v5681_v16  ;;  %v11270_v51 = vpop.eup %6293  ;;  %v11273_v39 = vadd.f32 1.0, %v6292_v25  ;;  %v3362_v36 = vsel %vm3359_vm3, %v3361_v0, %v3357_v49  ;;  %v11286_v16 = vsub.f32 %v11131_v43, %v4514_v35  ;;  %vm11312_vm6 = vmpackc.low %vm4166_vm13, %vm4158_vm0 }
 0x3f7   :  { %6303 = vrcp.f32 %v11262_v42  ;;  %v11277_v18 = vmul.f32 %v3362_v36, %v917_v52  ;;  %v3365_v22 = vmul.f32 %v11270_v51, %v11237_v40  ;;  %v11289_v24 = vsub.f32 %v11178_v7, %v4515_v38 }
 0x3f8   :  { %6305 = vpow2.f32 %v5665_v5  ;;  %v11283_v56 = vpop.eup %6295  ;;  %v11292_v12 = vsub.f32 %v11185_v48, %v4516_v59  ;;  %v3373_v52 = vand.u32 2147483647, %v11237_v40  ;;  %v5683_v0 = vmul.f32 -1.442695, %v1553_v37  ;;  %v920_v37 = vpop.f32.mrf.mxu1 }
 0x3f9   :  { %v6298_v5 = vpop.eup %6297  ;;  %6307 = vrcp.f32 %v11273_v39  ;;  %v3366_v25 = vsub.f32 1.0, %v3365_v22  ;;  %v3375_v49 = vand.u32 2147483648, %v11237_v40  ;;  %v11300_v43 = vsub.f32 %v11196_v47, %v4517_v55  ;;  %v1511_v22 = vpop.xlane.xlu1 %1510 }
 0x3fa   :  { %v11297_v36 = vpop.eup %6299  ;;  %v11303_v35 = vadd.f32 1.0, %v6298_v5  ;;  %vm3369_vm14 = vweird.f32 %v11237_v40  ;;  %v13536_v38 = vmov 0  ;;  %v11318_v47 = vpack.c.bf16 %v11277_v18, %v11277_v18 }
 0x3fb   :  { %v1543_v48 = vpop.xlane.xlu0 %1542  ;;  %v13537_v38 = vsel %vm11312_vm6, 4294967295, %v13536_v38  ;;  %6309 = vpow2.f32 %v5683_v0  ;;  %vm3370_vm10 = vweird.f32 %v11270_v51  ;;  %v5662_v31 = vmul.f32 -1.442695, %v1511_v22 }
 0x3fc   :  { %13538 = vst [vmem:[#allocation148_spill] sm:$0xff] %v13537_v38  ;;  %v6302_v59 = vpop.eup %6301  ;;  %v5678_v55 = vmul.f32 -1.442695, %v1543_v48  ;;  %6311 = vrcp.f32 %v11303_v35  ;;  %v3367_v15 = vmul.f32 %v11270_v51, %v3366_v25  ;;  %vm11327_vm9 = vcmp.eq.f32.partialorder %v3373_v52, 8.507059e+37  ;;  %vm3371_vm5 = vmor %vm3369_vm14, %vm3370_vm10 }
 0x3fd   :  { %13539 = vst [vmem:[#allocation105_spill] sm:$0xff] %v11318_v47  ;;  %v11321_v5 = vpop.eup %6303  ;;  %v11323_v7 = vadd.f32 1.0, %v6302_v59  ;;  %v3376_v48 = vor.u32 1.1754944e-38, %v3375_v49  ;;  %v3380_v0 = vmul.f32 %v11297_v36, %v11259_v21  ;;  %v11338_v59 = vmul.f32 %v11283_v56, %v11235_v29  ;;  %v1547_v28 = vpop.xlane.xlu2 %1546 }
 0x3fe   :  { %v6306_v17 = vpop.eup %6305  ;;  %6313 = vpow2.f32 %v5678_v55  ;;  %5763 = vmatmul.msk.bf16.gmra.mxu2 %vm11312_vm6, %v13364_v62  ;;  %v3368_v52 = vadd.f32 %v11270_v51, %v3367_v15  ;;  %vm3384_vm3 = vweird.f32 %v11259_v21  ;;  %v3388_v22 = vand.u32 2147483647, %v11259_v21  ;;  %v4769_v32 = vpop.f32.mrf.mxu2 }
 0x3ff   :  { %6315 = vrcp.f32 %v11323_v7  ;;  %v11341_v25 = vadd.f32 1.0, %v6306_v17  ;;  %v11344_v55 = vpop.eup %6307  ;;  %v3381_v49 = vsub.f32 1.0, %v3380_v0  ;;  %v11354_v38 = vmul.f32 %v11321_v5, %v11262_v42 }
 0x400   :  { %6317 = vpow2.f32 %v5662_v31  ;;  %v4519_v17 = vunpack.c.l.bf16 %v11318_v47  ;;  %v3372_v15 = vsel %vm3371_vm5, %v11270_v51, %v3368_v52  ;;  %v3390_v31 = vand.u32 2147483648, %v11259_v21 }
 0x401   :  { %v6310_v6 = vpop.eup %6309  ;;  %v3377_v40 = vsel %vm11327_vm9, %v3376_v48, %v3372_v15  ;;  %v5680_v0 = vmul.f32 -1.442695, %v1547_v28  ;;  %v3382_v57 = vmul.f32 %v11297_v36, %v3381_v49  ;;  %vm3385_vm0 = vweird.f32 %v11297_v36  ;;  %v1545_v48 = vpop.xlane.xlu1 %1544 }
 0x402   :  { %v11363_v10 = vpop.eup %6311  ;;  %v11367_v26 = vmul.f32 %v11344_v55, %v11273_v39  ;;  %6319 = vrcp.f32 %v11341_v25  ;;  %v11370_v51 = vadd.f32 1.0, %v6310_v6  ;;  %v4080_v52 = vmul.f32 %v3377_v40, %v920_v37  ;;  %vm3386_vm13 = vmor %vm3384_vm3, %vm3385_vm0 }
 0x403   :  { %v1509_v33 = vpop.xlane.xlu0 %1508  ;;  %v3665_v28 = vmul.f32 %v11363_v10, %v11303_v35  ;;  %6321 = vpow2.f32 %v5680_v0  ;;  %v3383_v49 = vadd.f32 %v11297_v36, %v3382_v57  ;;  %v5679_v47 = vmul.f32 -1.442695, %v1545_v48 }
 0x404   :  { %v6314_v30 = vpop.eup %6313  ;;  %v5661_v53 = vmul.f32 -1.442695, %v1509_v33  ;;  %6323 = vrcp.f32 %v11370_v51  ;;  %vm3389_vm14 = vcmp.eq.f32.partialorder %v3388_v22, 8.507059e+37  ;;  %v11384_v37 = vpack.c.bf16 %v4080_v52, %v4080_v52  ;;  %v923_v33 = vpop.f32.mrf.mxu1 }
 0x405   :  { %v11375_v15 = vpop.eup %6315  ;;  %v11377_v46 = vadd.f32 1.0, %v6314_v30  ;;  %v3387_v57 = vsel %vm3386_vm13, %v11297_v36, %v3383_v49  ;;  %v3391_v40 = vor.u32 1.1754944e-38, %v3390_v31  ;;  %v3666_v0 = vsub.f32 1.0, %v3665_v28 }
 0x406   :  { %v6318_v6 = vpop.eup %6317  ;;  %13542 = vst [vmem:[#allocation101_spill] sm:$0xff] %v11384_v37  ;;  %6325 = vpow2.f32 %v5661_v53  ;;  %vm4174_vm10 = vcmp.eq.s32.totalorder %v10499_v61, %v11163_v13  ;;  %v11394_v21 = vmul.f32 %v11375_v15, %v11323_v7  ;;  %vm4182_vm9 = vcmp.eq.s32.totalorder %v10502_v3, %v11163_v13 }
 0x407   :  { %6327 = vrcp.f32 %v11377_v46  ;;  %v11388_v30 = vadd.f32 1.0, %v6318_v6  ;;  %v3392_v22 = vsel %vm3389_vm14, %v3391_v40, %v3387_v57  ;;  %v3681_v36 = vsub.f32 1.0, %v11338_v59  ;;  %v1513_v6 = vpop.xlane.xlu2 %1512  ;;  %v4793_v59 = vpop.f32.mrf.mxu3  ;;  %vm11424_vm5 = vmpackc.low %vm4182_vm9, %vm4174_vm10 }
 0x408   :  { %6329 = vpow2.f32 %v5679_v47  ;;  %v11398_v53 = vpop.eup %6319  ;;  %v13543_v31 = vunpack.c.l.bf16 %v11268_v50  ;;  %v11407_v48 = vsub.f32 %v11277_v18, %v4519_v17  ;;  %v4081_v49 = vmul.f32 %v3392_v22, %v923_v33 }
 0x409   :  { %v6322_v14 = vpop.eup %6321  ;;  %6331 = vrcp.f32 %v11388_v30  ;;  %v4520_v57 = vunpack.c.l.bf16 %v11384_v37  ;;  %v5663_v40 = vmul.f32 -1.442695, %v1513_v6  ;;  %v13545_v17 = vmov 0  ;;  %v1539_v37 = vpop.xlane.xlu1 %1538 }
 0x40a   :  { %v11404_v28 = vsub.f32 %v11254_v63, %v13543_v31  ;;  %v11412_v34 = vpop.eup %6323  ;;  %v11414_v50 = vadd.f32 1.0, %v6322_v14  ;;  %v11416_v63 = vpack.c.bf16 %v4081_v49, %v4081_v49  ;;  %v13546_v17 = vsel %vm11424_vm5, 4294967295, %v13545_v17 }
 0x40b   :  { %v1503_v18 = vpop.xlane.xlu0 %1502  ;;  %13547 = vst [vmem:[#allocation155_spill] sm:$0xff] %v13546_v17  ;;  %v11428_v33 = vadd.f32 %v4793_v59, %v4769_v32  ;;  %v3667_v22 = vmul.f32 %v11363_v10, %v3666_v0  ;;  %6333 = vpow2.f32 %v5663_v40  ;;  %v11437_v13 = vmul.f32 %v11398_v53, %v11341_v25 }
 0x40c   :  { %13544 = vst [vmem:[#allocation53_spill] sm:$0xff] %v11416_v63  ;;  %v6326_v31 = vpop.eup %6325  ;;  %v5658_v47 = vmul.f32 -1.442695, %v1503_v18  ;;  %6335 = vrcp.f32 %v11414_v50  ;;  %v4521_v32 = vunpack.c.l.bf16 %v11416_v63  ;;  %v11445_v59 = vmul.f32 %v11412_v34, %v11370_v51 }
 0x40d   :  { %13548 = vst [vmem:[#allocation91_spill] sm:$0xff] %v11428_v33  ;;  %v11433_v1 = vpop.eup %6327  ;;  %v11439_v41 = vadd.f32 1.0, %v6326_v31  ;;  %v4648_v18 = vsub.f32 %v4080_v52, %v4520_v57  ;;  %v5676_v40 = vmul.f32 -1.442695, %v1539_v37  ;;  %v3668_v14 = vadd.f32 %v11363_v10, %v3667_v22 }
 0x40e   :  { %v6330_v0 = vpop.eup %6329  ;;  %6337 = vpow2.f32 %v5658_v47  ;;  %5765 = vmatmul.msk.bf16.gmra.mxu2 %vm11424_vm5, %v13364_v62  ;;  %v4649_v6 = vsub.f32 %v4081_v49, %v4521_v32  ;;  %v11458_v4 = vmul.f32 %v11433_v1, %v11377_v46  ;;  %vm3669_vm3 = vweird.f32 %v11303_v35 }
 0x40f   :  { %6339 = vrcp.f32 %v11439_v41  ;;  %v11451_v31 = vadd.f32 1.0, %v6330_v0  ;;  %v11454_v63 = vpop.eup %6331  ;;  %vm3670_vm0 = vweird.f32 %v11363_v10  ;;  %v1507_v37 = vpop.xlane.xlu2 %1506  ;;  %v3673_v47 = vand.u32 2147483647, %v11303_v35 }
 0x410   :  { %6341 = vpow2.f32 %v5676_v40  ;;  %v4733_v52 = vpack.c.bf16 %v4649_v6, %v4648_v18  ;;  %v3675_v49 = vand.u32 2147483648, %v11303_v35  ;;  %v5660_v32 = vmul.f32 -1.442695, %v1507_v37  ;;  %vm11468_vm13 = vmor %vm3669_vm3, %vm3670_vm0  ;;  %v13554_v40 = vld [vmem:[#allocation73_spill] sm:$0xff] }
 0x411   :  { %6343 = vrcp.f32 %v11451_v31  ;;  %v6334_v57 = vpop.eup %6333  ;;  %v4732_v0 = vpack.c.bf16 %v11407_v48, %v11404_v28  ;;  %v3682_v17 = vmul.f32 %v11283_v56, %v3681_v36  ;;  %v4731_v37 = vpack.c.bf16 %v11300_v43, %v11292_v12  ;;  %v1505_v8 = vpop.xlane.xlu1 %1504 }
 0x412   :  { %v11473_v11 = vpop.eup %6335  ;;  %v11476_v18 = vadd.f32 1.0, %v6334_v57  ;;  %4884 = vmatpush.bf16.msrb.mxu3 %v4733_v52  ;;  %v3672_v28 = vsel %vm11468_vm13, %v11363_v10, %v3668_v14  ;;  %6345 = vpow2.f32 %v5660_v32  ;;  %v3676_v36 = vor.u32 1.1754944e-38, %v3675_v49  ;;  %v13557_v57 = vld [vmem:[#allocation76_spill] sm:$0xff] }
 0x413   :  { %v1537_v35 = vpop.xlane.xlu0 %1536  ;;  %v3683_v54 = vadd.f32 %v11283_v56, %v3682_v17  ;;  %v5659_v6 = vmul.f32 -1.442695, %v1505_v8  ;;  %vm3674_vm14 = vcmp.eq.f32.partialorder %v3673_v47, 8.507059e+37  ;;  %vm3684_vm10 = vweird.f32 %v11235_v29 }
 0x414   :  { %v6338_v48 = vpop.eup %6337  ;;  %v5675_v22 = vmul.f32 -1.442695, %v1537_v35  ;;  %v3677_v43 = vsel %vm3674_vm14, %v3676_v36, %v3672_v28  ;;  %vm3685_vm9 = vweird.f32 %v11283_v56  ;;  %v3688_v8 = vand.u32 2147483647, %v11235_v29 }
 0x415   :  { %v11484_v44 = vpop.eup %6339  ;;  %v11487_v52 = vadd.f32 1.0, %v6338_v48  ;;  %vm11496_vm3 = vmor %vm3684_vm10, %vm3685_vm9  ;;  %v3690_v47 = vand.u32 2147483648, %v11235_v29  ;;  %v11504_v49 = vmul.f32 %v11454_v63, %v11388_v30  ;;  %v4100_v35 = vmul.f32 %v3677_v43, %v13554_v40 }
 0x416   :  { %v6342_v12 = vpop.eup %6341  ;;  %6347 = vpow2.f32 %v5675_v22  ;;  %4885 = vmatpush.bf16.msrb.mxu3 %v4732_v0  ;;  %v11508_v22 = vmul.f32 %v11473_v11, %v11414_v50  ;;  %v3687_v32 = vsel %vm11496_vm3, %v11283_v56, %v3683_v54  ;;  %v11515_v0 = vmul.f32 %v11484_v44, %v11439_v41 }
 0x417   :  { %v11491_v10 = vpop.eup %6343  ;;  %v11493_v14 = vadd.f32 1.0, %v6342_v12  ;;  %6349 = vrcp.f32 %v11476_v18  ;;  %v3691_v29 = vor.u32 1.1754944e-38, %v3690_v47  ;;  %v1541_v28 = vpop.xlane.xlu2 %1540  ;;  %vm3689_vm0 = vcmp.eq.f32.partialorder %v3688_v8, 8.507059e+37 }
 0x418   :  { %6351 = vpow2.f32 %v5659_v6  ;;  %v6346_v48 = vpop.eup %6345  ;;  %v11521_v36 = vmul.f32 %v11491_v10, %v11451_v31  ;;  %v5677_v6 = vmul.f32 -1.442695, %v1541_v28  ;;  %v11526_v12 = vpack.c.bf16 %v4100_v35, %v4100_v35 }
 0x419   :  { %13551 = vst [vmem:[#allocation90_spill] sm:$0xff] %v11493_v14  ;;  %6353 = vrcp.f32 %v11487_v52  ;;  %v11524_v54 = vadd.f32 1.0, %v6346_v48  ;;  %v3692_v56 = vsel %vm3689_vm0, %v3691_v29, %v3687_v32  ;;  %v13556_v47 = vsub.f32 1.0, %v11354_v38  ;;  %v1499_v33 = vpop.xlane.xlu1 %1498 }
 0x41a   :  { %6355 = vrcp.f32 %v11493_v14  ;;  %4886 = vmatpush.bf16.msrb.mxu3 %v4731_v37  ;;  %13555 = vst [vmem:[#allocation77_spill] sm:$0xff] %v11526_v12  ;;  %v4101_v45 = vmul.f32 %v3692_v56, %v13557_v57  ;;  %v4730_v8 = vpack.c.bf16 %v11289_v24, %v11286_v16  ;;  %v4540_v32 = vunpack.c.l.bf16 %v11526_v12  ;;  %v13562_v57 = vld [vmem:[#allocation139_spill] sm:$0xff]  ;;  %v11558_v16 = vpop.f32.mrf.mxu2 }
 0x41b   :  { %v1531_v17 = vpop.xlane.xlu0 %1530  ;;  %v3637_v43 = vmul.f32 %v11321_v5, %v13556_v47  ;;  %6357 = vpow2.f32 %v5677_v6  ;;  %v5656_v38 = vmul.f32 -1.442695, %v1499_v33  ;;  %vm3639_vm13 = vweird.f32 %v11262_v42 }
 0x41c   :  { %v6348_v40 = vpop.eup %6347  ;;  %v5672_v2 = vmul.f32 -1.442695, %v1531_v17  ;;  %6359 = vrcp.f32 %v11524_v54  ;;  %v11542_v56 = vpack.c.bf16 %v4101_v45, %v4101_v45  ;;  %v4668_v48 = vsub.f32 %v4100_v35, %v4540_v32 }
 0x41d   :  { %v11534_v28 = vpop.eup %6349  ;;  %v11536_v37 = vadd.f32 1.0, %v6348_v40  ;;  %v3638_v17 = vadd.f32 %v11321_v5, %v3637_v43  ;;  %vm3640_vm14 = vweird.f32 %v11321_v5  ;;  %v3643_v43 = vand.u32 2147483647, %v11262_v42 }
 0x41e   :  { %v6352_v29 = vpop.eup %6351  ;;  %13559 = vst [vmem:[#allocation76_spill] sm:$0xff] %v11542_v56  ;;  %6361 = vpow2.f32 %v5672_v2  ;;  %4887 = vmatpush.bf16.msrb.mxu3 %v4730_v8  ;;  %v4541_v40 = vunpack.c.l.bf16 %v11542_v56  ;;  %v13561_v2 = vld [vmem:[#allocation136_spill] sm:$0xff]  ;;  %v3645_v8 = vand.u32 2147483648, %v11262_v42  ;;  %vm3641_vm10 = vmor %vm3639_vm13, %vm3640_vm14  ;;  %vm3655_vm3 = vweird.f32 %v11398_v53 }
 0x41f   :  { %13558 = vst [vmem:[#allocation73_spill] sm:$0xff] %v11536_v37  ;;  %v11544_v6 = vpop.eup %6353  ;;  %6363 = vrcp.f32 %v11536_v37  ;;  %v11548_v24 = vadd.f32 1.0, %v6352_v29  ;;  %v13563_v12 = vpack.c.bf16 %v13561_v2, %v13562_v57  ;;  %v11564_v29 = vpop.f32.mrf.mxu3  ;;  %vm3644_vm9 = vcmp.eq.f32.partialorder %v3643_v43, 8.507059e+37 }
 0x420   :  { %v11551_v33 = vpop.eup %6355  ;;  %6365 = vpow2.f32 %v5656_v38  ;;  %13564 = vst [vmem:[#allocation136_spill] sm:$0xff] %v11558_v16  ;;  %v11568_v35 = vmul.f32 %v11544_v6, %v11487_v52  ;;  %v4669_v32 = vsub.f32 %v4101_v45, %v4541_v40  ;;  %v13566_v38 = vsub.f32 1.0, %v11437_v13 }
 0x421   :  { %13560 = vst [vmem:[#allocation156_spill] sm:$0xff] %v11551_v33  ;;  %v6358_v47 = vpop.eup %6357  ;;  %6367 = vrcp.f32 %v11548_v24  ;;  %v3646_v16 = vor.u32 1.1754944e-38, %v3645_v8  ;;  %vm3654_vm0 = vweird.f32 %v11341_v25  ;;  %vm3625_vm6 = vweird.f32 %v11534_v28 }
 0x422   :  { %4928 = vmatpush.bf16.msra.mxu3 %v13563_v12  ;;  %13565 = vst [vmem:[#allocation139_spill] sm:$0xff] %v11564_v29  ;;  %v11572_v12 = vmul.f32 %v11534_v28, %v11476_v18  ;;  %v3652_v57 = vmul.f32 %v11398_v53, %v13566_v38  ;;  %v11577_v2 = vpop.eup %6359  ;;  %v11580_v42 = vadd.f32 1.0, %v6358_v47  ;;  %v3642_v29 = vsel %vm3641_vm10, %v11321_v5, %v3638_v17  ;;  %vm11597_vm13 = vmor %vm3654_vm0, %vm3655_vm3 }
 0x423   :  { %v4743_v3 = vpack.c.bf16 %v4669_v32, %v4668_v48  ;;  %v3647_v40 = vsel %vm3644_vm9, %v3646_v16, %v3642_v29  ;;  %v3658_v47 = vand.u32 2147483647, %v11341_v25  ;;  %v11593_v5 = vmul.f32 %v11551_v33, %v11493_v14  ;;  %v1533_v16 = vpop.xlane.xlu1 %1532  ;;  %v13570_v29 = vld [vmem:[#allocation71_spill] sm:$0xff] }
 0x424   :  { %v6362_v56 = vpop.eup %6361  ;;  %v3653_v61 = vadd.f32 %v11398_v53, %v3652_v57  ;;  %6369 = vrcp.f32 %v11580_v42  ;;  %v4098_v32 = vmul.f32 %v3647_v40, %v13570_v29  ;;  %v4752_v29 = vpack.c.bf16 %v11244_v19, %v11221_v23 }
 0x425   :  { %v11585_v45 = vpop.eup %6363  ;;  %v11587_v13 = vadd.f32 1.0, %v6362_v56  ;;  %4906 = vmatpush.bf16.msra.mxu2 %v4743_v3  ;;  %v3660_v56 = vand.u32 2147483648, %v11341_v25  ;;  %v1535_v3 = vpop.xlane.xlu2 %1534  ;;  %v11616_v25 = vmul.f32 %v11577_v2, %v11524_v54  ;;  %vm3659_vm14 = vcmp.eq.f32.partialorder %v3658_v47, 8.507059e+37 }
 0x426   :  { %v6366_v38 = vpop.eup %6365  ;;  %v3657_v8 = vsel %vm11597_vm13, %v11398_v53, %v3653_v61  ;;  %v11612_v48 = vmul.f32 %v11585_v45, %v11536_v37  ;;  %v11620_v33 = vpack.c.bf16 %v4098_v32, %v4098_v32  ;;  %v11623_v61 = vperm.slane %v11160_v9, 5  ;;  %v13572_v37 = vld [vmem:[#allocation72_spill] sm:$0xff]  ;;  %v4774_v9 = vpop.f32.mrf.mxu2  ;;  %4929 = vmatpush.bf16.msra.mxu3 %v4752_v29 }
 0x427   :  { %13567 = vst [vmem:[#allocation157_spill] sm:$0xff] %v11587_v13  ;;  %6371 = vrcp.f32 %v11587_v13  ;;  %v11603_v43 = vadd.f32 1.0, %v6366_v38  ;;  %v3661_v14 = vor.u32 1.1754944e-38, %v3660_v56  ;;  %v11618_v38 = vpop.eup %6367  ;;  %v5673_v53 = vmul.f32 -1.442695, %v1533_v16  ;;  %v4798_v47 = vpop.f32.mrf.mxu3 }
 0x428   :  { %13571 = vst [vmem:[#allocation71_spill] sm:$0xff] %v11620_v33  ;;  %v5674_v57 = vmul.f32 -1.442695, %v1535_v3  ;;  %vm4143_vm10 = vcmp.eq.s32.totalorder %v13515_v58, %v11623_v61  ;;  %vm4151_vm9 = vcmp.eq.s32.totalorder %v13516_v20, %v11623_v61  ;;  %v11641_v23 = vadd.f32 %v4798_v47, %v4774_v9 }
 0x429   :  { %v3662_v17 = vsel %vm3659_vm14, %v3661_v14, %v3657_v8  ;;  %6373 = vrcp.f32 %v11603_v43  ;;  %v4538_v14 = vunpack.c.l.bf16 %v11620_v33  ;;  %vm11637_vm3 = vmpackc.low %vm4151_vm9, %vm4143_vm10  ;;  %v13573_v8 = vmov 0 }
 0x42a   :  { %v4099_v56 = vmul.f32 %v3662_v17, %v13572_v37  ;;  %v11634_v16 = vpop.eup %6369  ;;  %v13574_v8 = vsel %vm11637_vm3, 4294967295, %v13573_v8  ;;  %6375 = vpow2.f32 %v5673_v53  ;;  %13576 = vst [vmem:[#allocation158_spill] sm:$0xff] %v11641_v23  ;;  %v13577_v19 = vsub.f32 1.0, %v11367_v26  ;;  %5767 = vmatmul.msk.bf16.vlgmr.msrb.gmra.mxu3 %vm11637_vm3, %v13364_v62 }
 0x42b   :  { %13575 = vst [vmem:[#allocation72_spill] sm:$0xff] %v13574_v8  ;;  %6377 = vpow2.f32 %v5674_v57  ;;  %vm3909_vm0 = vweird.f32 %v11273_v39  ;;  %vm3910_vm13 = vweird.f32 %v11344_v55  ;;  %v3913_v47 = vand.u32 2147483647, %v11273_v39 }
 0x42c   :  { %v3907_v37 = vmul.f32 %v11344_v55, %v13577_v19  ;;  %v11650_v20 = vpack.c.bf16 %v4099_v56, %v4099_v56  ;;  %vm11663_vm14 = vmor %vm3909_vm0, %vm3910_vm13  ;;  %v3915_v57 = vand.u32 2147483648, %v11273_v39  ;;  %v13581_v19 = vsub.f32 1.0, %v11445_v59 }
 0x42d   :  { %v11646_v3 = vpop.eup %6371  ;;  %v11678_v40 = vmul.f32 %v11634_v16, %v11580_v42  ;;  %v4666_v8 = vsub.f32 %v4098_v32, %v4538_v14  ;;  %vm3914_vm10 = vcmp.eq.f32.partialorder %v3913_v47, 8.507059e+37  ;;  %vm3924_vm9 = vweird.f32 %v11370_v51 }
 0x42e   :  { %13578 = vst [vmem:[#allocation159_spill] sm:$0xff] %v11650_v20  ;;  %v11657_v53 = vmul.f32 %v11646_v3, %v11587_v13  ;;  %v3908_v26 = vadd.f32 %v11344_v55, %v3907_v37  ;;  %v4539_v29 = vunpack.c.l.bf16 %v11650_v20  ;;  %v3922_v17 = vmul.f32 %v11412_v34, %v13581_v19 }
 0x42f   :  { %v11674_v37 = vmul.f32 %v11618_v38, %v11548_v24  ;;  %v11683_v20 = vpop.eup %6373  ;;  %v3916_v58 = vor.u32 1.1754944e-38, %v3915_v57  ;;  %vm3925_vm0 = vweird.f32 %v11412_v34  ;;  %v3928_v32 = vand.u32 2147483647, %v11370_v51 }
 0x430   :  { %v3912_v33 = vsel %vm11663_vm14, %v11344_v55, %v3908_v26  ;;  %v3756_v39 = vsub.f32 1.0, %v11657_v53  ;;  %v4667_v59 = vsub.f32 %v4099_v56, %v4539_v29  ;;  %v3923_v19 = vadd.f32 %v11412_v34, %v3922_v17  ;;  %v6376_v23 = vpop.eup %6375  ;;  %vm11692_vm13 = vmor %vm3924_vm9, %vm3925_vm0  ;;  %v13584_v29 = vld [vmem:[#allocation144_spill] sm:$0xff] }
 0x431   :  { %v6378_v14 = vpop.eup %6377  ;;  %v11690_v9 = vadd.f32 1.0, %v6376_v23  ;;  %v3917_v55 = vsel %vm3914_vm10, %v3916_v58, %v3912_v33  ;;  %v3930_v56 = vand.u32 2147483648, %v11370_v51  ;;  %vm3929_vm14 = vcmp.eq.f32.partialorder %v3928_v32, 8.507059e+37  ;;  %v13588_v32 = vld [vmem:[#allocation145_spill] sm:$0xff] }
 0x432   :  { %v4742_v13 = vpack.c.bf16 %v4667_v59, %v4666_v8  ;;  %v11697_v17 = vadd.f32 1.0, %v6378_v14  ;;  %v3927_v53 = vsel %vm11692_vm13, %v11412_v34, %v3923_v19  ;;  %v4116_v47 = vmul.f32 %v3917_v55, %v13584_v29 }
 0x433   :  { %6379 = vrcp.f32 %v11690_v9  ;;  %v3931_v8 = vor.u32 1.1754944e-38, %v3930_v56  ;;  %v13585_v58 = vsub.f32 1.0, %v11508_v22  ;;  %vm3879_vm10 = vweird.f32 %v11414_v50  ;;  %v11729_v56 = vpop.f32.mrf.mxu2 }
 0x434   :  { %4907 = vmatpush.bf16.msra.mxu2 %v4742_v13  ;;  %6381 = vrcp.f32 %v11697_v17  ;;  %v11709_v51 = vpack.c.bf16 %v4116_v47, %v4116_v47  ;;  %vm3880_vm9 = vweird.f32 %v11473_v11  ;;  %v3883_v34 = vand.u32 2147483647, %v11414_v50  ;;  %13591 = vst [vmem:[#allocation145_spill] sm:$0xff] %v11729_v56 }
 0x435   :  { %v3877_v33 = vmul.f32 %v11473_v11, %v13585_v58  ;;  %v3932_v23 = vsel %vm3929_vm14, %v3931_v8, %v3927_v53  ;;  %v3885_v57 = vand.u32 2147483648, %v11414_v50  ;;  %v13587_v59 = vsub.f32 1.0, %v11394_v21  ;;  %vm11724_vm0 = vmor %vm3879_vm10, %vm3880_vm9 }
 0x436   :  { %13586 = vst [vmem:[#allocation144_spill] sm:$0xff] %v11709_v51  ;;  %v11720_v19 = vmul.f32 %v11683_v20, %v11603_v43  ;;  %v4117_v14 = vmul.f32 %v3932_v23, %v13588_v32  ;;  %v4556_v55 = vunpack.c.l.bf16 %v11709_v51  ;;  %vm3894_vm13 = vweird.f32 %v11323_v7  ;;  %v11744_v23 = vpop.f32.mrf.mxu3 }
 0x437   :  { %v3878_v13 = vadd.f32 %v11473_v11, %v3877_v33  ;;  %v3892_v22 = vmul.f32 %v11375_v15, %v13587_v59  ;;  %v3886_v21 = vor.u32 1.1754944e-38, %v3885_v57  ;;  %vm3895_vm14 = vweird.f32 %v11375_v15  ;;  %13594 = vst [vmem:[#allocation160_spill] sm:$0xff] %v11744_v23 }
 0x438   :  { %v11736_v29 = vpack.c.bf16 %v4117_v14, %v4117_v14  ;;  %vm3884_vm5 = vcmp.eq.f32.partialorder %v3883_v34, 8.507059e+37  ;;  %vm11738_vm10 = vmor %vm3894_vm13, %vm3895_vm14  ;;  %v3898_v58 = vand.u32 2147483647, %v11323_v7  ;;  %v3900_v33 = vand.u32 2147483648, %v11323_v7 }
 0x439   :  { %v3882_v50 = vsel %vm11724_vm0, %v11473_v11, %v3878_v13  ;;  %v3893_v53 = vadd.f32 %v11375_v15, %v3892_v22  ;;  %v11746_v59 = vpop.eup %6379  ;;  %v1501_v22 = vpop.xlane.xlu2 %1500  ;;  %v11756_v26 = vmul.f32 %v11646_v3, %v3756_v39  ;;  %v4684_v51 = vsub.f32 %v4116_v47, %v4556_v55  ;;  %v13595_v11 = vld [vmem:[#allocation116_spill] sm:$0xff] }
 0x43a   :  { %v3887_v57 = vsel %vm3884_vm5, %v3886_v21, %v3882_v50  ;;  %v11753_v32 = vpop.eup %6381  ;;  %v4557_v23 = vunpack.c.l.bf16 %v11736_v29  ;;  %v3901_v56 = vor.u32 1.1754944e-38, %v3900_v33  ;;  %vm3899_vm9 = vcmp.eq.f32.partialorder %v3898_v58, 8.507059e+37  ;;  %v13597_v33 = vld [vmem:[#allocation126_spill] sm:$0xff] }
 0x43b   :  { %v3897_v34 = vsel %vm11738_vm10, %v11375_v15, %v3893_v53  ;;  %v4114_v13 = vmul.f32 %v3887_v57, %v13595_v11  ;;  %v13596_v50 = vsub.f32 1.0, %v11458_v4  ;;  %v11766_v15 = vmul.f32 %v11746_v59, %v11690_v9 }
 0x43c   :  { %v4685_v53 = vsub.f32 %v4117_v14, %v4557_v23  ;;  %v3902_v39 = vsel %vm3899_vm9, %v3901_v56, %v3897_v34  ;;  %v5657_v8 = vmul.f32 -1.442695, %v1501_v22  ;;  %v11770_v7 = vmul.f32 %v11753_v32, %v11697_v17  ;;  %v13603_v23 = vld [vmem:[#allocation56_spill] sm:$0xff] }
 0x43d   :  { %v3847_v21 = vmul.f32 %v11433_v1, %v13596_v50  ;;  %v4115_v47 = vmul.f32 %v3902_v39, %v13597_v33  ;;  %v11773_v55 = vpack.c.bf16 %v4114_v13, %v4114_v13  ;;  %vm3849_vm5 = vweird.f32 %v11377_v46  ;;  %v4779_v50 = vpop.f32.mrf.mxu2 }
 0x43e   :  { %v4751_v4 = vpack.c.bf16 %v4685_v53, %v4684_v51  ;;  %vm3850_vm0 = vweird.f32 %v11433_v1  ;;  %v3853_v11 = vand.u32 2147483647, %v11377_v46  ;;  %v3855_v57 = vand.u32 2147483648, %v11377_v46  ;;  %v4803_v33 = vpop.f32.mrf.mxu3 }
 0x43f   :  { %v3848_v58 = vadd.f32 %v11433_v1, %v3847_v21  ;;  %v11779_v14 = vpack.c.bf16 %v4115_v47, %v4115_v47  ;;  %v4554_v56 = vunpack.c.l.bf16 %v11773_v55  ;;  %vm11782_vm13 = vmor %vm3849_vm5, %vm3850_vm0  ;;  %v13600_v34 = vsub.f32 1.0, %v11521_v36 }
 0x440   :  { %4930 = vmatpush.bf16.msra.mxu3 %v4751_v4  ;;  %6383 = vpow2.f32 %v5657_v8  ;;  %vm3864_vm14 = vweird.f32 %v11451_v31  ;;  %vm3865_vm10 = vweird.f32 %v11491_v10  ;;  %v3856_v39 = vor.u32 1.1754944e-38, %v3855_v57 }
 0x441   :  { %v3862_v51 = vmul.f32 %v11491_v10, %v13600_v34  ;;  %v3852_v22 = vsel %vm11782_vm13, %v11433_v1, %v3848_v58  ;;  %v4555_v21 = vunpack.c.l.bf16 %v11779_v14  ;;  %v4682_v53 = vsub.f32 %v4114_v13, %v4554_v56  ;;  %vm11797_vm5 = vmor %vm3864_vm14, %vm3865_vm10 }
 0x442   :  { %vm3854_vm9 = vcmp.eq.f32.partialorder %v3853_v11, 8.507059e+37  ;;  %v3868_v8 = vand.u32 2147483647, %v11451_v31  ;;  %v3870_v1 = vand.u32 2147483648, %v11451_v31  ;;  %vm4159_vm0 = vcmp.eq.s32.totalorder %v10356_v60, %v11623_v61 }
 0x443   :  { %v3863_v46 = vadd.f32 %v11491_v10, %v3862_v51  ;;  %v4683_v58 = vsub.f32 %v4115_v47, %v4555_v21  ;;  %v3857_v4 = vsel %vm3854_vm9, %v3856_v39, %v3852_v22  ;;  %vm4167_vm13 = vcmp.eq.s32.totalorder %v10359_v27, %v11623_v61  ;;  %v13608_v39 = vld [vmem:[#allocation100_spill] sm:$0xff] }
 0x444   :  { %v3771_v11 = vsub.f32 1.0, %v11766_v15  ;;  %vm3869_vm14 = vcmp.eq.f32.partialorder %v3868_v8, 8.507059e+37  ;;  %v3871_v56 = vor.u32 1.1754944e-38, %v3870_v1  ;;  %v4112_v57 = vmul.f32 %v3857_v4, %v13603_v23  ;;  %vm11812_vm10 = vmpackc.low %vm4167_vm13, %vm4159_vm0 }
 0x445   :  { %v3867_v13 = vsel %vm11797_vm5, %v11491_v10, %v3863_v46  ;;  %v13604_v31 = vmov 0  ;;  %v4750_v34 = vpack.c.bf16 %v4683_v58, %v4682_v53  ;;  %5769 = vmatmul.msk.bf16.gmra.mxu3 %vm11812_vm10, %v13364_v62  ;;  %v13607_v10 = vsub.f32 1.0, %v11504_v49 }
 0x446   :  { %v13605_v31 = vsel %vm11812_vm10, 4294967295, %v13604_v31  ;;  %vm3609_vm9 = vweird.f32 %v11388_v30  ;;  %vm3610_vm5 = vweird.f32 %v11454_v63  ;;  %v6384_v15 = vpop.eup %6383  ;;  %v3872_v51 = vsel %vm3869_vm14, %v3871_v56, %v3867_v13 }
 0x447   :  { %13606 = vst [vmem:[#allocation116_spill] sm:$0xff] %v13605_v31  ;;  %v3607_v47 = vmul.f32 %v11454_v63, %v13607_v10  ;;  %v11824_v22 = vpack.c.bf16 %v4112_v57, %v4112_v57  ;;  %v3613_v21 = vand.u32 2147483647, %v11388_v30  ;;  %v3615_v53 = vand.u32 2147483648, %v11388_v30  ;;  %4931 = vmatpush.bf16.msra.mxu3 %v4750_v34  ;;  %vm3611_vm13 = vmor %vm3609_vm9, %vm3610_vm5 }
 0x448   :  { %v4113_v46 = vmul.f32 %v3872_v51, %v13608_v39  ;;  %v13609_v49 = vsub.f32 1.0, %v11572_v12  ;;  %vm3624_vm0 = vweird.f32 %v11476_v18  ;;  %v3628_v56 = vand.u32 2147483647, %v11476_v18  ;;  %v11849_v51 = vpop.f32.mrf.mxu2 }
 0x449   :  { %v3608_v36 = vadd.f32 %v11454_v63, %v3607_v47  ;;  %v4552_v1 = vunpack.c.l.bf16 %v11824_v22  ;;  %vm3614_vm14 = vcmp.eq.f32.partialorder %v3613_v21, 8.507059e+37  ;;  %v3616_v58 = vor.u32 1.1754944e-38, %v3615_v53  ;;  %vm11842_vm10 = vmor %vm3624_vm0, %vm3625_vm6  ;;  %13612 = vst [vmem:[#allocation126_spill] sm:$0xff] %v11849_v51 }
 0x44a   :  { %v3622_v8 = vmul.f32 %v11534_v28, %v13609_v49  ;;  %v11836_v4 = vpack.c.bf16 %v4113_v46, %v4113_v46  ;;  %v3786_v12 = vsub.f32 1.0, %v11770_v7  ;;  %v3630_v10 = vand.u32 2147483648, %v11476_v18  ;;  %v13613_v49 = vld [vmem:[#allocation69_spill] sm:$0xff] }
 0x44b   :  { %v3612_v30 = vsel %vm3611_vm13, %v11454_v63, %v3608_v36  ;;  %v11847_v47 = vadd.f32 %v4803_v33, %v4779_v50  ;;  %v11852_v21 = vmul.f32 %v11746_v59, %v3771_v11  ;;  %v4680_v53 = vsub.f32 %v4112_v57, %v4552_v1  ;;  %v11862_v33 = vpop.f32.mrf.mxu3 }
 0x44c   :  { %v3623_v13 = vadd.f32 %v11534_v28, %v3622_v8  ;;  %v3617_v23 = vsel %vm3614_vm14, %v3616_v58, %v3612_v30  ;;  %v4553_v63 = vunpack.c.l.bf16 %v11836_v4  ;;  %vm3629_vm6 = vcmp.eq.f32.partialorder %v3628_v56, 8.507059e+37  ;;  %13615 = vst [vmem:[#allocation56_spill] sm:$0xff] %v11862_v33  ;;  %v13616_v56 = vld [vmem:[#allocation70_spill] sm:$0xff] }
 0x44d   :  { %v3631_v36 = vor.u32 1.1754944e-38, %v3630_v10  ;;  %v4096_v8 = vmul.f32 %v3617_v23, %v13613_v49  ;;  %v13614_v18 = vsub.f32 1.0, %v11616_v25  ;;  %vm3579_vm9 = vweird.f32 %v11524_v54 }
 0x44e   :  { %v3627_v39 = vsel %vm11842_vm10, %v11534_v28, %v3623_v13  ;;  %v4681_v58 = vsub.f32 %v4113_v46, %v4553_v63  ;;  %vm3580_vm5 = vweird.f32 %v11577_v2  ;;  %v3583_v11 = vand.u32 2147483647, %v11524_v54 }
 0x44f   :  { %v3577_v50 = vmul.f32 %v11577_v2, %v13614_v18  ;;  %v3632_v57 = vsel %vm3629_vm6, %v3631_v36, %v3627_v39  ;;  %v11867_v1 = vpack.c.bf16 %v4096_v8, %v4096_v8  ;;  %v3585_v30 = vand.u32 2147483648, %v11524_v54  ;;  %vm3581_vm10 = vmor %vm3579_vm9, %vm3580_vm5 }
 0x450   :  { %v11871_v13 = vadd.f32 1.0, %v6384_v15  ;;  %v4749_v25 = vpack.c.bf16 %v4681_v58, %v4680_v53  ;;  %v4097_v23 = vmul.f32 %v3632_v57, %v13616_v56  ;;  %vm3584_vm0 = vcmp.eq.f32.partialorder %v3583_v11, 8.507059e+37 }
 0x451   :  { %v3578_v28 = vadd.f32 %v11577_v2, %v3577_v50  ;;  %v4536_v46 = vunpack.c.l.bf16 %v11867_v1  ;;  %v3586_v10 = vor.u32 1.1754944e-38, %v3585_v30  ;;  %v13617_v63 = vsub.f32 1.0, %v11515_v0  ;;  %v13618_v0 = vld [vmem:[#allocation63_spill] sm:$0xff] }
 0x452   :  { %4932 = vmatpush.bf16.msra.mxu3 %v4749_v25  ;;  %v11879_v36 = vpack.c.bf16 %v4097_v23, %v4097_v23  ;;  %vm3594_vm13 = vweird.f32 %v11439_v41  ;;  %vm3595_vm14 = vweird.f32 %v11484_v44  ;;  %v3598_v54 = vand.u32 2147483647, %v11439_v41 }
 0x453   :  { %v3582_v34 = vsel %vm3581_vm10, %v11577_v2, %v3578_v28  ;;  %v3592_v39 = vmul.f32 %v11484_v44, %v13617_v63  ;;  %v4664_v15 = vsub.f32 %v4096_v8, %v4536_v46  ;;  %v3600_v2 = vand.u32 2147483648, %v11439_v41  ;;  %vm3596_vm6 = vmor %vm3594_vm13, %vm3595_vm14  ;;  %v11894_v8 = vpop.f32.mrf.mxu2  ;;  %v13628_v46 = vld [vmem:[#allocation85_spill] sm:$0xff] }
 0x454   :  { %v3587_v53 = vsel %vm3584_vm0, %v3586_v10, %v3582_v34  ;;  %v4537_v18 = vunpack.c.l.bf16 %v11879_v36  ;;  %vm3599_vm9 = vcmp.eq.f32.partialorder %v3598_v54, 8.507059e+37  ;;  %v13619_v58 = vsub.f32 1.0, %v11568_v35 }
 0x455   :  { %v3593_v49 = vadd.f32 %v11484_v44, %v3592_v39  ;;  %v4094_v50 = vmul.f32 %v3587_v53, %v13618_v0  ;;  %v3601_v28 = vor.u32 1.1754944e-38, %v3600_v2  ;;  %vm3549_vm5 = vweird.f32 %v11487_v52  ;;  %v13623_v39 = vld [vmem:[#allocation67_spill] sm:$0xff] }
 0x456   :  { %v3547_v11 = vmul.f32 %v11544_v6, %v13619_v58  ;;  %vm3550_vm10 = vweird.f32 %v11544_v6  ;;  %v4665_v41 = vsub.f32 %v4097_v23, %v4537_v18  ;;  %v3553_v56 = vand.u32 2147483647, %v11487_v52  ;;  %v11909_v23 = vpop.f32.mrf.mxu3 }
 0x457   :  { %v3597_v57 = vsel %vm3596_vm6, %v11484_v44, %v3593_v49  ;;  %v11896_v30 = vpack.c.bf16 %v4094_v50, %v4094_v50  ;;  %6385 = vrcp.f32 %v11871_v13  ;;  %vm11901_vm0 = vmor %vm3549_vm5, %vm3550_vm10  ;;  %v3555_v44 = vand.u32 2147483648, %v11487_v52 }
 0x458   :  { %v3548_v25 = vadd.f32 %v11544_v6, %v3547_v11  ;;  %v3602_v35 = vsel %vm3599_vm9, %v3601_v28, %v3597_v57  ;;  %v13622_v34 = vsub.f32 1.0, %v11674_v37  ;;  %v4741_v63 = vpack.c.bf16 %v4665_v41, %v4664_v15  ;;  %v13626_v57 = vld [vmem:[#allocation89_spill] sm:$0xff] }
 0x459   :  { %v4095_v54 = vmul.f32 %v3602_v35, %v13623_v39  ;;  %v4534_v53 = vunpack.c.l.bf16 %v11896_v30  ;;  %v3556_v2 = vor.u32 1.1754944e-38, %v3555_v44  ;;  %vm3564_vm13 = vweird.f32 %v11548_v24 }
 0x45a   :  { %v3562_v10 = vmul.f32 %v11618_v38, %v13622_v34  ;;  %v3552_v49 = vsel %vm11901_vm0, %v11544_v6, %v3548_v25  ;;  %vm3565_vm14 = vweird.f32 %v11618_v38  ;;  %4908 = vmatpush.bf16.msra.mxu2 %v4741_v63  ;;  %vm3554_vm6 = vcmp.eq.f32.partialorder %v3553_v56, 8.507059e+37  ;;  %v13627_v25 = vld [vmem:[#allocation50_spill] sm:$0xff] }
 0x45b   :  { %v11919_v52 = vpack.c.bf16 %v4095_v54, %v4095_v54  ;;  %vm11921_vm9 = vmor %vm3564_vm13, %vm3565_vm14  ;;  %v3568_v15 = vand.u32 2147483647, %v11548_v24  ;;  %v3570_v0 = vand.u32 2147483648, %v11548_v24  ;;  %v4662_v6 = vsub.f32 %v4094_v50, %v4534_v53  ;;  %v13630_v50 = vld [vmem:[#allocation156_spill] sm:$0xff]  ;;  %v13631_v34 = vld [vmem:[#allocation90_spill] sm:$0xff]  ;;  %v11959_v37 = vpop.f32.mrf.mxu2 }
 0x45c   :  { %v3563_v18 = vadd.f32 %v11618_v38, %v3562_v10  ;;  %v3557_v58 = vsel %vm3554_vm6, %v3556_v2, %v3552_v49  ;;  %vm4175_vm5 = vcmp.eq.s32.totalorder %v13626_v57, %v11623_v61  ;;  %vm4183_vm0 = vcmp.eq.s32.totalorder %v13628_v46, %v11623_v61  ;;  %v13636_v49 = vld [vmem:[#allocation58_spill] sm:$0xff]  ;;  %13638 = vst [vmem:[#allocation70_spill] sm:$0xff] %v11959_v37  ;;  %v13721_v37 = vld [vmem:[#allocation29_spill] sm:$0xff] }
 0x45d   :  { %v4535_v28 = vunpack.c.l.bf16 %v11919_v52  ;;  %vm3569_vm10 = vcmp.eq.f32.partialorder %v3568_v15, 8.507059e+37  ;;  %v3571_v41 = vor.u32 1.1754944e-38, %v3570_v0  ;;  %v4092_v56 = vmul.f32 %v3557_v58, %v13627_v25  ;;  %v11934_v35 = vpop.eup %6385  ;;  %vm11945_vm6 = vmpackc.low %vm4183_vm0, %vm4175_vm5 }
 0x45e   :  { %v3567_v11 = vsel %vm11921_vm9, %v11618_v38, %v3563_v18  ;;  %v13629_v24 = vsub.f32 1.0, %v11593_v5  ;;  %vm3819_vm13 = vweird.f32 %v13631_v34  ;;  %vm3820_vm14 = vweird.f32 %v13630_v50  ;;  %5771 = vmatmul.msk.bf16.gmra.mxu3 %vm11945_vm6, %v13364_v62 }
 0x45f   :  { %v4663_v38 = vsub.f32 %v4095_v54, %v4535_v28  ;;  %v3572_v10 = vsel %vm3569_vm10, %v3571_v41, %v3567_v11  ;;  %v11943_v63 = vpack.c.bf16 %v4092_v56, %v4092_v56  ;;  %v13633_v39 = vmov 0  ;;  %vm3821_vm9 = vmor %vm3819_vm13, %vm3820_vm14  ;;  %v11969_v41 = vpop.f32.mrf.mxu3 }
 0x460   :  { %v3817_v44 = vmul.f32 %v13630_v50, %v13629_v24  ;;  %v13634_v39 = vsel %vm11945_vm6, 4294967295, %v13633_v39  ;;  %v3823_v53 = vand.u32 2147483647, %v13631_v34  ;;  %v4093_v61 = vmul.f32 %v3572_v10, %v13636_v49  ;;  %13639 = vst [vmem:[#allocation63_spill] sm:$0xff] %v11969_v41  ;;  %v13641_v49 = vld [vmem:[#allocation68_spill] sm:$0xff] }
 0x461   :  { %13632 = vst [vmem:[#allocation100_spill] sm:$0xff] %v11943_v63  ;;  %v3825_v2 = vand.u32 2147483648, %v13631_v34  ;;  %v13637_v54 = vsub.f32 1.0, %v11678_v40  ;;  %v4740_v15 = vpack.c.bf16 %v4663_v38, %v4662_v6  ;;  %v4532_v0 = vunpack.c.l.bf16 %v11943_v63  ;;  %v13640_v38 = vld [vmem:[#allocation91_spill] sm:$0xff]  ;;  %v13754_v63 = vld [vmem:[#allocation96_spill] sm:$0xff] }
 0x462   :  { %13635 = vst [vmem:[#allocation69_spill] sm:$0xff] %v13634_v39  ;;  %v3818_v5 = vadd.f32 %v13630_v50, %v3817_v44  ;;  %vm3824_vm5 = vcmp.eq.f32.partialorder %v3823_v53, 8.507059e+37  ;;  %vm3834_vm10 = vweird.f32 %v11580_v42  ;;  %v11965_v58 = vpack.c.bf16 %v4093_v61, %v4093_v61  ;;  %v13698_v39 = vld [vmem:[#allocation117_spill] sm:$0xff] }
 0x463   :  { %v3832_v18 = vmul.f32 %v11634_v16, %v13637_v54  ;;  %v3826_v28 = vor.u32 1.1754944e-38, %v3825_v2  ;;  %4909 = vmatpush.bf16.msra.mxu2 %v4740_v15  ;;  %v4660_v25 = vsub.f32 %v4092_v56, %v4532_v0  ;;  %vm3835_vm0 = vweird.f32 %v11634_v16 }
 0x464   :  { %v3822_v11 = vsel %vm3821_vm9, %v13630_v50, %v3818_v5  ;;  %v3838_v6 = vand.u32 2147483647, %v11580_v42  ;;  %v3840_v24 = vand.u32 2147483648, %v11580_v42  ;;  %v4533_v44 = vunpack.c.l.bf16 %v11965_v58  ;;  %vm3836_vm13 = vmor %vm3834_vm10, %vm3835_vm0 }
 0x465   :  { %v3833_v40 = vadd.f32 %v11634_v16, %v3832_v18  ;;  %v3827_v34 = vsel %vm3824_vm5, %v3826_v28, %v3822_v11  ;;  %v4818_v50 = vadd.f32 %v11894_v8, %v13640_v38  ;;  %v3787_v10 = vmul.f32 %v11753_v32, %v3786_v12  ;;  %v13642_v12 = vld [vmem:[#allocation60_spill] sm:$0xff]  ;;  %v13654_v38 = vld [vmem:[#allocation130_spill] sm:$0xff] }
 0x466   :  { %vm3839_vm14 = vcmp.eq.f32.partialorder %v3838_v6, 8.507059e+37  ;;  %v3841_v56 = vor.u32 1.1754944e-38, %v3840_v24  ;;  %v4110_v5 = vmul.f32 %v3827_v34, %v13641_v49  ;;  %v4661_v2 = vsub.f32 %v4093_v61, %v4533_v44  ;;  %v13646_v6 = vld [vmem:[#allocation73_spill] sm:$0xff] }
 0x467   :  { %v3837_v53 = vsel %vm3836_vm13, %v11634_v16, %v3833_v40  ;;  %v11983_v42 = vadd.f32 %v11909_v23, %v4818_v50  ;;  %v3788_v54 = vadd.f32 %v11753_v32, %v3787_v10  ;;  %vm3789_vm9 = vweird.f32 %v11697_v17 }
 0x468   :  { %v3842_v18 = vsel %vm3839_vm14, %v3841_v56, %v3837_v53  ;;  %v11987_v8 = vpack.c.bf16 %v4110_v5, %v4110_v5  ;;  %vm3790_vm5 = vweird.f32 %v11753_v32  ;;  %v3793_v7 = vand.u32 2147483647, %v11697_v17 }
 0x469   :  { %v4739_v16 = vpack.c.bf16 %v4661_v2, %v4660_v25  ;;  %v4111_v15 = vmul.f32 %v3842_v18, %v13642_v12  ;;  %vm11992_vm10 = vmor %vm3789_vm9, %vm3790_vm5  ;;  %v3795_v23 = vand.u32 2147483648, %v11697_v17  ;;  %v13645_v61 = vsub.f32 1.0, %v11612_v48  ;;  %v12011_v48 = vpop.f32.mrf.mxu2 }
 0x46a   :  { %v3530_v28 = vmul.f32 %v11934_v35, %v11871_v13  ;;  %v4550_v40 = vunpack.c.l.bf16 %v11987_v8  ;;  %v3792_v25 = vsel %vm11992_vm10, %v11753_v32, %v3788_v54  ;;  %vm3804_vm0 = vweird.f32 %v13646_v6  ;;  %v13649_v54 = vld [vmem:[#allocation59_spill] sm:$0xff] }
 0x46b   :  { %v3802_v11 = vmul.f32 %v11585_v45, %v13645_v61  ;;  %4910 = vmatpush.bf16.msra.mxu2 %v4739_v16  ;;  %v12007_v24 = vpack.c.bf16 %v4111_v15, %v4111_v15  ;;  %v3796_v44 = vor.u32 1.1754944e-38, %v3795_v23  ;;  %vm3805_vm13 = vweird.f32 %v11585_v45 }
 0x46c   :  { %v4678_v34 = vsub.f32 %v4110_v5, %v4550_v40  ;;  %vm3794_vm14 = vcmp.eq.f32.partialorder %v3793_v7, 8.507059e+37  ;;  %vm12013_vm9 = vmor %vm3804_vm0, %vm3805_vm13  ;;  %v3808_v32 = vand.u32 2147483647, %v13646_v6  ;;  %v3810_v50 = vand.u32 2147483648, %v13646_v6  ;;  %v12025_v5 = vpop.f32.mrf.mxu3  ;;  %v13650_v7 = vld [vmem:[#allocation157_spill] sm:$0xff] }
 0x46d   :  { %v3803_v17 = vadd.f32 %v11585_v45, %v3802_v11  ;;  %v4551_v10 = vunpack.c.l.bf16 %v12007_v24  ;;  %v3797_v53 = vsel %vm3794_vm14, %v3796_v44, %v3792_v25  ;;  %v3758_v49 = vadd.f32 %v11646_v3, %v11756_v26  ;;  %v13653_v25 = vld [vmem:[#allocation52_spill] sm:$0xff] }
 0x46e   :  { %vm3809_vm5 = vcmp.eq.f32.partialorder %v3808_v32, 8.507059e+37  ;;  %v3811_v2 = vor.u32 1.1754944e-38, %v3810_v50  ;;  %v4108_v18 = vmul.f32 %v3797_v53, %v13649_v54  ;;  %vm3759_vm10 = vweird.f32 %v13650_v7  ;;  %v13671_v32 = vld [vmem:[#allocation150_spill] sm:$0xff] }
 0x46f   :  { %v3807_v56 = vsel %vm12013_vm9, %v11585_v45, %v3803_v17  ;;  %v4679_v16 = vsub.f32 %v4111_v15, %v4551_v10  ;;  %vm3760_vm0 = vweird.f32 %v11646_v3  ;;  %v3763_v12 = vand.u32 2147483647, %v13650_v7  ;;  %v13658_v10 = vld [vmem:[#allocation129_spill] sm:$0xff] }
 0x470   :  { %v3765_v0 = vand.u32 2147483648, %v13650_v7  ;;  %v3531_v23 = vsub.f32 1.0, %v3530_v28  ;;  %v3812_v45 = vsel %vm3809_vm5, %v3811_v2, %v3807_v56  ;;  %v12032_v61 = vpack.c.bf16 %v4108_v18, %v4108_v18  ;;  %vm12034_vm13 = vmor %vm3759_vm10, %vm3760_vm0 }
 0x471   :  { %v3773_v11 = vadd.f32 %v11746_v59, %v11852_v21  ;;  %v4748_v40 = vpack.c.bf16 %v4679_v16, %v4678_v34  ;;  %v4109_v15 = vmul.f32 %v3812_v45, %v13653_v25  ;;  %v3762_v6 = vsel %vm12034_vm13, %v11646_v3, %v3758_v49  ;;  %v12056_v50 = vpop.f32.mrf.mxu2  ;;  %v6444_v34 = vld [vmem:[#allocation5] sm:$0xff] }
 0x472   :  { %vm3774_vm14 = vweird.f32 %v11690_v9  ;;  %v4548_v28 = vunpack.c.l.bf16 %v12032_v61  ;;  %v3766_v44 = vor.u32 1.1754944e-38, %v3765_v0  ;;  %vm3775_vm9 = vweird.f32 %v11746_v59  ;;  %13657 = vst [vmem:[#allocation67_spill] sm:$0xff] %v12056_v50  ;;  %v13718_v50 = vld [vmem:[#allocation37_spill] sm:$0xff] }
 0x473   :  { %v3778_v17 = vand.u32 2147483647, %v11690_v9  ;;  %4933 = vmatpush.bf16.msra.mxu3 %v4748_v40  ;;  %v12049_v21 = vpack.c.bf16 %v4109_v15, %v4109_v15  ;;  %vm3764_vm5 = vcmp.eq.f32.partialorder %v3763_v12, 8.507059e+37  ;;  %vm12051_vm10 = vmor %vm3774_vm14, %vm3775_vm9  ;;  %v3780_v3 = vand.u32 2147483648, %v11690_v9  ;;  %v13659_v12 = vld [vmem:[#allocation98_spill] sm:$0xff] }
 0x474   :  { %v3532_v56 = vmul.f32 %v11934_v35, %v3531_v23  ;;  %v3767_v49 = vsel %vm3764_vm5, %v3766_v44, %v3762_v6  ;;  %v3777_v2 = vsel %vm12051_vm10, %v11746_v59, %v3773_v11  ;;  %v4676_v7 = vsub.f32 %v4108_v18, %v4548_v28  ;;  %v12073_v11 = vpop.f32.mrf.mxu3  ;;  %v13662_v18 = vld [vmem:[#allocation99_spill] sm:$0xff] }
 0x475   :  { %v4549_v54 = vunpack.c.l.bf16 %v12049_v21  ;;  %v3781_v16 = vor.u32 1.1754944e-38, %v3780_v3  ;;  %v4106_v0 = vmul.f32 %v3767_v49, %v13659_v12  ;;  %vm3779_vm0 = vcmp.eq.f32.partialorder %v3778_v17, 8.507059e+37  ;;  %13661 = vst [vmem:[#allocation89_spill] sm:$0xff] %v12073_v11 }
 0x476   :  { %v13660_v9 = vsub.f32 1.0, %v11720_v19  ;;  %vm3519_vm13 = vweird.f32 %v11603_v43  ;;  %vm3520_vm14 = vweird.f32 %v11683_v20  ;;  %v3523_v59 = vand.u32 2147483647, %v11603_v43 }
 0x477   :  { %v4677_v23 = vsub.f32 %v4109_v15, %v4549_v54  ;;  %v3782_v26 = vsel %vm3779_vm0, %v3781_v16, %v3777_v2  ;;  %v12070_v40 = vpack.c.bf16 %v4106_v0, %v4106_v0  ;;  %v3525_v19 = vand.u32 2147483648, %v11603_v43  ;;  %vm12084_vm9 = vmor %vm3519_vm13, %vm3520_vm14  ;;  %v13667_v16 = vld [vmem:[#allocation158_spill] sm:$0xff] }
 0x478   :  { %v3517_v45 = vmul.f32 %v11683_v20, %v13660_v9  ;;  %v4107_v25 = vmul.f32 %v3782_v26, %v13662_v18  ;;  %v3533_v28 = vadd.f32 %v11934_v35, %v3532_v56  ;;  %v12080_v15 = vperm.slane %v6444_v34, 7  ;;  %v13669_v18 = vld [vmem:[#allocation132_spill] sm:$0xff] }
 0x479   :  { %v4747_v44 = vpack.c.bf16 %v4677_v23, %v4676_v7  ;;  %v4546_v17 = vunpack.c.l.bf16 %v12070_v40  ;;  %vm3534_vm5 = vweird.f32 %v11871_v13  ;;  %v3526_v2 = vor.u32 1.1754944e-38, %v3525_v19  ;;  %v4827_v9 = vpop.f32.mrf.mxu2 }
 0x47a   :  { %v3518_v6 = vadd.f32 %v11683_v20, %v3517_v45  ;;  %v12089_v49 = vpack.c.bf16 %v4107_v25, %v4107_v25  ;;  %vm3535_vm10 = vweird.f32 %v11934_v35  ;;  %vm3524_vm0 = vcmp.eq.f32.partialorder %v3523_v59, 8.507059e+37  ;;  %v13668_v45 = vld [vmem:[#allocation128_spill] sm:$0xff] }
 0x47b   :  { %4934 = vmatpush.bf16.msra.mxu3 %v4747_v44  ;;  %vm12095_vm6 = vmor %vm3534_vm5, %vm3535_vm10  ;;  %v3538_v43 = vand.u32 2147483647, %v11871_v13  ;;  %v3540_v7 = vand.u32 2147483648, %v11871_v13  ;;  %v4823_v12 = vadd.f32 %v12011_v48, %v13667_v16  ;;  %v5126_v23 = vunpack.c.l.b16 %v13668_v45  ;;  %v13670_v44 = vld [vmem:[#allocation45_spill] sm:$0xff]  ;;  %v13672_v45 = vld [vmem:[#allocation107_spill] sm:$0xff] }
 0x47c   :  { %v3522_v56 = vsel %vm12084_vm9, %v11683_v20, %v3518_v6  ;;  %v4547_v20 = vunpack.c.l.bf16 %v12089_v49  ;;  %v3537_v59 = vsel %vm12095_vm6, %v11934_v35, %v3533_v28  ;;  %v5127_v6 = vunpack.c.l.b16 %v13669_v18 }
 0x47d   :  { %v3527_v26 = vsel %vm3524_vm0, %v3526_v2, %v3522_v56  ;;  %v3541_v19 = vor.u32 1.1754944e-38, %v3540_v7  ;;  %v12111_v13 = vadd.f32 %v12025_v5, %v4823_v12  ;;  %v5143_v48 = vunpack.c.l.b16 %v13671_v32  ;;  %v13673_v56 = vld [vmem:[#allocation135_spill] sm:$0xff]  ;;  %v13677_v32 = vld [vmem:[#allocation137_spill] sm:$0xff] }
 0x47e   :  { %v4090_v3 = vmul.f32 %v3527_v26, %v13670_v44  ;;  %v4674_v16 = vsub.f32 %v4106_v0, %v4546_v17  ;;  %v4675_v53 = vsub.f32 %v4107_v25, %v4547_v20  ;;  %vm3539_vm13 = vcmp.eq.f32.partialorder %v3538_v43, 8.507059e+37  ;;  %v13675_v2 = vld [vmem:[#allocation131_spill] sm:$0xff]  ;;  %v13678_v25 = vld [vmem:[#allocation146_spill] sm:$0xff]  ;;  %v4851_v20 = vpop.f32.mrf.mxu3  ;;  %v13684_v44 = vld [vmem:[#allocation133_spill] sm:$0xff] }
 0x47f   :  { %vm4145_vm14 = vcmp.eq.s32.totalorder %v13672_v45, %v12080_v15  ;;  %vm4153_vm9 = vcmp.eq.s32.totalorder %v13673_v56, %v12080_v15  ;;  %v3542_v35 = vsel %vm3539_vm13, %v3541_v19, %v3537_v59  ;;  %v5124_v54 = vunpack.c.l.b16 %v13675_v2  ;;  %v13676_v26 = vld [vmem:[#allocation47_spill] sm:$0xff] }
 0x480   :  { %v12118_v28 = vpack.c.bf16 %v4090_v3, %v4090_v3  ;;  %v4746_v7 = vpack.c.bf16 %v4675_v53, %v4674_v16  ;;  %v4091_v5 = vmul.f32 %v3542_v35, %v13676_v26  ;;  %v4828_v12 = vadd.f32 %v4827_v9, %v11847_v47  ;;  %vm12128_vm6 = vmpackc.low %vm4153_vm9, %vm4145_vm14 }
 0x481   :  { %v5120_v0 = vunpack.c.l.b16 %v13677_v32  ;;  %v5142_v17 = vunpack.c.l.b16 %v13678_v25  ;;  %v12126_v18 = vpack.c.b16 %v5127_v6, %v5126_v23  ;;  %v13679_v59 = vmov 0  ;;  %v13687_v23 = vld [vmem:[#allocation62_spill] sm:$0xff] }
 0x482   :  { %13674 = vst [vmem:[#allocation50_spill] sm:$0xff] %v12118_v28  ;;  %v4530_v43 = vunpack.c.l.bf16 %v12118_v28  ;;  %4935 = vmatpush.bf16.msra.mxu3 %v4746_v7  ;;  %v13680_v59 = vsel %vm12128_vm6, 4294967295, %v13679_v59  ;;  %v12132_v19 = vpack.c.bf16 %v4091_v5, %v4091_v5  ;;  %v12134_v53 = vadd.f32 %v4851_v20, %v4828_v12  ;;  %v12149_v7 = vpop.f32.mrf.mxu2  ;;  %v13689_v12 = vld [vmem:[#allocation134_spill] sm:$0xff]  ;;  %v13693_v20 = vld [vmem:[#allocation125_spill] sm:$0xff] }
 0x483   :  { %13681 = vst [vmem:[#allocation85_spill] sm:$0xff] %v13680_v59  ;;  %v13683_v47 = vunpack.c.l.b16 %v13658_v10  ;;  %v13685_v16 = vunpack.c.l.b16 %v13684_v44  ;;  %v13686_v35 = vunpack.c.l.b16 %v13654_v38  ;;  %v12147_v6 = vperm.slane %v6444_v34, 6  ;;  %v13691_v10 = vld [vmem:[#allocation122_spill] sm:$0xff]  ;;  %v13695_v38 = vld [vmem:[#allocation147_spill] sm:$0xff] }
 0x484   :  { %13682 = vst [vmem:[#allocation156_spill] sm:$0xff] %v12132_v19  ;;  %v12151_v26 = vpack.c.b16 %v5143_v48, %v5142_v17  ;;  %v13690_v32 = vunpack.c.l.b16 %v13689_v12  ;;  %v13696_v34 = vld [vmem:[#allocation115_spill] sm:$0xff]  ;;  %v13700_v17 = vld [vmem:[#allocation113_spill] sm:$0xff]  ;;  %vm4161_vm13 = vcmp.eq.s32.totalorder %v10356_v60, %v12080_v15  ;;  %vm4169_vm14 = vcmp.eq.s32.totalorder %v10359_v27, %v12080_v15 }
 0x485   :  { %v12138_v9 = vpack.c.b16 %v13683_v47, %v5124_v54  ;;  %v12144_v2 = vpack.c.b16 %v13686_v35, %v13685_v16  ;;  %13688 = vst [vmem:[#allocation90_spill] sm:$0xff] %v12149_v7  ;;  %v13692_v54 = vunpack.c.l.b16 %v13691_v10  ;;  %v13694_v47 = vunpack.c.l.b16 %v13693_v20  ;;  %5779 = vmatmul.msk.bf16.vlgmr.msra.gmra.mxu3 %vm12128_vm6, %v13364_v62  ;;  %v13704_v10 = vld [vmem:[#allocation49_spill] sm:$0xff]  ;;  %v13706_v20 = vld [vmem:[#allocation51_spill] sm:$0xff]  ;;  %vm12250_vm9 = vmpackc.low %vm4169_vm14, %vm4161_vm13 }
 0x486   :  { %5360 = vmatpush.bf16.msrb.mxu3 %v13687_v23  ;;  %v12155_v25 = vpack.c.b16 %v13690_v32, %v5120_v0  ;;  %v5141_v16 = vunpack.c.l.b16 %v13695_v38  ;;  %v4531_v35 = vunpack.c.l.bf16 %v12132_v19  ;;  %v13697_v23 = vunpack.c.l.b16 %v13696_v34  ;;  %v13702_v0 = vld [vmem:[#allocation114_spill] sm:$0xff]  ;;  %v13708_v34 = vld [vmem:[#allocation123_spill] sm:$0xff] }
 0x487   :  { %v12161_v44 = vpack.c.b16 %v13694_v47, %v13692_v54  ;;  %v13699_v7 = vunpack.c.l.b16 %v13698_v39  ;;  %v13701_v12 = vunpack.c.l.b16 %v13700_v17  ;;  %v13703_v32 = vunpack.c.l.b16 %v13702_v0  ;;  %v13712_v17 = vld [vmem:[#allocation120_spill] sm:$0xff]  ;;  %v13716_v59 = vld [vmem:[#allocation35_spill] sm:$0xff] }
 0x488   :  { %v13705_v54 = vunpack.c.l.b16 %v13704_v10  ;;  %v13707_v47 = vunpack.c.l.b16 %v13706_v20  ;;  %v13709_v39 = vunpack.c.l.b16 %v13708_v34  ;;  %v13713_v0 = vunpack.c.l.b16 %v13712_v17  ;;  %v13725_v17 = vld [vmem:[#allocation83_spill] sm:$0xff] }
 0x489   :  { %v12169_v48 = vpack.c.b16 %v13699_v7, %v13697_v23  ;;  %v12175_v33 = vpack.c.b16 %v13703_v32, %v13701_v12  ;;  %v13710_v7 = vld [vmem:[#allocation124_spill] sm:$0xff]  ;;  %v13714_v12 = vld [vmem:[#allocation121_spill] sm:$0xff]  ;;  %v13717_v31 = vunpack.c.l.b16 %v13716_v59  ;;  %v13719_v10 = vunpack.c.l.b16 %v13718_v50 }
 0x48a   :  { %v12184_v38 = vpack.c.b16 %v13707_v47, %v13705_v54  ;;  %v13711_v23 = vunpack.c.l.b16 %v13710_v7  ;;  %v13715_v32 = vunpack.c.l.b16 %v13714_v12  ;;  %v13720_v54 = vld [vmem:[#allocation149_spill] sm:$0xff]  ;;  %v4658_v47 = vsub.f32 %v4090_v3, %v4530_v43  ;;  %5361 = vmatpush.bf16.msrb.mxu3 %v13725_v17  ;;  %v13727_v3 = vld [vmem:[#allocation152_spill] sm:$0xff]  ;;  %v13731_v43 = vld [vmem:[#allocation103_spill] sm:$0xff] }
 0x48b   :  { %v12202_v41 = vpack.c.b16 %v13719_v10, %v13717_v31  ;;  %v5140_v20 = vunpack.c.l.b16 %v13720_v54  ;;  %v4659_v34 = vsub.f32 %v4091_v5, %v4531_v35  ;;  %v13722_v7 = vunpack.c.l.b16 %v13721_v37  ;;  %v13726_v31 = vld [vmem:[#allocation151_spill] sm:$0xff]  ;;  %v13732_v35 = vld [vmem:[#allocation84_spill] sm:$0xff]  ;;  %v13733_v12 = vld [vmem:[#allocation154_spill] sm:$0xff] }
 0x48c   :  { %v12190_v51 = vpack.c.b16 %v13711_v23, %v13709_v39  ;;  %v12196_v11 = vpack.c.b16 %v13715_v32, %v13713_v0  ;;  %v13723_v39 = vld [vmem:[#allocation31_spill] sm:$0xff]  ;;  %vm4144_vm5 = vcmp.eq.s32.totalorder %v13672_v45, %v12147_v6  ;;  %vm4152_vm10 = vcmp.eq.s32.totalorder %v13673_v56, %v12147_v6  ;;  %v4865_v45 = vpop.f32.mrf.mxu2 }
 0x48d   :  { %v13724_v23 = vunpack.c.l.b16 %v13723_v39  ;;  %v5139_v50 = vunpack.c.l.b16 %v13726_v31  ;;  %v4738_v59 = vpack.c.bf16 %v4659_v34, %v4658_v47  ;;  %v12217_v0 = vpack.c.b16 %v5141_v16, %v5140_v20  ;;  %vm12220_vm0 = vmpackc.low %vm4152_vm10, %vm4144_vm5  ;;  %v13734_v16 = vld [vmem:[#allocation79_spill] sm:$0xff]  ;;  %v13735_v20 = vld [vmem:[#allocation110_spill] sm:$0xff] }
 0x48e   :  { %v5138_v5 = vunpack.c.l.b16 %v13727_v3  ;;  %v13728_v37 = vmov 0  ;;  %5362 = vmatpush.bf16.msrb.mxu3 %v13732_v35  ;;  %v5137_v32 = vunpack.c.l.b16 %v13733_v12  ;;  %v12228_v56 = vadd.f32 %v4865_v45, %v11983_v42  ;;  %v13736_v34 = vld [vmem:[#allocation78_spill] sm:$0xff]  ;;  %v13737_v39 = vld [vmem:[#allocation61_spill] sm:$0xff]  ;;  %v13739_v42 = vld [vmem:[#allocation127_spill] sm:$0xff] }
 0x48f   :  { %v12209_v28 = vpack.c.b16 %v13724_v23, %v13722_v7  ;;  %4911 = vmatpush.bf16.msra.mxu2 %v4738_v59  ;;  %v13729_v37 = vsel %vm12220_vm0, 4294967295, %v13728_v37  ;;  %v5103_v54 = vunpack.c.l.b16 %v13734_v16  ;;  %v5136_v47 = vunpack.c.l.b16 %v13735_v20  ;;  %v13738_v23 = vld [vmem:[#allocation88_spill] sm:$0xff]  ;;  %v13741_v3 = vld [vmem:[#allocation94_spill] sm:$0xff]  ;;  %v13742_v35 = vld [vmem:[#allocation153_spill] sm:$0xff] }
 0x490   :  { %13730 = vst [vmem:[#allocation58_spill] sm:$0xff] %v13729_v37  ;;  %v12230_v10 = vpack.c.b16 %v5139_v50, %v5138_v5  ;;  %v5102_v7 = vunpack.c.l.b16 %v13736_v34  ;;  %v5135_v17 = vunpack.c.l.b16 %v13739_v42  ;;  %v13740_v50 = vld [vmem:[#allocation42_spill] sm:$0xff]  ;;  %v5101_v5 = vunpack.c.l.b16 %v13741_v3  ;;  %v13745_v16 = vld [vmem:[#allocation41_spill] sm:$0xff]  ;;  %v13746_v34 = vld [vmem:[#allocation75_spill] sm:$0xff] }
 0x491   :  { %v12245_v31 = vpack.c.b16 %v5137_v32, %v5136_v47  ;;  %v5089_v59 = vunpack.c.l.b16 %v13740_v50  ;;  %v5134_v45 = vunpack.c.l.b16 %v13742_v35  ;;  %v5088_v20 = vunpack.c.l.b16 %v13745_v16  ;;  %v13749_v47 = vld [vmem:[#allocation140_spill] sm:$0xff]  ;;  %v13751_v3 = vld [vmem:[#allocation97_spill] sm:$0xff] }
 0x492   :  { %5773 = vmatmul.msk.bf16.vlgmr.msra.gmra.mxu2 %vm12220_vm0, %v13364_v62  ;;  %5363 = vmatpush.bf16.msrb.mxu3 %v13738_v23  ;;  %v13747_v23 = vld [vmem:[#allocation54_spill] sm:$0xff]  ;;  %v5133_v42 = vunpack.c.l.b16 %v13749_v47  ;;  %v5099_v35 = vunpack.c.l.b16 %v13751_v3  ;;  %vm4160_vm5 = vcmp.eq.s32.totalorder %v10356_v60, %v12147_v6  ;;  %vm4168_vm10 = vcmp.eq.s32.totalorder %v10359_v27, %v12147_v6  ;;  %v13761_v60 = vld [vmem:[#allocation33_spill] sm:$0xff] }
 0x493   :  { %5336 = vmatpush.bf16.msrb.mxu2 %v13731_v43  ;;  %v5219_v43 = vpack.c.b16 %v5103_v54, %v5102_v7  ;;  %v12260_v50 = vpack.c.b16 %v5135_v17, %v5134_v45  ;;  %v13750_v54 = vld [vmem:[#allocation65_spill] sm:$0xff]  ;;  %v5212_v37 = vpack.c.b16 %v5089_v59, %v5088_v20  ;;  %v13755_v17 = vld [vmem:[#allocation104_spill] sm:$0xff]  ;;  %v13756_v20 = vld [vmem:[#allocation66_spill] sm:$0xff]  ;;  %vm4177_vm14 = vcmp.eq.s32.totalorder %v13626_v57, %v12080_v15 }
 0x494   :  { %v12257_v32 = vpop.f32.mrf.mxu2  ;;  %v5087_v7 = vunpack.c.l.b16 %v13750_v54  ;;  %v5131_v59 = vunpack.c.l.b16 %v13755_v17  ;;  %vm12280_vm13 = vmpackc.low %vm4168_vm10, %vm4160_vm5  ;;  %vm4185_vm5 = vcmp.eq.s32.totalorder %v13628_v46, %v12080_v15 }
 0x495   :  { %13748 = vst [vmem:[#allocation91_spill] sm:$0xff] %v12257_v32  ;;  %5781 = vmatmul.msk.bf16.gmra.mxu3 %vm12250_vm9, %v13364_v62  ;;  %v5098_v32 = vunpack.c.l.b16 %v13754_v63  ;;  %vm12303_vm10 = vmpackc.low %vm4185_vm5, %vm4177_vm14  ;;  %vm4176_vm14 = vcmp.eq.s32.totalorder %v13626_v57, %v12147_v6  ;;  %vm4184_vm5 = vcmp.eq.s32.totalorder %v13628_v46, %v12147_v6  ;;  %v13779_v6 = vld [vmem:[#allocation20_spill] sm:$0xff] }
 0x496   :  { %5364 = vmatpush.bf16.msrb.mxu3 %v5219_v43 }
 0x497   :  { %5337 = vmatpush.bf16.msrb.mxu2 %v13737_v39  ;;  %v5100_v39 = vunpack.c.l.b16 %v13746_v34  ;;  %v13752_v34 = vld [vmem:[#allocation102_spill] sm:$0xff]  ;;  %v5217_v3 = vpack.c.b16 %v5099_v35, %v5098_v32  ;;  %v13764_v32 = vld [vmem:[#allocation27_spill] sm:$0xff] }
 0x498   :  { %v5132_v19 = vunpack.c.l.b16 %v13752_v34  ;;  %v13758_v34 = vld [vmem:[#allocation138_spill] sm:$0xff]  ;;  %v5083_v35 = vunpack.c.l.b16 %v13764_v32 }
 0x499   :  { %v5218_v16 = vpack.c.b16 %v5101_v5, %v5100_v39  ;;  %v5085_v5 = vunpack.c.l.b16 %v13756_v20  ;;  %v13757_v39 = vld [vmem:[#allocation95_spill] sm:$0xff]  ;;  %v5130_v63 = vunpack.c.l.b16 %v13758_v34  ;;  %v13765_v34 = vld [vmem:[#allocation109_spill] sm:$0xff] }
 0x49a   :  { %v12275_v45 = vpack.c.b16 %v5133_v42, %v5132_v19  ;;  %v5097_v47 = vunpack.c.l.b16 %v13757_v39  ;;  %v13763_v42 = vld [vmem:[#allocation143_spill] sm:$0xff] }
 0x49b   :  { %5338 = vmatpush.bf16.msrb.mxu2 %v13747_v23  ;;  %v13753_v23 = vld [vmem:[#allocation64_spill] sm:$0xff]  ;;  %5365 = vmatpush.bf16.msrb.mxu3 %v5218_v16  ;;  %v5084_v16 = vunpack.c.l.b16 %v13761_v60  ;;  %v5129_v17 = vunpack.c.l.b16 %v13763_v42  ;;  %v5128_v60 = vunpack.c.l.b16 %v13765_v34  ;;  %v13772_v42 = vld [vmem:[#allocation17_spill] sm:$0xff] }
 0x49c   :  { %v5086_v43 = vunpack.c.l.b16 %v13753_v23  ;;  %v13762_v23 = vld [vmem:[#allocation74_spill] sm:$0xff]  ;;  %v4870_v19 = vpop.f32.mrf.mxu2  ;;  %v5156_v32 = vunpack.c.l.b16 %v13772_v42  ;;  %v13784_v42 = vld [vmem:[#allocation105_spill] sm:$0xff] }
 0x49d   :  { %v5096_v27 = vunpack.c.l.b16 %v13762_v23  ;;  %v12288_v20 = vadd.f32 %v4870_v19, %v12111_v13  ;;  %v13766_v23 = vld [vmem:[#allocation22_spill] sm:$0xff]  ;;  %v5232_v13 = vpack.c.b16 %v5129_v17, %v5128_v60  ;;  %v13773_v17 = vld [vmem:[#allocation24_spill] sm:$0xff]  ;;  %v13777_v60 = vld [vmem:[#allocation15_spill] sm:$0xff] }
 0x49e   :  { %v5211_v54 = vpack.c.b16 %v5087_v7, %v5086_v43  ;;  %v5233_v7 = vpack.c.b16 %v5131_v59, %v5130_v63  ;;  %v5210_v43 = vpack.c.b16 %v5085_v5, %v5084_v16  ;;  %v13767_v59 = vld [vmem:[#allocation25_spill] sm:$0xff]  ;;  %v13768_v63 = vld [vmem:[#allocation18_spill] sm:$0xff] }
 0x49f   :  { %5339 = vmatpush.bf16.msrb.mxu2 %v5212_v37  ;;  %v13759_v37 = vmov 0  ;;  %5366 = vmatpush.bf16.msrb.mxu3 %v5217_v3  ;;  %v5216_v39 = vpack.c.b16 %v5097_v47, %v5096_v27  ;;  %v5081_v3 = vunpack.c.l.b16 %v13767_v59  ;;  %v5157_v5 = vunpack.c.l.b16 %v13768_v63  ;;  %v13771_v27 = vld [vmem:[#allocation23_spill] sm:$0xff]  ;;  %v13778_v59 = vld [vmem:[#allocation112_spill] sm:$0xff] }
 0x4a0   :  { %v13760_v37 = vsel %vm12280_vm13, 4294967295, %v13759_v37  ;;  %v5080_v19 = vunpack.c.l.b16 %v13771_v27  ;;  %v5152_v57 = vunpack.c.l.b16 %v13778_v59 }
 0x4a2   :  { %5775 = vmatmul.msk.bf16.gmra.mxu2 %vm12280_vm13, %v13364_v62  ;;  %v5208_v15 = vpack.c.b16 %v5081_v3, %v5080_v19  ;;  %vm12325_vm13 = vmpackc.low %vm4184_vm5, %vm4176_vm14  ;;  %v13780_v3 = vld [vmem:[#allocation53_spill] sm:$0xff] }
 0x4a3   :  { %5340 = vmatpush.bf16.msrb.mxu2 %v5211_v54  ;;  %v5082_v54 = vunpack.c.l.b16 %v13766_v23  ;;  %5367 = vmatpush.bf16.msrb.mxu3 %v5216_v39  ;;  %v5154_v23 = vunpack.c.l.b16 %v13777_v60  ;;  %v5167_v63 = vunpack.c.l.b16 %v13780_v3  ;;  %v13782_v19 = vld [vmem:[#allocation101_spill] sm:$0xff] }
 0x4a5   :  { %v5209_v47 = vpack.c.b16 %v5083_v35, %v5082_v54  ;;  %5783 = vmatmul.msk.bf16.gmra.mxu3 %vm12303_vm10, %v13364_v62  ;;  %v13774_v35 = vld [vmem:[#allocation12_spill] sm:$0xff] }
 0x4a6   :  { %v5153_v39 = vunpack.c.l.b16 %v13774_v35  ;;  %v13785_v35 = vld [vmem:[#allocation13_spill] sm:$0xff] }
 0x4a7   :  { %5341 = vmatpush.bf16.msrb.mxu2 %v5210_v43  ;;  %5408 = vmatpush.bf16.msra.mxu3 %v12151_v26  ;;  %v12309_v43 = vpop.f32.mrf.mxu2  ;;  %v12315_v26 = vpack.c.b16 %v5157_v5, %v5156_v32  ;;  %v5165_v32 = vunpack.c.l.b16 %v13784_v42  ;;  %v5148_v60 = vunpack.c.l.b16 %v13785_v35 }
 0x4a8   :  { %v12341_v5 = vpack.c.b16 %v5153_v39, %v5152_v57  ;;  %v13786_v39 = vld [vmem:[#allocation43_spill] sm:$0xff] }
 0x4ab   :  { %5342 = vmatpush.bf16.msrb.mxu2 %v5209_v47  ;;  %5409 = vmatpush.bf16.msra.mxu3 %v12217_v0  ;;  %v5155_v0 = vunpack.c.l.b16 %v13773_v17  ;;  %v13781_v47 = vld [vmem:[#allocation55_spill] sm:$0xff] }
 0x4ac   :  { %v5150_v27 = vunpack.c.l.b16 %v13781_v47  ;;  %v13791_v47 = vld [vmem:[#allocation39_spill] sm:$0xff] }
 0x4af   :  { %5343 = vmatpush.bf16.msrb.mxu2 %v5208_v15  ;;  %5410 = vmatpush.bf16.msra.mxu3 %v12230_v10  ;;  %v4875_v54 = vpop.f32.mrf.mxu2  ;;  %v5151_v10 = vunpack.c.l.b16 %v13779_v6  ;;  %v12349_v15 = vpop.f32.mrf.mxu3  ;;  %v13789_v6 = vld [vmem:[#allocation32_spill] sm:$0xff] }
 0x4b0   :  { %v12334_v46 = vadd.f32 %v4875_v54, %v12134_v53  ;;  %v13783_v53 = vld [vmem:[#allocation118_spill] sm:$0xff]  ;;  %v5162_v3 = vunpack.c.l.b16 %v13789_v6 }
 0x4b2   :  { %5777 = vmatmul.msk.bf16.gmra.mxu2 %vm12325_vm13, %v13364_v62 }
 0x4b3   :  { %5384 = vmatpush.bf16.msra.mxu2 %v12126_v18  ;;  %5411 = vmatpush.bf16.msra.mxu3 %v12245_v31  ;;  %v5245_v18 = vpack.c.b16 %v5155_v0, %v5154_v23  ;;  %v5149_v31 = vunpack.c.l.b16 %v13783_v53  ;;  %v5243_v0 = vpack.c.b16 %v5151_v10, %v5150_v27  ;;  %v5164_v23 = vunpack.c.l.b16 %v13786_v39  ;;  %v13790_v10 = vld [vmem:[#allocation16_spill] sm:$0xff]  ;;  %v13793_v53 = vld [vmem:[#allocation19_spill] sm:$0xff] }
 0x4b4   :  { %v5145_v27 = vunpack.c.l.b16 %v13791_v47  ;;  %v5146_v42 = vunpack.c.l.b16 %v13793_v53  ;;  %v13806_v53 = vld [vmem:[#allocation36_spill] sm:$0xff] }
 0x4b5   :  { %5791 = vmatmul.msk.bf16.vlgmr.msrb.gmra.mxu3 %vm10126_vm11, %v13364_v62  ;;  %v5250_v59 = vpack.c.b16 %v5165_v32, %v5164_v23  ;;  %v5242_v57 = vpack.c.b16 %v5149_v31, %v5148_v60  ;;  %v13794_v32 = vld [vmem:[#allocation87_spill] sm:$0xff]  ;;  %v13795_v60 = vld [vmem:[#allocation28_spill] sm:$0xff] }
 0x4b6   :  { %v5144_v31 = vunpack.c.l.b16 %v13794_v32  ;;  %v5160_v39 = vunpack.c.l.b16 %v13795_v60 }
 0x4b7   :  { %5385 = vmatpush.bf16.msra.mxu2 %v12138_v9  ;;  %v5166_v9 = vunpack.c.l.b16 %v13782_v19  ;;  %5412 = vmatpush.bf16.msra.mxu3 %v12260_v50  ;;  %v13788_v50 = vld [vmem:[#allocation106_spill] sm:$0xff] }
 0x4b8   :  { %v5163_v54 = vunpack.c.l.b16 %v13788_v50 }
 0x4b9   :  { %v5251_v17 = vpack.c.b16 %v5167_v63, %v5166_v9  ;;  %v5147_v63 = vunpack.c.l.b16 %v13790_v10  ;;  %v4889_v9 = vpop.f32.mrf.mxu3 }
 0x4ba   :  { %v12366_v35 = vadd.f32 %v4889_v9, %v12228_v56  ;;  %v13797_v56 = vld [vmem:[#allocation141_spill] sm:$0xff] }
 0x4bb   :  { %5386 = vmatpush.bf16.msra.mxu2 %v12144_v2  ;;  %5413 = vmatpush.bf16.msra.mxu3 %v12275_v45  ;;  %v5249_v45 = vpack.c.b16 %v5163_v54, %v5162_v3  ;;  %v5240_v2 = vpack.c.b16 %v5145_v27, %v5144_v31  ;;  %v5206_v50 = vunpack.c.l.b16 %v13797_v56  ;;  %v13798_v54 = vld [vmem:[#allocation108_spill] sm:$0xff]  ;;  %v13818_v56 = vld [vmem:[#allocation77_spill] sm:$0xff] }
 0x4bc   :  { %v5207_v6 = vunpack.c.l.b16 %v13798_v54  ;;  %v5199_v54 = vunpack.c.l.b16 %v11836_v4  ;;  %v5196_v4 = vunpack.c.l.b16 %v11987_v8 }
 0x4bf   :  { %5387 = vmatpush.bf16.msra.mxu2 %v12155_v25  ;;  %5414 = vmatpush.bf16.msra.mxu3 %v5233_v7  ;;  %v13792_v25 = vld [vmem:[#allocation30_spill] sm:$0xff]  ;;  %v5241_v7 = vpack.c.b16 %v5147_v63, %v5146_v42  ;;  %v5205_v42 = vunpack.c.l.b16 %v13806_v53 }
 0x4c0   :  { %v5161_v19 = vunpack.c.l.b16 %v13792_v25  ;;  %v13802_v63 = vld [vmem:[#allocation86_spill] sm:$0xff]  ;;  %v13804_v25 = vld [vmem:[#allocation44_spill] sm:$0xff] }
 0x4c1   :  { %v12379_v3 = vpop.f32.mrf.mxu3  ;;  %v5191_v47 = vunpack.c.l.b16 %v13802_v63  ;;  %v13837_v63 = vld [vmem:[#allocation160_spill] sm:$0xff] }
 0x4c2   :  { %5785 = vmatmul.msk.bf16.vlgmr.msrb.gmra.mxu2 %vm10291_vm12, %v13364_v62  ;;  %v5248_v23 = vpack.c.b16 %v5161_v19, %v5160_v39  ;;  %v5189_v19 = vunpack.c.l.b16 %v13804_v25  ;;  %v5194_v25 = vunpack.c.l.b16 %v12032_v61 }
 0x4c3   :  { %5388 = vmatpush.bf16.msra.mxu2 %v12161_v44  ;;  %5415 = vmatpush.bf16.msra.mxu3 %v5232_v13  ;;  %v13809_v44 = vld [vmem:[#allocation92_spill] sm:$0xff]  ;;  %v13820_v13 = vld [vmem:[#allocation159_spill] sm:$0xff] }
 0x4c4   :  { %vm13810_vm12 = vnez %v13809_v44 }
 0x4c5   :  { %5793 = vmatmul.msk.bf16.gmra.mxu3 %vm10396_vm4, %v13364_v62 }
 0x4c7   :  { %5389 = vmatpush.bf16.msra.mxu2 %v12169_v48  ;;  %5456 = vmatpush.bf16.msrb.mxu3 %v12184_v38  ;;  %v13799_v48 = vld [vmem:[#allocation119_spill] sm:$0xff]  ;;  %v5271_v38 = vpack.c.b16 %v5207_v6, %v5206_v50 }
 0x4c9   :  { %v4894_v32 = vpop.f32.mrf.mxu3 }
 0x4ca   :  { %v12396_v31 = vadd.f32 %v4894_v32, %v12288_v20  ;;  %v13811_v20 = vld [vmem:[#allocation57_spill] sm:$0xff] }
 0x4cb   :  { %5390 = vmatpush.bf16.msra.mxu2 %v12175_v33  ;;  %5457 = vmatpush.bf16.msrb.mxu3 %v12196_v11  ;;  %v13801_v33 = vld [vmem:[#allocation82_spill] sm:$0xff]  ;;  %vm13812_vm4 = vnez %v13811_v20 }
 0x4cc   :  { %v5190_v10 = vunpack.c.l.b16 %v13801_v33  ;;  %v13803_v11 = vld [vmem:[#allocation142_spill] sm:$0xff] }
 0x4cd   :  { %v5188_v27 = vunpack.c.l.b16 %v13803_v11 }
 0x4ce   :  { %v5263_v60 = vpack.c.b16 %v5191_v47, %v5190_v10  ;;  %v5197_v10 = vunpack.c.l.b16 %v12007_v24  ;;  %v5195_v24 = vunpack.c.l.b16 %v12049_v21  ;;  %v5179_v21 = vunpack.c.l.b16 %v11965_v58  ;;  %v13849_v58 = vld [vmem:[#allocation155_spill] sm:$0xff] }
 0x4cf   :  { %5391 = vmatpush.bf16.msra.mxu2 %v12190_v51  ;;  %5458 = vmatpush.bf16.msrb.mxu3 %v12202_v41  ;;  %v13805_v51 = vld [vmem:[#allocation48_spill] sm:$0xff]  ;;  %v13807_v41 = vld [vmem:[#allocation26_spill] sm:$0xff]  ;;  %v5262_v39 = vpack.c.b16 %v5189_v19, %v5188_v27  ;;  %v5183_v27 = vunpack.c.l.b16 %v11879_v36  ;;  %v5182_v19 = vunpack.c.l.b16 %v11867_v1  ;;  %v5181_v36 = vunpack.c.l.b16 %v11919_v52 }
 0x4d0   :  { %v5204_v9 = vunpack.c.l.b16 %v13805_v51  ;;  %vm13808_vm11 = vnez %v13807_v41  ;;  %v5265_v53 = vpack.c.b16 %v5195_v24, %v5194_v25  ;;  %v5192_v1 = vunpack.c.l.b16 %v12070_v40  ;;  %v13827_v52 = vld [vmem:[#allocation50_spill] sm:$0xff] }
 0x4d1   :  { %v5259_v51 = vpack.c.b16 %v5183_v27, %v5182_v19  ;;  %v5176_v20 = vunpack.c.l.b16 %v13827_v52  ;;  %v13839_v19 = vld [vmem:[#allocation116_spill] sm:$0xff] }
 0x4d2   :  { %5787 = vmatmul.msk.bf16.gmra.mxu2 %vm13808_vm11, %v13364_v62 }
 0x4d3   :  { %5432 = vmatpush.bf16.msrb.mxu2 %v13799_v48  ;;  %5459 = vmatpush.bf16.msrb.mxu3 %v12209_v28  ;;  %v12405_v28 = vpop.f32.mrf.mxu3  ;;  %v5198_v48 = vunpack.c.l.b16 %v11824_v22  ;;  %v5266_v22 = vpack.c.b16 %v5197_v10, %v5196_v4  ;;  %v13836_v10 = vld [vmem:[#allocation145_spill] sm:$0xff] }
 0x4d5   :  { %5795 = vmatmul.msk.bf16.gmra.mxu3 %vm13810_vm12, %v13364_v62  ;;  %v5267_v33 = vpack.c.b16 %v5199_v54, %v5198_v48  ;;  %v13834_v48 = vld [vmem:[#allocation91_spill] sm:$0xff] }
 0x4d7   :  { %5433 = vmatpush.bf16.msrb.mxu2 %v12315_v26  ;;  %5460 = vmatpush.bf16.msrb.mxu3 %v5251_v17  ;;  %v5270_v26 = vpack.c.b16 %v5205_v42, %v5204_v9  ;;  %v5180_v9 = vunpack.c.l.b16 %v11896_v30  ;;  %v5193_v42 = vunpack.c.l.b16 %v12089_v49  ;;  %v13824_v30 = vld [vmem:[#allocation100_spill] sm:$0xff] }
 0x4d9   :  { %v5258_v32 = vpack.c.b16 %v5181_v36, %v5180_v9  ;;  %v5264_v41 = vpack.c.b16 %v5193_v42, %v5192_v1  ;;  %v13842_v36 = vld [vmem:[#allocation148_spill] sm:$0xff]  ;;  %v13844_v1 = vld [vmem:[#allocation126_spill] sm:$0xff] }
 0x4db   :  { %5434 = vmatpush.bf16.msrb.mxu2 %v5245_v18  ;;  %5461 = vmatpush.bf16.msrb.mxu3 %v5250_v59  ;;  %v13815_v59 = vld [vmem:[#allocation144_spill] sm:$0xff] }
 0x4df   :  { %5435 = vmatpush.bf16.msrb.mxu2 %v12341_v5  ;;  %5462 = vmatpush.bf16.msrb.mxu3 %v5249_v45  ;;  %v13813_v5 = vld [vmem:[#allocation93_spill] sm:$0xff] }
 0x4e0   :  { %vm13814_vm14 = vnez %v13813_v5 }
 0x4e1   :  { %v4899_v18 = vpop.f32.mrf.mxu3 }
 0x4e2   :  { %5789 = vmatmul.msk.bf16.gmra.mxu2 %vm13812_vm4, %v13364_v62  ;;  %v12414_v17 = vadd.f32 %v4899_v18, %v12334_v46  ;;  %v5186_v46 = vunpack.c.l.b16 %v13818_v56  ;;  %v4877_v18 = vpop.f32.mrf.mxu2 }
 0x4e3   :  { %5436 = vmatpush.bf16.msrb.mxu2 %v5243_v0  ;;  %5463 = vmatpush.bf16.msrb.mxu3 %v5248_v23  ;;  %v5203_v0 = vunpack.c.l.b16 %v11736_v29  ;;  %v5200_v23 = vunpack.c.l.b16 %v11773_v55  ;;  %v13819_v29 = vld [vmem:[#allocation76_spill] sm:$0xff] }
 0x4e4   :  { %v5187_v6 = vunpack.c.l.b16 %v13819_v29 }
 0x4e5   :  { %5803 = vmatmul.msk.bf16.vlgmr.msra.gmra.mxu3 %vm13814_vm14, %v13364_v62 }
 0x4e6   :  { %v5261_v55 = vpack.c.b16 %v5187_v6, %v5186_v46 }
 0x4e7   :  { %5437 = vmatpush.bf16.msrb.mxu2 %v5242_v57  ;;  %5504 = vmatpush.bf16.msra.mxu3 %v5271_v38  ;;  %v5202_v57 = vunpack.c.l.b16 %v13815_v59  ;;  %v5185_v38 = vunpack.c.l.b16 %v13820_v13  ;;  %v13830_v59 = vld [vmem:[#allocation139_spill] sm:$0xff] }
 0x4e9   :  { %v5269_v45 = vpack.c.b16 %v5203_v0, %v5202_v57  ;;  %v4901_v61 = vpop.f32.mrf.mxu3  ;;  %v13829_v0 = vld [vmem:[#allocation136_spill] sm:$0xff] }
 0x4ea   :  { %v4796_v57 = vadd.f32 %v13830_v59, %v13829_v0 }
 0x4eb   :  { %5438 = vmatpush.bf16.msrb.mxu2 %v5241_v7  ;;  %5505 = vmatpush.bf16.msra.mxu3 %v5270_v26  ;;  %v13816_v7 = vld [vmem:[#allocation40_spill] sm:$0xff] }
 0x4ec   :  { %vm13817_vm5 = vnez %v13816_v7  ;;  %v13825_v26 = vld [vmem:[#allocation156_spill] sm:$0xff] }
 0x4ef   :  { %5439 = vmatpush.bf16.msrb.mxu2 %v5240_v2  ;;  %5506 = vmatpush.bf16.msra.mxu3 %v5269_v45  ;;  %v5201_v2 = vunpack.c.l.b16 %v11779_v14  ;;  %v13822_v14 = vld [vmem:[#allocation71_spill] sm:$0xff] }
 0x4f0   :  { %v5184_v47 = vunpack.c.l.b16 %v13822_v14  ;;  %v4801_v14 = vadd.f32 %v13837_v63, %v13836_v10 }
 0x4f1   :  { %v5268_v50 = vpack.c.b16 %v5201_v2, %v5200_v23  ;;  %v13831_v2 = vld [vmem:[#allocation70_spill] sm:$0xff] }
 0x4f2   :  { %5797 = vmatmul.msk.bf16.vlgmr.msra.gmra.mxu2 %vm13817_vm5, %v13364_v62  ;;  %v5260_v11 = vpack.c.b16 %v5185_v38, %v5184_v47  ;;  %v4820_v56 = vadd.f32 %v13831_v2, %v4796_v57 }
 0x4f3   :  { %5480 = vmatpush.bf16.msra.mxu2 %v5263_v60  ;;  %5507 = vmatpush.bf16.msra.mxu3 %v5268_v50  ;;  %v5178_v60 = vunpack.c.l.b16 %v13824_v30  ;;  %v13833_v50 = vld [vmem:[#allocation63_spill] sm:$0xff] }
 0x4f4   :  { %v4844_v54 = vadd.f32 %v13833_v50, %v4820_v56 }
 0x4f5   :  { %5805 = vmatmul.msk.bf16.gmra.mxu3 %vm10848_vm2, %v13364_v62  ;;  %v5257_v49 = vpack.c.b16 %v5179_v21, %v5178_v60  ;;  %vm13840_vm2 = vnez %v13839_v19 }
 0x4f7   :  { %5481 = vmatpush.bf16.msra.mxu2 %v5262_v39  ;;  %5508 = vmatpush.bf16.msra.mxu3 %v5267_v33  ;;  %v5177_v39 = vunpack.c.l.b16 %v13825_v26  ;;  %v13846_v26 = vld [vmem:[#allocation90_spill] sm:$0xff] }
 0x4f9   :  { %v5256_v40 = vpack.c.b16 %v5177_v39, %v5176_v20 }
 0x4fb   :  { %5482 = vmatpush.bf16.msra.mxu2 %v5261_v55  ;;  %5509 = vmatpush.bf16.msra.mxu3 %v5266_v22  ;;  %v4868_v55 = vadd.f32 %v13834_v48, %v4844_v54  ;;  %v13838_v22 = vld [vmem:[#allocation67_spill] sm:$0xff] }
 0x4fc   :  { %v4825_v25 = vadd.f32 %v13838_v22, %v4801_v14 }
 0x4fd   :  { %v4892_v13 = vadd.f32 %v12379_v3, %v4868_v55  ;;  %v13841_v3 = vld [vmem:[#allocation89_spill] sm:$0xff] }
 0x4fe   :  { %v4849_v24 = vadd.f32 %v13841_v3, %v4825_v25 }
 0x4ff   :  { %5483 = vmatpush.bf16.msra.mxu2 %v5260_v11  ;;  %5510 = vmatpush.bf16.msra.mxu3 %v5265_v53 }
 0x500   :  { %v4873_v53 = vadd.f32 %v12309_v43, %v4849_v24  ;;  %v13847_v43 = vld [vmem:[#allocation69_spill] sm:$0xff] }
 0x502   :  { %5799 = vmatmul.msk.bf16.gmra.mxu2 %vm10876_vm7, %v13364_v62  ;;  %v4897_v42 = vadd.f32 %v12405_v28, %v4873_v53  ;;  %vm13843_vm7 = vnez %v13842_v36 }
 0x503   :  { %5484 = vmatpush.bf16.msra.mxu2 %v5259_v51  ;;  %5511 = vmatpush.bf16.msra.mxu3 %v5264_v41 }
 0x505   :  { %5807 = vmatmul.msk.bf16.gmra.mxu3 %vm11060_vm1, %v13364_v62  ;;  %vm13850_vm1 = vnez %v13849_v58 }
 0x507   :  { %5485 = vmatpush.bf16.msra.mxu2 %v5258_v32  ;;  %v13845_v32 = vld [vmem:[#allocation56_spill] sm:$0xff] }
 0x508   :  { %v4937_v5 = vpop.f32.mrf.mxu3  ;;  %v4806_v21 = vadd.f32 %v13845_v32, %v13844_v1 }
 0x50a   :  { %v4830_v39 = vadd.f32 %v13846_v26, %v4806_v21 }
 0x50b   :  { %5486 = vmatpush.bf16.msra.mxu2 %v5257_v49 }
 0x50c   :  { %v4854_v28 = vadd.f32 %v12349_v15, %v4830_v39 }
 0x50e   :  { %v4878_v20 = vadd.f32 %v4877_v18, %v4854_v28 }
 0x50f   :  { %5487 = vmatpush.bf16.msra.mxu2 %v5256_v40 }
 0x510   :  { %v4939_v23 = vpop.f32.mrf.mxu3  ;;  %v4902_v40 = vadd.f32 %v4901_v61, %v4878_v20 }
 0x512   :  { %5801 = vmatmul.msk.bf16.gmra.mxu2 %vm11004_vm15, %v13364_v62  ;;  %vm13848_vm15 = vnez %v13847_v43 }
 0x515   :  { %v4913_v45 = vpop.f32.mrf.mxu2  ;;  %5815 = vmatmul.msk.bf16.vlgmr.msrb.gmra.mxu3 %vm11637_vm3, %v13364_v62 }
 0x516   :  { %v4914_v7 = vadd.f32 %v4913_v45, %v12366_v35 }
 0x518   :  { %v4942_v6 = vpop.f32.mrf.mxu3  ;;  %v4938_v35 = vadd.f32 %v4937_v5, %v4914_v7 }
 0x51d   :  { %v4915_v29 = vpop.f32.mrf.mxu2 }
 0x51e   :  { %v4916_v38 = vadd.f32 %v4915_v29, %v4892_v13 }
 0x520   :  { %v4944_v4 = vpop.f32.mrf.mxu3  ;;  %v4940_v27 = vadd.f32 %v4939_v23, %v4916_v38 }
 0x522   :  { %5809 = vmatmul.msk.bf16.vlgmr.msrb.gmra.mxu2 %vm11204_vm8, %v13364_v62  ;;  %vm13853_vm8 = vnez %v13760_v37 }
 0x525   :  { %v4918_v47 = vpop.f32.mrf.mxu2  ;;  %5817 = vmatmul.msk.bf16.gmra.mxu3 %vm13840_vm2, %v13364_v62 }
 0x526   :  { %v4919_v11 = vadd.f32 %v4918_v47, %v12396_v31 }
 0x528   :  { %v4947_v9 = vpop.f32.mrf.mxu3  ;;  %v4943_v31 = vadd.f32 %v4942_v6, %v4919_v11 }
 0x52d   :  { %v4920_v51 = vpop.f32.mrf.mxu2 }
 0x52e   :  { %v4921_v8 = vadd.f32 %v4920_v51, %v4897_v42 }
 0x530   :  { %v4949_v30 = vpop.f32.mrf.mxu3  ;;  %v4945_v49 = vadd.f32 %v4944_v4, %v4921_v8 }
 0x532   :  { %5811 = vmatmul.msk.bf16.gmra.mxu2 %vm13843_vm7, %v13364_v62 }
 0x535   :  { %v4923_v41 = vpop.f32.mrf.mxu2  ;;  %5819 = vmatmul.msk.bf16.gmra.mxu3 %vm13848_vm15, %v13364_v62 }
 0x536   :  { %v4924_v60 = vadd.f32 %v4923_v41, %v12414_v17 }
 0x538   :  { %v5369_v52 = vpop.f32.mrf.mxu3  ;;  %v4948_v0 = vadd.f32 %v4947_v9, %v4924_v60 }
 0x53d   :  { %v4925_v44 = vpop.f32.mrf.mxu2 }
 0x53e   :  { %v4926_v5 = vadd.f32 %v4925_v44, %v4902_v40 }
 0x540   :  { %v5371_v59 = vpop.f32.mrf.mxu3  ;;  %v4950_v45 = vadd.f32 %v4949_v30, %v4926_v5 }
 0x542   :  { %5813 = vmatmul.msk.bf16.gmra.mxu2 %vm13850_vm1, %v13364_v62 }
 0x545   :  { %v5345_v17 = vpop.f32.mrf.mxu2  ;;  %5827 = vmatmul.msk.bf16.vlgmr.msra.gmra.mxu3 %vm12128_vm6, %v13364_v62 }
 0x546   :  { %v5346_v57 = vadd.f32 %v5345_v17, %v4938_v35 }
 0x548   :  { %v5374_v15 = vpop.f32.mrf.mxu3  ;;  %v5370_v61 = vadd.f32 %v5369_v52, %v5346_v57 }
 0x54d   :  { %v5347_v7 = vpop.f32.mrf.mxu2 }
 0x54e   :  { %v5348_v2 = vadd.f32 %v5347_v7, %v4940_v27 }
 0x550   :  { %v5376_v46 = vpop.f32.mrf.mxu3  ;;  %v5372_v54 = vadd.f32 %v5371_v59, %v5348_v2 }
 0x552   :  { %5821 = vmatmul.msk.bf16.vlgmr.msra.gmra.mxu2 %vm12220_vm0, %v13364_v62 }
 0x555   :  { %v5350_v56 = vpop.f32.mrf.mxu2  ;;  %5829 = vmatmul.msk.bf16.gmra.mxu3 %vm12250_vm9, %v13364_v62 }
 0x556   :  { %v5351_v50 = vadd.f32 %v5350_v56, %v4943_v31 }
 0x558   :  { %v5379_v6 = vpop.f32.mrf.mxu3  ;;  %v5375_v55 = vadd.f32 %v5374_v15, %v5351_v50 }
 0x55d   :  { %v5352_v29 = vpop.f32.mrf.mxu2 }
 0x55e   :  { %v5353_v48 = vadd.f32 %v5352_v29, %v4945_v49 }
 0x560   :  { %v5381_v38 = vpop.f32.mrf.mxu3  ;;  %v5377_v35 = vadd.f32 %v5376_v46, %v5353_v48 }
 0x562   :  { %5823 = vmatmul.msk.bf16.gmra.mxu2 %vm13853_vm8, %v13364_v62 }
 0x565   :  { %v5355_v13 = vpop.f32.mrf.mxu2  ;;  %5831 = vmatmul.msk.bf16.gmra.mxu3 %vm12303_vm10, %v13364_v62 }
 0x566   :  { %v5356_v33 = vadd.f32 %v5355_v13, %v4948_v0 }
 0x568   :  { %v5417_v63 = vpop.f32.mrf.mxu3  ;;  %v5380_v14 = vadd.f32 %v5379_v6, %v5356_v33 }
 0x56d   :  { %v5357_v10 = vpop.f32.mrf.mxu2 }
 0x56e   :  { %v5358_v12 = vadd.f32 %v5357_v10, %v4950_v45 }
 0x570   :  { %v5419_v4 = vpop.f32.mrf.mxu3  ;;  %v5382_v11 = vadd.f32 %v5381_v38, %v5358_v12 }
 0x572   :  { %5825 = vmatmul.msk.bf16.gmra.mxu2 %vm12325_vm13, %v13364_v62 }
 0x575   :  { %v5393_v47 = vpop.f32.mrf.mxu2 }
 0x576   :  { %v5394_v37 = vadd.f32 %v5393_v47, %v5370_v61 }
 0x578   :  { %v5422_v22 = vpop.f32.mrf.mxu3  ;;  %v5418_v19 = vadd.f32 %v5417_v63, %v5394_v37 }
 0x57d   :  { %v5395_v27 = vpop.f32.mrf.mxu2 }
 0x57e   :  { %v5396_v25 = vadd.f32 %v5395_v27, %v5372_v54 }
 0x580   :  { %v5424_v24 = vpop.f32.mrf.mxu3  ;;  %v5420_v51 = vadd.f32 %v5419_v4, %v5396_v25 }
 0x585   :  { %v5398_v3 = vpop.f32.mrf.mxu2 }
 0x586   :  { %v5399_v16 = vadd.f32 %v5398_v3, %v5375_v55 }
 0x588   :  { %v5427_v53 = vpop.f32.mrf.mxu3  ;;  %v5423_v8 = vadd.f32 %v5422_v22, %v5399_v16 }
 0x58d   :  { %v5400_v9 = vpop.f32.mrf.mxu2 }
 0x58e   :  { %v5401_v42 = vadd.f32 %v5400_v9, %v5377_v35 }
 0x590   :  { %v5429_v31 = vpop.f32.mrf.mxu3  ;;  %v5425_v62 = vadd.f32 %v5424_v24, %v5401_v42 }
 0x595   :  { %v5403_v36 = vpop.f32.mrf.mxu2 }
 0x596   :  { %v5404_v34 = vadd.f32 %v5403_v36, %v5380_v14 }
 0x598   :  { %v5465_v32 = vpop.f32.mrf.mxu3  ;;  %v5428_v41 = vadd.f32 %v5427_v53, %v5404_v34 }
 0x59d   :  { %v5405_v1 = vpop.f32.mrf.mxu2 }
 0x59e   :  { %v5406_v21 = vadd.f32 %v5405_v1, %v5382_v11 }
 0x5a0   :  { %v5467_v60 = vpop.f32.mrf.mxu3  ;;  %v5430_v49 = vadd.f32 %v5429_v31, %v5406_v21 }
 0x5a5   :  { %v5441_v30 = vpop.f32.mrf.mxu2 }
 0x5a6   :  { %v5442_v0 = vadd.f32 %v5441_v30, %v5418_v19 }
 0x5a8   :  { %v5470_v39 = vpop.f32.mrf.mxu3  ;;  %v5466_v17 = vadd.f32 %v5465_v32, %v5442_v0 }
 0x5ad   :  { %v5443_v26 = vpop.f32.mrf.mxu2 }
 0x5ae   :  { %v5444_v23 = vadd.f32 %v5443_v26, %v5420_v51 }
 0x5b0   :  { %v5472_v28 = vpop.f32.mrf.mxu3  ;;  %v5468_v15 = vadd.f32 %v5467_v60, %v5444_v23 }
 0x5b5   :  { %v5446_v43 = vpop.f32.mrf.mxu2 }
 0x5b6   :  { %v5447_v61 = vadd.f32 %v5446_v43, %v5423_v8 }
 0x5b8   :  { %v5475_v52 = vpop.f32.mrf.mxu3  ;;  %v5471_v50 = vadd.f32 %v5470_v39, %v5447_v61 }
 0x5bd   :  { %v5448_v44 = vpop.f32.mrf.mxu2 }
 0x5be   :  { %v5449_v6 = vadd.f32 %v5448_v44, %v5425_v62 }
 0x5c0   :  { %v5477_v40 = vpop.f32.mrf.mxu3  ;;  %v5473_v13 = vadd.f32 %v5472_v28, %v5449_v6 }
 0x5c5   :  { %v5451_v20 = vpop.f32.mrf.mxu2 }
 0x5c6   :  { %v5452_v35 = vadd.f32 %v5451_v20, %v5428_v41 }
 0x5c8   :  { %v5513_v58 = vpop.f32.mrf.mxu3  ;;  %v5476_v63 = vadd.f32 %v5475_v52, %v5452_v35 }
 0x5cd   :  { %v5453_v5 = vpop.f32.mrf.mxu2 }
 0x5ce   :  { %v5454_v4 = vadd.f32 %v5453_v5, %v5430_v49 }
 0x5d0   :  { %v5515_v45 = vpop.f32.mrf.mxu3  ;;  %v5478_v11 = vadd.f32 %v5477_v40, %v5454_v4 }
 0x5d5   :  { %v5489_v59 = vpop.f32.mrf.mxu2 }
 0x5d6   :  { %v5490_v57 = vadd.f32 %v5489_v59, %v5466_v17 }
 0x5d8   :  { %v5514_v7 = vadd.f32 %v5513_v58, %v5490_v57  ;;  %v5518_v46 = vpop.f32.mrf.mxu3 }
 0x5da   :  { %5534 = vst [vmem:[#allocation8] sm:$0xff] %v5514_v7 }
 0x5dd   :  { %v5491_v2 = vpop.f32.mrf.mxu2 }
 0x5de   :  { %v5492_v18 = vadd.f32 %v5491_v2, %v5468_v15 }
 0x5e0   :  { %v5516_v56 = vadd.f32 %v5515_v45, %v5492_v18  ;;  %v5520_v55 = vpop.f32.mrf.mxu3 }
 0x5e2   :  { %5535 = vst [vmem:[#allocation8 + $0x8] sm:$0xff] %v5516_v56 }
 0x5e5   :  { %v5494_v54 = vpop.f32.mrf.mxu2 }
 0x5e6   :  { %v5495_v29 = vadd.f32 %v5494_v54, %v5471_v50 }
 0x5e8   :  { %v5519_v48 = vadd.f32 %v5518_v46, %v5495_v29  ;;  %v5523_v12 = vpop.f32.mrf.mxu3 }
 0x5ea   :  { %5536 = vst [vmem:[#allocation8 + $0x10] sm:$0xff] %v5519_v48 }
 0x5ed   :  { %v5496_v38 = vpop.f32.mrf.mxu2 }
 0x5ee   :  { %v5497_v33 = vadd.f32 %v5496_v38, %v5473_v13 }
 0x5f0   :  { %v5521_v10 = vadd.f32 %v5520_v55, %v5497_v33  ;;  %v5525_v25 = vpop.f32.mrf.mxu3 }
 0x5f2   :  { %5537 = vst [vmem:[#allocation8 + $0x18] sm:$0xff] %v5521_v10 }
 0x5f5   :  { %v5499_v14 = vpop.f32.mrf.mxu2 }
 0x5f6   :  { %v5500_v47 = vadd.f32 %v5499_v14, %v5476_v63 }
 0x5f8   :  { %v5524_v37 = vadd.f32 %v5523_v12, %v5500_v47 }
 0x5fa   :  { %5538 = vst [vmem:[#allocation8 + $0x20] sm:$0xff] %v5524_v37 }
 0x5fd   :  { %v5501_v27 = vpop.f32.mrf.mxu2 }
 0x5fe   :  { %v5502_v22 = vadd.f32 %v5501_v27, %v5478_v11 }
 0x600   :  { %v5526_v19 = vadd.f32 %v5525_v25, %v5502_v22 }
 0x602   :  { %5539 = vst [vmem:[#allocation8 + $0x28] sm:$0xff] %v5526_v19 }
 0x603   :  { %5552 = dma.vmem_to_hbm [thread:$0]  %s5545_s19, 768, %s5547_s22, [#allocation4], %s6549_s25, %s6549_s25, %s6550_s26  }
 0x604   :  { %6545 = dma.done.wait [#allocation4], 768  }
 0x605   :  { %6546 = vsyncadd [#allocation4], 4294966528 }
 0x606   :  { %5557 = vsyncpa [#allocation3], 1 }
 0x607   :  { %5558 = vsyncpa [#allocation6], 1 }
 0x608   :  { %5559 = vsyncpa [#allocation4], 1 }

</bundles_post_ra>
